<compile_context>
chip_gen: v7x
topology: tpu7x:2x2x1
jax: 0.10.0
libtpu: 0.0.40
codegen_flags: <defaults>
</compile_context>

<pallas_src>
from functools import partial

import numpy as np
import jax
import jax.numpy as jnp
from jax import lax
from jax.experimental import pallas as pl
from jax.experimental.pallas import tpu as pltpu


def lstm_kernel(x_ref, wih_ref, whh_ref, b_ref, wlin_ref, blin_ref, out_ref, *, T, H):
    """One batch tile: LSTM recurrence + linear head, feature-major.

    x_ref    : (Bt, T, I) f32   original (batch, time, sensors) layout, one batch tile
    wih_ref  : (4H, I)    f32   W_ih, gate rows permuted to (i, f, o, g)
    whh_ref  : (4H, H)    f32   W_hh, gate rows permuted
    b_ref    : (4H, 1)    f32   b_ih + b_hh, permuted
    wlin_ref : (1, H)     f32   linear head weight
    blin_ref : (1, 1)     f32   linear head bias
    out_ref  : (1, Bt)    f32   lane-dense output tile
    """
    Bt = x_ref.shape[0]

    # Loop-invariant loads hoisted out of the recurrence.
    wih = wih_ref[...]      # (4H, I)
    whh = whh_ref[...]      # (4H, H)
    b = b_ref[...]          # (4H, 1) -- broadcasts along lanes
    wlin = wlin_ref[...]    # (1, H)
    blin = blin_ref[...]    # (1, 1)

    h = jnp.zeros((H, Bt), jnp.float32)
    c = jnp.zeros((H, Bt), jnp.float32)

    # T is small & static: full unroll keeps the whole recurrence in one basic block
    # so the scheduler can overlap the (h-independent) input projection of step t
    # with the EUP work of step t-1.
    for t in range(T):
        xt = x_ref[:, t, :]                                        # (Bt, I)
        # Input projection directly in feature-major: contract I of (4H, I) with I of
        # (Bt, I) -> (4H, Bt).  Off the h->h critical path; bias folded in here.
        gx = lax.dot_general(wih, xt, (((1,), (1,)), ((), ())),
                             preferred_element_type=jnp.float32) + b
        # Recurrent projection: (4H, H) x (H, Bt) -> (4H, Bt); batch fills the MXU N dim.
        # TODO(synk): hold whh in MXU weight regs across all T steps via
        # pltpu.matmul_push_rhs/_acc_lhs/_pop for the small-batch latency-bound regime.
        gates = gx + jnp.dot(whh, h, preferred_element_type=jnp.float32)

        sig = jax.nn.sigmoid(gates[:3 * H, :])                     # i | f | o rows, one EUP pass
        i_g = sig[0 * H:1 * H, :]
        f_g = sig[1 * H:2 * H, :]
        o_g = sig[2 * H:3 * H, :]
        g_g = jnp.tanh(gates[3 * H:, :])

        c = f_g * c + i_g * g_g
        h = o_g * jnp.tanh(c)

    # Linear head: (1, H) x (H, Bt) -> lane-dense (1, Bt), unmasked store.
    out_ref[...] = jnp.dot(wlin, h, preferred_element_type=jnp.float32) + blin


@partial(jax.jit, static_argnames=("block_b",))
def shallow_regression_lstm(x, w_ih, w_hh, b_ih, b_hh, w_lin, b_lin, *, block_b=256):
    """x: (B, T, I) float32 -> (B,) float32 (matches the PyTorch module forward)."""
    B, T, I = x.shape
    H4 = w_ih.shape[0]
    H = H4 // 4

    # Permute PyTorch gate-row order (i, f, g, o) -> (i, f, o, g) so the three sigmoid
    # gates are one contiguous sublane block.  W_ih, W_hh and the bias are permuted
    # consistently; weights stay in their native (4H, in) orientation (feature-major).
    perm = np.concatenate([np.arange(0, 2 * H),
                           np.arange(3 * H, 4 * H),
                           np.arange(2 * H, 3 * H)])
    wih_fm = w_ih.astype(jnp.float32)[perm, :]                        # (4H, I)
    whh_fm = w_hh.astype(jnp.float32)[perm, :]                        # (4H, H)
    bias = (b_ih + b_hh).astype(jnp.float32)[perm].reshape(H4, 1)     # (4H, 1)
    wlin = w_lin.astype(jnp.float32).reshape(1, H)                    # (1, H)
    blin = b_lin.astype(jnp.float32).reshape(1, 1)                    # (1, 1)

    # Batch tile: multiple of 256 (v6e/v7x MXU N width), hence also of 128 (v5e).
    Bt = block_b
    B_pad = ((B + Bt - 1) // Bt) * Bt
    x_f = x.astype(jnp.float32)
    if B_pad != B:
        x_f = jnp.pad(x_f, ((0, B_pad - B), (0, 0), (0, 0)))

    out = pl.pallas_call(
        partial(lstm_kernel, T=T, H=H),
        out_shape=jax.ShapeDtypeStruct((1, B_pad), jnp.float32),
        grid_spec=pltpu.PrefetchScalarGridSpec(
            num_scalar_prefetch=0,
            grid=(B_pad // Bt,),
            in_specs=[
                pl.BlockSpec((Bt, T, I), lambda i: (i, 0, 0)),   # x batch tile (pipelined)
                pl.BlockSpec((H4, I), lambda i: (0, 0)),         # W_ih  (resident, DMA'd once)
                pl.BlockSpec((H4, H), lambda i: (0, 0)),         # W_hh  (resident)
                pl.BlockSpec((H4, 1), lambda i: (0, 0)),         # bias  (resident)
                pl.BlockSpec((1, H), lambda i: (0, 0)),          # W_lin (resident)
                pl.BlockSpec((1, 1), lambda i: (0, 0)),          # b_lin (resident)
            ],
            out_specs=pl.BlockSpec((1, Bt), lambda i: (0, i)),
        ),
        compiler_params=pltpu.CompilerParams(
            dimension_semantics=("parallel",),   # batch tiles independent -> v7x megacore
        ),
    )(x_f, wih_fm, whh_fm, bias, wlin, blin)

    return out[0, :B]


def _reference_lstm(x, w_ih, w_hh, b_ih, b_hh, w_lin, b_lin):
    """Pure-JAX reference mirroring nn.LSTM + nn.Linear (gate order i, f, g, o)."""
    B, T, I = x.shape
    H = w_hh.shape[1]
    h = jnp.zeros((B, H), jnp.float32)
    c = jnp.zeros((B, H), jnp.float32)
    for t in range(T):
        g = x[:, t, :] @ w_ih.T + b_ih + h @ w_hh.T + b_hh
        i_g = jax.nn.sigmoid(g[:, 0 * H:1 * H])
        f_g = jax.nn.sigmoid(g[:, 1 * H:2 * H])
        g_g = jnp.tanh(g[:, 2 * H:3 * H])
        o_g = jax.nn.sigmoid(g[:, 3 * H:4 * H])
        c = f_g * c + i_g * g_g
        h = o_g * jnp.tanh(c)
    return (h @ w_lin.T + b_lin).reshape(-1)


if __name__ == "__main__":
    # Module hyperparameters (from __init__)
    NUM_SENSORS = 4     # input_size
    HIDDEN = 16         # hidden_units
    BATCH = 2
    SEQ = 8

    key = jax.random.PRNGKey(0)
    ks = jax.random.split(key, 8)
    bound = 1.0 / jnp.sqrt(HIDDEN)

    # Deterministic parameter init (shapes match nn.LSTM / nn.Linear)
    w_ih = jax.random.uniform(ks[0], (4 * HIDDEN, NUM_SENSORS), jnp.float32, -bound, bound)
    w_hh = jax.random.uniform(ks[1], (4 * HIDDEN, HIDDEN), jnp.float32, -bound, bound)
    b_ih = jax.random.uniform(ks[2], (4 * HIDDEN,), jnp.float32, -bound, bound)
    b_hh = jax.random.uniform(ks[3], (4 * HIDDEN,), jnp.float32, -bound, bound)
    w_lin = jax.random.uniform(ks[4], (1, HIDDEN), jnp.float32, -bound, bound)
    b_lin = jax.random.uniform(ks[5], (1,), jnp.float32, -bound, bound)

    # Example input: (batch, seq, num_sensors)
    x = jax.random.normal(ks[6], (BATCH, SEQ, NUM_SENSORS), jnp.float32)

    out = shallow_regression_lstm(x, w_ih, w_hh, b_ih, b_hh, w_lin, b_lin)
    out = jax.block_until_ready(out)

    ref = _reference_lstm(x, w_ih, w_hh, b_ih, b_hh, w_lin, b_lin)
    assert out.shape == (BATCH,)
    assert jnp.allclose(out, ref, atol=1e-5, rtol=1e-5), (out, ref)

    print("KERNEL_OK")
</pallas_src>

<mosaic_0001>
module attributes {stable_mosaic.version = 11 : i64} {
  func.func @lstm_kernel(%arg0: i32, %arg1: memref<256x8x4xf32, #tpu.memory_space<vmem>>, %arg2: memref<64x4xf32, #tpu.memory_space<vmem>>, %arg3: memref<64x16xf32, #tpu.memory_space<vmem>>, %arg4: memref<64x1xf32, #tpu.memory_space<vmem>>, %arg5: memref<1x16xf32, #tpu.memory_space<vmem>>, %arg6: memref<1x1xf32, #tpu.memory_space<vmem>>, %arg7: memref<1x256xf32, #tpu.memory_space<vmem>>) attributes {dimension_semantics = [#tpu.dimension_semantics<parallel>], iteration_bounds = array<i64: 1>, scalar_prefetch = 0 : i64, scratch_operands = 0 : i64, tpu.core_type = #tpu.core_type<tc>, window_params = [{transform_indices = @transform_0, window_bounds = array<i64: 256, 8, 4>}, {pipeline_mode = #tpu.pipeline_mode<synchronous>, transform_indices = @transform_1, window_bounds = array<i64: 64, 4>}, {pipeline_mode = #tpu.pipeline_mode<synchronous>, transform_indices = @transform_2, window_bounds = array<i64: 64, 16>}, {pipeline_mode = #tpu.pipeline_mode<synchronous>, transform_indices = @transform_3, window_bounds = array<i64: 64, 1>}, {pipeline_mode = #tpu.pipeline_mode<synchronous>, transform_indices = @transform_4, window_bounds = array<i64: 1, 16>}, {pipeline_mode = #tpu.pipeline_mode<synchronous>, transform_indices = @transform_5, window_bounds = array<i64: 1, 1>}, {transform_indices = @transform_6, window_bounds = array<i64: 1, 256>}]} {
    %c0 = arith.constant 0 : index
    %c0_0 = arith.constant 0 : index
    %0 = vector.load %arg2[%c0, %c0_0] : memref<64x4xf32, #tpu.memory_space<vmem>>, vector<64x4xf32>
    %c0_1 = arith.constant 0 : index
    %c0_2 = arith.constant 0 : index
    %1 = vector.load %arg3[%c0_1, %c0_2] : memref<64x16xf32, #tpu.memory_space<vmem>>, vector<64x16xf32>
    %c0_3 = arith.constant 0 : index
    %c0_4 = arith.constant 0 : index
    %2 = vector.load %arg4[%c0_3, %c0_4] : memref<64x1xf32, #tpu.memory_space<vmem>>, vector<64x1xf32>
    %c0_5 = arith.constant 0 : index
    %c0_6 = arith.constant 0 : index
    %3 = vector.load %arg5[%c0_5, %c0_6] : memref<1x16xf32, #tpu.memory_space<vmem>>, vector<1x16xf32>
    %c0_7 = arith.constant 0 : index
    %c0_8 = arith.constant 0 : index
    %4 = vector.load %arg6[%c0_7, %c0_8] : memref<1x1xf32, #tpu.memory_space<vmem>>, vector<1x1xf32>
    %cst = arith.constant 0.000000e+00 : f32
    %5 = vector.broadcast %cst : f32 to vector<16x256xf32>
    %cst_9 = arith.constant 0.000000e+00 : f32
    %6 = vector.broadcast %cst_9 : f32 to vector<16x256xf32>
    %c0_10 = arith.constant 0 : index
    %c0_11 = arith.constant 0 : index
    %c0_12 = arith.constant 0 : index
    %7 = vector.load %arg1[%c0_10, %c0_11, %c0_12] : memref<256x8x4xf32, #tpu.memory_space<vmem>>, vector<256x1x4xf32>
    %8 = vector.shape_cast %7 : vector<256x1x4xf32> to vector<256x4xf32>
    %cst_13 = arith.constant dense<0.000000e+00> : vector<64x256xf32>
    %9 = tpu.matmul %0, %8, %cst_13 {dimension_numbers = #tpu.dot_dimension_numbers<[1], [1], [0], [0], [0, 0, 1, 0], [], []>} : vector<64x4xf32>, vector<256x4xf32>, vector<64x256xf32> -> vector<64x256xf32>
    %10 = vector.broadcast %2 : vector<64x1xf32> to vector<64x256xf32>
    %11 = arith.addf %9, %10 : vector<64x256xf32>
    %cst_14 = arith.constant dense<0.000000e+00> : vector<64x256xf32>
    %12 = tpu.matmul %1, %5, %cst_14 {dimension_numbers = #tpu.dot_dimension_numbers<[1], [0], [0], [1], [0, 0, 1, 1], [], []>} : vector<64x16xf32>, vector<16x256xf32>, vector<64x256xf32> -> vector<64x256xf32>
    %13 = arith.addf %11, %12 : vector<64x256xf32>
    %14 = vector.extract_strided_slice %13 {offsets = [0, 0], sizes = [48, 256], strides = [1, 1]} : vector<64x256xf32> to vector<48x256xf32>
    %15 = arith.negf %14 : vector<48x256xf32>
    %16 = math.exp %15 : vector<48x256xf32>
    %cst_15 = arith.constant 1.000000e+00 : f32
    %17 = vector.broadcast %cst_15 : f32 to vector<48x256xf32>
    %18 = arith.addf %17, %16 : vector<48x256xf32>
    %19 = arith.divf %17, %18 : vector<48x256xf32>
    %20 = vector.extract_strided_slice %19 {offsets = [0, 0], sizes = [16, 256], strides = [1, 1]} : vector<48x256xf32> to vector<16x256xf32>
    %21 = vector.extract_strided_slice %19 {offsets = [16, 0], sizes = [16, 256], strides = [1, 1]} : vector<48x256xf32> to vector<16x256xf32>
    %22 = vector.extract_strided_slice %19 {offsets = [32, 0], sizes = [16, 256], strides = [1, 1]} : vector<48x256xf32> to vector<16x256xf32>
    %23 = vector.extract_strided_slice %13 {offsets = [48, 0], sizes = [16, 256], strides = [1, 1]} : vector<64x256xf32> to vector<16x256xf32>
    %24 = math.tanh %23 : vector<16x256xf32>
    %25 = arith.mulf %21, %6 : vector<16x256xf32>
    %26 = arith.mulf %20, %24 : vector<16x256xf32>
    %27 = arith.addf %25, %26 : vector<16x256xf32>
    %28 = math.tanh %27 : vector<16x256xf32>
    %29 = arith.mulf %22, %28 : vector<16x256xf32>
    %c0_16 = arith.constant 0 : index
    %c1 = arith.constant 1 : index
    %c0_17 = arith.constant 0 : index
    %30 = vector.load %arg1[%c0_16, %c1, %c0_17] : memref<256x8x4xf32, #tpu.memory_space<vmem>>, vector<256x1x4xf32>
    %31 = vector.shape_cast %30 : vector<256x1x4xf32> to vector<256x4xf32>
    %cst_18 = arith.constant dense<0.000000e+00> : vector<64x256xf32>
    %32 = tpu.matmul %0, %31, %cst_18 {dimension_numbers = #tpu.dot_dimension_numbers<[1], [1], [0], [0], [0, 0, 1, 0], [], []>} : vector<64x4xf32>, vector<256x4xf32>, vector<64x256xf32> -> vector<64x256xf32>
    %33 = vector.broadcast %2 : vector<64x1xf32> to vector<64x256xf32>
    %34 = arith.addf %32, %33 : vector<64x256xf32>
    %cst_19 = arith.constant dense<0.000000e+00> : vector<64x256xf32>
    %35 = tpu.matmul %1, %29, %cst_19 {dimension_numbers = #tpu.dot_dimension_numbers<[1], [0], [0], [1], [0, 0, 1, 1], [], []>} : vector<64x16xf32>, vector<16x256xf32>, vector<64x256xf32> -> vector<64x256xf32>
    %36 = arith.addf %34, %35 : vector<64x256xf32>
    %37 = vector.extract_strided_slice %36 {offsets = [0, 0], sizes = [48, 256], strides = [1, 1]} : vector<64x256xf32> to vector<48x256xf32>
    %38 = arith.negf %37 : vector<48x256xf32>
    %39 = math.exp %38 : vector<48x256xf32>
    %cst_20 = arith.constant 1.000000e+00 : f32
    %40 = vector.broadcast %cst_20 : f32 to vector<48x256xf32>
    %41 = arith.addf %40, %39 : vector<48x256xf32>
    %42 = arith.divf %40, %41 : vector<48x256xf32>
    %43 = vector.extract_strided_slice %42 {offsets = [0, 0], sizes = [16, 256], strides = [1, 1]} : vector<48x256xf32> to vector<16x256xf32>
    %44 = vector.extract_strided_slice %42 {offsets = [16, 0], sizes = [16, 256], strides = [1, 1]} : vector<48x256xf32> to vector<16x256xf32>
    %45 = vector.extract_strided_slice %42 {offsets = [32, 0], sizes = [16, 256], strides = [1, 1]} : vector<48x256xf32> to vector<16x256xf32>
    %46 = vector.extract_strided_slice %36 {offsets = [48, 0], sizes = [16, 256], strides = [1, 1]} : vector<64x256xf32> to vector<16x256xf32>
    %47 = math.tanh %46 : vector<16x256xf32>
    %48 = arith.mulf %44, %27 : vector<16x256xf32>
    %49 = arith.mulf %43, %47 : vector<16x256xf32>
    %50 = arith.addf %48, %49 : vector<16x256xf32>
    %51 = math.tanh %50 : vector<16x256xf32>
    %52 = arith.mulf %45, %51 : vector<16x256xf32>
    %c0_21 = arith.constant 0 : index
    %c2 = arith.constant 2 : index
    %c0_22 = arith.constant 0 : index
    %53 = vector.load %arg1[%c0_21, %c2, %c0_22] : memref<256x8x4xf32, #tpu.memory_space<vmem>>, vector<256x1x4xf32>
    %54 = vector.shape_cast %53 : vector<256x1x4xf32> to vector<256x4xf32>
    %cst_23 = arith.constant dense<0.000000e+00> : vector<64x256xf32>
    %55 = tpu.matmul %0, %54, %cst_23 {dimension_numbers = #tpu.dot_dimension_numbers<[1], [1], [0], [0], [0, 0, 1, 0], [], []>} : vector<64x4xf32>, vector<256x4xf32>, vector<64x256xf32> -> vector<64x256xf32>
    %56 = vector.broadcast %2 : vector<64x1xf32> to vector<64x256xf32>
    %57 = arith.addf %55, %56 : vector<64x256xf32>
    %cst_24 = arith.constant dense<0.000000e+00> : vector<64x256xf32>
    %58 = tpu.matmul %1, %52, %cst_24 {dimension_numbers = #tpu.dot_dimension_numbers<[1], [0], [0], [1], [0, 0, 1, 1], [], []>} : vector<64x16xf32>, vector<16x256xf32>, vector<64x256xf32> -> vector<64x256xf32>
    %59 = arith.addf %57, %58 : vector<64x256xf32>
    %60 = vector.extract_strided_slice %59 {offsets = [0, 0], sizes = [48, 256], strides = [1, 1]} : vector<64x256xf32> to vector<48x256xf32>
    %61 = arith.negf %60 : vector<48x256xf32>
    %62 = math.exp %61 : vector<48x256xf32>
    %cst_25 = arith.constant 1.000000e+00 : f32
    %63 = vector.broadcast %cst_25 : f32 to vector<48x256xf32>
    %64 = arith.addf %63, %62 : vector<48x256xf32>
    %65 = arith.divf %63, %64 : vector<48x256xf32>
    %66 = vector.extract_strided_slice %65 {offsets = [0, 0], sizes = [16, 256], strides = [1, 1]} : vector<48x256xf32> to vector<16x256xf32>
    %67 = vector.extract_strided_slice %65 {offsets = [16, 0], sizes = [16, 256], strides = [1, 1]} : vector<48x256xf32> to vector<16x256xf32>
    %68 = vector.extract_strided_slice %65 {offsets = [32, 0], sizes = [16, 256], strides = [1, 1]} : vector<48x256xf32> to vector<16x256xf32>
    %69 = vector.extract_strided_slice %59 {offsets = [48, 0], sizes = [16, 256], strides = [1, 1]} : vector<64x256xf32> to vector<16x256xf32>
    %70 = math.tanh %69 : vector<16x256xf32>
    %71 = arith.mulf %67, %50 : vector<16x256xf32>
    %72 = arith.mulf %66, %70 : vector<16x256xf32>
    %73 = arith.addf %71, %72 : vector<16x256xf32>
    %74 = math.tanh %73 : vector<16x256xf32>
    %75 = arith.mulf %68, %74 : vector<16x256xf32>
    %c0_26 = arith.constant 0 : index
    %c3 = arith.constant 3 : index
    %c0_27 = arith.constant 0 : index
    %76 = vector.load %arg1[%c0_26, %c3, %c0_27] : memref<256x8x4xf32, #tpu.memory_space<vmem>>, vector<256x1x4xf32>
    %77 = vector.shape_cast %76 : vector<256x1x4xf32> to vector<256x4xf32>
    %cst_28 = arith.constant dense<0.000000e+00> : vector<64x256xf32>
    %78 = tpu.matmul %0, %77, %cst_28 {dimension_numbers = #tpu.dot_dimension_numbers<[1], [1], [0], [0], [0, 0, 1, 0], [], []>} : vector<64x4xf32>, vector<256x4xf32>, vector<64x256xf32> -> vector<64x256xf32>
    %79 = vector.broadcast %2 : vector<64x1xf32> to vector<64x256xf32>
    %80 = arith.addf %78, %79 : vector<64x256xf32>
    %cst_29 = arith.constant dense<0.000000e+00> : vector<64x256xf32>
    %81 = tpu.matmul %1, %75, %cst_29 {dimension_numbers = #tpu.dot_dimension_numbers<[1], [0], [0], [1], [0, 0, 1, 1], [], []>} : vector<64x16xf32>, vector<16x256xf32>, vector<64x256xf32> -> vector<64x256xf32>
    %82 = arith.addf %80, %81 : vector<64x256xf32>
    %83 = vector.extract_strided_slice %82 {offsets = [0, 0], sizes = [48, 256], strides = [1, 1]} : vector<64x256xf32> to vector<48x256xf32>
    %84 = arith.negf %83 : vector<48x256xf32>
    %85 = math.exp %84 : vector<48x256xf32>
    %cst_30 = arith.constant 1.000000e+00 : f32
    %86 = vector.broadcast %cst_30 : f32 to vector<48x256xf32>
    %87 = arith.addf %86, %85 : vector<48x256xf32>
    %88 = arith.divf %86, %87 : vector<48x256xf32>
    %89 = vector.extract_strided_slice %88 {offsets = [0, 0], sizes = [16, 256], strides = [1, 1]} : vector<48x256xf32> to vector<16x256xf32>
    %90 = vector.extract_strided_slice %88 {offsets = [16, 0], sizes = [16, 256], strides = [1, 1]} : vector<48x256xf32> to vector<16x256xf32>
    %91 = vector.extract_strided_slice %88 {offsets = [32, 0], sizes = [16, 256], strides = [1, 1]} : vector<48x256xf32> to vector<16x256xf32>
    %92 = vector.extract_strided_slice %82 {offsets = [48, 0], sizes = [16, 256], strides = [1, 1]} : vector<64x256xf32> to vector<16x256xf32>
    %93 = math.tanh %92 : vector<16x256xf32>
    %94 = arith.mulf %90, %73 : vector<16x256xf32>
    %95 = arith.mulf %89, %93 : vector<16x256xf32>
    %96 = arith.addf %94, %95 : vector<16x256xf32>
    %97 = math.tanh %96 : vector<16x256xf32>
    %98 = arith.mulf %91, %97 : vector<16x256xf32>
    %c0_31 = arith.constant 0 : index
    %c4 = arith.constant 4 : index
    %c0_32 = arith.constant 0 : index
    %99 = vector.load %arg1[%c0_31, %c4, %c0_32] : memref<256x8x4xf32, #tpu.memory_space<vmem>>, vector<256x1x4xf32>
    %100 = vector.shape_cast %99 : vector<256x1x4xf32> to vector<256x4xf32>
    %cst_33 = arith.constant dense<0.000000e+00> : vector<64x256xf32>
    %101 = tpu.matmul %0, %100, %cst_33 {dimension_numbers = #tpu.dot_dimension_numbers<[1], [1], [0], [0], [0, 0, 1, 0], [], []>} : vector<64x4xf32>, vector<256x4xf32>, vector<64x256xf32> -> vector<64x256xf32>
    %102 = vector.broadcast %2 : vector<64x1xf32> to vector<64x256xf32>
    %103 = arith.addf %101, %102 : vector<64x256xf32>
    %cst_34 = arith.constant dense<0.000000e+00> : vector<64x256xf32>
    %104 = tpu.matmul %1, %98, %cst_34 {dimension_numbers = #tpu.dot_dimension_numbers<[1], [0], [0], [1], [0, 0, 1, 1], [], []>} : vector<64x16xf32>, vector<16x256xf32>, vector<64x256xf32> -> vector<64x256xf32>
    %105 = arith.addf %103, %104 : vector<64x256xf32>
    %106 = vector.extract_strided_slice %105 {offsets = [0, 0], sizes = [48, 256], strides = [1, 1]} : vector<64x256xf32> to vector<48x256xf32>
    %107 = arith.negf %106 : vector<48x256xf32>
    %108 = math.exp %107 : vector<48x256xf32>
    %cst_35 = arith.constant 1.000000e+00 : f32
    %109 = vector.broadcast %cst_35 : f32 to vector<48x256xf32>
    %110 = arith.addf %109, %108 : vector<48x256xf32>
    %111 = arith.divf %109, %110 : vector<48x256xf32>
    %112 = vector.extract_strided_slice %111 {offsets = [0, 0], sizes = [16, 256], strides = [1, 1]} : vector<48x256xf32> to vector<16x256xf32>
    %113 = vector.extract_strided_slice %111 {offsets = [16, 0], sizes = [16, 256], strides = [1, 1]} : vector<48x256xf32> to vector<16x256xf32>
    %114 = vector.extract_strided_slice %111 {offsets = [32, 0], sizes = [16, 256], strides = [1, 1]} : vector<48x256xf32> to vector<16x256xf32>
    %115 = vector.extract_strided_slice %105 {offsets = [48, 0], sizes = [16, 256], strides = [1, 1]} : vector<64x256xf32> to vector<16x256xf32>
    %116 = math.tanh %115 : vector<16x256xf32>
    %117 = arith.mulf %113, %96 : vector<16x256xf32>
    %118 = arith.mulf %112, %116 : vector<16x256xf32>
    %119 = arith.addf %117, %118 : vector<16x256xf32>
    %120 = math.tanh %119 : vector<16x256xf32>
    %121 = arith.mulf %114, %120 : vector<16x256xf32>
    %c0_36 = arith.constant 0 : index
    %c5 = arith.constant 5 : index
    %c0_37 = arith.constant 0 : index
    %122 = vector.load %arg1[%c0_36, %c5, %c0_37] : memref<256x8x4xf32, #tpu.memory_space<vmem>>, vector<256x1x4xf32>
    %123 = vector.shape_cast %122 : vector<256x1x4xf32> to vector<256x4xf32>
    %cst_38 = arith.constant dense<0.000000e+00> : vector<64x256xf32>
    %124 = tpu.matmul %0, %123, %cst_38 {dimension_numbers = #tpu.dot_dimension_numbers<[1], [1], [0], [0], [0, 0, 1, 0], [], []>} : vector<64x4xf32>, vector<256x4xf32>, vector<64x256xf32> -> vector<64x256xf32>
    %125 = vector.broadcast %2 : vector<64x1xf32> to vector<64x256xf32>
    %126 = arith.addf %124, %125 : vector<64x256xf32>
    %cst_39 = arith.constant dense<0.000000e+00> : vector<64x256xf32>
    %127 = tpu.matmul %1, %121, %cst_39 {dimension_numbers = #tpu.dot_dimension_numbers<[1], [0], [0], [1], [0, 0, 1, 1], [], []>} : vector<64x16xf32>, vector<16x256xf32>, vector<64x256xf32> -> vector<64x256xf32>
    %128 = arith.addf %126, %127 : vector<64x256xf32>
    %129 = vector.extract_strided_slice %128 {offsets = [0, 0], sizes = [48, 256], strides = [1, 1]} : vector<64x256xf32> to vector<48x256xf32>
    %130 = arith.negf %129 : vector<48x256xf32>
    %131 = math.exp %130 : vector<48x256xf32>
    %cst_40 = arith.constant 1.000000e+00 : f32
    %132 = vector.broadcast %cst_40 : f32 to vector<48x256xf32>
    %133 = arith.addf %132, %131 : vector<48x256xf32>
    %134 = arith.divf %132, %133 : vector<48x256xf32>
    %135 = vector.extract_strided_slice %134 {offsets = [0, 0], sizes = [16, 256], strides = [1, 1]} : vector<48x256xf32> to vector<16x256xf32>
    %136 = vector.extract_strided_slice %134 {offsets = [16, 0], sizes = [16, 256], strides = [1, 1]} : vector<48x256xf32> to vector<16x256xf32>
    %137 = vector.extract_strided_slice %134 {offsets = [32, 0], sizes = [16, 256], strides = [1, 1]} : vector<48x256xf32> to vector<16x256xf32>
    %138 = vector.extract_strided_slice %128 {offsets = [48, 0], sizes = [16, 256], strides = [1, 1]} : vector<64x256xf32> to vector<16x256xf32>
    %139 = math.tanh %138 : vector<16x256xf32>
    %140 = arith.mulf %136, %119 : vector<16x256xf32>
    %141 = arith.mulf %135, %139 : vector<16x256xf32>
    %142 = arith.addf %140, %141 : vector<16x256xf32>
    %143 = math.tanh %142 : vector<16x256xf32>
    %144 = arith.mulf %137, %143 : vector<16x256xf32>
    %c0_41 = arith.constant 0 : index
    %c6 = arith.constant 6 : index
    %c0_42 = arith.constant 0 : index
    %145 = vector.load %arg1[%c0_41, %c6, %c0_42] : memref<256x8x4xf32, #tpu.memory_space<vmem>>, vector<256x1x4xf32>
    %146 = vector.shape_cast %145 : vector<256x1x4xf32> to vector<256x4xf32>
    %cst_43 = arith.constant dense<0.000000e+00> : vector<64x256xf32>
    %147 = tpu.matmul %0, %146, %cst_43 {dimension_numbers = #tpu.dot_dimension_numbers<[1], [1], [0], [0], [0, 0, 1, 0], [], []>} : vector<64x4xf32>, vector<256x4xf32>, vector<64x256xf32> -> vector<64x256xf32>
    %148 = vector.broadcast %2 : vector<64x1xf32> to vector<64x256xf32>
    %149 = arith.addf %147, %148 : vector<64x256xf32>
    %cst_44 = arith.constant dense<0.000000e+00> : vector<64x256xf32>
    %150 = tpu.matmul %1, %144, %cst_44 {dimension_numbers = #tpu.dot_dimension_numbers<[1], [0], [0], [1], [0, 0, 1, 1], [], []>} : vector<64x16xf32>, vector<16x256xf32>, vector<64x256xf32> -> vector<64x256xf32>
    %151 = arith.addf %149, %150 : vector<64x256xf32>
    %152 = vector.extract_strided_slice %151 {offsets = [0, 0], sizes = [48, 256], strides = [1, 1]} : vector<64x256xf32> to vector<48x256xf32>
    %153 = arith.negf %152 : vector<48x256xf32>
    %154 = math.exp %153 : vector<48x256xf32>
    %cst_45 = arith.constant 1.000000e+00 : f32
    %155 = vector.broadcast %cst_45 : f32 to vector<48x256xf32>
    %156 = arith.addf %155, %154 : vector<48x256xf32>
    %157 = arith.divf %155, %156 : vector<48x256xf32>
    %158 = vector.extract_strided_slice %157 {offsets = [0, 0], sizes = [16, 256], strides = [1, 1]} : vector<48x256xf32> to vector<16x256xf32>
    %159 = vector.extract_strided_slice %157 {offsets = [16, 0], sizes = [16, 256], strides = [1, 1]} : vector<48x256xf32> to vector<16x256xf32>
    %160 = vector.extract_strided_slice %157 {offsets = [32, 0], sizes = [16, 256], strides = [1, 1]} : vector<48x256xf32> to vector<16x256xf32>
    %161 = vector.extract_strided_slice %151 {offsets = [48, 0], sizes = [16, 256], strides = [1, 1]} : vector<64x256xf32> to vector<16x256xf32>
    %162 = math.tanh %161 : vector<16x256xf32>
    %163 = arith.mulf %159, %142 : vector<16x256xf32>
    %164 = arith.mulf %158, %162 : vector<16x256xf32>
    %165 = arith.addf %163, %164 : vector<16x256xf32>
    %166 = math.tanh %165 : vector<16x256xf32>
    %167 = arith.mulf %160, %166 : vector<16x256xf32>
    %c0_46 = arith.constant 0 : index
    %c7 = arith.constant 7 : index
    %c0_47 = arith.constant 0 : index
    %168 = vector.load %arg1[%c0_46, %c7, %c0_47] : memref<256x8x4xf32, #tpu.memory_space<vmem>>, vector<256x1x4xf32>
    %169 = vector.shape_cast %168 : vector<256x1x4xf32> to vector<256x4xf32>
    %cst_48 = arith.constant dense<0.000000e+00> : vector<64x256xf32>
    %170 = tpu.matmul %0, %169, %cst_48 {dimension_numbers = #tpu.dot_dimension_numbers<[1], [1], [0], [0], [0, 0, 1, 0], [], []>} : vector<64x4xf32>, vector<256x4xf32>, vector<64x256xf32> -> vector<64x256xf32>
    %171 = vector.broadcast %2 : vector<64x1xf32> to vector<64x256xf32>
    %172 = arith.addf %170, %171 : vector<64x256xf32>
    %cst_49 = arith.constant dense<0.000000e+00> : vector<64x256xf32>
    %173 = tpu.matmul %1, %167, %cst_49 {dimension_numbers = #tpu.dot_dimension_numbers<[1], [0], [0], [1], [0, 0, 1, 1], [], []>} : vector<64x16xf32>, vector<16x256xf32>, vector<64x256xf32> -> vector<64x256xf32>
    %174 = arith.addf %172, %173 : vector<64x256xf32>
    %175 = vector.extract_strided_slice %174 {offsets = [0, 0], sizes = [48, 256], strides = [1, 1]} : vector<64x256xf32> to vector<48x256xf32>
    %176 = arith.negf %175 : vector<48x256xf32>
    %177 = math.exp %176 : vector<48x256xf32>
    %cst_50 = arith.constant 1.000000e+00 : f32
    %178 = vector.broadcast %cst_50 : f32 to vector<48x256xf32>
    %179 = arith.addf %178, %177 : vector<48x256xf32>
    %180 = arith.divf %178, %179 : vector<48x256xf32>
    %181 = vector.extract_strided_slice %180 {offsets = [0, 0], sizes = [16, 256], strides = [1, 1]} : vector<48x256xf32> to vector<16x256xf32>
    %182 = vector.extract_strided_slice %180 {offsets = [16, 0], sizes = [16, 256], strides = [1, 1]} : vector<48x256xf32> to vector<16x256xf32>
    %183 = vector.extract_strided_slice %180 {offsets = [32, 0], sizes = [16, 256], strides = [1, 1]} : vector<48x256xf32> to vector<16x256xf32>
    %184 = vector.extract_strided_slice %174 {offsets = [48, 0], sizes = [16, 256], strides = [1, 1]} : vector<64x256xf32> to vector<16x256xf32>
    %185 = math.tanh %184 : vector<16x256xf32>
    %186 = arith.mulf %182, %165 : vector<16x256xf32>
    %187 = arith.mulf %181, %185 : vector<16x256xf32>
    %188 = arith.addf %186, %187 : vector<16x256xf32>
    %189 = math.tanh %188 : vector<16x256xf32>
    %190 = arith.mulf %183, %189 : vector<16x256xf32>
    %cst_51 = arith.constant dense<0.000000e+00> : vector<1x256xf32>
    %191 = tpu.matmul %3, %190, %cst_51 {dimension_numbers = #tpu.dot_dimension_numbers<[1], [0], [0], [1], [0, 0, 1, 1], [], []>} : vector<1x16xf32>, vector<16x256xf32>, vector<1x256xf32> -> vector<1x256xf32>
    %192 = vector.broadcast %4 : vector<1x1xf32> to vector<1x256xf32>
    %193 = arith.addf %191, %192 : vector<1x256xf32>
    %c0_52 = arith.constant 0 : index
    %c0_53 = arith.constant 0 : index
    %194 = vector.load %arg7[%c0_52, %c0_53] : memref<1x256xf32, #tpu.memory_space<vmem>>, vector<1x256xf32>
    tpu.vector_store %arg7[%c0_52, %c0_53], %193 {strides = array<i32>} : memref<1x256xf32, #tpu.memory_space<vmem>>, vector<1x256xf32>,
    return
  }
  func.func @transform_0(%arg0: i32) -> (i32, i32, i32) {
    %c0_i32 = arith.constant 0 : i32
    %c0_i32_0 = arith.constant 0 : i32
    %c0_i32_1 = arith.constant 0 : i32
    return %arg0, %c0_i32, %c0_i32_0 : i32, i32, i32
  }
  func.func @transform_1(%arg0: i32) -> (i32, i32) {
    %c0_i32 = arith.constant 0 : i32
    %c0_i32_0 = arith.constant 0 : i32
    %c0_i32_1 = arith.constant 0 : i32
    return %c0_i32, %c0_i32_0 : i32, i32
  }
  func.func @transform_2(%arg0: i32) -> (i32, i32) {
    %c0_i32 = arith.constant 0 : i32
    %c0_i32_0 = arith.constant 0 : i32
    %c0_i32_1 = arith.constant 0 : i32
    return %c0_i32, %c0_i32_0 : i32, i32
  }
  func.func @transform_3(%arg0: i32) -> (i32, i32) {
    %c0_i32 = arith.constant 0 : i32
    %c0_i32_0 = arith.constant 0 : i32
    %c0_i32_1 = arith.constant 0 : i32
    return %c0_i32, %c0_i32_0 : i32, i32
  }
  func.func @transform_4(%arg0: i32) -> (i32, i32) {
    %c0_i32 = arith.constant 0 : i32
    %c0_i32_0 = arith.constant 0 : i32
    %c0_i32_1 = arith.constant 0 : i32
    return %c0_i32, %c0_i32_0 : i32, i32
  }
  func.func @transform_5(%arg0: i32) -> (i32, i32) {
    %c0_i32 = arith.constant 0 : i32
    %c0_i32_0 = arith.constant 0 : i32
    %c0_i32_1 = arith.constant 0 : i32
    return %c0_i32, %c0_i32_0 : i32, i32
  }
  func.func @transform_6(%arg0: i32) -> (i32, i32) {
    %c0_i32 = arith.constant 0 : i32
    %c0_i32_0 = arith.constant 0 : i32
    return %c0_i32, %arg0 : i32, i32
  }
}

</mosaic_0001>

<bundles_post_ra>
// kernel: shallow_regression_lstm.1
= control target key start
LH: loop header
LB: loop body
LE: loop exit
PB: predicated region body
PF: predicated region fallthrough
CT: control target
= control target key end

     0   :  { %vm604_vm0 = vcmask 1041409   ;;  %vm607_vm1 = vcmask 1042434   ;;  %vm610_vm2 = vcmask 1043459   ;;  %vm613_vm3 = vcmask 1044484   ;;  %s22879_s0 = inlined_call_operand.vmem [shape: f32[256,8,4], index: 0, kind: input, shape index: {}]   ;;  %s22880_s1 = inlined_call_operand.vmem [shape: f32[64,4], index: 1, kind: input, shape index: {}]   ;;  %s22881_s5 = inlined_call_operand.<no memory space> [shape: f32[1,1], index: 5, kind: input, shape index: {}]   ;;  %s22882_s2 = inlined_call_operand.vmem [shape: f32[64,16], index: 2, kind: input, shape index: {}]   ;;  %s22883_s3 = inlined_call_operand.vmem [shape: f32[64,1], index: 3, kind: input, shape index: {}]   ;;  %s22884_s4 = inlined_call_operand.vmem [shape: f32[1,16], index: 4, kind: input, shape index: {}]   ;;  %s22885_s6 = inlined_call_operand.vmem [shape: f32[1,256], index: 6, kind: output, shape index: {}]  }
   0x1   :  { %v180_v0 = vld [vmem:[%s22879_s0 + $0x408] sm:$0x1]  ;;  %v181_v1 = vld [vmem:[%s22879_s0 + $0x410] sm:$0x1]  ;;  %v182_v2 = vld [vmem:[%s22879_s0 + $0x418] sm:$0x1] }
   0x2   :  { %v179_v3 = vld [vmem:[%s22879_s0 + $0x400] sm:$0x1]  ;;  %v184_v5 = vld [vmem:[%s22879_s0 + $0x428] sm:$0x1]  ;;  %v185_v6 = vld [vmem:[%s22879_s0 + $0x430] sm:$0x1] }
   0x3   :  { %v183_v4 = vld [vmem:[%s22879_s0 + $0x420] sm:$0x1]  ;;  %v186_v7 = vld [vmem:[%s22879_s0 + $0x438] sm:$0x1]  ;;  %v188_v8 = vld [vmem:[%s22879_s0 + $0x448] sm:$0x1] }
   0x4   :  { %v189_v9 = vld [vmem:[%s22879_s0 + $0x450] sm:$0x1]  ;;  %v187_v10 = vld [vmem:[%s22879_s0 + $0x440] sm:$0x1]  ;;  %v190_v11 = vld [vmem:[%s22879_s0 + $0x458] sm:$0x1] }
   0x5   :  { %v191_v12 = vld [vmem:[%s22879_s0 + $0x460] sm:$0x1]  ;;  %v192_v13 = vld [vmem:[%s22879_s0 + $0x468] sm:$0x1]  ;;  %v193_v14 = vld [vmem:[%s22879_s0 + $0x470] sm:$0x1] }
   0x6   :  { %vm616_vm4 = vcmask 1045509   ;;  %vm619_vm5 = vcmask 1046534   ;;  %vm622_vm6 = vcmask 1047559   ;;  %v834_v15 = vrot.slane %v180_v0, 7  ;;  %v194_v16 = vld [vmem:[%s22879_s0 + $0x478] sm:$0x1] }
   0x7   :  { %v836_v17 = vrot.slane %v181_v1, 6  ;;  %v838_v18 = vrot.slane %v182_v2, 5  ;;  %v840_v19 = vrot.slane %v183_v4, 4  ;;  %v842_v20 = vrot.slane %v184_v5, 3  ;;  %v52_v25 = vld [vmem:[%s22879_s0 + $0x8] sm:$0x1] }
   0x8   :  { %v835_v21 = vsel %vm604_vm0, %v834_v15, %v179_v3  ;;  %v844_v22 = vrot.slane %v185_v6, 2  ;;  %v846_v23 = vrot.slane %v186_v7, 1  ;;  %v848_v24 = vrot.slane %v188_v8, 7  ;;  %v53_v30 = vld [vmem:[%s22879_s0 + $0x10] sm:$0x1]  ;;  %v25_v3 = vld [vmem:[%s22880_s1] sm:$0xff] }
   0x9   :  { %v837_v26 = vsel %vm607_vm1, %v836_v17, %v835_v21  ;;  %v850_v27 = vrot.slane %v189_v9, 6  ;;  %v852_v28 = vrot.slane %v190_v11, 5  ;;  %v854_v29 = vrot.slane %v191_v12, 4  ;;  %v51_v38 = vld [vmem:[%s22879_s0] sm:$0x1] }
   0xa   :  { %v839_v31 = vsel %vm610_vm2, %v838_v18, %v837_v26  ;;  %v849_v32 = vsel %vm604_vm0, %v848_v24, %v187_v10  ;;  %v856_v33 = vrot.slane %v192_v13, 3  ;;  %v858_v34 = vrot.slane %v193_v14, 2  ;;  %v54_v41 = vld [vmem:[%s22879_s0 + $0x18] sm:$0x1]  ;;  %v55_v42 = vld [vmem:[%s22879_s0 + $0x20] sm:$0x1] }
   0xb   :  { %v841_v35 = vsel %vm613_vm3, %v840_v19, %v839_v31  ;;  %v851_v36 = vsel %vm607_vm1, %v850_v27, %v849_v32  ;;  %v860_v37 = vrot.slane %v194_v16, 1  ;;  %vm1058_vm7 = vcmask 31744   ;;  %v56_v47 = vld [vmem:[%s22879_s0 + $0x28] sm:$0x1]  ;;  %v57_v48 = vld [vmem:[%s22879_s0 + $0x30] sm:$0x1] }
   0xc   :  { %v843_v39 = vsel %vm616_vm4, %v842_v20, %v841_v35  ;;  %v853_v40 = vsel %vm610_vm2, %v852_v28, %v851_v36  ;;  %v603_v43 = vrot.slane %v52_v25, 7  ;;  %v606_v44 = vrot.slane %v53_v30, 6  ;;  %v58_v49 = vld [vmem:[%s22879_s0 + $0x38] sm:$0x1]  ;;  %v59_v52 = vld [vmem:[%s22879_s0 + $0x40] sm:$0x1]  ;;  %vm13442_vm8 = vmpackc.low %vm1058_vm7, %vm1058_vm7  ;;  %11667 = vmatprep.mubr.msk.f32.mxu0 %vm1058_vm7, %v25_v3 }
   0xd   :  { %v845_v45 = vsel %vm619_vm5, %v844_v22, %v843_v39  ;;  %v855_v46 = vsel %vm613_vm3, %v854_v29, %v853_v40  ;;  %v60_v53 = vld [vmem:[%s22879_s0 + $0x48] sm:$0x1]  ;;  %v61_v54 = vld [vmem:[%s22879_s0 + $0x50] sm:$0x1]  ;;  %v62_v57 = vld [vmem:[%s22879_s0 + $0x58] sm:$0x1] }
   0xe   :  { %v847_v50 = vsel %vm622_vm6, %v846_v23, %v845_v45  ;;  %v857_v51 = vsel %vm616_vm4, %v856_v33, %v855_v46  ;;  %v605_v55 = vsel %vm604_vm0, %v603_v43, %v51_v38  ;;  %v63_v58 = vld [vmem:[%s22879_s0 + $0x60] sm:$0x1]  ;;  %v609_v60 = vrot.slane %v54_v41, 5  ;;  %v64_v0 = vld [vmem:[%s22879_s0 + $0x68] sm:$0x1] }
   0xf   :  { %v859_v56 = vsel %vm619_vm5, %v858_v34, %v857_v51  ;;  %v608_v59 = vsel %vm607_vm1, %v606_v44, %v605_v55  ;;  %v612_v61 = vrot.slane %v55_v42, 4  ;;  %v615_v1 = vrot.slane %v56_v47, 3  ;;  %v65_v5 = vld [vmem:[%s22879_s0 + $0x70] sm:$0x1]  ;;  %v66_v6 = vld [vmem:[%s22879_s0 + $0x78] sm:$0x1] }
  0x10   :  { %v861_v62 = vsel %vm622_vm6, %v860_v37, %v859_v56  ;;  %v618_v2 = vrot.slane %v57_v48, 2  ;;  %v611_v7 = vsel %vm610_vm2, %v609_v60, %v608_v59  ;;  %v624_v8 = vrot.slane %v60_v53, 7  ;;  %v196_v17 = vld [vmem:[%s22879_s0 + $0x488] sm:$0x1]  ;;  %v197_v18 = vld [vmem:[%s22879_s0 + $0x490] sm:$0x1] }
  0x11   :  { %v12042_v4 = vpack.c.bf16 %v861_v62, %v847_v50  ;;  %v626_v9 = vrot.slane %v61_v54, 6  ;;  %v614_v10 = vsel %vm613_vm3, %v612_v61, %v611_v7  ;;  %v621_v11 = vrot.slane %v58_v49, 1  ;;  %v195_v23 = vld [vmem:[%s22879_s0 + $0x480] sm:$0x1]  ;;  %v198_v24 = vld [vmem:[%s22879_s0 + $0x498] sm:$0x1] }
  0x12   :  { %v628_v12 = vrot.slane %v62_v57, 5  ;;  %v630_v13 = vrot.slane %v63_v58, 4  ;;  %v617_v14 = vsel %vm616_vm4, %v615_v1, %v614_v10  ;;  %v625_v15 = vsel %vm604_vm0, %v624_v8, %v59_v52  ;;  %v199_v25 = vld [vmem:[%s22879_s0 + $0x4a0] sm:$0x1]  ;;  %v200_v27 = vld [vmem:[%s22879_s0 + $0x4a8] sm:$0x1] }
  0x13   :  { %12044 = vmatprep.subr.msk.bf16.mxu0 %vm13442_vm8, %v12042_v4  ;;  %v632_v16 = vrot.slane %v64_v0, 3  ;;  %v620_v19 = vsel %vm619_vm5, %v618_v2, %v617_v14  ;;  %v627_v20 = vsel %vm607_vm1, %v626_v9, %v625_v15  ;;  %v634_v21 = vrot.slane %v65_v5, 2  ;;  %v201_v28 = vld [vmem:[%s22879_s0 + $0x4b0] sm:$0x1]  ;;  %v202_v29 = vld [vmem:[%s22879_s0 + $0x4b8] sm:$0x1] }
  0x14   :  { %v636_v22 = vrot.slane %v66_v6, 1  ;;  %v629_v26 = vsel %vm610_vm2, %v628_v12, %v627_v20  ;;  %v623_v30 = vsel %vm622_vm6, %v621_v11, %v620_v19  ;;  %v203_v32 = vld [vmem:[%s22879_s0 + $0x4c0] sm:$0x1]  ;;  %v204_v33 = vld [vmem:[%s22879_s0 + $0x4c8] sm:$0x1]  ;;  %v862_v38 = vrot.slane %v196_v17, 7 }
  0x15   :  { %v631_v31 = vsel %vm613_vm3, %v630_v13, %v629_v26  ;;  %v205_v34 = vld [vmem:[%s22879_s0 + $0x4d0] sm:$0x1]  ;;  %v206_v35 = vld [vmem:[%s22879_s0 + $0x4d8] sm:$0x1]  ;;  %v207_v37 = vld [vmem:[%s22879_s0 + $0x4e0] sm:$0x1] }
  0x16   :  { %v633_v36 = vsel %vm616_vm4, %v632_v16, %v631_v31  ;;  %v864_v39 = vrot.slane %v197_v18, 6  ;;  %v866_v40 = vrot.slane %v198_v24, 5  ;;  %v208_v42 = vld [vmem:[%s22879_s0 + $0x4e8] sm:$0x1]  ;;  %v868_v43 = vrot.slane %v199_v25, 4 }
  0x17   :  { %v635_v41 = vsel %vm619_vm5, %v634_v21, %v633_v36  ;;  %v870_v44 = vrot.slane %v200_v27, 3  ;;  %v872_v45 = vrot.slane %v201_v28, 2  ;;  %v209_v47 = vld [vmem:[%s22879_s0 + $0x4f0] sm:$0x1]  ;;  %v863_v48 = vsel %vm604_vm0, %v862_v38, %v195_v23  ;;  %v210_v52 = vld [vmem:[%s22879_s0 + $0x4f8] sm:$0x1] }
  0x18   :  { %v637_v46 = vsel %vm622_vm6, %v636_v22, %v635_v41  ;;  %v874_v49 = vrot.slane %v202_v29, 1  ;;  %v876_v50 = vrot.slane %v204_v33, 7  ;;  %v865_v53 = vsel %vm607_vm1, %v864_v39, %v863_v48  ;;  %v68_v60 = vld [vmem:[%s22879_s0 + $0x88] sm:$0x1]  ;;  %v67_v1 = vld [vmem:[%s22879_s0 + $0x80] sm:$0x1] }
  0x19   :  { %v12045_v51 = vpack.c.bf16 %v637_v46, %v623_v30  ;;  %v878_v54 = vrot.slane %v205_v34, 6  ;;  %v880_v55 = vrot.slane %v206_v35, 5  ;;  %v867_v56 = vsel %vm610_vm2, %v866_v40, %v865_v53  ;;  %v69_v2 = vld [vmem:[%s22879_s0 + $0x90] sm:$0x1]  ;;  %v70_v3 = vld [vmem:[%s22879_s0 + $0x98] sm:$0x1] }
  0x1a   :  { %v877_v57 = vsel %vm604_vm0, %v876_v50, %v203_v32  ;;  %v882_v58 = vrot.slane %v207_v37, 4  ;;  %v884_v59 = vrot.slane %v208_v42, 3  ;;  %v869_v61 = vsel %vm613_vm3, %v868_v43, %v867_v56  ;;  %v71_v7 = vld [vmem:[%s22879_s0 + $0xa0] sm:$0x1]  ;;  %v72_v8 = vld [vmem:[%s22879_s0 + $0xa8] sm:$0x1] }
  0x1b   :  { %12047 = vmatpush3.bf16.xpose.msk.msra.mxu0 %vm13442_vm8, %v12045_v51  ;;  %v879_v62 = vsel %vm607_vm1, %v878_v54, %v877_v57  ;;  %v886_v0 = vrot.slane %v209_v47, 2  ;;  %v871_v4 = vsel %vm616_vm4, %v870_v44, %v869_v61  ;;  %v888_v6 = vrot.slane %v210_v52, 1  ;;  %v73_v11 = vld [vmem:[%s22879_s0 + $0xb0] sm:$0x1]  ;;  %v74_v12 = vld [vmem:[%s22879_s0 + $0xb8] sm:$0x1] }
  0x1c   :  { %v881_v5 = vsel %vm610_vm2, %v880_v55, %v879_v62  ;;  %v873_v9 = vsel %vm619_vm5, %v872_v45, %v871_v4  ;;  %v76_v13 = vld [vmem:[%s22879_s0 + $0xc8] sm:$0x1]  ;;  %v75_v16 = vld [vmem:[%s22879_s0 + $0xc0] sm:$0x1]  ;;  %v77_v17 = vld [vmem:[%s22879_s0 + $0xd0] sm:$0x1] }
  0x1d   :  { %v883_v10 = vsel %vm613_vm3, %v882_v58, %v881_v5  ;;  %v875_v14 = vsel %vm622_vm6, %v874_v49, %v873_v9  ;;  %v78_v18 = vld [vmem:[%s22879_s0 + $0xd8] sm:$0x1]  ;;  %v638_v19 = vrot.slane %v68_v60, 7  ;;  %v640_v20 = vrot.slane %v69_v2, 6  ;;  %v79_v22 = vld [vmem:[%s22879_s0 + $0xe0] sm:$0x1] }
  0x1e   :  { %v885_v15 = vsel %vm616_vm4, %v884_v59, %v883_v10  ;;  %v80_v23 = vld [vmem:[%s22879_s0 + $0xe8] sm:$0x1]  ;;  %v642_v24 = vrot.slane %v70_v3, 5  ;;  %v644_v25 = vrot.slane %v71_v7, 4  ;;  %v81_v27 = vld [vmem:[%s22879_s0 + $0xf0] sm:$0x1] }
  0x1f   :  { %v887_v21 = vsel %vm619_vm5, %v886_v0, %v885_v15  ;;  %v82_v28 = vld [vmem:[%s22879_s0 + $0xf8] sm:$0x1]  ;;  %v639_v29 = vsel %vm604_vm0, %v638_v19, %v67_v1  ;;  %v646_v30 = vrot.slane %v72_v8, 3  ;;  %v648_v31 = vrot.slane %v73_v11, 2  ;;  %v212_v36 = vld [vmem:[%s22879_s0 + $0x508] sm:$0x1] }
  0x20   :  { %v889_v26 = vsel %vm622_vm6, %v888_v6, %v887_v21  ;;  %v641_v33 = vsel %vm607_vm1, %v640_v20, %v639_v29  ;;  %v652_v34 = vrot.slane %v76_v13, 7  ;;  %v654_v35 = vrot.slane %v77_v17, 6  ;;  %v213_v37 = vld [vmem:[%s22879_s0 + $0x510] sm:$0x1]  ;;  %v214_v42 = vld [vmem:[%s22879_s0 + $0x518] sm:$0x1] }
  0x21   :  { %v12048_v32 = vpack.c.bf16 %v889_v26, %v875_v14  ;;  %v643_v38 = vsel %vm610_vm2, %v642_v24, %v641_v33  ;;  %v650_v39 = vrot.slane %v74_v12, 1  ;;  %v656_v40 = vrot.slane %v78_v18, 5  ;;  %v211_v46 = vld [vmem:[%s22879_s0 + $0x500] sm:$0x1]  ;;  %v216_v48 = vld [vmem:[%s22879_s0 + $0x528] sm:$0x1] }
  0x22   :  { %v658_v41 = vrot.slane %v79_v22, 4  ;;  %v645_v43 = vsel %vm613_vm3, %v644_v25, %v643_v38  ;;  %v653_v44 = vsel %vm604_vm0, %v652_v34, %v75_v16  ;;  %v660_v45 = vrot.slane %v80_v23, 3  ;;  %v215_v47 = vld [vmem:[%s22879_s0 + $0x520] sm:$0x1]  ;;  %v217_v52 = vld [vmem:[%s22879_s0 + $0x530] sm:$0x1] }
  0x23   :  { %12050 = vmatprep.subr.msk.bf16.mxu0 %vm13442_vm8, %v12048_v32  ;;  %v647_v49 = vsel %vm616_vm4, %v646_v30, %v645_v43  ;;  %v655_v50 = vsel %vm607_vm1, %v654_v35, %v653_v44  ;;  %v662_v51 = vrot.slane %v81_v27, 2  ;;  %v218_v53 = vld [vmem:[%s22879_s0 + $0x538] sm:$0x1]  ;;  %v664_v56 = vrot.slane %v82_v28, 1  ;;  %v220_v57 = vld [vmem:[%s22879_s0 + $0x548] sm:$0x1] }
  0x24   :  { %v649_v54 = vsel %vm619_vm5, %v648_v31, %v647_v49  ;;  %v657_v55 = vsel %vm610_vm2, %v656_v40, %v655_v50  ;;  %v221_v58 = vld [vmem:[%s22879_s0 + $0x550] sm:$0x1]  ;;  %v219_v61 = vld [vmem:[%s22879_s0 + $0x540] sm:$0x1]  ;;  %v222_v62 = vld [vmem:[%s22879_s0 + $0x558] sm:$0x1] }
  0x25   :  { %v651_v59 = vsel %vm622_vm6, %v650_v39, %v649_v54  ;;  %v659_v60 = vsel %vm613_vm3, %v658_v41, %v657_v55  ;;  %v223_v0 = vld [vmem:[%s22879_s0 + $0x560] sm:$0x1]  ;;  %v890_v1 = vrot.slane %v212_v36, 7  ;;  %v892_v2 = vrot.slane %v213_v37, 6  ;;  %v224_v4 = vld [vmem:[%s22879_s0 + $0x568] sm:$0x1] }
  0x26   :  { %v661_v3 = vsel %vm616_vm4, %v660_v45, %v659_v60  ;;  %v894_v5 = vrot.slane %v214_v42, 5  ;;  %v896_v6 = vrot.slane %v215_v47, 4  ;;  %v898_v7 = vrot.slane %v216_v48, 3  ;;  %v225_v9 = vld [vmem:[%s22879_s0 + $0x570] sm:$0x1] }
  0x27   :  { %v663_v8 = vsel %vm619_vm5, %v662_v51, %v661_v3  ;;  %v226_v10 = vld [vmem:[%s22879_s0 + $0x578] sm:$0x1]  ;;  %v891_v11 = vsel %vm604_vm0, %v890_v1, %v211_v46  ;;  %v900_v12 = vrot.slane %v217_v52, 2  ;;  %v902_v13 = vrot.slane %v218_v53, 1  ;;  %v83_v18 = vld [vmem:[%s22879_s0 + $0x100] sm:$0x1] }
  0x28   :  { %v665_v14 = vsel %vm622_vm6, %v664_v56, %v663_v8  ;;  %v893_v15 = vsel %vm607_vm1, %v892_v2, %v891_v11  ;;  %v904_v16 = vrot.slane %v220_v57, 7  ;;  %v906_v17 = vrot.slane %v221_v58, 6  ;;  %v84_v19 = vld [vmem:[%s22879_s0 + $0x108] sm:$0x1]  ;;  %v85_v24 = vld [vmem:[%s22879_s0 + $0x110] sm:$0x1] }
  0x29   :  { %v12051_v20 = vpack.c.bf16 %v665_v14, %v651_v59  ;;  %v895_v21 = vsel %vm610_vm2, %v894_v5, %v893_v15  ;;  %v908_v22 = vrot.slane %v222_v62, 5  ;;  %v910_v23 = vrot.slane %v223_v0, 4  ;;  %v86_v25 = vld [vmem:[%s22879_s0 + $0x118] sm:$0x1]  ;;  %v87_v29 = vld [vmem:[%s22879_s0 + $0x120] sm:$0x1] }
  0x2a   :  { %v897_v26 = vsel %vm613_vm3, %v896_v6, %v895_v21  ;;  %v905_v27 = vsel %vm604_vm0, %v904_v16, %v219_v61  ;;  %v912_v28 = vrot.slane %v224_v4, 3  ;;  %v88_v30 = vld [vmem:[%s22879_s0 + $0x128] sm:$0x1]  ;;  %v914_v33 = vrot.slane %v225_v9, 2  ;;  %v89_v34 = vld [vmem:[%s22879_s0 + $0x130] sm:$0x1] }
  0x2b   :  { %12053 = vmatpush3.bf16.xpose.msk.msra.mxu0 %vm13442_vm8, %v12051_v20  ;;  %v899_v31 = vsel %vm616_vm4, %v898_v7, %v897_v26  ;;  %v907_v32 = vsel %vm607_vm1, %v906_v17, %v905_v27  ;;  %v90_v35 = vld [vmem:[%s22879_s0 + $0x138] sm:$0x1]  ;;  %v666_v36 = vrot.slane %v84_v19, 7  ;;  %v916_v39 = vrot.slane %v226_v10, 1  ;;  %v92_v40 = vld [vmem:[%s22879_s0 + $0x148] sm:$0x1] }
  0x2c   :  { %v901_v37 = vsel %vm619_vm5, %v900_v12, %v899_v31  ;;  %v909_v38 = vsel %vm610_vm2, %v908_v22, %v907_v32  ;;  %v93_v41 = vld [vmem:[%s22879_s0 + $0x150] sm:$0x1]  ;;  %v91_v44 = vld [vmem:[%s22879_s0 + $0x140] sm:$0x1]  ;;  %v94_v45 = vld [vmem:[%s22879_s0 + $0x158] sm:$0x1]  ;;  %v11_v26 = vstv %s22881_s5 }
  0x2d   :  { %v903_v42 = vsel %vm622_vm6, %v902_v13, %v901_v37  ;;  %v911_v43 = vsel %vm613_vm3, %v910_v23, %v909_v38  ;;  %v95_v46 = vld [vmem:[%s22879_s0 + $0x160] sm:$0x1]  ;;  %v667_v47 = vsel %vm604_vm0, %v666_v36, %v83_v18  ;;  %v668_v48 = vrot.slane %v85_v24, 6  ;;  %v96_v50 = vld [vmem:[%s22879_s0 + $0x168] sm:$0x1] }
  0x2e   :  { %v913_v49 = vsel %vm616_vm4, %v912_v28, %v911_v43  ;;  %v670_v51 = vrot.slane %v86_v25, 5  ;;  %v672_v52 = vrot.slane %v87_v29, 4  ;;  %v674_v53 = vrot.slane %v88_v30, 3  ;;  %v97_v55 = vld [vmem:[%s22879_s0 + $0x170] sm:$0x1] }
  0x2f   :  { %v915_v54 = vsel %vm619_vm5, %v914_v33, %v913_v49  ;;  %v98_v56 = vld [vmem:[%s22879_s0 + $0x178] sm:$0x1]  ;;  %v669_v57 = vsel %vm607_vm1, %v668_v48, %v667_v47  ;;  %v676_v58 = vrot.slane %v89_v34, 2  ;;  %v678_v59 = vrot.slane %v90_v35, 1  ;;  %v227_v1 = vld [vmem:[%s22879_s0 + $0x580] sm:$0x1] }
  0x30   :  { %v917_v60 = vsel %vm622_vm6, %v916_v39, %v915_v54  ;;  %v671_v61 = vsel %vm610_vm2, %v670_v51, %v669_v57  ;;  %v680_v62 = vrot.slane %v92_v40, 7  ;;  %v682_v0 = vrot.slane %v93_v41, 6  ;;  %v228_v2 = vld [vmem:[%s22879_s0 + $0x588] sm:$0x1]  ;;  %v229_v7 = vld [vmem:[%s22879_s0 + $0x590] sm:$0x1] }
  0x31   :  { %v12054_v3 = vpack.c.bf16 %v917_v60, %v903_v42  ;;  %v673_v4 = vsel %vm613_vm3, %v672_v52, %v671_v61  ;;  %v684_v5 = vrot.slane %v94_v45, 5  ;;  %v686_v6 = vrot.slane %v95_v46, 4  ;;  %v230_v8 = vld [vmem:[%s22879_s0 + $0x598] sm:$0x1]  ;;  %v231_v12 = vld [vmem:[%s22879_s0 + $0x5a0] sm:$0x1] }
  0x32   :  { %v675_v9 = vsel %vm616_vm4, %v674_v53, %v673_v4  ;;  %v681_v10 = vsel %vm604_vm0, %v680_v62, %v91_v44  ;;  %v688_v11 = vrot.slane %v96_v50, 3  ;;  %v232_v13 = vld [vmem:[%s22879_s0 + $0x5a8] sm:$0x1]  ;;  %v690_v16 = vrot.slane %v97_v55, 2  ;;  %v233_v17 = vld [vmem:[%s22879_s0 + $0x5b0] sm:$0x1] }
  0x33   :  { %12056 = vmatprep.subr.msk.bf16.mxu0 %vm13442_vm8, %v12054_v3  ;;  %v677_v14 = vsel %vm619_vm5, %v676_v58, %v675_v9  ;;  %v683_v15 = vsel %vm607_vm1, %v682_v0, %v681_v10  ;;  %v234_v18 = vld [vmem:[%s22879_s0 + $0x5b8] sm:$0x1]  ;;  %v918_v19 = vrot.slane %v228_v2, 7  ;;  %v692_v22 = vrot.slane %v98_v56, 1  ;;  %v235_v23 = vld [vmem:[%s22879_s0 + $0x5c0] sm:$0x1] }
  0x34   :  { %v679_v20 = vsel %vm622_vm6, %v678_v59, %v677_v14  ;;  %v685_v21 = vsel %vm610_vm2, %v684_v5, %v683_v15  ;;  %v236_v24 = vld [vmem:[%s22879_s0 + $0x5c8] sm:$0x1]  ;;  %v237_v25 = vld [vmem:[%s22879_s0 + $0x5d0] sm:$0x1]  ;;  %v238_v28 = vld [vmem:[%s22879_s0 + $0x5d8] sm:$0x1] }
  0x35   :  { %v687_v27 = vsel %vm613_vm3, %v686_v6, %v685_v21  ;;  %v239_v29 = vld [vmem:[%s22879_s0 + $0x5e0] sm:$0x1]  ;;  %v919_v30 = vsel %vm604_vm0, %v918_v19, %v227_v1  ;;  %v920_v31 = vrot.slane %v229_v7, 6  ;;  %v922_v32 = vrot.slane %v230_v8, 5  ;;  %12 = vst [vmem:[#allocation2] sm:$0x1] %v11_v26 }
  0x36   :  { %v689_v33 = vsel %vm616_vm4, %v688_v11, %v687_v27  ;;  %v240_v34 = vld [vmem:[%s22879_s0 + $0x5e8] sm:$0x1]  ;;  %v924_v35 = vrot.slane %v231_v12, 4  ;;  %v926_v36 = vrot.slane %v232_v13, 3  ;;  %v928_v37 = vrot.slane %v233_v17, 2 }
  0x37   :  { %v691_v38 = vsel %vm619_vm5, %v690_v16, %v689_v33  ;;  %v241_v39 = vld [vmem:[%s22879_s0 + $0x5f0] sm:$0x1]  ;;  %v242_v40 = vld [vmem:[%s22879_s0 + $0x5f8] sm:$0x1]  ;;  %v921_v41 = vsel %vm607_vm1, %v920_v31, %v919_v30  ;;  %v930_v42 = vrot.slane %v234_v18, 1  ;;  %v932_v43 = vrot.slane %v236_v24, 7 }
  0x38   :  { %v693_v44 = vsel %vm622_vm6, %v692_v22, %v691_v38  ;;  %v923_v45 = vsel %vm610_vm2, %v922_v32, %v921_v41  ;;  %v934_v46 = vrot.slane %v237_v25, 6  ;;  %v936_v47 = vrot.slane %v238_v28, 5  ;;  %v99_v48 = vld [vmem:[%s22879_s0 + $0x180] sm:$0x1]  ;;  %v100_v49 = vld [vmem:[%s22879_s0 + $0x188] sm:$0x1] }
  0x39   :  { %v12057_v50 = vpack.c.bf16 %v693_v44, %v679_v20  ;;  %v925_v51 = vsel %vm613_vm3, %v924_v35, %v923_v45  ;;  %v933_v52 = vsel %vm604_vm0, %v932_v43, %v235_v23  ;;  %v938_v53 = vrot.slane %v239_v29, 4  ;;  %v101_v54 = vld [vmem:[%s22879_s0 + $0x190] sm:$0x1]  ;;  %v102_v55 = vld [vmem:[%s22879_s0 + $0x198] sm:$0x1] }
  0x3a   :  { %v927_v56 = vsel %vm616_vm4, %v926_v36, %v925_v51  ;;  %v935_v57 = vsel %vm607_vm1, %v934_v46, %v933_v52  ;;  %v940_v58 = vrot.slane %v240_v34, 3  ;;  %v942_v59 = vrot.slane %v241_v39, 2  ;;  %v103_v60 = vld [vmem:[%s22879_s0 + $0x1a0] sm:$0x1]  ;;  %v104_v61 = vld [vmem:[%s22879_s0 + $0x1a8] sm:$0x1] }
  0x3b   :  { %12059 = vmatpush3.bf16.xpose.msk.msra.mxu0 %vm13442_vm8, %v12057_v50  ;;  %v929_v62 = vsel %vm619_vm5, %v928_v37, %v927_v56  ;;  %v937_v0 = vsel %vm610_vm2, %v936_v47, %v935_v57  ;;  %v944_v1 = vrot.slane %v242_v40, 1  ;;  %v105_v2 = vld [vmem:[%s22879_s0 + $0x1b0] sm:$0x1]  ;;  %v106_v3 = vld [vmem:[%s22879_s0 + $0x1b8] sm:$0x1]  ;;  %v694_v4 = vrot.slane %v100_v49, 7 }
  0x3c   :  { %v931_v5 = vsel %vm622_vm6, %v930_v42, %v929_v62  ;;  %v939_v6 = vsel %vm613_vm3, %v938_v53, %v937_v0  ;;  %v107_v7 = vld [vmem:[%s22879_s0 + $0x1c0] sm:$0x1]  ;;  %v108_v8 = vld [vmem:[%s22879_s0 + $0x1c8] sm:$0x1]  ;;  %v109_v9 = vld [vmem:[%s22879_s0 + $0x1d0] sm:$0x1] }
  0x3d   :  { %v110_v10 = vld [vmem:[%s22879_s0 + $0x1d8] sm:$0x1]  ;;  %v941_v11 = vsel %vm616_vm4, %v940_v58, %v939_v6  ;;  %v111_v12 = vld [vmem:[%s22879_s0 + $0x1e0] sm:$0x1]  ;;  %v112_v13 = vld [vmem:[%s22879_s0 + $0x1e8] sm:$0x1]  ;;  %v695_v14 = vsel %vm604_vm0, %v694_v4, %v99_v48 }
  0x3e   :  { %v696_v15 = vrot.slane %v101_v54, 6  ;;  %v698_v16 = vrot.slane %v102_v55, 5  ;;  %v943_v17 = vsel %vm619_vm5, %v942_v59, %v941_v11  ;;  %v113_v18 = vld [vmem:[%s22879_s0 + $0x1f0] sm:$0x1]  ;;  %v700_v19 = vrot.slane %v103_v60, 4 }
  0x3f   :  { %v702_v20 = vrot.slane %v104_v61, 3  ;;  %v704_v21 = vrot.slane %v105_v2, 2  ;;  %v945_v22 = vsel %vm622_vm6, %v944_v1, %v943_v17  ;;  %v114_v23 = vld [vmem:[%s22879_s0 + $0x1f8] sm:$0x1]  ;;  %v706_v25 = vrot.slane %v106_v3, 1 }
  0x40   :  { %v697_v24 = vsel %vm607_vm1, %v696_v15, %v695_v14  ;;  %v708_v26 = vrot.slane %v108_v8, 7  ;;  %v244_v27 = vld [vmem:[%s22879_s0 + $0x608] sm:$0x1]  ;;  %v12060_v28 = vpack.c.bf16 %v945_v22, %v931_v5  ;;  %v710_v30 = vrot.slane %v109_v9, 6  ;;  %v245_v32 = vld [vmem:[%s22879_s0 + $0x610] sm:$0x1] }
  0x41   :  { %v699_v29 = vsel %vm610_vm2, %v698_v16, %v697_v24  ;;  %v712_v31 = vrot.slane %v110_v10, 5  ;;  %v246_v33 = vld [vmem:[%s22879_s0 + $0x618] sm:$0x1]  ;;  %v714_v36 = vrot.slane %v111_v12, 4  ;;  %v716_v37 = vrot.slane %v112_v13, 3 }
  0x42   :  { %v701_v34 = vsel %vm613_vm3, %v700_v19, %v699_v29  ;;  %v709_v35 = vsel %vm604_vm0, %v708_v26, %v107_v7  ;;  %v243_v38 = vld [vmem:[%s22879_s0 + $0x600] sm:$0x1]  ;;  %v248_v40 = vld [vmem:[%s22879_s0 + $0x628] sm:$0x1]  ;;  %12062 = vmatprep.subr.msk.bf16.mxu0 %vm13442_vm8, %v12060_v28  ;;  %v718_v43 = vrot.slane %v113_v18, 2  ;;  %v720_v48 = vrot.slane %v114_v23, 1 }
  0x43   :  { %v247_v39 = vld [vmem:[%s22879_s0 + $0x620] sm:$0x1]  ;;  %v703_v41 = vsel %vm616_vm4, %v702_v20, %v701_v34  ;;  %v711_v42 = vsel %vm607_vm1, %v710_v30, %v709_v35  ;;  %v249_v44 = vld [vmem:[%s22879_s0 + $0x630] sm:$0x1]  ;;  %v250_v45 = vld [vmem:[%s22879_s0 + $0x638] sm:$0x1] }
  0x44   :  { %v705_v46 = vsel %vm619_vm5, %v704_v21, %v703_v41  ;;  %v713_v47 = vsel %vm610_vm2, %v712_v31, %v711_v42  ;;  %v252_v49 = vld [vmem:[%s22879_s0 + $0x648] sm:$0x1]  ;;  %v253_v50 = vld [vmem:[%s22879_s0 + $0x650] sm:$0x1]  ;;  %v251_v53 = vld [vmem:[%s22879_s0 + $0x640] sm:$0x1] }
  0x45   :  { %v707_v51 = vsel %vm622_vm6, %v706_v25, %v705_v46  ;;  %v715_v52 = vsel %vm613_vm3, %v714_v36, %v713_v47  ;;  %v254_v54 = vld [vmem:[%s22879_s0 + $0x658] sm:$0x1]  ;;  %v255_v55 = vld [vmem:[%s22879_s0 + $0x660] sm:$0x1]  ;;  %v946_v56 = vrot.slane %v244_v27, 7  ;;  %v948_v57 = vrot.slane %v245_v32, 6 }
  0x46   :  { %v717_v58 = vsel %vm616_vm4, %v716_v37, %v715_v52  ;;  %v256_v59 = vld [vmem:[%s22879_s0 + $0x668] sm:$0x1]  ;;  %v950_v60 = vrot.slane %v246_v33, 5  ;;  %v952_v61 = vrot.slane %v247_v39, 4  ;;  %v954_v62 = vrot.slane %v248_v40, 3 }
  0x47   :  { %v719_v0 = vsel %vm619_vm5, %v718_v43, %v717_v58  ;;  %v257_v1 = vld [vmem:[%s22879_s0 + $0x670] sm:$0x1]  ;;  %v258_v2 = vld [vmem:[%s22879_s0 + $0x678] sm:$0x1]  ;;  %v947_v3 = vsel %vm604_vm0, %v946_v56, %v243_v38  ;;  %v956_v4 = vrot.slane %v249_v44, 2  ;;  %v958_v5 = vrot.slane %v250_v45, 1 }
  0x48   :  { %v721_v6 = vsel %vm622_vm6, %v720_v48, %v719_v0  ;;  %v949_v7 = vsel %vm607_vm1, %v948_v57, %v947_v3  ;;  %v960_v8 = vrot.slane %v252_v49, 7  ;;  %v962_v9 = vrot.slane %v253_v50, 6  ;;  %v115_v10 = vld [vmem:[%s22879_s0 + $0x200] sm:$0x1]  ;;  %v116_v11 = vld [vmem:[%s22879_s0 + $0x208] sm:$0x1] }
  0x49   :  { %v12063_v12 = vpack.c.bf16 %v721_v6, %v707_v51  ;;  %v951_v13 = vsel %vm610_vm2, %v950_v60, %v949_v7  ;;  %v964_v14 = vrot.slane %v254_v54, 5  ;;  %v966_v15 = vrot.slane %v255_v55, 4  ;;  %v117_v16 = vld [vmem:[%s22879_s0 + $0x210] sm:$0x1]  ;;  %v118_v17 = vld [vmem:[%s22879_s0 + $0x218] sm:$0x1] }
  0x4a   :  { %v953_v18 = vsel %vm613_vm3, %v952_v61, %v951_v13  ;;  %v961_v19 = vsel %vm604_vm0, %v960_v8, %v251_v53  ;;  %v968_v20 = vrot.slane %v256_v59, 3  ;;  %v119_v21 = vld [vmem:[%s22879_s0 + $0x220] sm:$0x1]  ;;  %v120_v22 = vld [vmem:[%s22879_s0 + $0x228] sm:$0x1]  ;;  %v970_v25 = vrot.slane %v257_v1, 2 }
  0x4b   :  { %12065 = vmatpush3.bf16.xpose.msk.msra.mxu0 %vm13442_vm8, %v12063_v12  ;;  %v955_v23 = vsel %vm616_vm4, %v954_v62, %v953_v18  ;;  %v963_v24 = vsel %vm607_vm1, %v962_v9, %v961_v19  ;;  %v121_v26 = vld [vmem:[%s22879_s0 + $0x230] sm:$0x1]  ;;  %v122_v27 = vld [vmem:[%s22879_s0 + $0x238] sm:$0x1]  ;;  %v722_v28 = vrot.slane %v116_v11, 7  ;;  %v972_v31 = vrot.slane %v258_v2, 1 }
  0x4c   :  { %v957_v29 = vsel %vm619_vm5, %v956_v4, %v955_v23  ;;  %v965_v30 = vsel %vm610_vm2, %v964_v14, %v963_v24  ;;  %v124_v32 = vld [vmem:[%s22879_s0 + $0x248] sm:$0x1]  ;;  %v125_v33 = vld [vmem:[%s22879_s0 + $0x250] sm:$0x1]  ;;  %v123_v36 = vld [vmem:[%s22879_s0 + $0x240] sm:$0x1] }
  0x4d   :  { %v959_v34 = vsel %vm622_vm6, %v958_v5, %v957_v29  ;;  %v967_v35 = vsel %vm613_vm3, %v966_v15, %v965_v30  ;;  %v126_v37 = vld [vmem:[%s22879_s0 + $0x258] sm:$0x1]  ;;  %v127_v38 = vld [vmem:[%s22879_s0 + $0x260] sm:$0x1]  ;;  %v723_v39 = vsel %vm604_vm0, %v722_v28, %v115_v10  ;;  %v724_v40 = vrot.slane %v117_v16, 6 }
  0x4e   :  { %v969_v41 = vsel %vm616_vm4, %v968_v20, %v967_v35  ;;  %v128_v42 = vld [vmem:[%s22879_s0 + $0x268] sm:$0x1]  ;;  %v726_v43 = vrot.slane %v118_v17, 5  ;;  %v728_v44 = vrot.slane %v119_v21, 4  ;;  %v730_v45 = vrot.slane %v120_v22, 3 }
  0x4f   :  { %v971_v46 = vsel %vm619_vm5, %v970_v25, %v969_v41  ;;  %v129_v47 = vld [vmem:[%s22879_s0 + $0x270] sm:$0x1]  ;;  %v130_v48 = vld [vmem:[%s22879_s0 + $0x278] sm:$0x1]  ;;  %v725_v49 = vsel %vm607_vm1, %v724_v40, %v723_v39  ;;  %v732_v50 = vrot.slane %v121_v26, 2  ;;  %v734_v51 = vrot.slane %v122_v27, 1 }
  0x50   :  { %v973_v52 = vsel %vm622_vm6, %v972_v31, %v971_v46  ;;  %v727_v53 = vsel %vm610_vm2, %v726_v43, %v725_v49  ;;  %v736_v54 = vrot.slane %v124_v32, 7  ;;  %v738_v55 = vrot.slane %v125_v33, 6  ;;  %v259_v56 = vld [vmem:[%s22879_s0 + $0x680] sm:$0x1]  ;;  %v260_v57 = vld [vmem:[%s22879_s0 + $0x688] sm:$0x1] }
  0x51   :  { %v12066_v58 = vpack.c.bf16 %v973_v52, %v959_v34  ;;  %v729_v59 = vsel %vm613_vm3, %v728_v44, %v727_v53  ;;  %v740_v60 = vrot.slane %v126_v37, 5  ;;  %v742_v61 = vrot.slane %v127_v38, 4  ;;  %v261_v62 = vld [vmem:[%s22879_s0 + $0x690] sm:$0x1]  ;;  %v262_v0 = vld [vmem:[%s22879_s0 + $0x698] sm:$0x1] }
  0x52   :  { %v731_v1 = vsel %vm616_vm4, %v730_v45, %v729_v59  ;;  %v737_v2 = vsel %vm604_vm0, %v736_v54, %v123_v36  ;;  %v744_v3 = vrot.slane %v128_v42, 3  ;;  %v263_v4 = vld [vmem:[%s22879_s0 + $0x6a0] sm:$0x1]  ;;  %v264_v5 = vld [vmem:[%s22879_s0 + $0x6a8] sm:$0x1]  ;;  %v746_v8 = vrot.slane %v129_v47, 2 }
  0x53   :  { %12068 = vmatprep.subr.msk.bf16.mxu0 %vm13442_vm8, %v12066_v58  ;;  %v733_v6 = vsel %vm619_vm5, %v732_v50, %v731_v1  ;;  %v739_v7 = vsel %vm607_vm1, %v738_v55, %v737_v2  ;;  %v265_v9 = vld [vmem:[%s22879_s0 + $0x6b0] sm:$0x1]  ;;  %v266_v10 = vld [vmem:[%s22879_s0 + $0x6b8] sm:$0x1]  ;;  %v974_v11 = vrot.slane %v260_v57, 7  ;;  %v748_v14 = vrot.slane %v130_v48, 1 }
  0x54   :  { %v735_v12 = vsel %vm622_vm6, %v734_v51, %v733_v6  ;;  %v741_v13 = vsel %vm610_vm2, %v740_v60, %v739_v7  ;;  %v267_v15 = vld [vmem:[%s22879_s0 + $0x6c0] sm:$0x1]  ;;  %v268_v16 = vld [vmem:[%s22879_s0 + $0x6c8] sm:$0x1]  ;;  %v269_v17 = vld [vmem:[%s22879_s0 + $0x6d0] sm:$0x1] }
  0x55   :  { %v743_v18 = vsel %vm613_vm3, %v742_v61, %v741_v13  ;;  %v270_v19 = vld [vmem:[%s22879_s0 + $0x6d8] sm:$0x1]  ;;  %v271_v20 = vld [vmem:[%s22879_s0 + $0x6e0] sm:$0x1]  ;;  %v975_v21 = vsel %vm604_vm0, %v974_v11, %v259_v56  ;;  %v976_v22 = vrot.slane %v261_v62, 6  ;;  %v978_v23 = vrot.slane %v262_v0, 5 }
  0x56   :  { %v745_v24 = vsel %vm616_vm4, %v744_v3, %v743_v18  ;;  %v272_v25 = vld [vmem:[%s22879_s0 + $0x6e8] sm:$0x1]  ;;  %v980_v26 = vrot.slane %v263_v4, 4  ;;  %v982_v27 = vrot.slane %v264_v5, 3  ;;  %v984_v28 = vrot.slane %v265_v9, 2 }
  0x57   :  { %v747_v29 = vsel %vm619_vm5, %v746_v8, %v745_v24  ;;  %v273_v30 = vld [vmem:[%s22879_s0 + $0x6f0] sm:$0x1]  ;;  %v274_v31 = vld [vmem:[%s22879_s0 + $0x6f8] sm:$0x1]  ;;  %v977_v32 = vsel %vm607_vm1, %v976_v22, %v975_v21  ;;  %v986_v33 = vrot.slane %v266_v10, 1  ;;  %v988_v34 = vrot.slane %v268_v16, 7 }
  0x58   :  { %v749_v35 = vsel %vm622_vm6, %v748_v14, %v747_v29  ;;  %v979_v36 = vsel %vm610_vm2, %v978_v23, %v977_v32  ;;  %v990_v37 = vrot.slane %v269_v17, 6  ;;  %v992_v38 = vrot.slane %v270_v19, 5  ;;  %v131_v39 = vld [vmem:[%s22879_s0 + $0x280] sm:$0x1]  ;;  %v132_v40 = vld [vmem:[%s22879_s0 + $0x288] sm:$0x1] }
  0x59   :  { %v12069_v41 = vpack.c.bf16 %v749_v35, %v735_v12  ;;  %v981_v42 = vsel %vm613_vm3, %v980_v26, %v979_v36  ;;  %v989_v43 = vsel %vm604_vm0, %v988_v34, %v267_v15  ;;  %v994_v44 = vrot.slane %v271_v20, 4  ;;  %v133_v45 = vld [vmem:[%s22879_s0 + $0x290] sm:$0x1]  ;;  %v134_v46 = vld [vmem:[%s22879_s0 + $0x298] sm:$0x1] }
  0x5a   :  { %v983_v47 = vsel %vm616_vm4, %v982_v27, %v981_v42  ;;  %v991_v48 = vsel %vm607_vm1, %v990_v37, %v989_v43  ;;  %v996_v49 = vrot.slane %v272_v25, 3  ;;  %v998_v50 = vrot.slane %v273_v30, 2  ;;  %v135_v51 = vld [vmem:[%s22879_s0 + $0x2a0] sm:$0x1]  ;;  %v136_v52 = vld [vmem:[%s22879_s0 + $0x2a8] sm:$0x1] }
  0x5b   :  { %12071 = vmatpush3.bf16.xpose.msk.msra.mxu0 %vm13442_vm8, %v12069_v41  ;;  %v985_v53 = vsel %vm619_vm5, %v984_v28, %v983_v47  ;;  %v993_v54 = vsel %vm610_vm2, %v992_v38, %v991_v48  ;;  %v1000_v55 = vrot.slane %v274_v31, 1  ;;  %v137_v56 = vld [vmem:[%s22879_s0 + $0x2b0] sm:$0x1]  ;;  %v138_v57 = vld [vmem:[%s22879_s0 + $0x2b8] sm:$0x1]  ;;  %v750_v58 = vrot.slane %v132_v40, 7 }
  0x5c   :  { %v987_v59 = vsel %vm622_vm6, %v986_v33, %v985_v53  ;;  %v995_v60 = vsel %vm613_vm3, %v994_v44, %v993_v54  ;;  %v139_v61 = vld [vmem:[%s22879_s0 + $0x2c0] sm:$0x1]  ;;  %v140_v62 = vld [vmem:[%s22879_s0 + $0x2c8] sm:$0x1]  ;;  %v141_v0 = vld [vmem:[%s22879_s0 + $0x2d0] sm:$0x1] }
  0x5d   :  { %v997_v1 = vsel %vm616_vm4, %v996_v49, %v995_v60  ;;  %v142_v2 = vld [vmem:[%s22879_s0 + $0x2d8] sm:$0x1]  ;;  %v143_v3 = vld [vmem:[%s22879_s0 + $0x2e0] sm:$0x1]  ;;  %v751_v4 = vsel %vm604_vm0, %v750_v58, %v131_v39  ;;  %v752_v5 = vrot.slane %v133_v45, 6  ;;  %v754_v6 = vrot.slane %v134_v46, 5 }
  0x5e   :  { %v999_v7 = vsel %vm619_vm5, %v998_v50, %v997_v1  ;;  %v144_v8 = vld [vmem:[%s22879_s0 + $0x2e8] sm:$0x1]  ;;  %v756_v9 = vrot.slane %v135_v51, 4  ;;  %v758_v10 = vrot.slane %v136_v52, 3  ;;  %v760_v11 = vrot.slane %v137_v56, 2 }
  0x5f   :  { %v1001_v12 = vsel %vm622_vm6, %v1000_v55, %v999_v7  ;;  %v145_v13 = vld [vmem:[%s22879_s0 + $0x2f0] sm:$0x1]  ;;  %v753_v14 = vsel %vm607_vm1, %v752_v5, %v751_v4  ;;  %v762_v15 = vrot.slane %v138_v57, 1  ;;  %v764_v16 = vrot.slane %v140_v62, 7  ;;  %v146_v18 = vld [vmem:[%s22879_s0 + $0x2f8] sm:$0x1] }
  0x60   :  { %v12072_v17 = vpack.c.bf16 %v1001_v12, %v987_v59  ;;  %v755_v19 = vsel %vm610_vm2, %v754_v6, %v753_v14  ;;  %v766_v20 = vrot.slane %v141_v0, 6  ;;  %v768_v21 = vrot.slane %v142_v2, 5  ;;  %v276_v22 = vld [vmem:[%s22879_s0 + $0x708] sm:$0x1]  ;;  %v277_v27 = vld [vmem:[%s22879_s0 + $0x710] sm:$0x1] }
  0x61   :  { %v757_v23 = vsel %vm613_vm3, %v756_v9, %v755_v19  ;;  %v765_v24 = vsel %vm604_vm0, %v764_v16, %v139_v61  ;;  %v770_v25 = vrot.slane %v143_v3, 4  ;;  %v772_v26 = vrot.slane %v144_v8, 3  ;;  %v278_v28 = vld [vmem:[%s22879_s0 + $0x718] sm:$0x1]  ;;  %v275_v32 = vld [vmem:[%s22879_s0 + $0x700] sm:$0x1] }
  0x62   :  { %12074 = vmatprep.subr.msk.bf16.mxu0 %vm13442_vm8, %v12072_v17  ;;  %v759_v29 = vsel %vm616_vm4, %v758_v10, %v757_v23  ;;  %v767_v30 = vsel %vm607_vm1, %v766_v20, %v765_v24  ;;  %v774_v31 = vrot.slane %v145_v13, 2  ;;  %v279_v33 = vld [vmem:[%s22879_s0 + $0x720] sm:$0x1]  ;;  %v280_v34 = vld [vmem:[%s22879_s0 + $0x728] sm:$0x1]  ;;  %v776_v37 = vrot.slane %v146_v18, 1 }
  0x63   :  { %v761_v35 = vsel %vm619_vm5, %v760_v11, %v759_v29  ;;  %v769_v36 = vsel %vm610_vm2, %v768_v21, %v767_v30  ;;  %v281_v38 = vld [vmem:[%s22879_s0 + $0x730] sm:$0x1]  ;;  %v282_v39 = vld [vmem:[%s22879_s0 + $0x738] sm:$0x1]  ;;  %v283_v42 = vld [vmem:[%s22879_s0 + $0x740] sm:$0x1] }
  0x64   :  { %v763_v40 = vsel %vm622_vm6, %v762_v15, %v761_v35  ;;  %v771_v41 = vsel %vm613_vm3, %v770_v25, %v769_v36  ;;  %v284_v43 = vld [vmem:[%s22879_s0 + $0x748] sm:$0x1]  ;;  %v285_v44 = vld [vmem:[%s22879_s0 + $0x750] sm:$0x1]  ;;  %v286_v45 = vld [vmem:[%s22879_s0 + $0x758] sm:$0x1] }
  0x65   :  { %v773_v46 = vsel %vm616_vm4, %v772_v26, %v771_v41  ;;  %v287_v47 = vld [vmem:[%s22879_s0 + $0x760] sm:$0x1]  ;;  %v1002_v48 = vrot.slane %v276_v22, 7  ;;  %v1004_v49 = vrot.slane %v277_v27, 6  ;;  %v1006_v50 = vrot.slane %v278_v28, 5 }
  0x66   :  { %v775_v51 = vsel %vm619_vm5, %v774_v31, %v773_v46  ;;  %v288_v52 = vld [vmem:[%s22879_s0 + $0x768] sm:$0x1]  ;;  %v1008_v53 = vrot.slane %v279_v33, 4  ;;  %v1010_v54 = vrot.slane %v280_v34, 3  ;;  %v1012_v55 = vrot.slane %v281_v38, 2 }
  0x67   :  { %v777_v56 = vsel %vm622_vm6, %v776_v37, %v775_v51  ;;  %v289_v57 = vld [vmem:[%s22879_s0 + $0x770] sm:$0x1]  ;;  %v1003_v58 = vsel %vm604_vm0, %v1002_v48, %v275_v32  ;;  %v1014_v59 = vrot.slane %v282_v39, 1  ;;  %v1016_v60 = vrot.slane %v284_v43, 7  ;;  %v290_v62 = vld [vmem:[%s22879_s0 + $0x778] sm:$0x1] }
  0x68   :  { %v12075_v61 = vpack.c.bf16 %v777_v56, %v763_v40  ;;  %v1005_v0 = vsel %vm607_vm1, %v1004_v49, %v1003_v58  ;;  %v1018_v1 = vrot.slane %v285_v44, 6  ;;  %v1020_v2 = vrot.slane %v286_v45, 5  ;;  %v147_v10 = vld [vmem:[%s22879_s0 + $0x300] sm:$0x1]  ;;  %v148_v11 = vld [vmem:[%s22879_s0 + $0x308] sm:$0x1] }
  0x69   :  { %v1007_v3 = vsel %vm610_vm2, %v1006_v50, %v1005_v0  ;;  %v1017_v4 = vsel %vm604_vm0, %v1016_v60, %v283_v42  ;;  %v1022_v5 = vrot.slane %v287_v47, 4  ;;  %v1024_v6 = vrot.slane %v288_v52, 3  ;;  %v149_v12 = vld [vmem:[%s22879_s0 + $0x310] sm:$0x1]  ;;  %v150_v16 = vld [vmem:[%s22879_s0 + $0x318] sm:$0x1] }
  0x6a   :  { %12077 = vmatpush3.bf16.xpose.msk.msra.mxu0 %vm13442_vm8, %v12075_v61  ;;  %v1009_v7 = vsel %vm613_vm3, %v1008_v53, %v1007_v3  ;;  %v1019_v8 = vsel %vm607_vm1, %v1018_v1, %v1017_v4  ;;  %v1026_v9 = vrot.slane %v289_v57, 2  ;;  %v1028_v15 = vrot.slane %v290_v62, 1  ;;  %v151_v17 = vld [vmem:[%s22879_s0 + $0x320] sm:$0x1]  ;;  %v152_v20 = vld [vmem:[%s22879_s0 + $0x328] sm:$0x1] }
  0x6b   :  { %v1011_v13 = vsel %vm616_vm4, %v1010_v54, %v1009_v7  ;;  %v1021_v14 = vsel %vm610_vm2, %v1020_v2, %v1019_v8  ;;  %v153_v21 = vld [vmem:[%s22879_s0 + $0x330] sm:$0x1]  ;;  %v154_v22 = vld [vmem:[%s22879_s0 + $0x338] sm:$0x1]  ;;  %v155_v25 = vld [vmem:[%s22879_s0 + $0x340] sm:$0x1] }
  0x6c   :  { %v1013_v18 = vsel %vm619_vm5, %v1012_v55, %v1011_v13  ;;  %v1023_v19 = vsel %vm613_vm3, %v1022_v5, %v1021_v14  ;;  %v156_v26 = vld [vmem:[%s22879_s0 + $0x348] sm:$0x1]  ;;  %v157_v27 = vld [vmem:[%s22879_s0 + $0x350] sm:$0x1]  ;;  %v778_v28 = vrot.slane %v148_v11, 7  ;;  %v780_v29 = vrot.slane %v149_v12, 6 }
  0x6d   :  { %v1015_v23 = vsel %vm622_vm6, %v1014_v59, %v1013_v18  ;;  %v1025_v24 = vsel %vm616_vm4, %v1024_v6, %v1023_v19  ;;  %v158_v31 = vld [vmem:[%s22879_s0 + $0x358] sm:$0x1]  ;;  %v159_v32 = vld [vmem:[%s22879_s0 + $0x360] sm:$0x1]  ;;  %v782_v33 = vrot.slane %v150_v16, 5  ;;  %v784_v34 = vrot.slane %v151_v17, 4 }
  0x6e   :  { %v1027_v30 = vsel %vm619_vm5, %v1026_v9, %v1025_v24  ;;  %v160_v36 = vld [vmem:[%s22879_s0 + $0x368] sm:$0x1]  ;;  %v161_v37 = vld [vmem:[%s22879_s0 + $0x370] sm:$0x1]  ;;  %v779_v38 = vsel %vm604_vm0, %v778_v28, %v147_v10  ;;  %v786_v39 = vrot.slane %v152_v20, 3  ;;  %v788_v40 = vrot.slane %v153_v21, 2 }
  0x6f   :  { %v1029_v35 = vsel %vm622_vm6, %v1028_v15, %v1027_v30  ;;  %v162_v42 = vld [vmem:[%s22879_s0 + $0x378] sm:$0x1]  ;;  %v781_v43 = vsel %vm607_vm1, %v780_v29, %v779_v38  ;;  %v792_v44 = vrot.slane %v156_v26, 7  ;;  %v794_v45 = vrot.slane %v157_v27, 6  ;;  %v292_v46 = vld [vmem:[%s22879_s0 + $0x788] sm:$0x1] }
  0x70   :  { %v12078_v41 = vpack.c.bf16 %v1029_v35, %v1015_v23  ;;  %v783_v47 = vsel %vm610_vm2, %v782_v33, %v781_v43  ;;  %v790_v48 = vrot.slane %v154_v22, 1  ;;  %v796_v49 = vrot.slane %v158_v31, 5  ;;  %v293_v51 = vld [vmem:[%s22879_s0 + $0x790] sm:$0x1]  ;;  %v291_v55 = vld [vmem:[%s22879_s0 + $0x780] sm:$0x1] }
  0x71   :  { %v798_v50 = vrot.slane %v159_v32, 4  ;;  %v785_v52 = vsel %vm613_vm3, %v784_v34, %v783_v47  ;;  %v793_v53 = vsel %vm604_vm0, %v792_v44, %v155_v25  ;;  %v800_v54 = vrot.slane %v160_v36, 3  ;;  %v294_v56 = vld [vmem:[%s22879_s0 + $0x798] sm:$0x1]  ;;  %v295_v57 = vld [vmem:[%s22879_s0 + $0x7a0] sm:$0x1] }
  0x72   :  { %12080 = vmatprep.subr.msk.bf16.mxu0 %vm13442_vm8, %v12078_v41  ;;  %v787_v58 = vsel %vm616_vm4, %v786_v39, %v785_v52  ;;  %v795_v59 = vsel %vm607_vm1, %v794_v45, %v793_v53  ;;  %v802_v60 = vrot.slane %v161_v37, 2  ;;  %v296_v61 = vld [vmem:[%s22879_s0 + $0x7a8] sm:$0x1]  ;;  %v297_v62 = vld [vmem:[%s22879_s0 + $0x7b0] sm:$0x1]  ;;  %v804_v2 = vrot.slane %v162_v42, 1 }
  0x73   :  { %v789_v0 = vsel %vm619_vm5, %v788_v40, %v787_v58  ;;  %v797_v1 = vsel %vm610_vm2, %v796_v49, %v795_v59  ;;  %v298_v3 = vld [vmem:[%s22879_s0 + $0x7b8] sm:$0x1]  ;;  %v300_v4 = vld [vmem:[%s22879_s0 + $0x7c8] sm:$0x1]  ;;  %v299_v7 = vld [vmem:[%s22879_s0 + $0x7c0] sm:$0x1] }
  0x74   :  { %v791_v5 = vsel %vm622_vm6, %v790_v48, %v789_v0  ;;  %v799_v6 = vsel %vm613_vm3, %v798_v50, %v797_v1  ;;  %v301_v8 = vld [vmem:[%s22879_s0 + $0x7d0] sm:$0x1]  ;;  %v302_v9 = vld [vmem:[%s22879_s0 + $0x7d8] sm:$0x1]  ;;  %v1030_v10 = vrot.slane %v292_v46, 7  ;;  %v1032_v11 = vrot.slane %v293_v51, 6 }
  0x75   :  { %v801_v12 = vsel %vm616_vm4, %v800_v54, %v799_v6  ;;  %v303_v13 = vld [vmem:[%s22879_s0 + $0x7e0] sm:$0x1]  ;;  %v1034_v14 = vrot.slane %v294_v56, 5  ;;  %v1036_v15 = vrot.slane %v295_v57, 4  ;;  %v1038_v16 = vrot.slane %v296_v61, 3 }
  0x76   :  { %v803_v17 = vsel %vm619_vm5, %v802_v60, %v801_v12  ;;  %v304_v18 = vld [vmem:[%s22879_s0 + $0x7e8] sm:$0x1]  ;;  %v305_v19 = vld [vmem:[%s22879_s0 + $0x7f0] sm:$0x1]  ;;  %v1031_v20 = vsel %vm604_vm0, %v1030_v10, %v291_v55  ;;  %v1040_v21 = vrot.slane %v297_v62, 2  ;;  %v1042_v22 = vrot.slane %v298_v3, 1 }
  0x77   :  { %v805_v23 = vsel %vm622_vm6, %v804_v2, %v803_v17  ;;  %v306_v24 = vld [vmem:[%s22879_s0 + $0x7f8] sm:$0x1]  ;;  %v1033_v25 = vsel %vm607_vm1, %v1032_v11, %v1031_v20  ;;  %v1044_v26 = vrot.slane %v300_v4, 7  ;;  %v1046_v27 = vrot.slane %v301_v8, 6  ;;  %v164_v28 = vld [vmem:[%s22879_s0 + $0x388] sm:$0x1] }
  0x78   :  { %v12081_v29 = vpack.c.bf16 %v805_v23, %v791_v5  ;;  %v1035_v30 = vsel %vm610_vm2, %v1034_v14, %v1033_v25  ;;  %v1048_v31 = vrot.slane %v302_v9, 5  ;;  %v1050_v32 = vrot.slane %v303_v13, 4  ;;  %v163_v33 = vld [vmem:[%s22879_s0 + $0x380] sm:$0x1]  ;;  %v165_v34 = vld [vmem:[%s22879_s0 + $0x390] sm:$0x1] }
  0x79   :  { %v1037_v35 = vsel %vm613_vm3, %v1036_v15, %v1035_v30  ;;  %v1045_v36 = vsel %vm604_vm0, %v1044_v26, %v299_v7  ;;  %v1052_v37 = vrot.slane %v304_v18, 3  ;;  %v166_v38 = vld [vmem:[%s22879_s0 + $0x398] sm:$0x1]  ;;  %v167_v39 = vld [vmem:[%s22879_s0 + $0x3a0] sm:$0x1]  ;;  %v1054_v42 = vrot.slane %v305_v19, 2 }
  0x7a   :  { %12083 = vmatpush3.bf16.xpose.msk.msra.mxu0 %vm13442_vm8, %v12081_v29  ;;  %v1039_v40 = vsel %vm616_vm4, %v1038_v16, %v1037_v35  ;;  %v1047_v41 = vsel %vm607_vm1, %v1046_v27, %v1045_v36  ;;  %v168_v43 = vld [vmem:[%s22879_s0 + $0x3a8] sm:$0x1]  ;;  %v169_v44 = vld [vmem:[%s22879_s0 + $0x3b0] sm:$0x1]  ;;  %v806_v45 = vrot.slane %v164_v28, 7  ;;  %v1056_v48 = vrot.slane %v306_v24, 1 }
  0x7b   :  { %v1041_v46 = vsel %vm619_vm5, %v1040_v21, %v1039_v40  ;;  %v1049_v47 = vsel %vm610_vm2, %v1048_v31, %v1047_v41  ;;  %v170_v49 = vld [vmem:[%s22879_s0 + $0x3b8] sm:$0x1]  ;;  %v172_v50 = vld [vmem:[%s22879_s0 + $0x3c8] sm:$0x1]  ;;  %v173_v53 = vld [vmem:[%s22879_s0 + $0x3d0] sm:$0x1] }
  0x7c   :  { %v1043_v51 = vsel %vm622_vm6, %v1042_v22, %v1041_v46  ;;  %v1051_v52 = vsel %vm613_vm3, %v1050_v32, %v1049_v47  ;;  %v174_v54 = vld [vmem:[%s22879_s0 + $0x3d8] sm:$0x1]  ;;  %v807_v55 = vsel %vm604_vm0, %v806_v45, %v163_v33  ;;  %v808_v56 = vrot.slane %v165_v34, 6  ;;  %v175_v58 = vld [vmem:[%s22879_s0 + $0x3e0] sm:$0x1]  ;;  %v34_v16 = vld [vmem:[%s22882_s2 + $0x8] sm:$0xff] }
  0x7d   :  { %v1053_v57 = vsel %vm616_vm4, %v1052_v37, %v1051_v52  ;;  %v810_v59 = vrot.slane %v166_v38, 5  ;;  %v812_v60 = vrot.slane %v167_v39, 4  ;;  %v814_v61 = vrot.slane %v168_v43, 3  ;;  %v171_v0 = vld [vmem:[%s22879_s0 + $0x3c0] sm:$0x1]  ;;  %v35_v22 = vld [vmem:[%s22882_s2 + $0x10] sm:$0xff] }
  0x7e   :  { %v1055_v62 = vsel %vm619_vm5, %v1054_v42, %v1053_v57  ;;  %v176_v1 = vld [vmem:[%s22879_s0 + $0x3e8] sm:$0x1]  ;;  %v809_v2 = vsel %vm607_vm1, %v808_v56, %v807_v55  ;;  %v816_v3 = vrot.slane %v169_v44, 2  ;;  %v818_v4 = vrot.slane %v170_v49, 1  ;;  %v177_v6 = vld [vmem:[%s22879_s0 + $0x3f0] sm:$0x1] }
  0x7f   :  { %v1057_v5 = vsel %vm622_vm6, %v1056_v48, %v1055_v62  ;;  %v178_v7 = vld [vmem:[%s22879_s0 + $0x3f8] sm:$0x1]  ;;  %v811_v8 = vsel %vm610_vm2, %v810_v59, %v809_v2  ;;  %v820_v9 = vrot.slane %v172_v50, 7  ;;  %v822_v10 = vrot.slane %v173_v53, 6  ;;  %v33_v11 = vld [vmem:[%s22882_s2] sm:$0xff]  ;;  %v43_v44 = vld [vmem:[%s22883_s3 + $0x10] sm:$0xff] }
  0x80   :  { %v12084_v12 = vpack.c.bf16 %v1057_v5, %v1043_v51  ;;  %v813_v13 = vsel %vm613_vm3, %v812_v60, %v811_v8  ;;  %v824_v14 = vrot.slane %v174_v54, 5  ;;  %v826_v15 = vrot.slane %v175_v58, 4  ;;  %v1639_v17 = vld [vmem:[%s22879_s0 + $0x409] sm:$0x1]  ;;  %v1640_v18 = vld [vmem:[%s22879_s0 + $0x411] sm:$0x1] }
  0x81   :  { %v815_v19 = vsel %vm616_vm4, %v814_v61, %v813_v13  ;;  %v821_v20 = vsel %vm604_vm0, %v820_v9, %v171_v0  ;;  %v828_v21 = vrot.slane %v176_v1, 3  ;;  %v1641_v23 = vld [vmem:[%s22879_s0 + $0x419] sm:$0x1]  ;;  %v14383_v24 = vld [vmem:[%s22879_s0 + $0x421] sm:$0x1]  ;;  %v830_v27 = vrot.slane %v177_v6, 2 }
  0x82   :  { %12086 = vmatprep.subr.msk.bf16.mxu0 %vm13442_vm8, %v12084_v12  ;;  %v817_v25 = vsel %vm619_vm5, %v816_v3, %v815_v19  ;;  %v823_v26 = vsel %vm607_vm1, %v822_v10, %v821_v20  ;;  %v1638_v28 = vld [vmem:[%s22879_s0 + $0x401] sm:$0x1]  ;;  %v14395_v29 = vld [vmem:[%s22879_s0 + $0x429] sm:$0x1]  ;;  %v14400_v30 = vld [vmem:[%s22879_s0 + $0x431] sm:$0x1] }
  0x83   :  { %v825_v31 = vsel %vm610_vm2, %v824_v14, %v823_v26  ;;  %v832_v32 = vrot.slane %v178_v7, 1  ;;  %v22886_v33 = vmov 0.0   ;;  %vm1260_vm9 = vcmask 130048   ;;  %v41_v34 = vld [vmem:[%s22883_s3] sm:$0xff]  ;;  %v14410_v35 = vld [vmem:[%s22879_s0 + $0x439] sm:$0x1] }
  0x84   :  { %12028 = vmatprep.subr.mxu1 %v22886_v33  ;;  %v819_v36 = vsel %vm622_vm6, %v818_v4, %v817_v25  ;;  %v827_v37 = vsel %vm613_vm3, %v826_v15, %v825_v31  ;;  %12030 = vmatprep.mubr.msk.f32.mxu1 %vm1260_vm9, %v33_v11  ;;  %v1646_v38 = vld [vmem:[%s22879_s0 + $0x441] sm:$0x1]  ;;  %v1647_v39 = vld [vmem:[%s22879_s0 + $0x449] sm:$0x1]  ;;  %v1648_v40 = vld [vmem:[%s22879_s0 + $0x451] sm:$0x1] }
  0x85   :  { %12029 = vmatpush3.msra.mxu1 %v22886_v33  ;;  %v1649_v41 = vld [vmem:[%s22879_s0 + $0x459] sm:$0x1]  ;;  %v829_v42 = vsel %vm616_vm4, %v828_v21, %v827_v37  ;;  %v13300_v43 = vmov 0   ;;  %v1650_v45 = vld [vmem:[%s22879_s0 + $0x461] sm:$0x1]  ;;  %v2246_v46 = vrot.slane %v1639_v17, 7 }
  0x86   :  { %12031 = vmatmul.mubr.msk.f32.vlgmr.msra.gmra.mrb[0].mxu1 %vm1260_vm9, %v34_v16  ;;  %12687 = vset.pattern.permute.xlu0 %v13300_v43  ;;  %v2248_v47 = vrot.slane %v1640_v18, 6  ;;  %v2250_v48 = vrot.slane %v1641_v23, 5  ;;  %v831_v49 = vsel %vm619_vm5, %v830_v27, %v829_v42  ;;  %v36_v50 = vld [vmem:[%s22882_s2 + $0x18] sm:$0xff]  ;;  %v1651_v51 = vld [vmem:[%s22879_s0 + $0x469] sm:$0x1]  ;;  %v2252_v52 = vrot.slane %v14383_v24, 4 }
  0x87   :  { %12033 = vmatprep.mubr.msk.f32.mxu1 %vm1260_vm9, %v35_v22  ;;  %309 = vperm.xlu0 %12687, %v41_v34   ;;  %v2254_v53 = vrot.slane %v14395_v29, 3  ;;  %v2256_v54 = vrot.slane %v14400_v30, 2  ;;  %v833_v55 = vsel %vm622_vm6, %v832_v32, %v831_v49  ;;  %v37_v56 = vld [vmem:[%s22882_s2 + $0x20] sm:$0xff]  ;;  %v1652_v57 = vld [vmem:[%s22879_s0 + $0x471] sm:$0x1]  ;;  %v2247_v58 = vsel %vm604_vm0, %v2246_v46, %v1638_v28  ;;  %v38_v62 = vld [vmem:[%s22882_s2 + $0x28] sm:$0xff] }
  0x88   :  { %12688 = vset.pattern.permute.xlu1 %v13300_v43  ;;  %v2258_v59 = vrot.slane %v14410_v35, 1  ;;  %v2260_v60 = vrot.slane %v1647_v39, 7  ;;  %v12087_v61 = vpack.c.bf16 %v833_v55, %v819_v36  ;;  %v42_v0 = vld [vmem:[%s22883_s3 + $0x8] sm:$0xff]  ;;  %v1653_v1 = vld [vmem:[%s22879_s0 + $0x479] sm:$0x1]  ;;  %v2249_v2 = vsel %vm607_vm1, %v2248_v47, %v2247_v58  ;;  %v39_v5 = vld [vmem:[%s22882_s2 + $0x30] sm:$0xff] }
  0x89   :  { %319 = vperm.xlu1 %12688, %v43_v44   ;;  %v2262_v3 = vrot.slane %v1648_v40, 6  ;;  %v2264_v4 = vrot.slane %v1649_v41, 5  ;;  %v44_v6 = vld [vmem:[%s22883_s3 + $0x18] sm:$0xff]  ;;  %v2251_v7 = vsel %vm610_vm2, %v2250_v48, %v2249_v2  ;;  %v2266_v9 = vrot.slane %v1650_v45, 4  ;;  %v1511_v11 = vld [vmem:[%s22879_s0 + $0x9] sm:$0x1] }
  0x8a   :  { %12034 = vmatmul.mubr.msk.f32.gmra.mrb[2].mxu1 %vm1260_vm9, %v36_v50  ;;  %v2261_v8 = vsel %vm604_vm0, %v2260_v60, %v1646_v38  ;;  %v2268_v10 = vrot.slane %v1651_v51, 3  ;;  %12089 = vmatpush3.bf16.xpose.msk.msra.mxu0 %vm13442_vm8, %v12087_v61  ;;  %v45_v12 = vld [vmem:[%s22883_s3 + $0x20] sm:$0xff]  ;;  %v2253_v13 = vsel %vm613_vm3, %v2252_v52, %v2251_v7  ;;  %v2270_v15 = vrot.slane %v1652_v57, 2  ;;  %v1512_v17 = vld [vmem:[%s22879_s0 + $0x11] sm:$0x1]  ;;  %v46_v19 = vld [vmem:[%s22883_s3 + $0x28] sm:$0xff] }
  0x8b   :  { %12036 = vmatprep.mubr.msk.f32.mxu1 %vm1260_vm9, %v37_v56  ;;  %v2263_v14 = vsel %vm607_vm1, %v2262_v3, %v2261_v8  ;;  %v1510_v16 = vld [vmem:[%s22879_s0 + $0x1] sm:$0x1]  ;;  %v1513_v18 = vld [vmem:[%s22879_s0 + $0x19] sm:$0x1]  ;;  %314 = vperm.xlu0 %12687, %v42_v0   ;;  %v2255_v20 = vsel %vm616_vm4, %v2254_v53, %v2253_v13  ;;  %v2272_v22 = vrot.slane %v1653_v1, 1  ;;  %v26_v31 = vld [vmem:[%s22880_s1 + $0x8] sm:$0xff] }
  0x8c   :  { %v2265_v21 = vsel %vm610_vm2, %v2264_v4, %v2263_v14  ;;  %v1514_v23 = vld [vmem:[%s22879_s0 + $0x21] sm:$0x1]  ;;  %v1515_v24 = vld [vmem:[%s22879_s0 + $0x29] sm:$0x1]  ;;  %v40_v25 = vld [vmem:[%s22882_s2 + $0x38] sm:$0xff]  ;;  %v2257_v26 = vsel %vm619_vm5, %v2256_v54, %v2255_v20  ;;  %v2022_v38 = vrot.slane %v1511_v11, 7 }
  0x8d   :  { %324 = vperm.xlu1 %12688, %v44_v6   ;;  %v2267_v27 = vsel %vm613_vm3, %v2266_v9, %v2265_v21  ;;  %v1516_v28 = vld [vmem:[%s22879_s0 + $0x31] sm:$0x1]  ;;  %v14517_v29 = vld [vmem:[%s22879_s0 + $0x39] sm:$0x1]  ;;  %v1519_v30 = vld [vmem:[%s22879_s0 + $0x49] sm:$0x1]  ;;  %v2259_v32 = vsel %vm622_vm6, %v2258_v59, %v2257_v26 }
  0x8e   :  { %12037 = vmatmul.mubr.msk.f32.gmra.mrb[4].mxu1 %vm1260_vm9, %v38_v62  ;;  %v2269_v34 = vsel %vm616_vm4, %v2268_v10, %v2267_v27  ;;  %v1518_v35 = vld [vmem:[%s22879_s0 + $0x41] sm:$0x1]  ;;  %v1520_v36 = vld [vmem:[%s22879_s0 + $0x51] sm:$0x1]  ;;  %v1521_v37 = vld [vmem:[%s22879_s0 + $0x59] sm:$0x1]  ;;  %v2023_v49 = vsel %vm604_vm0, %v2022_v38, %v1510_v16 }
  0x8f   :  { %v2024_v39 = vrot.slane %v1512_v17, 6  ;;  %12039 = vmatprep.mubr.msk.f32.mxu1 %vm1260_vm9, %v39_v5  ;;  %v47_v40 = vld [vmem:[%s22883_s3 + $0x30] sm:$0xff]  ;;  %v2271_v41 = vsel %vm619_vm5, %v2270_v15, %v2269_v34  ;;  %v1522_v42 = vld [vmem:[%s22879_s0 + $0x61] sm:$0x1]  ;;  %v1523_v43 = vld [vmem:[%s22879_s0 + $0x69] sm:$0x1]  ;;  %329 = vperm.xlu0 %12687, %v45_v12  }
  0x90   :  { %v2026_v44 = vrot.slane %v1513_v18, 5  ;;  %v2028_v45 = vrot.slane %v1514_v23, 4  ;;  %v2273_v46 = vsel %vm622_vm6, %v2272_v22, %v2271_v41  ;;  %v1524_v47 = vld [vmem:[%s22879_s0 + $0x71] sm:$0x1]  ;;  %v14555_v48 = vld [vmem:[%s22879_s0 + $0x79] sm:$0x1] }
  0x91   :  { %v2030_v50 = vrot.slane %v1515_v24, 3  ;;  %v2032_v51 = vrot.slane %v1516_v28, 2  ;;  %334 = vperm.xlu1 %12688, %v46_v19   ;;  %v12090_v52 = vpack.c.bf16 %v2273_v46, %v2259_v32  ;;  %v2025_v53 = vsel %vm607_vm1, %v2024_v39, %v2023_v49  ;;  %v1655_v56 = vld [vmem:[%s22879_s0 + $0x489] sm:$0x1]  ;;  %v1656_v57 = vld [vmem:[%s22879_s0 + $0x491] sm:$0x1] }
  0x92   :  { %v2036_v54 = vrot.slane %v1519_v30, 7  ;;  %v2038_v55 = vrot.slane %v1520_v36, 6  ;;  %v14568_v58 = vld [vmem:[%s22880_s1] sm:$0xff]  ;;  %12040 = vmatmul.mubr.msk.f32.gmra.mrb[6].mxu1 %vm1260_vm9, %v40_v25  ;;  %v48_v59 = vld [vmem:[%s22883_s3 + $0x38] sm:$0xff]  ;;  %v2027_v60 = vsel %vm610_vm2, %v2026_v44, %v2025_v53  ;;  %v2034_v61 = vrot.slane %v14517_v29, 1  ;;  %v27_v9 = vld [vmem:[%s22880_s1 + $0x10] sm:$0xff] }
  0x93   :  { %11668 = vmatmul.mubr.msk.f32.vlgmr.msra.gmra.mrb[0].mxu0 %vm1058_vm7, %v14568_v58  ;;  %v2040_v62 = vrot.slane %v1521_v37, 5  ;;  %v2042_v0 = vrot.slane %v1522_v42, 4  ;;  %v1657_v1 = vld [vmem:[%s22879_s0 + $0x499] sm:$0x1]  ;;  %v50_v2 = vld [vmem:[#allocation2] sm:$0x1]  ;;  %12092 = vmatprep.subr.msk.bf16.mxu1 %vm13442_vm8, %v12090_v52  ;;  %v2029_v3 = vsel %vm613_vm3, %v2028_v45, %v2027_v60 }
  0x94   :  { %11669 = vmatprep.mubr.msk.f32.mxu0 %vm1058_vm7, %v26_v31  ;;  %v2037_v4 = vsel %vm604_vm0, %v2036_v54, %v1518_v35  ;;  %v2044_v5 = vrot.slane %v1523_v43, 3  ;;  %v1654_v6 = vld [vmem:[%s22879_s0 + $0x481] sm:$0x1]  ;;  %v1659_v8 = vld [vmem:[%s22879_s0 + $0x4a9] sm:$0x1]  ;;  %339 = vperm.xlu0 %12687, %v47_v40   ;;  %v2031_v10 = vsel %vm616_vm4, %v2030_v50, %v2029_v3  ;;  %v2046_v12 = vrot.slane %v1524_v47, 2 }
  0x95   :  { %v1658_v7 = vld [vmem:[%s22879_s0 + $0x4a1] sm:$0x1]  ;;  %v2039_v11 = vsel %vm607_vm1, %v2038_v55, %v2037_v4  ;;  %v1660_v13 = vld [vmem:[%s22879_s0 + $0x4b1] sm:$0x1]  ;;  %v14606_v14 = vld [vmem:[%s22879_s0 + $0x4b9] sm:$0x1]  ;;  %11724 = vmatprep.mubr.msk.f32.mxu1 %vm1058_vm7, %v14568_v58  ;;  %344 = vperm.xlu1 %12688, %v48_v59   ;;  %v2033_v15 = vsel %vm619_vm5, %v2032_v51, %v2031_v10 }
  0x96   :  { %v2041_v16 = vsel %vm610_vm2, %v2040_v62, %v2039_v11  ;;  %v2048_v17 = vrot.slane %v14555_v48, 1  ;;  %v1663_v18 = vld [vmem:[%s22879_s0 + $0x4c9] sm:$0x1]  ;;  %v1664_v19 = vld [vmem:[%s22879_s0 + $0x4d1] sm:$0x1]  ;;  %v2035_v20 = vsel %vm622_vm6, %v2034_v61, %v2033_v15  ;;  %v2274_v25 = vrot.slane %v1655_v56, 7 }
  0x97   :  { %11670 = vmatmul.mubr.msk.f32.gmra.mrb[2].mxu0 %vm1058_vm7, %v26_v31  ;;  %v2043_v21 = vsel %vm613_vm3, %v2042_v0, %v2041_v16  ;;  %v1662_v22 = vld [vmem:[%s22879_s0 + $0x4c1] sm:$0x1]  ;;  %v1665_v23 = vld [vmem:[%s22879_s0 + $0x4d9] sm:$0x1]  ;;  %v2276_v26 = vrot.slane %v1656_v57, 6  ;;  %v2278_v30 = vrot.slane %v1657_v1, 5 }
  0x98   :  { %v1666_v24 = vld [vmem:[%s22879_s0 + $0x4e1] sm:$0x1]  ;;  %11671 = vmatprep.mubr.msk.f32.mxu0 %vm1058_vm7, %v27_v9  ;;  %v28_v27 = vld [vmem:[%s22880_s1 + $0x18] sm:$0xff]  ;;  %v2045_v28 = vsel %vm616_vm4, %v2044_v5, %v2043_v21  ;;  %v1667_v29 = vld [vmem:[%s22879_s0 + $0x4e9] sm:$0x1]  ;;  %v2280_v31 = vrot.slane %v1658_v7, 4  ;;  %11046 = vperm.xlu0 %12687, %v50_v2   ;;  %v2275_v37 = vsel %vm604_vm0, %v2274_v25, %v1654_v6 }
  0x99   :  { %v2282_v32 = vrot.slane %v1659_v8, 3  ;;  %v2047_v34 = vsel %vm619_vm5, %v2046_v12, %v2045_v28  ;;  %v1668_v35 = vld [vmem:[%s22879_s0 + $0x4f1] sm:$0x1]  ;;  %v1669_v36 = vld [vmem:[%s22879_s0 + $0x4f9] sm:$0x1]  ;;  %v2284_v38 = vrot.slane %v1660_v13, 2  ;;  %v2277_v41 = vsel %vm607_vm1, %v2276_v26, %v2275_v37 }
  0x9a   :  { %v2286_v39 = vrot.slane %v14606_v14, 1  ;;  %v2049_v40 = vsel %vm622_vm6, %v2048_v17, %v2047_v34  ;;  %v2288_v42 = vrot.slane %v1663_v18, 7  ;;  %v2290_v43 = vrot.slane %v1664_v19, 6  ;;  %v1526_v44 = vld [vmem:[%s22879_s0 + $0x81] sm:$0x1]  ;;  %v30_v14 = vld [vmem:[%s22880_s1 + $0x28] sm:$0xff] }
  0x9b   :  { %v1527_v45 = vld [vmem:[%s22879_s0 + $0x89] sm:$0x1]  ;;  %11672 = vmatmul.mubr.msk.f32.gmra.mrb[4].mxu0 %vm1058_vm7, %v27_v9  ;;  %v12093_v46 = vpack.c.bf16 %v2049_v40, %v2035_v20  ;;  %v2279_v47 = vsel %vm610_vm2, %v2278_v30, %v2277_v41  ;;  %v2292_v48 = vrot.slane %v1665_v23, 5  ;;  %v2294_v49 = vrot.slane %v1666_v24, 4  ;;  %v1528_v50 = vld [vmem:[%s22879_s0 + $0x91] sm:$0x1] }
  0x9c   :  { %v1529_v51 = vld [vmem:[%s22879_s0 + $0x99] sm:$0x1]  ;;  %11673 = vmatprep.mubr.msk.f32.mxu0 %vm1058_vm7, %v28_v27  ;;  %v29_v52 = vld [vmem:[%s22880_s1 + $0x20] sm:$0xff]  ;;  %v2281_v53 = vsel %vm613_vm3, %v2280_v31, %v2279_v47  ;;  %v2289_v54 = vsel %vm604_vm0, %v2288_v42, %v1662_v22  ;;  %v2296_v55 = vrot.slane %v1667_v29, 3  ;;  %v1531_v57 = vld [vmem:[%s22879_s0 + $0xa9] sm:$0x1] }
  0x9d   :  { %v1530_v56 = vld [vmem:[%s22879_s0 + $0xa1] sm:$0x1]  ;;  %12095 = vmatpush3.bf16.xpose.msk.msra.mxu1 %vm13442_vm8, %v12093_v46  ;;  %v2283_v59 = vsel %vm616_vm4, %v2282_v32, %v2281_v53  ;;  %v2291_v60 = vsel %vm607_vm1, %v2290_v43, %v2289_v54  ;;  %v2298_v61 = vrot.slane %v1668_v35, 2  ;;  %v1532_v62 = vld [vmem:[%s22879_s0 + $0xb1] sm:$0x1]  ;;  %v2050_v1 = vrot.slane %v1527_v45, 7 }
  0x9e   :  { %v1533_v0 = vld [vmem:[%s22879_s0 + $0xb9] sm:$0x1]  ;;  %v2285_v2 = vsel %vm619_vm5, %v2284_v38, %v2283_v59  ;;  %v2293_v3 = vsel %vm610_vm2, %v2292_v48, %v2291_v60  ;;  %v2300_v4 = vrot.slane %v1669_v36, 1  ;;  %v1535_v5 = vld [vmem:[%s22879_s0 + $0xc9] sm:$0x1]  ;;  %v2052_v13 = vrot.slane %v1528_v50, 6 }
  0x9f   :  { %v1536_v6 = vld [vmem:[%s22879_s0 + $0xd1] sm:$0x1]  ;;  %11674 = vmatmul.mubr.msk.f32.gmra.mrb[6].mxu0 %vm1058_vm7, %v28_v27  ;;  %v2287_v7 = vsel %vm622_vm6, %v2286_v39, %v2285_v2  ;;  %v2295_v8 = vsel %vm613_vm3, %v2294_v49, %v2293_v3  ;;  %v1534_v9 = vld [vmem:[%s22879_s0 + $0xc1] sm:$0x1]  ;;  %v1537_v10 = vld [vmem:[%s22879_s0 + $0xd9] sm:$0x1]  ;;  %v2051_v12 = vsel %vm604_vm0, %v2050_v1, %v1526_v44 }
  0xa0   :  { %v1538_v11 = vld [vmem:[%s22879_s0 + $0xe1] sm:$0x1]  ;;  %11675 = vmatprep.mubr.msk.f32.mxu0 %vm1058_vm7, %v29_v52  ;;  %v2297_v15 = vsel %vm616_vm4, %v2296_v55, %v2295_v8  ;;  %v1539_v16 = vld [vmem:[%s22879_s0 + $0xe9] sm:$0x1]  ;;  %v2054_v17 = vrot.slane %v1529_v51, 5  ;;  %v2056_v18 = vrot.slane %v1530_v56, 4  ;;  %v2053_v23 = vsel %vm607_vm1, %v2052_v13, %v2051_v12 }
  0xa1   :  { %v2058_v19 = vrot.slane %v1531_v57, 3  ;;  %v2299_v20 = vsel %vm619_vm5, %v2298_v61, %v2297_v15  ;;  %v1540_v21 = vld [vmem:[%s22879_s0 + $0xf1] sm:$0x1]  ;;  %v1541_v22 = vld [vmem:[%s22879_s0 + $0xf9] sm:$0x1]  ;;  %v2060_v24 = vrot.slane %v1532_v62, 2 }
  0xa2   :  { %v2062_v25 = vrot.slane %v1533_v0, 1  ;;  %v2301_v26 = vsel %vm622_vm6, %v2300_v4, %v2299_v20  ;;  %v2055_v27 = vsel %vm610_vm2, %v2054_v17, %v2053_v23  ;;  %v2064_v28 = vrot.slane %v1535_v5, 7  ;;  %v1670_v30 = vld [vmem:[%s22879_s0 + $0x501] sm:$0x1]  ;;  %v1671_v31 = vld [vmem:[%s22879_s0 + $0x509] sm:$0x1] }
  0xa3   :  { %v2066_v29 = vrot.slane %v1536_v6, 6  ;;  %11676 = vmatmul.mubr.msk.f32.gmra.mrb[8].mxu0 %vm1058_vm7, %v29_v52  ;;  %v12096_v32 = vpack.c.bf16 %v2301_v26, %v2287_v7  ;;  %v2057_v34 = vsel %vm613_vm3, %v2056_v18, %v2055_v27  ;;  %v2068_v35 = vrot.slane %v1537_v10, 5  ;;  %v1672_v37 = vld [vmem:[%s22879_s0 + $0x511] sm:$0x1]  ;;  %v1673_v38 = vld [vmem:[%s22879_s0 + $0x519] sm:$0x1] }
  0xa4   :  { %v2070_v36 = vrot.slane %v1538_v11, 4  ;;  %11677 = vmatprep.mubr.msk.f32.mxu0 %vm1058_vm7, %v30_v14  ;;  %v31_v39 = vld [vmem:[%s22880_s1 + $0x30] sm:$0xff]  ;;  %v2059_v40 = vsel %vm616_vm4, %v2058_v19, %v2057_v34  ;;  %v2065_v41 = vsel %vm604_vm0, %v2064_v28, %v1534_v9  ;;  %v2072_v42 = vrot.slane %v1539_v16, 3  ;;  %v1674_v43 = vld [vmem:[%s22879_s0 + $0x521] sm:$0x1]  ;;  %v32_v1 = vld [vmem:[%s22880_s1 + $0x38] sm:$0xff] }
  0xa5   :  { %v1675_v44 = vld [vmem:[%s22879_s0 + $0x529] sm:$0x1]  ;;  %12098 = vmatprep.subr.msk.bf16.mxu1 %vm13442_vm8, %v12096_v32  ;;  %v2061_v45 = vsel %vm619_vm5, %v2060_v24, %v2059_v40  ;;  %v2067_v46 = vsel %vm607_vm1, %v2066_v29, %v2065_v41  ;;  %v2074_v47 = vrot.slane %v1540_v21, 2  ;;  %v1676_v48 = vld [vmem:[%s22879_s0 + $0x531] sm:$0x1]  ;;  %v2302_v50 = vrot.slane %v1671_v31, 7 }
  0xa6   :  { %v1677_v49 = vld [vmem:[%s22879_s0 + $0x539] sm:$0x1]  ;;  %v2063_v51 = vsel %vm622_vm6, %v2062_v25, %v2061_v45  ;;  %v2069_v52 = vsel %vm610_vm2, %v2068_v35, %v2067_v46  ;;  %v2076_v53 = vrot.slane %v1541_v22, 1  ;;  %v1678_v54 = vld [vmem:[%s22879_s0 + $0x541] sm:$0x1]  ;;  %v2304_v62 = vrot.slane %v1672_v37, 6 }
  0xa7   :  { %v1679_v55 = vld [vmem:[%s22879_s0 + $0x549] sm:$0x1]  ;;  %v1680_v56 = vld [vmem:[%s22879_s0 + $0x551] sm:$0x1]  ;;  %11678 = vmatmul.mubr.msk.f32.gmra.mrb[10].mxu0 %vm1058_vm7, %v30_v14  ;;  %v2071_v57 = vsel %vm613_vm3, %v2070_v36, %v2069_v52  ;;  %v1681_v59 = vld [vmem:[%s22879_s0 + $0x559] sm:$0x1]  ;;  %v2303_v61 = vsel %vm604_vm0, %v2302_v50, %v1670_v30 }
  0xa8   :  { %v1682_v60 = vld [vmem:[%s22879_s0 + $0x561] sm:$0x1]  ;;  %v2306_v0 = vrot.slane %v1673_v38, 5  ;;  %11679 = vmatprep.mubr.msk.f32.mxu0 %vm1058_vm7, %v31_v39  ;;  %v2073_v2 = vsel %vm616_vm4, %v2072_v42, %v2071_v57  ;;  %v1683_v3 = vld [vmem:[%s22879_s0 + $0x569] sm:$0x1]  ;;  %v2308_v4 = vrot.slane %v1674_v43, 4  ;;  %v2305_v10 = vsel %vm607_vm1, %v2304_v62, %v2303_v61 }
  0xa9   :  { %v2310_v5 = vrot.slane %v1675_v44, 3  ;;  %v2312_v6 = vrot.slane %v1676_v48, 2  ;;  %v2075_v7 = vsel %vm619_vm5, %v2074_v47, %v2073_v2  ;;  %v1684_v8 = vld [vmem:[%s22879_s0 + $0x571] sm:$0x1]  ;;  %v1685_v9 = vld [vmem:[%s22879_s0 + $0x579] sm:$0x1] }
  0xaa   :  { %v2314_v11 = vrot.slane %v1677_v49, 1  ;;  %v2316_v12 = vrot.slane %v1679_v55, 7  ;;  %v2077_v13 = vsel %vm622_vm6, %v2076_v53, %v2075_v7  ;;  %v2307_v14 = vsel %vm610_vm2, %v2306_v0, %v2305_v10  ;;  %v1542_v17 = vld [vmem:[%s22879_s0 + $0x101] sm:$0x1]  ;;  %v1543_v18 = vld [vmem:[%s22879_s0 + $0x109] sm:$0x1] }
  0xab   :  { %v2318_v15 = vrot.slane %v1680_v56, 6  ;;  %v2320_v16 = vrot.slane %v1681_v59, 5  ;;  %11680 = vmatmul.mubr.msk.f32.gmra.mrb[12].mxu0 %vm1058_vm7, %v31_v39  ;;  %v12099_v19 = vpack.c.bf16 %v2077_v13, %v2063_v51  ;;  %v2309_v20 = vsel %vm613_vm3, %v2308_v4, %v2307_v14  ;;  %v1544_v23 = vld [vmem:[%s22879_s0 + $0x111] sm:$0x1]  ;;  %v1545_v24 = vld [vmem:[%s22879_s0 + $0x119] sm:$0x1] }
  0xac   :  { %v2317_v21 = vsel %vm604_vm0, %v2316_v12, %v1678_v54  ;;  %v2322_v22 = vrot.slane %v1682_v60, 4  ;;  %11681 = vmatprep.mubr.msk.f32.mxu0 %vm1058_vm7, %v32_v1  ;;  %v2311_v25 = vsel %vm616_vm4, %v2310_v5, %v2309_v20  ;;  %v2324_v27 = vrot.slane %v1683_v3, 3  ;;  %v1546_v29 = vld [vmem:[%s22879_s0 + $0x121] sm:$0x1]  ;;  %v1547_v30 = vld [vmem:[%s22879_s0 + $0x129] sm:$0x1] }
  0xad   :  { %v2319_v26 = vsel %vm607_vm1, %v2318_v15, %v2317_v21  ;;  %v2326_v28 = vrot.slane %v1684_v8, 2  ;;  %12101 = vmatpush3.bf16.xpose.msk.msra.mxu1 %vm13442_vm8, %v12099_v19  ;;  %v2313_v31 = vsel %vm619_vm5, %v2312_v6, %v2311_v25  ;;  %v2328_v34 = vrot.slane %v1685_v9, 1  ;;  %v1548_v35 = vld [vmem:[%s22879_s0 + $0x131] sm:$0x1]  ;;  %v1549_v36 = vld [vmem:[%s22879_s0 + $0x139] sm:$0x1] }
  0xae   :  { %v2321_v32 = vsel %vm610_vm2, %v2320_v16, %v2319_v26  ;;  %v2078_v37 = vrot.slane %v1543_v18, 7  ;;  %v2315_v38 = vsel %vm622_vm6, %v2314_v11, %v2313_v31  ;;  %v1550_v40 = vld [vmem:[%s22879_s0 + $0x141] sm:$0x1]  ;;  %v1551_v41 = vld [vmem:[%s22879_s0 + $0x149] sm:$0x1]  ;;  %v2080_v47 = vrot.slane %v1544_v23, 6 }
  0xaf   :  { %v2323_v39 = vsel %vm613_vm3, %v2322_v22, %v2321_v32  ;;  %v1552_v42 = vld [vmem:[%s22879_s0 + $0x151] sm:$0x1]  ;;  %11682 = vmatmul.mubr.msk.f32.gmra.mrb[14].mxu0 %vm1058_vm7, %v32_v1  ;;  %v1553_v44 = vld [vmem:[%s22879_s0 + $0x159] sm:$0x1]  ;;  %v1554_v45 = vld [vmem:[%s22879_s0 + $0x161] sm:$0x1] }
  0xb0   :  { %v2325_v43 = vsel %vm616_vm4, %v2324_v27, %v2323_v39  ;;  %v2079_v46 = vsel %vm604_vm0, %v2078_v37, %v1542_v17  ;;  %v2082_v48 = vrot.slane %v1545_v24, 5  ;;  %v1555_v50 = vld [vmem:[%s22879_s0 + $0x169] sm:$0x1]  ;;  %v2084_v51 = vrot.slane %v1546_v29, 4  ;;  %11772 = vmatprep.mubr.msk.f32.mxu0 %vm1058_vm7, %v14568_v58  ;;  %v1556_v55 = vld [vmem:[%s22879_s0 + $0x171] sm:$0x1] }
  0xb1   :  { %v2327_v49 = vsel %vm619_vm5, %v2326_v28, %v2325_v43  ;;  %v2086_v52 = vrot.slane %v1547_v30, 3  ;;  %v2088_v53 = vrot.slane %v1548_v35, 2  ;;  %v1557_v56 = vld [vmem:[%s22879_s0 + $0x179] sm:$0x1]  ;;  %v2081_v57 = vsel %vm607_vm1, %v2080_v47, %v2079_v46  ;;  %v1687_v58 = vld [vmem:[%s22879_s0 + $0x589] sm:$0x1] }
  0xb2   :  { %v2329_v54 = vsel %vm622_vm6, %v2328_v34, %v2327_v49  ;;  %v2090_v59 = vrot.slane %v1549_v36, 1  ;;  %v2092_v60 = vrot.slane %v1551_v41, 7  ;;  %v2083_v62 = vsel %vm610_vm2, %v2082_v48, %v2081_v57  ;;  %v1688_v2 = vld [vmem:[%s22879_s0 + $0x591] sm:$0x1]  ;;  %v1686_v7 = vld [vmem:[%s22879_s0 + $0x581] sm:$0x1] }
  0xb3   :  { %v12102_v61 = vpack.c.bf16 %v2329_v54, %v2315_v38  ;;  %v2094_v0 = vrot.slane %v1552_v42, 6  ;;  %v2096_v1 = vrot.slane %v1553_v44, 5  ;;  %v2085_v3 = vsel %vm613_vm3, %v2084_v51, %v2083_v62  ;;  %v1689_v8 = vld [vmem:[%s22879_s0 + $0x599] sm:$0x1]  ;;  %v1690_v9 = vld [vmem:[%s22879_s0 + $0x5a1] sm:$0x1] }
  0xb4   :  { %v2093_v4 = vsel %vm604_vm0, %v2092_v60, %v1550_v40  ;;  %v2098_v5 = vrot.slane %v1554_v45, 4  ;;  %v2100_v6 = vrot.slane %v1555_v50, 3  ;;  %v2087_v10 = vsel %vm616_vm4, %v2086_v52, %v2085_v3  ;;  %v1691_v13 = vld [vmem:[%s22879_s0 + $0x5a9] sm:$0x1]  ;;  %v1692_v14 = vld [vmem:[%s22879_s0 + $0x5b1] sm:$0x1] }
  0xb5   :  { %12104 = vmatprep.subr.msk.bf16.mxu1 %vm13442_vm8, %v12102_v61  ;;  %v2095_v11 = vsel %vm607_vm1, %v2094_v0, %v2093_v4  ;;  %v2102_v12 = vrot.slane %v1556_v55, 2  ;;  %v2089_v15 = vsel %vm619_vm5, %v2088_v53, %v2087_v10  ;;  %v2104_v17 = vrot.slane %v1557_v56, 1  ;;  %v1693_v18 = vld [vmem:[%s22879_s0 + $0x5b9] sm:$0x1]  ;;  %v1695_v19 = vld [vmem:[%s22879_s0 + $0x5c9] sm:$0x1] }
  0xb6   :  { %v2097_v16 = vsel %vm610_vm2, %v2096_v1, %v2095_v11  ;;  %v2091_v20 = vsel %vm622_vm6, %v2090_v59, %v2089_v15  ;;  %v1696_v22 = vld [vmem:[%s22879_s0 + $0x5d1] sm:$0x1]  ;;  %v1697_v23 = vld [vmem:[%s22879_s0 + $0x5d9] sm:$0x1]  ;;  %v2330_v24 = vrot.slane %v1687_v58, 7  ;;  %v2332_v25 = vrot.slane %v1688_v2, 6 }
  0xb7   :  { %v2099_v21 = vsel %vm613_vm3, %v2098_v5, %v2097_v16  ;;  %v1698_v27 = vld [vmem:[%s22879_s0 + $0x5e1] sm:$0x1]  ;;  %v2334_v28 = vrot.slane %v1689_v8, 5  ;;  %v2336_v29 = vrot.slane %v1690_v9, 4  ;;  %v2338_v30 = vrot.slane %v1691_v13, 3 }
  0xb8   :  { %v2101_v26 = vsel %vm616_vm4, %v2100_v6, %v2099_v21  ;;  %v1694_v32 = vld [vmem:[%s22879_s0 + $0x5c1] sm:$0x1]  ;;  %v1699_v34 = vld [vmem:[%s22879_s0 + $0x5e9] sm:$0x1]  ;;  %v2331_v35 = vsel %vm604_vm0, %v2330_v24, %v1686_v7  ;;  %v2340_v36 = vrot.slane %v1692_v14, 2  ;;  %v2342_v37 = vrot.slane %v1693_v18, 1 }
  0xb9   :  { %v2103_v31 = vsel %vm619_vm5, %v2102_v12, %v2101_v26  ;;  %v1700_v39 = vld [vmem:[%s22879_s0 + $0x5f1] sm:$0x1]  ;;  %v2333_v40 = vsel %vm607_vm1, %v2332_v25, %v2331_v35  ;;  %v2344_v41 = vrot.slane %v1695_v19, 7  ;;  %v2346_v42 = vrot.slane %v1696_v22, 6  ;;  %v1559_v43 = vld [vmem:[%s22879_s0 + $0x189] sm:$0x1] }
  0xba   :  { %v2105_v38 = vsel %vm622_vm6, %v2104_v17, %v2103_v31  ;;  %v1701_v45 = vld [vmem:[%s22879_s0 + $0x5f9] sm:$0x1]  ;;  %v2335_v46 = vsel %vm610_vm2, %v2334_v28, %v2333_v40  ;;  %v2348_v47 = vrot.slane %v1697_v23, 5  ;;  %v2350_v48 = vrot.slane %v1698_v27, 4  ;;  %v1558_v49 = vld [vmem:[%s22879_s0 + $0x181] sm:$0x1] }
  0xbb   :  { %v12105_v44 = vpack.c.bf16 %v2105_v38, %v2091_v20  ;;  %v2337_v50 = vsel %vm613_vm3, %v2336_v29, %v2335_v46  ;;  %v2345_v51 = vsel %vm604_vm0, %v2344_v41, %v1694_v32  ;;  %v2352_v52 = vrot.slane %v1699_v34, 3  ;;  %v1560_v53 = vld [vmem:[%s22879_s0 + $0x191] sm:$0x1]  ;;  %v1561_v54 = vld [vmem:[%s22879_s0 + $0x199] sm:$0x1] }
  0xbc   :  { %v2339_v55 = vsel %vm616_vm4, %v2338_v30, %v2337_v50  ;;  %v2347_v56 = vsel %vm607_vm1, %v2346_v42, %v2345_v51  ;;  %v2354_v57 = vrot.slane %v1700_v39, 2  ;;  %v1562_v59 = vld [vmem:[%s22879_s0 + $0x1a1] sm:$0x1]  ;;  %v1563_v60 = vld [vmem:[%s22879_s0 + $0x1a9] sm:$0x1]  ;;  %v2106_v61 = vrot.slane %v1559_v43, 7 }
  0xbd   :  { %12107 = vmatpush3.bf16.xpose.msk.msra.mxu1 %vm13442_vm8, %v12105_v44  ;;  %v2341_v62 = vsel %vm619_vm5, %v2340_v36, %v2339_v55  ;;  %v2349_v0 = vsel %vm610_vm2, %v2348_v47, %v2347_v56  ;;  %v2356_v1 = vrot.slane %v1701_v45, 1  ;;  %v1564_v58 = vld [vmem:[%s22879_s0 + $0x1b1] sm:$0x1]  ;;  %v1567_v2 = vld [vmem:[%s22879_s0 + $0x1c9] sm:$0x1]  ;;  %v2108_v9 = vrot.slane %v1560_v53, 6 }
  0xbe   :  { %v2343_v3 = vsel %vm622_vm6, %v2342_v37, %v2341_v62  ;;  %v2351_v4 = vsel %vm613_vm3, %v2350_v48, %v2349_v0  ;;  %v1565_v5 = vld [vmem:[%s22879_s0 + $0x1b9] sm:$0x1]  ;;  %v1568_v6 = vld [vmem:[%s22879_s0 + $0x1d1] sm:$0x1]  ;;  %v2107_v8 = vsel %vm604_vm0, %v2106_v61, %v1558_v49  ;;  %v1570_v11 = vld [vmem:[%s22879_s0 + $0x1e1] sm:$0x1] }
  0xbf   :  { %v1569_v7 = vld [vmem:[%s22879_s0 + $0x1d9] sm:$0x1]  ;;  %v2353_v10 = vsel %vm616_vm4, %v2352_v52, %v2351_v4  ;;  %v2110_v12 = vrot.slane %v1561_v54, 5  ;;  %v2112_v13 = vrot.slane %v1562_v59, 4  ;;  %v2114_v14 = vrot.slane %v1563_v60, 3 }
  0xc0   :  { %v2355_v15 = vsel %vm619_vm5, %v2354_v57, %v2353_v10  ;;  %v1566_v16 = vld [vmem:[%s22879_s0 + $0x1c1] sm:$0x1]  ;;  %v1571_v17 = vld [vmem:[%s22879_s0 + $0x1e9] sm:$0x1]  ;;  %v2109_v18 = vsel %vm607_vm1, %v2108_v9, %v2107_v8  ;;  %v2116_v19 = vrot.slane %v1564_v58, 2  ;;  %v2120_v23 = vrot.slane %v1567_v2, 7 }
  0xc1   :  { %v2357_v20 = vsel %vm622_vm6, %v2356_v1, %v2355_v15  ;;  %v1572_v21 = vld [vmem:[%s22879_s0 + $0x1f1] sm:$0x1]  ;;  %v2111_v22 = vsel %vm610_vm2, %v2110_v12, %v2109_v18  ;;  %v2122_v24 = vrot.slane %v1568_v6, 6  ;;  %v1573_v26 = vld [vmem:[%s22879_s0 + $0x1f9] sm:$0x1]  ;;  %v2124_v28 = vrot.slane %v1569_v7, 5 }
  0xc2   :  { %v12108_v25 = vpack.c.bf16 %v2357_v20, %v2343_v3  ;;  %v2113_v27 = vsel %vm613_vm3, %v2112_v13, %v2111_v22  ;;  %v2126_v29 = vrot.slane %v1570_v11, 4  ;;  %v2118_v31 = vrot.slane %v1565_v5, 1  ;;  %v1703_v46 = vld [vmem:[%s22879_s0 + $0x609] sm:$0x1]  ;;  %v1704_v48 = vld [vmem:[%s22879_s0 + $0x611] sm:$0x1] }
  0xc3   :  { %v2115_v30 = vsel %vm616_vm4, %v2114_v14, %v2113_v27  ;;  %v2121_v32 = vsel %vm604_vm0, %v2120_v23, %v1566_v16  ;;  %v2128_v34 = vrot.slane %v1571_v17, 3  ;;  %v2130_v37 = vrot.slane %v1572_v21, 2  ;;  %v1711_v47 = vld [vmem:[%s22879_s0 + $0x649] sm:$0x1]  ;;  %v1712_v49 = vld [vmem:[%s22879_s0 + $0x651] sm:$0x1] }
  0xc4   :  { %12110 = vmatprep.subr.msk.bf16.mxu1 %vm13442_vm8, %v12108_v25  ;;  %v2117_v35 = vsel %vm619_vm5, %v2116_v19, %v2115_v30  ;;  %v2123_v36 = vsel %vm607_vm1, %v2122_v24, %v2121_v32  ;;  %v2132_v39 = vrot.slane %v1573_v26, 1  ;;  %v2358_v50 = vrot.slane %v1703_v46, 7  ;;  %v1702_v52 = vld [vmem:[%s22879_s0 + $0x601] sm:$0x1]  ;;  %v1705_v53 = vld [vmem:[%s22879_s0 + $0x619] sm:$0x1] }
  0xc5   :  { %v2125_v38 = vsel %vm610_vm2, %v2124_v28, %v2123_v36  ;;  %v2119_v41 = vsel %vm622_vm6, %v2118_v31, %v2117_v35  ;;  %v2372_v51 = vrot.slane %v1711_v47, 7  ;;  %v1710_v54 = vld [vmem:[%s22879_s0 + $0x641] sm:$0x1]  ;;  %v1713_v56 = vld [vmem:[%s22879_s0 + $0x659] sm:$0x1]  ;;  %v2360_v62 = vrot.slane %v1704_v48, 6 }
  0xc6   :  { %v2127_v40 = vsel %vm613_vm3, %v2126_v29, %v2125_v38  ;;  %v1706_v55 = vld [vmem:[%s22879_s0 + $0x621] sm:$0x1]  ;;  %v2359_v59 = vsel %vm604_vm0, %v2358_v50, %v1702_v52  ;;  %v1707_v60 = vld [vmem:[%s22879_s0 + $0x629] sm:$0x1]  ;;  %v2362_v0 = vrot.slane %v1705_v53, 5  ;;  %v2374_v9 = vrot.slane %v1712_v49, 6 }
  0xc7   :  { %v2129_v42 = vsel %vm616_vm4, %v2128_v34, %v2127_v40  ;;  %v1714_v57 = vld [vmem:[%s22879_s0 + $0x661] sm:$0x1]  ;;  %v1715_v61 = vld [vmem:[%s22879_s0 + $0x669] sm:$0x1]  ;;  %v1708_v1 = vld [vmem:[%s22879_s0 + $0x631] sm:$0x1]  ;;  %v2373_v4 = vsel %vm604_vm0, %v2372_v51, %v1710_v54  ;;  %v2361_v7 = vsel %vm607_vm1, %v2360_v62, %v2359_v59 }
  0xc8   :  { %v2131_v43 = vsel %vm619_vm5, %v2130_v37, %v2129_v42  ;;  %v1716_v58 = vld [vmem:[%s22879_s0 + $0x671] sm:$0x1]  ;;  %v2364_v2 = vrot.slane %v1706_v55, 4  ;;  %v2366_v3 = vrot.slane %v1707_v60, 3  ;;  %v1709_v5 = vld [vmem:[%s22879_s0 + $0x639] sm:$0x1]  ;;  %v2363_v10 = vsel %vm610_vm2, %v2362_v0, %v2361_v7 }
  0xc9   :  { %v2133_v44 = vsel %vm622_vm6, %v2132_v39, %v2131_v43  ;;  %v1717_v6 = vld [vmem:[%s22879_s0 + $0x679] sm:$0x1]  ;;  %v2368_v8 = vrot.slane %v1708_v1, 2  ;;  %v2370_v11 = vrot.slane %v1709_v5, 1  ;;  %v2376_v12 = vrot.slane %v1713_v56, 5 }
  0xca   :  { %v12111_v45 = vpack.c.bf16 %v2133_v44, %v2119_v41  ;;  %v2378_v13 = vrot.slane %v1714_v57, 4  ;;  %v2365_v14 = vsel %vm613_vm3, %v2364_v2, %v2363_v10  ;;  %v2375_v15 = vsel %vm607_vm1, %v2374_v9, %v2373_v4  ;;  %v1575_v18 = vld [vmem:[%s22879_s0 + $0x209] sm:$0x1]  ;;  %v1574_v22 = vld [vmem:[%s22879_s0 + $0x201] sm:$0x1] }
  0xcb   :  { %v2380_v16 = vrot.slane %v1715_v61, 3  ;;  %v2382_v17 = vrot.slane %v1716_v58, 2  ;;  %v2367_v19 = vsel %vm616_vm4, %v2366_v3, %v2365_v14  ;;  %v2377_v20 = vsel %vm610_vm2, %v2376_v12, %v2375_v15  ;;  %v1576_v26 = vld [vmem:[%s22879_s0 + $0x211] sm:$0x1]  ;;  %v1577_v27 = vld [vmem:[%s22879_s0 + $0x219] sm:$0x1] }
  0xcc   :  { %12113 = vmatpush3.bf16.xpose.msk.msra.mxu1 %vm13442_vm8, %v12111_v45  ;;  %v2384_v21 = vrot.slane %v1717_v6, 1  ;;  %v2134_v23 = vrot.slane %v1575_v18, 7  ;;  %v2369_v24 = vsel %vm619_vm5, %v2368_v8, %v2367_v19  ;;  %v2379_v25 = vsel %vm613_vm3, %v2378_v13, %v2377_v20  ;;  %v1578_v30 = vld [vmem:[%s22879_s0 + $0x221] sm:$0x1]  ;;  %v1579_v31 = vld [vmem:[%s22879_s0 + $0x229] sm:$0x1] }
  0xcd   :  { %v2371_v28 = vsel %vm622_vm6, %v2370_v11, %v2369_v24  ;;  %v2381_v29 = vsel %vm616_vm4, %v2380_v16, %v2379_v25  ;;  %v1580_v32 = vld [vmem:[%s22879_s0 + $0x231] sm:$0x1]  ;;  %v1581_v35 = vld [vmem:[%s22879_s0 + $0x239] sm:$0x1]  ;;  %v1582_v36 = vld [vmem:[%s22879_s0 + $0x241] sm:$0x1] }
  0xce   :  { %v2383_v34 = vsel %vm619_vm5, %v2382_v17, %v2381_v29  ;;  %v1583_v37 = vld [vmem:[%s22879_s0 + $0x249] sm:$0x1]  ;;  %v1584_v38 = vld [vmem:[%s22879_s0 + $0x251] sm:$0x1]  ;;  %v2135_v39 = vsel %vm604_vm0, %v2134_v23, %v1574_v22  ;;  %v1585_v41 = vld [vmem:[%s22879_s0 + $0x259] sm:$0x1] }
  0xcf   :  { %v2385_v40 = vsel %vm622_vm6, %v2384_v21, %v2383_v34  ;;  %v1586_v42 = vld [vmem:[%s22879_s0 + $0x261] sm:$0x1]  ;;  %v2136_v43 = vrot.slane %v1576_v26, 6  ;;  %v2138_v44 = vrot.slane %v1577_v27, 5  ;;  %v1587_v46 = vld [vmem:[%s22879_s0 + $0x269] sm:$0x1] }
  0xd0   :  { %v12114_v45 = vpack.c.bf16 %v2385_v40, %v2371_v28  ;;  %v1588_v47 = vld [vmem:[%s22879_s0 + $0x271] sm:$0x1]  ;;  %v2140_v48 = vrot.slane %v1578_v30, 4  ;;  %v2142_v49 = vrot.slane %v1579_v31, 3  ;;  %v1589_v50 = vld [vmem:[%s22879_s0 + $0x279] sm:$0x1] }
  0xd1   :  { %v2137_v51 = vsel %vm607_vm1, %v2136_v43, %v2135_v39  ;;  %v2144_v52 = vrot.slane %v1580_v32, 2  ;;  %v2148_v53 = vrot.slane %v1583_v37, 7  ;;  %v2150_v54 = vrot.slane %v1584_v38, 6  ;;  %v1719_v0 = vld [vmem:[%s22879_s0 + $0x689] sm:$0x1] }
  0xd2   :  { %12116 = vmatprep.subr.msk.bf16.mxu1 %vm13442_vm8, %v12114_v45  ;;  %v2139_v55 = vsel %vm610_vm2, %v2138_v44, %v2137_v51  ;;  %v2152_v56 = vrot.slane %v1585_v41, 5  ;;  %v2154_v57 = vrot.slane %v1586_v42, 4  ;;  %v2146_v60 = vrot.slane %v1581_v35, 1  ;;  %v1718_v4 = vld [vmem:[%s22879_s0 + $0x681] sm:$0x1] }
  0xd3   :  { %v2141_v59 = vsel %vm613_vm3, %v2140_v48, %v2139_v55  ;;  %v2149_v61 = vsel %vm604_vm0, %v2148_v53, %v1582_v36  ;;  %v2156_v62 = vrot.slane %v1587_v46, 3  ;;  %v2158_v2 = vrot.slane %v1588_v47, 2  ;;  %v1720_v5 = vld [vmem:[%s22879_s0 + $0x691] sm:$0x1]  ;;  %v1721_v8 = vld [vmem:[%s22879_s0 + $0x699] sm:$0x1] }
  0xd4   :  { %v2143_v1 = vsel %vm616_vm4, %v2142_v49, %v2141_v59  ;;  %v2151_v58 = vsel %vm607_vm1, %v2150_v54, %v2149_v61  ;;  %v2160_v3 = vrot.slane %v1589_v50, 1  ;;  %v1722_v9 = vld [vmem:[%s22879_s0 + $0x6a1] sm:$0x1]  ;;  %v1723_v10 = vld [vmem:[%s22879_s0 + $0x6a9] sm:$0x1]  ;;  %v2386_v14 = vrot.slane %v1719_v0, 7 }
  0xd5   :  { %v2145_v6 = vsel %vm619_vm5, %v2144_v52, %v2143_v1  ;;  %v2153_v7 = vsel %vm610_vm2, %v2152_v56, %v2151_v58  ;;  %v1724_v12 = vld [vmem:[%s22879_s0 + $0x6b1] sm:$0x1]  ;;  %v1725_v13 = vld [vmem:[%s22879_s0 + $0x6b9] sm:$0x1]  ;;  %v1727_v17 = vld [vmem:[%s22879_s0 + $0x6c9] sm:$0x1] }
  0xd6   :  { %v2155_v11 = vsel %vm613_vm3, %v2154_v57, %v2153_v7  ;;  %v2147_v15 = vsel %vm622_vm6, %v2146_v60, %v2145_v6  ;;  %v1728_v18 = vld [vmem:[%s22879_s0 + $0x6d1] sm:$0x1]  ;;  %v1729_v19 = vld [vmem:[%s22879_s0 + $0x6d9] sm:$0x1]  ;;  %v1726_v21 = vld [vmem:[%s22879_s0 + $0x6c1] sm:$0x1]  ;;  %v2387_v24 = vsel %vm604_vm0, %v2386_v14, %v1718_v4 }
  0xd7   :  { %v2157_v16 = vsel %vm616_vm4, %v2156_v62, %v2155_v11  ;;  %v1730_v22 = vld [vmem:[%s22879_s0 + $0x6e1] sm:$0x1]  ;;  %v1731_v23 = vld [vmem:[%s22879_s0 + $0x6e9] sm:$0x1]  ;;  %v2388_v25 = vrot.slane %v1720_v5, 6  ;;  %v2390_v28 = vrot.slane %v1721_v8, 5 }
  0xd8   :  { %v2159_v20 = vsel %vm619_vm5, %v2158_v2, %v2157_v16  ;;  %v1732_v27 = vld [vmem:[%s22879_s0 + $0x6f1] sm:$0x1]  ;;  %v2392_v29 = vrot.slane %v1722_v9, 4  ;;  %v2394_v30 = vrot.slane %v1723_v10, 3  ;;  %v1733_v32 = vld [vmem:[%s22879_s0 + $0x6f9] sm:$0x1] }
  0xd9   :  { %v2161_v26 = vsel %vm622_vm6, %v2160_v3, %v2159_v20  ;;  %v2389_v34 = vsel %vm607_vm1, %v2388_v25, %v2387_v24  ;;  %v2396_v35 = vrot.slane %v1724_v12, 2  ;;  %v2398_v36 = vrot.slane %v1725_v13, 1  ;;  %v1591_v37 = vld [vmem:[%s22879_s0 + $0x289] sm:$0x1]  ;;  %v1590_v42 = vld [vmem:[%s22879_s0 + $0x281] sm:$0x1] }
  0xda   :  { %v12117_v31 = vpack.c.bf16 %v2161_v26, %v2147_v15  ;;  %v2391_v38 = vsel %vm610_vm2, %v2390_v28, %v2389_v34  ;;  %v2400_v39 = vrot.slane %v1727_v17, 7  ;;  %v2402_v40 = vrot.slane %v1728_v18, 6  ;;  %v1592_v45 = vld [vmem:[%s22879_s0 + $0x291] sm:$0x1]  ;;  %v1593_v46 = vld [vmem:[%s22879_s0 + $0x299] sm:$0x1] }
  0xdb   :  { %v2404_v41 = vrot.slane %v1729_v19, 5  ;;  %v2393_v43 = vsel %vm613_vm3, %v2392_v29, %v2391_v38  ;;  %v2406_v44 = vrot.slane %v1730_v22, 4  ;;  %v2408_v49 = vrot.slane %v1731_v23, 3  ;;  %v1594_v50 = vld [vmem:[%s22879_s0 + $0x2a1] sm:$0x1] }
  0xdc   :  { %12119 = vmatpush3.bf16.xpose.msk.msra.mxu1 %vm13442_vm8, %v12117_v31  ;;  %v2395_v47 = vsel %vm616_vm4, %v2394_v30, %v2393_v43  ;;  %v2401_v48 = vsel %vm604_vm0, %v2400_v39, %v1726_v21  ;;  %v1595_v51 = vld [vmem:[%s22879_s0 + $0x2a9] sm:$0x1]  ;;  %v2162_v52 = vrot.slane %v1591_v37, 7  ;;  %v2410_v55 = vrot.slane %v1732_v27, 2  ;;  %v1596_v57 = vld [vmem:[%s22879_s0 + $0x2b1] sm:$0x1] }
  0xdd   :  { %v2397_v53 = vsel %vm619_vm5, %v2396_v35, %v2395_v47  ;;  %v2403_v54 = vsel %vm607_vm1, %v2402_v40, %v2401_v48  ;;  %v2412_v56 = vrot.slane %v1733_v32, 1  ;;  %v1597_v59 = vld [vmem:[%s22879_s0 + $0x2b9] sm:$0x1]  ;;  %v1599_v62 = vld [vmem:[%s22879_s0 + $0x2c9] sm:$0x1]  ;;  %v2164_v4 = vrot.slane %v1592_v45, 6 }
  0xde   :  { %v2399_v60 = vsel %vm622_vm6, %v2398_v36, %v2397_v53  ;;  %v2405_v61 = vsel %vm610_vm2, %v2404_v41, %v2403_v54  ;;  %v1600_v0 = vld [vmem:[%s22879_s0 + $0x2d1] sm:$0x1]  ;;  %v1601_v1 = vld [vmem:[%s22879_s0 + $0x2d9] sm:$0x1]  ;;  %v2163_v58 = vsel %vm604_vm0, %v2162_v52, %v1590_v42  ;;  %v1602_v3 = vld [vmem:[%s22879_s0 + $0x2e1] sm:$0x1] }
  0xdf   :  { %v2407_v2 = vsel %vm613_vm3, %v2406_v44, %v2405_v61  ;;  %v2166_v5 = vrot.slane %v1593_v46, 5  ;;  %v2168_v6 = vrot.slane %v1594_v50, 4  ;;  %v1598_v8 = vld [vmem:[%s22879_s0 + $0x2c1] sm:$0x1]  ;;  %v2170_v9 = vrot.slane %v1595_v51, 3 }
  0xe0   :  { %v2409_v7 = vsel %vm616_vm4, %v2408_v49, %v2407_v2  ;;  %v2172_v10 = vrot.slane %v1596_v57, 2  ;;  %v2174_v11 = vrot.slane %v1597_v59, 1  ;;  %v1603_v13 = vld [vmem:[%s22879_s0 + $0x2e9] sm:$0x1]  ;;  %v1604_v14 = vld [vmem:[%s22879_s0 + $0x2f1] sm:$0x1]  ;;  %v2165_v15 = vsel %vm607_vm1, %v2164_v4, %v2163_v58 }
  0xe1   :  { %v2411_v12 = vsel %vm619_vm5, %v2410_v55, %v2409_v7  ;;  %v2176_v16 = vrot.slane %v1599_v62, 7  ;;  %v2178_v17 = vrot.slane %v1600_v0, 6  ;;  %v1605_v19 = vld [vmem:[%s22879_s0 + $0x2f9] sm:$0x1]  ;;  %v2167_v20 = vsel %vm610_vm2, %v2166_v5, %v2165_v15  ;;  %v1735_v23 = vld [vmem:[%s22879_s0 + $0x709] sm:$0x1] }
  0xe2   :  { %v2413_v18 = vsel %vm622_vm6, %v2412_v56, %v2411_v12  ;;  %v2180_v21 = vrot.slane %v1601_v1, 5  ;;  %v2182_v22 = vrot.slane %v1602_v3, 4  ;;  %v2169_v25 = vsel %vm613_vm3, %v2168_v6, %v2167_v20  ;;  %v1734_v27 = vld [vmem:[%s22879_s0 + $0x701] sm:$0x1]  ;;  %v1736_v28 = vld [vmem:[%s22879_s0 + $0x711] sm:$0x1] }
  0xe3   :  { %v12120_v24 = vpack.c.bf16 %v2413_v18, %v2399_v60  ;;  %v2177_v26 = vsel %vm604_vm0, %v2176_v16, %v1598_v8  ;;  %v1737_v29 = vld [vmem:[%s22879_s0 + $0x719] sm:$0x1]  ;;  %v2171_v30 = vsel %vm616_vm4, %v2170_v9, %v2169_v25  ;;  %v2184_v32 = vrot.slane %v1603_v13, 3  ;;  %v1738_v35 = vld [vmem:[%s22879_s0 + $0x721] sm:$0x1] }
  0xe4   :  { %v2179_v31 = vsel %vm607_vm1, %v2178_v17, %v2177_v26  ;;  %v2186_v34 = vrot.slane %v1604_v14, 2  ;;  %v1739_v36 = vld [vmem:[%s22879_s0 + $0x729] sm:$0x1]  ;;  %v2173_v37 = vsel %vm619_vm5, %v2172_v10, %v2171_v30  ;;  %v2188_v39 = vrot.slane %v1605_v19, 1  ;;  %v1740_v40 = vld [vmem:[%s22879_s0 + $0x731] sm:$0x1] }
  0xe5   :  { %12122 = vmatprep.subr.msk.bf16.mxu1 %vm13442_vm8, %v12120_v24  ;;  %v2181_v38 = vsel %vm610_vm2, %v2180_v21, %v2179_v31  ;;  %v1741_v41 = vld [vmem:[%s22879_s0 + $0x739] sm:$0x1]  ;;  %v2414_v42 = vrot.slane %v1735_v23, 7  ;;  %v2175_v43 = vsel %vm622_vm6, %v2174_v11, %v2173_v37  ;;  %v1742_v45 = vld [vmem:[%s22879_s0 + $0x741] sm:$0x1]  ;;  %v2416_v52 = vrot.slane %v1736_v28, 6 }
  0xe6   :  { %v2183_v44 = vsel %vm613_vm3, %v2182_v22, %v2181_v38  ;;  %v1743_v46 = vld [vmem:[%s22879_s0 + $0x749] sm:$0x1]  ;;  %v1744_v47 = vld [vmem:[%s22879_s0 + $0x751] sm:$0x1]  ;;  %v1745_v49 = vld [vmem:[%s22879_s0 + $0x759] sm:$0x1] }
  0xe7   :  { %v2185_v48 = vsel %vm616_vm4, %v2184_v32, %v2183_v44  ;;  %v1746_v50 = vld [vmem:[%s22879_s0 + $0x761] sm:$0x1]  ;;  %v2415_v51 = vsel %vm604_vm0, %v2414_v42, %v1734_v27  ;;  %v2418_v53 = vrot.slane %v1737_v29, 5  ;;  %v1747_v55 = vld [vmem:[%s22879_s0 + $0x769] sm:$0x1]  ;;  %v2420_v56 = vrot.slane %v1738_v35, 4 }
  0xe8   :  { %v2187_v54 = vsel %vm619_vm5, %v2186_v34, %v2185_v48  ;;  %v2422_v57 = vrot.slane %v1739_v36, 3  ;;  %v2424_v59 = vrot.slane %v1740_v40, 2  ;;  %v1748_v61 = vld [vmem:[%s22879_s0 + $0x771] sm:$0x1]  ;;  %v2417_v62 = vsel %vm607_vm1, %v2416_v52, %v2415_v51  ;;  %v1749_v2 = vld [vmem:[%s22879_s0 + $0x779] sm:$0x1] }
  0xe9   :  { %v2189_v60 = vsel %vm622_vm6, %v2188_v39, %v2187_v54  ;;  %v2426_v0 = vrot.slane %v1741_v41, 1  ;;  %v2428_v1 = vrot.slane %v1743_v46, 7  ;;  %v2419_v3 = vsel %vm610_vm2, %v2418_v53, %v2417_v62  ;;  %v1607_v6 = vld [vmem:[%s22879_s0 + $0x309] sm:$0x1]  ;;  %v1608_v11 = vld [vmem:[%s22879_s0 + $0x311] sm:$0x1] }
  0xea   :  { %v12123_v58 = vpack.c.bf16 %v2189_v60, %v2175_v43  ;;  %v2430_v4 = vrot.slane %v1744_v47, 6  ;;  %v2432_v5 = vrot.slane %v1745_v49, 5  ;;  %v2421_v7 = vsel %vm613_vm3, %v2420_v56, %v2419_v3  ;;  %v1609_v12 = vld [vmem:[%s22879_s0 + $0x319] sm:$0x1]  ;;  %v1606_v16 = vld [vmem:[%s22879_s0 + $0x301] sm:$0x1] }
  0xeb   :  { %v2429_v8 = vsel %vm604_vm0, %v2428_v1, %v1742_v45  ;;  %v2434_v9 = vrot.slane %v1746_v50, 4  ;;  %v2436_v10 = vrot.slane %v1747_v55, 3  ;;  %v2423_v13 = vsel %vm616_vm4, %v2422_v57, %v2421_v7  ;;  %v1610_v17 = vld [vmem:[%s22879_s0 + $0x321] sm:$0x1]  ;;  %v1611_v18 = vld [vmem:[%s22879_s0 + $0x329] sm:$0x1] }
  0xec   :  { %12125 = vmatpush3.bf16.xpose.msk.msra.mxu1 %vm13442_vm8, %v12123_v58  ;;  %v2431_v14 = vsel %vm607_vm1, %v2430_v4, %v2429_v8  ;;  %v2438_v15 = vrot.slane %v1748_v61, 2  ;;  %v2425_v19 = vsel %vm619_vm5, %v2424_v59, %v2423_v13  ;;  %v2440_v21 = vrot.slane %v1749_v2, 1  ;;  %v1612_v22 = vld [vmem:[%s22879_s0 + $0x331] sm:$0x1]  ;;  %v1613_v23 = vld [vmem:[%s22879_s0 + $0x339] sm:$0x1] }
  0xed   :  { %v2433_v20 = vsel %vm610_vm2, %v2432_v5, %v2431_v14  ;;  %v2427_v24 = vsel %vm622_vm6, %v2426_v0, %v2425_v19  ;;  %v1614_v26 = vld [vmem:[%s22879_s0 + $0x341] sm:$0x1]  ;;  %v1615_v27 = vld [vmem:[%s22879_s0 + $0x349] sm:$0x1]  ;;  %v1616_v28 = vld [vmem:[%s22879_s0 + $0x351] sm:$0x1] }
  0xee   :  { %v2435_v25 = vsel %vm613_vm3, %v2434_v9, %v2433_v20  ;;  %v1617_v29 = vld [vmem:[%s22879_s0 + $0x359] sm:$0x1]  ;;  %v1618_v31 = vld [vmem:[%s22879_s0 + $0x361] sm:$0x1]  ;;  %v2190_v32 = vrot.slane %v1607_v6, 7  ;;  %v2192_v34 = vrot.slane %v1608_v11, 6 }
  0xef   :  { %v2437_v30 = vsel %vm616_vm4, %v2436_v10, %v2435_v25  ;;  %v2194_v35 = vrot.slane %v1609_v12, 5  ;;  %v1619_v37 = vld [vmem:[%s22879_s0 + $0x369] sm:$0x1]  ;;  %v2196_v38 = vrot.slane %v1610_v17, 4  ;;  %v2198_v39 = vrot.slane %v1611_v18, 3 }
  0xf0   :  { %v2439_v36 = vsel %vm619_vm5, %v2438_v15, %v2437_v30  ;;  %v2200_v40 = vrot.slane %v1612_v22, 2  ;;  %v1620_v42 = vld [vmem:[%s22879_s0 + $0x371] sm:$0x1]  ;;  %v2191_v43 = vsel %vm604_vm0, %v2190_v32, %v1606_v16  ;;  %v2202_v44 = vrot.slane %v1613_v23, 1  ;;  %v1621_v47 = vld [vmem:[%s22879_s0 + $0x379] sm:$0x1] }
  0xf1   :  { %v2441_v41 = vsel %vm622_vm6, %v2440_v21, %v2439_v36  ;;  %v2204_v45 = vrot.slane %v1615_v27, 7  ;;  %v2193_v48 = vsel %vm607_vm1, %v2192_v34, %v2191_v43  ;;  %v2206_v49 = vrot.slane %v1616_v28, 6  ;;  %v1751_v59 = vld [vmem:[%s22879_s0 + $0x789] sm:$0x1]  ;;  %v1752_v60 = vld [vmem:[%s22879_s0 + $0x791] sm:$0x1] }
  0xf2   :  { %v12126_v46 = vpack.c.bf16 %v2441_v41, %v2427_v24  ;;  %v2208_v50 = vrot.slane %v1617_v29, 5  ;;  %v2195_v51 = vsel %vm610_vm2, %v2194_v35, %v2193_v48  ;;  %v2210_v53 = vrot.slane %v1618_v31, 4  ;;  %v1753_v1 = vld [vmem:[%s22879_s0 + $0x799] sm:$0x1]  ;;  %v1754_v58 = vld [vmem:[%s22879_s0 + $0x7a1] sm:$0x1] }
  0xf3   :  { %v2205_v52 = vsel %vm604_vm0, %v2204_v45, %v1614_v26  ;;  %v2212_v54 = vrot.slane %v1619_v37, 3  ;;  %v2197_v55 = vsel %vm613_vm3, %v2196_v38, %v2195_v51  ;;  %v2214_v57 = vrot.slane %v1620_v42, 2  ;;  %v1750_v4 = vld [vmem:[%s22879_s0 + $0x781] sm:$0x1]  ;;  %v1755_v5 = vld [vmem:[%s22879_s0 + $0x7a9] sm:$0x1] }
  0xf4   :  { %12128 = vmatprep.subr.msk.bf16.mxu1 %vm13442_vm8, %v12126_v46  ;;  %v2207_v56 = vsel %vm607_vm1, %v2206_v49, %v2205_v52  ;;  %v2199_v61 = vsel %vm616_vm4, %v2198_v39, %v2197_v55  ;;  %v2216_v0 = vrot.slane %v1621_v47, 1  ;;  %v1756_v6 = vld [vmem:[%s22879_s0 + $0x7b1] sm:$0x1]  ;;  %v1757_v9 = vld [vmem:[%s22879_s0 + $0x7b9] sm:$0x1]  ;;  %v2442_v12 = vrot.slane %v1751_v59, 7 }
  0xf5   :  { %v2209_v62 = vsel %vm610_vm2, %v2208_v50, %v2207_v56  ;;  %v2201_v2 = vsel %vm619_vm5, %v2200_v40, %v2199_v61  ;;  %v1759_v10 = vld [vmem:[%s22879_s0 + $0x7c9] sm:$0x1]  ;;  %v1760_v11 = vld [vmem:[%s22879_s0 + $0x7d1] sm:$0x1]  ;;  %v2444_v13 = vrot.slane %v1752_v60, 6  ;;  %v2446_v17 = vrot.slane %v1753_v1, 5 }
  0xf6   :  { %v2211_v3 = vsel %vm613_vm3, %v2210_v53, %v2209_v62  ;;  %v2203_v7 = vsel %vm622_vm6, %v2202_v44, %v2201_v2  ;;  %v1761_v15 = vld [vmem:[%s22879_s0 + $0x7d9] sm:$0x1]  ;;  %v1762_v16 = vld [vmem:[%s22879_s0 + $0x7e1] sm:$0x1]  ;;  %v2448_v18 = vrot.slane %v1754_v58, 4  ;;  %v2443_v22 = vsel %vm604_vm0, %v2442_v12, %v1750_v4 }
  0xf7   :  { %v2213_v8 = vsel %vm616_vm4, %v2212_v54, %v2211_v3  ;;  %v1758_v20 = vld [vmem:[%s22879_s0 + $0x7c1] sm:$0x1]  ;;  %v1763_v21 = vld [vmem:[%s22879_s0 + $0x7e9] sm:$0x1]  ;;  %v2450_v23 = vrot.slane %v1755_v5, 3  ;;  %v2452_v24 = vrot.slane %v1756_v6, 2  ;;  %v2445_v27 = vsel %vm607_vm1, %v2444_v13, %v2443_v22 }
  0xf8   :  { %v2215_v14 = vsel %vm619_vm5, %v2214_v57, %v2213_v8  ;;  %v1764_v26 = vld [vmem:[%s22879_s0 + $0x7f1] sm:$0x1]  ;;  %v2456_v28 = vrot.slane %v1759_v10, 7  ;;  %v2458_v29 = vrot.slane %v1760_v11, 6  ;;  %v1765_v30 = vld [vmem:[%s22879_s0 + $0x7f9] sm:$0x1]  ;;  %v2447_v31 = vsel %vm610_vm2, %v2446_v17, %v2445_v27 }
  0xf9   :  { %v2217_v19 = vsel %vm622_vm6, %v2216_v0, %v2215_v14  ;;  %v2460_v32 = vrot.slane %v1761_v15, 5  ;;  %v2462_v34 = vrot.slane %v1762_v16, 4  ;;  %v2449_v35 = vsel %vm613_vm3, %v2448_v18, %v2447_v31  ;;  %v1622_v39 = vld [vmem:[%s22879_s0 + $0x381] sm:$0x1]  ;;  %v1623_v40 = vld [vmem:[%s22879_s0 + $0x389] sm:$0x1] }
  0xfa   :  { %v12129_v25 = vpack.c.bf16 %v2217_v19, %v2203_v7  ;;  %v2454_v36 = vrot.slane %v1757_v9, 1  ;;  %v2457_v37 = vsel %vm604_vm0, %v2456_v28, %v1758_v20  ;;  %v2464_v38 = vrot.slane %v1763_v21, 3  ;;  %v1624_v41 = vld [vmem:[%s22879_s0 + $0x391] sm:$0x1]  ;;  %v1625_v45 = vld [vmem:[%s22879_s0 + $0x399] sm:$0x1] }
  0xfb   :  { %v2451_v42 = vsel %vm616_vm4, %v2450_v23, %v2449_v35  ;;  %v2459_v43 = vsel %vm607_vm1, %v2458_v29, %v2457_v37  ;;  %v2466_v44 = vrot.slane %v1764_v26, 2  ;;  %v1626_v46 = vld [vmem:[%s22879_s0 + $0x3a1] sm:$0x1]  ;;  %v2468_v49 = vrot.slane %v1765_v30, 1  ;;  %v1627_v50 = vld [vmem:[%s22879_s0 + $0x3a9] sm:$0x1] }
  0xfc   :  { %12131 = vmatpush3.bf16.xpose.msk.msra.mxu1 %vm13442_vm8, %v12129_v25  ;;  %v2453_v47 = vsel %vm619_vm5, %v2452_v24, %v2451_v42  ;;  %v2461_v48 = vsel %vm610_vm2, %v2460_v32, %v2459_v43  ;;  %v1628_v51 = vld [vmem:[%s22879_s0 + $0x3b1] sm:$0x1]  ;;  %v1629_v53 = vld [vmem:[%s22879_s0 + $0x3b9] sm:$0x1]  ;;  %v1631_v54 = vld [vmem:[%s22879_s0 + $0x3c9] sm:$0x1] }
  0xfd   :  { %v2463_v52 = vsel %vm613_vm3, %v2462_v34, %v2461_v48  ;;  %v1632_v55 = vld [vmem:[%s22879_s0 + $0x3d1] sm:$0x1]  ;;  %v2218_v56 = vrot.slane %v1623_v40, 7  ;;  %v2220_v57 = vrot.slane %v1624_v41, 6  ;;  %v2455_v59 = vsel %vm622_vm6, %v2454_v36, %v2453_v47  ;;  %v1633_v61 = vld [vmem:[%s22879_s0 + $0x3d9] sm:$0x1] }
  0xfe   :  { %v2465_v60 = vsel %vm616_vm4, %v2464_v38, %v2463_v52  ;;  %v1634_v62 = vld [vmem:[%s22879_s0 + $0x3e1] sm:$0x1]  ;;  %v2222_v0 = vrot.slane %v1625_v45, 5  ;;  %v2224_v1 = vrot.slane %v1626_v46, 4  ;;  %v1635_v3 = vld [vmem:[%s22879_s0 + $0x3e9] sm:$0x1] }
  0xff   :  { %v2467_v58 = vsel %vm619_vm5, %v2466_v44, %v2465_v60  ;;  %v1630_v2 = vld [vmem:[%s22879_s0 + $0x3c1] sm:$0x1]  ;;  %v2219_v4 = vsel %vm604_vm0, %v2218_v56, %v1622_v39  ;;  %v2226_v5 = vrot.slane %v1627_v50, 3  ;;  %v2228_v6 = vrot.slane %v1628_v51, 2  ;;  %v1636_v8 = vld [vmem:[%s22879_s0 + $0x3f1] sm:$0x1] }
 0x100   :  { %v2469_v7 = vsel %vm622_vm6, %v2468_v49, %v2467_v58  ;;  %v2221_v9 = vsel %vm607_vm1, %v2220_v57, %v2219_v4  ;;  %v2232_v10 = vrot.slane %v1631_v54, 7  ;;  %v2234_v11 = vrot.slane %v1632_v55, 6  ;;  %v1637_v13 = vld [vmem:[%s22879_s0 + $0x3f9] sm:$0x1]  ;;  %v13202_v34 = vld [vmem:[%s22880_s1] sm:$0xff]  ;;  %v13203_v35 = vld [vmem:[%s22880_s1 + $0x8] sm:$0xff] }
 0x101   :  { %v12132_v12 = vpack.c.bf16 %v2469_v7, %v2455_v59  ;;  %v2223_v14 = vsel %vm610_vm2, %v2222_v0, %v2221_v9  ;;  %v2236_v15 = vrot.slane %v1633_v61, 5  ;;  %v2238_v16 = vrot.slane %v1634_v62, 4  ;;  %v13204_v36 = vld [vmem:[%s22880_s1 + $0x10] sm:$0xff]  ;;  %v13205_v37 = vld [vmem:[%s22880_s1 + $0x18] sm:$0xff]  ;;  %v13206_v38 = vld [vmem:[%s22880_s1 + $0x20] sm:$0xff] }
 0x102   :  { %v2225_v17 = vsel %vm613_vm3, %v2224_v1, %v2223_v14  ;;  %v2230_v18 = vrot.slane %v1629_v53, 1  ;;  %v2233_v19 = vsel %vm604_vm0, %v2232_v10, %v1630_v2  ;;  %v2240_v20 = vrot.slane %v1635_v3, 3  ;;  %v13207_v39 = vld [vmem:[%s22880_s1 + $0x28] sm:$0xff]  ;;  %v13208_v40 = vld [vmem:[%s22880_s1 + $0x30] sm:$0xff]  ;;  %v13209_v41 = vld [vmem:[%s22880_s1 + $0x38] sm:$0xff] }
 0x103   :  { %12134 = vmatprep.subr.msk.bf16.mxu1 %vm13442_vm8, %v12132_v12  ;;  %v2227_v21 = vsel %vm616_vm4, %v2226_v5, %v2225_v17  ;;  %v2235_v22 = vsel %vm607_vm1, %v2234_v11, %v2233_v19  ;;  %v2242_v23 = vrot.slane %v1636_v8, 2  ;;  %v2244_v26 = vrot.slane %v1637_v13, 1  ;;  %v3001_v42 = vld [vmem:[%s22879_s0 + $0x40a] sm:$0x1]  ;;  %v3002_v43 = vld [vmem:[%s22879_s0 + $0x412] sm:$0x1] }
 0x104   :  { %v2229_v24 = vsel %vm619_vm5, %v2228_v6, %v2227_v21  ;;  %v2237_v25 = vsel %vm610_vm2, %v2236_v15, %v2235_v22  ;;  %v3003_v44 = vld [vmem:[%s22879_s0 + $0x41a] sm:$0x1]  ;;  %v3000_v45 = vld [vmem:[%s22879_s0 + $0x402] sm:$0x1]  ;;  %v3005_v47 = vld [vmem:[%s22879_s0 + $0x42a] sm:$0x1] }
 0x105   :  { %v2239_v27 = vsel %vm613_vm3, %v2238_v16, %v2237_v25  ;;  %v2231_v28 = vsel %vm622_vm6, %v2230_v18, %v2229_v24  ;;  %v3004_v46 = vld [vmem:[%s22879_s0 + $0x422] sm:$0x1]  ;;  %v3006_v48 = vld [vmem:[%s22879_s0 + $0x432] sm:$0x1]  ;;  %v3007_v49 = vld [vmem:[%s22879_s0 + $0x43a] sm:$0x1] }
 0x106   :  { %v2241_v29 = vsel %vm616_vm4, %v2240_v20, %v2239_v27  ;;  %v3008_v50 = vld [vmem:[%s22879_s0 + $0x442] sm:$0x1]  ;;  %v3009_v51 = vld [vmem:[%s22879_s0 + $0x44a] sm:$0x1]  ;;  %v3010_v52 = vld [vmem:[%s22879_s0 + $0x452] sm:$0x1] }
 0x107   :  { %v2243_v30 = vsel %vm619_vm5, %v2242_v23, %v2241_v29  ;;  %v3011_v53 = vld [vmem:[%s22879_s0 + $0x45a] sm:$0x1]  ;;  %v3012_v54 = vld [vmem:[%s22879_s0 + $0x462] sm:$0x1]  ;;  %v3013_v55 = vld [vmem:[%s22879_s0 + $0x46a] sm:$0x1] }
 0x108   :  { %v2245_v31 = vsel %vm622_vm6, %v2244_v26, %v2243_v30  ;;  %v3014_v56 = vld [vmem:[%s22879_s0 + $0x472] sm:$0x1]  ;;  %v3608_v57 = vrot.slane %v3001_v42, 7  ;;  %v3610_v59 = vrot.slane %v3002_v43, 6  ;;  %v3612_v60 = vrot.slane %v3003_v44, 5 }
 0x109   :  { %v12135_v32 = vpack.c.bf16 %v2245_v31, %v2231_v28  ;;  %v3015_v61 = vld [vmem:[%s22879_s0 + $0x47a] sm:$0x1]  ;;  %v3614_v62 = vrot.slane %v3004_v46, 4  ;;  %v3616_v0 = vrot.slane %v3005_v47, 3  ;;  %v3618_v1 = vrot.slane %v3006_v48, 2 }
 0x10a   :  { %v3622_v58 = vrot.slane %v3009_v51, 7  ;;  %v3609_v2 = vsel %vm604_vm0, %v3608_v57, %v3000_v45  ;;  %v3624_v3 = vrot.slane %v3010_v52, 6  ;;  %v3626_v4 = vrot.slane %v3011_v53, 5  ;;  %v2873_v6 = vld [vmem:[%s22879_s0 + $0xa] sm:$0x1] }
 0x10b   :  { %12137 = vmatpush3.bf16.xpose.msk.msra.mxu1 %vm13442_vm8, %v12135_v32  ;;  %v3628_v5 = vrot.slane %v3012_v54, 4  ;;  %v3611_v7 = vsel %vm607_vm1, %v3610_v59, %v3609_v2  ;;  %v3620_v8 = vrot.slane %v3007_v49, 1  ;;  %v3630_v10 = vrot.slane %v3013_v55, 3  ;;  %v2872_v14 = vld [vmem:[%s22879_s0 + $0x2] sm:$0x1] }
 0x10c   :  { %v3623_v9 = vsel %vm604_vm0, %v3622_v58, %v3008_v50  ;;  %v3613_v11 = vsel %vm610_vm2, %v3612_v60, %v3611_v7  ;;  %v3632_v13 = vrot.slane %v3014_v56, 2  ;;  %v2874_v15 = vld [vmem:[%s22879_s0 + $0x12] sm:$0x1]  ;;  %v3384_v16 = vrot.slane %v2873_v6, 7  ;;  %v2875_v20 = vld [vmem:[%s22879_s0 + $0x1a] sm:$0x1] }
 0x10d   :  { %v3625_v12 = vsel %vm607_vm1, %v3624_v3, %v3623_v9  ;;  %v3615_v17 = vsel %vm613_vm3, %v3614_v62, %v3613_v11  ;;  %v3634_v19 = vrot.slane %v3015_v61, 1  ;;  %v2876_v21 = vld [vmem:[%s22879_s0 + $0x22] sm:$0x1]  ;;  %v2877_v24 = vld [vmem:[%s22879_s0 + $0x2a] sm:$0x1] }
 0x10e   :  { %v3627_v18 = vsel %vm610_vm2, %v3626_v4, %v3625_v12  ;;  %v3617_v22 = vsel %vm616_vm4, %v3616_v0, %v3615_v17  ;;  %v2878_v25 = vld [vmem:[%s22879_s0 + $0x32] sm:$0x1]  ;;  %v2879_v26 = vld [vmem:[%s22879_s0 + $0x3a] sm:$0x1]  ;;  %v2880_v29 = vld [vmem:[%s22879_s0 + $0x42] sm:$0x1] }
 0x10f   :  { %v3629_v23 = vsel %vm613_vm3, %v3628_v5, %v3627_v18  ;;  %v3619_v27 = vsel %vm619_vm5, %v3618_v1, %v3617_v22  ;;  %v2881_v30 = vld [vmem:[%s22879_s0 + $0x4a] sm:$0x1]  ;;  %v2882_v31 = vld [vmem:[%s22879_s0 + $0x52] sm:$0x1]  ;;  %v2883_v32 = vld [vmem:[%s22879_s0 + $0x5a] sm:$0x1] }
 0x110   :  { %v3631_v28 = vsel %vm616_vm4, %v3630_v10, %v3629_v23  ;;  %v2886_v42 = vld [vmem:[%s22879_s0 + $0x72] sm:$0x1]  ;;  %v3390_v43 = vrot.slane %v2876_v21, 4  ;;  %v3392_v44 = vrot.slane %v2877_v24, 3  ;;  %v3394_v45 = vrot.slane %v2878_v25, 2 }
 0x111   :  { %v2887_v47 = vld [vmem:[%s22879_s0 + $0x7a] sm:$0x1]  ;;  %v3396_v49 = vrot.slane %v2879_v26, 1  ;;  %v3398_v50 = vrot.slane %v2881_v30, 7  ;;  %v3017_v51 = vld [vmem:[%s22879_s0 + $0x48a] sm:$0x1] }
 0x112   :  { %11725 = vmatmul.mubr.msk.f32.vlgmr.msra.gmra.mrb[8].mxu1 %vm1058_vm7, %v13202_v34  ;;  %v3385_v34 = vsel %vm604_vm0, %v3384_v16, %v2872_v14  ;;  %v3400_v53 = vrot.slane %v2882_v31, 6  ;;  %v3402_v54 = vrot.slane %v2883_v32, 5  ;;  %v3016_v56 = vld [vmem:[%s22879_s0 + $0x482] sm:$0x1]  ;;  %v3018_v57 = vld [vmem:[%s22879_s0 + $0x492] sm:$0x1] }
 0x113   :  { %11726 = vmatprep.mubr.msk.f32.mxu1 %vm1058_vm7, %v13203_v35  ;;  %v3399_v60 = vsel %vm604_vm0, %v3398_v50, %v2880_v29  ;;  %v3019_v62 = vld [vmem:[%s22879_s0 + $0x49a] sm:$0x1]  ;;  %v3020_v0 = vld [vmem:[%s22879_s0 + $0x4a2] sm:$0x1]  ;;  %v3408_v3 = vrot.slane %v2886_v42, 2  ;;  %v3410_v9 = vrot.slane %v2887_v47, 1 }
 0x114   :  { %v3401_v2 = vsel %vm607_vm1, %v3400_v53, %v3399_v60  ;;  %v3021_v4 = vld [vmem:[%s22879_s0 + $0x4aa] sm:$0x1]  ;;  %v3022_v5 = vld [vmem:[%s22879_s0 + $0x4b2] sm:$0x1]  ;;  %v3023_v10 = vld [vmem:[%s22879_s0 + $0x4ba] sm:$0x1] }
 0x115   :  { %v3636_v11 = vrot.slane %v3017_v51, 7  ;;  %v3024_v14 = vld [vmem:[%s22879_s0 + $0x4c2] sm:$0x1]  ;;  %v3026_v16 = vld [vmem:[%s22879_s0 + $0x4d2] sm:$0x1]  ;;  %v3638_v21 = vrot.slane %v3018_v57, 6 }
 0x116   :  { %11727 = vmatmul.mubr.msk.f32.gmra.mrb[10].mxu1 %vm1058_vm7, %v13203_v35  ;;  %v3621_v35 = vsel %vm622_vm6, %v3620_v8, %v3619_v27  ;;  %v3403_v8 = vsel %vm610_vm2, %v3402_v54, %v3401_v2  ;;  %v3027_v18 = vld [vmem:[%s22879_s0 + $0x4da] sm:$0x1]  ;;  %v3640_v22 = vrot.slane %v3019_v62, 5  ;;  %v3029_v25 = vld [vmem:[%s22879_s0 + $0x4ea] sm:$0x1]  ;;  %v3642_v26 = vrot.slane %v3020_v0, 4 }
 0x117   :  { %11728 = vmatprep.mubr.msk.f32.mxu1 %vm1058_vm7, %v13204_v36  ;;  %v3644_v27 = vrot.slane %v3021_v4, 3  ;;  %v3030_v31 = vld [vmem:[%s22879_s0 + $0x4f2] sm:$0x1]  ;;  %v2888_v50 = vld [vmem:[%s22879_s0 + $0x82] sm:$0x1] }
 0x118   :  { %v2890_v51 = vld [vmem:[%s22879_s0 + $0x92] sm:$0x1]  ;;  %v2893_v62 = vld [vmem:[%s22879_s0 + $0xaa] sm:$0x1] }
 0x119   :  { %v2894_v2 = vld [vmem:[%s22879_s0 + $0xb2] sm:$0x1] }
 0x11a   :  { %11729 = vmatmul.mubr.msk.f32.gmra.mrb[12].mxu1 %vm1058_vm7, %v13204_v36  ;;  %v3633_v36 = vsel %vm619_vm5, %v3632_v13, %v3631_v28  ;;  %v3646_v28 = vrot.slane %v3022_v5, 2 }
 0x11b   :  { %11730 = vmatprep.mubr.msk.f32.mxu1 %vm1058_vm7, %v13205_v37 }
 0x11e   :  { %11731 = vmatmul.mubr.msk.f32.gmra.mrb[14].mxu1 %vm1058_vm7, %v13205_v37  ;;  %v2884_v37 = vld [vmem:[%s22879_s0 + $0x62] sm:$0x1] }
 0x11f   :  { %11732 = vmatprep.mubr.msk.f32.mxu1 %vm1058_vm7, %v13206_v38  ;;  %v3404_v55 = vrot.slane %v2884_v37, 4  ;;  %v3031_v37 = vld [vmem:[%s22879_s0 + $0x4fa] sm:$0x1] }
 0x121   :  { %v3405_v13 = vsel %vm613_vm3, %v3404_v55, %v3403_v8  ;;  %v3662_v55 = vrot.slane %v3031_v37, 1 }
 0x122   :  { %11733 = vmatmul.mubr.msk.f32.gmra.mrb[16].mxu1 %vm1058_vm7, %v13206_v38  ;;  %v2885_v38 = vld [vmem:[%s22879_s0 + $0x6a] sm:$0x1] }
 0x123   :  { %11734 = vmatprep.mubr.msk.f32.mxu1 %vm1058_vm7, %v13207_v39  ;;  %v3406_v61 = vrot.slane %v2885_v38, 3 }
 0x125   :  { %v3407_v17 = vsel %vm616_vm4, %v3406_v61, %v3405_v13  ;;  %v2892_v61 = vld [vmem:[%s22879_s0 + $0xa2] sm:$0x1] }
 0x126   :  { %11735 = vmatmul.mubr.msk.f32.gmra.mrb[18].mxu1 %vm1058_vm7, %v13207_v39  ;;  %v3386_v39 = vrot.slane %v2874_v15, 6  ;;  %v3025_v15 = vld [vmem:[%s22879_s0 + $0x4ca] sm:$0x1]  ;;  %v3409_v24 = vsel %vm619_vm5, %v3408_v3, %v3407_v17  ;;  %v3418_v17 = vrot.slane %v2892_v61, 4 }
 0x127   :  { %11736 = vmatprep.mubr.msk.f32.mxu1 %vm1058_vm7, %v13208_v40  ;;  %v3411_v30 = vsel %vm622_vm6, %v3410_v9, %v3409_v24  ;;  %v2897_v3 = vld [vmem:[%s22879_s0 + $0xca] sm:$0x1]  ;;  %v2898_v9 = vld [vmem:[%s22879_s0 + $0xd2] sm:$0x1] }
 0x128   :  { %v3387_v48 = vsel %vm607_vm1, %v3386_v39, %v3385_v34  ;;  %v3648_v34 = vrot.slane %v3023_v10, 1  ;;  %v3652_v39 = vrot.slane %v3026_v16, 6  ;;  %v3414_v10 = vrot.slane %v2890_v51, 6  ;;  %v2899_v16 = vld [vmem:[%s22879_s0 + $0xda] sm:$0x1] }
 0x129   :  { %v3430_v37 = vrot.slane %v2899_v16, 5 }
 0x12a   :  { %11737 = vmatmul.mubr.msk.f32.gmra.mrb[20].mxu1 %vm1058_vm7, %v13208_v40  ;;  %v3388_v40 = vrot.slane %v2875_v20, 5  ;;  %v3637_v20 = vsel %vm604_vm0, %v3636_v11, %v3016_v56  ;;  %v2891_v56 = vld [vmem:[%s22879_s0 + $0x9a] sm:$0x1] }
 0x12b   :  { %11738 = vmatprep.mubr.msk.f32.mxu1 %vm1058_vm7, %v13209_v41  ;;  %v3639_v32 = vsel %vm607_vm1, %v3638_v21, %v3637_v20  ;;  %v3416_v11 = vrot.slane %v2891_v56, 5  ;;  %v2895_v21 = vld [vmem:[%s22879_s0 + $0xba] sm:$0x1] }
 0x12c   :  { %v3389_v52 = vsel %vm610_vm2, %v3388_v40, %v3387_v48  ;;  %v3641_v38 = vsel %vm610_vm2, %v3640_v22, %v3639_v32  ;;  %v3654_v40 = vrot.slane %v3027_v18, 5  ;;  %v3420_v18 = vrot.slane %v2893_v62, 3  ;;  %v2896_v22 = vld [vmem:[%s22879_s0 + $0xc2] sm:$0x1] }
 0x12d   :  { %v3391_v59 = vsel %vm613_vm3, %v3390_v43, %v3389_v52  ;;  %v3643_v42 = vsel %vm613_vm3, %v3642_v26, %v3641_v38  ;;  %v2900_v26 = vld [vmem:[%s22879_s0 + $0xe2] sm:$0x1] }
 0x12e   :  { %11739 = vmatmul.mubr.msk.f32.gmra.mrb[22].mxu1 %vm1058_vm7, %v13209_v41  ;;  %v3635_v41 = vsel %vm622_vm6, %v3634_v19, %v3633_v36  ;;  %v3393_v58 = vsel %vm616_vm4, %v3392_v44, %v3391_v59  ;;  %v3028_v19 = vld [vmem:[%s22879_s0 + $0x4e2] sm:$0x1]  ;;  %v3645_v47 = vsel %vm616_vm4, %v3644_v27, %v3643_v42  ;;  %v15772_v59 = vpop.permute.xlu0 %309  ;;  %v2901_v27 = vld [vmem:[%s22879_s0 + $0xea] sm:$0x1] }
 0x12f   :  { %2711 = vmatprep.mubr.f32.mxu1 %v22886_v33  ;;  %v12142_v46 = vpack.c.bf16 %v3635_v41, %v3621_v35  ;;  %v3395_v7 = vsel %vm619_vm5, %v3394_v45, %v3393_v58  ;;  %v3650_v35 = vrot.slane %v3025_v15, 7  ;;  %v2889_v41 = vld [vmem:[%s22879_s0 + $0x8a] sm:$0x1]  ;;  %v3656_v44 = vrot.slane %v3028_v19, 4 }
 0x130   :  { %v3397_v12 = vsel %vm622_vm6, %v3396_v49, %v3395_v7  ;;  %v3658_v45 = vrot.slane %v3029_v25, 3  ;;  %v3660_v49 = vrot.slane %v3030_v31, 2  ;;  %v3647_v53 = vsel %vm619_vm5, %v3646_v28, %v3645_v47  ;;  %v2903_v47 = vld [vmem:[%s22879_s0 + $0xfa] sm:$0x1] }
 0x131   :  { %12144 = vmatprep.subr.msk.bf16.mxu0 %vm13442_vm8, %v12142_v46  ;;  %v12145_v36 = vpack.c.bf16 %v3411_v30, %v3397_v12  ;;  %v3651_v43 = vsel %vm604_vm0, %v3650_v35, %v3024_v14  ;;  %v3412_v57 = vrot.slane %v2889_v41, 7  ;;  %v3649_v0 = vsel %vm622_vm6, %v3648_v34, %v3647_v53  ;;  %v2902_v41 = vld [vmem:[%s22879_s0 + $0xf2] sm:$0x1] }
 0x132   :  { %v3653_v48 = vsel %vm607_vm1, %v3652_v39, %v3651_v43  ;;  %v3422_v30 = vrot.slane %v2894_v2, 2  ;;  %v3426_v31 = vrot.slane %v2897_v3, 7  ;;  %v15819_v32 = vpop.permute.xlu0 %314  ;;  %v3434_v61 = vrot.slane %v2901_v27, 3  ;;  %v3035_v3 = vld [vmem:[%s22879_s0 + $0x51a] sm:$0x1] }
 0x133   :  { %12147 = vmatpush3.bf16.xpose.msk.msra.mxu0 %vm13442_vm8, %v12145_v36  ;;  %v3655_v54 = vsel %vm610_vm2, %v3654_v40, %v3653_v48  ;;  %v3413_v4 = vsel %vm604_vm0, %v3412_v57, %v2888_v50  ;;  %v3428_v36 = vrot.slane %v2898_v9, 6  ;;  %v3424_v48 = vrot.slane %v2895_v21, 1  ;;  %v3032_v9 = vld [vmem:[%s22879_s0 + $0x502] sm:$0x1]  ;;  %v3039_v27 = vld [vmem:[%s22879_s0 + $0x53a] sm:$0x1] }
 0x134   :  { %v3657_v60 = vsel %vm613_vm3, %v3656_v44, %v3655_v54  ;;  %v3415_v24 = vsel %vm607_vm1, %v3414_v10, %v3413_v4  ;;  %v3427_v43 = vsel %vm604_vm0, %v3426_v31, %v2896_v22  ;;  %v15830_v44 = vpop.permute.xlu1 %319  ;;  %v3033_v54 = vld [vmem:[%s22879_s0 + $0x50a] sm:$0x1]  ;;  %v3436_v62 = vrot.slane %v2902_v41, 2  ;;  %v3036_v10 = vld [vmem:[%s22879_s0 + $0x522] sm:$0x1] }
 0x135   :  { %v3659_v58 = vsel %vm616_vm4, %v3658_v45, %v3657_v60  ;;  %v3417_v28 = vsel %vm610_vm2, %v3416_v11, %v3415_v24  ;;  %v3432_v60 = vrot.slane %v2900_v26, 4  ;;  %v3438_v2 = vrot.slane %v2903_v47, 1 }
 0x136   :  { %v3661_v8 = vsel %vm619_vm5, %v3660_v49, %v3659_v58  ;;  %v3429_v49 = vsel %vm607_vm1, %v3428_v36, %v3427_v43  ;;  %v3664_v16 = vrot.slane %v3033_v54, 7  ;;  %v3668_v22 = vrot.slane %v3035_v3, 5 }
 0x137   :  { %v3663_v15 = vsel %vm622_vm6, %v3662_v55, %v3661_v8  ;;  %v3431_v53 = vsel %vm610_vm2, %v3430_v37, %v3429_v49  ;;  %v3034_v55 = vld [vmem:[%s22879_s0 + $0x512] sm:$0x1]  ;;  %v3670_v37 = vrot.slane %v3036_v10, 4 }
 0x138   :  { %v12148_v20 = vpack.c.bf16 %v3663_v15, %v3649_v0  ;;  %v3433_v8 = vsel %vm613_vm3, %v3432_v60, %v3431_v53  ;;  %v3038_v15 = vld [vmem:[%s22879_s0 + $0x532] sm:$0x1]  ;;  %v3666_v21 = vrot.slane %v3034_v55, 6  ;;  %v3040_v60 = vld [vmem:[%s22879_s0 + $0x542] sm:$0x1] }
 0x139   :  { %v3674_v43 = vrot.slane %v3038_v15, 2 }
 0x13a   :  { %12150 = vmatprep.subr.msk.bf16.mxu0 %vm13442_vm8, %v12148_v20 }
 0x159   :  { %v15695_v1 = vpop.f32.mrb[0].mxu1 }
 0x15a   :  { %v15705_v6 = vpop.f32.mrb[1].mxu1 }
 0x15d   :  { %v15731_v23 = vpop.f32.mrb[2].mxu1 }
 0x15e   :  { %v15737_v29 = vpop.f32.mrb[3].mxu1 }
 0x161   :  { %v15753_v46 = vpop.f32.mrb[4].mxu1 }
 0x162   :  { %v15765_v52 = vpop.f32.mrb[5].mxu1 }
 0x165   :  { %v15790_v7 = vpop.f32.mrb[6].mxu1 }
 0x166   :  { %v1213_v5 = vpop.f32.mrb[0].mxu0  ;;  %v15797_v14 = vpop.f32.mrb[7].mxu1 }
 0x167   :  { %v1214_v12 = vadd.f32 %v1213_v5, %v15772_v59  ;;  %v1215_v13 = vpop.f32.mrb[1].mxu0 }
 0x168   :  { %v1216_v19 = vadd.f32 %v1215_v13, %v15772_v59  ;;  %v3037_v13 = vld [vmem:[%s22879_s0 + $0x52a] sm:$0x1] }
 0x169   :  { %v1398_v25 = vadd.f32 %v15705_v6, %v1214_v12  ;;  %v3419_v6 = vsel %vm613_vm3, %v3418_v17, %v3417_v28  ;;  %v3435_v12 = vsel %vm616_vm4, %v3434_v61, %v3433_v8  ;;  %v15867_v17 = vpop.permute.xlu1 %324  ;;  %v3665_v28 = vsel %vm604_vm0, %v3664_v16, %v3032_v9  ;;  %v3043_v61 = vld [vmem:[%s22879_s0 + $0x55a] sm:$0x1] }
 0x16a   :  { %v11203_v34 = vmul.f32 -1.442695, %v1216_v19  ;;  %v1219_v35 = vpop.f32.mrb[2].mxu0  ;;  %v3421_v42 = vsel %vm616_vm4, %v3420_v18, %v3419_v6  ;;  %v3437_v20 = vsel %vm619_vm5, %v3436_v62, %v3435_v12  ;;  %v3041_v6 = vld [vmem:[%s22879_s0 + $0x54a] sm:$0x1] }
 0x16b   :  { %v11202_v38 = vmul.f32 -1.442695, %v1398_v25  ;;  %v1220_v39 = vadd.f32 %v1219_v35, %v15819_v32  ;;  %v1221_v40 = vpop.f32.mrb[3].mxu0  ;;  %v3423_v51 = vsel %vm619_vm5, %v3422_v30, %v3421_v42  ;;  %v3439_v26 = vsel %vm622_vm6, %v3438_v2, %v3437_v20  ;;  %v3046_v20 = vld [vmem:[%s22879_s0 + $0x572] sm:$0x1] }
 0x16c   :  { %12689 = vpow2.f32 %v11203_v34  ;;  %v1222_v45 = vadd.f32 %v1221_v40, %v15819_v32  ;;  %v3425_v5 = vsel %vm622_vm6, %v3424_v48, %v3423_v51  ;;  %v3667_v34 = vsel %vm607_vm1, %v3666_v21, %v3665_v28  ;;  %v3042_v51 = vld [vmem:[%s22879_s0 + $0x552] sm:$0x1]  ;;  %v3047_v21 = vld [vmem:[%s22879_s0 + $0x57a] sm:$0x1] }
 0x16d   :  { %12691 = vpow2.f32 %v11202_v38  ;;  %v1400_v50 = vadd.f32 %v15695_v1, %v1220_v39  ;;  %v12151_v31 = vpack.c.bf16 %v3439_v26, %v3425_v5  ;;  %v3669_v36 = vsel %vm610_vm2, %v3668_v22, %v3667_v34  ;;  %v15883_v39 = vpop.permute.xlu0 %329 }
 0x16e   :  { %v11205_v56 = vmul.f32 -1.442695, %v1222_v45  ;;  %v1225_v57 = vpop.f32.mrb[4].mxu0  ;;  %v3672_v42 = vrot.slane %v3037_v13, 3  ;;  %v3676_v45 = vrot.slane %v3039_v27, 1  ;;  %v3671_v53 = vsel %vm613_vm3, %v3670_v37, %v3669_v36 }
 0x16f   :  { %v11204_v0 = vmul.f32 -1.442695, %v1400_v50  ;;  %v1226_v1 = vadd.f32 %v1225_v57, %v15830_v44  ;;  %v1227_v58 = vpop.f32.mrb[5].mxu0  ;;  %12153 = vmatpush3.bf16.xpose.msk.msra.mxu0 %vm13442_vm8, %v12151_v31  ;;  %v3680_v5 = vrot.slane %v3042_v51, 6  ;;  %v3045_v13 = vld [vmem:[%s22879_s0 + $0x56a] sm:$0x1] }
 0x170   :  { %12693 = vpow2.f32 %v11205_v56  ;;  %v1228_v4 = vadd.f32 %v1227_v58, %v15830_v44  ;;  %v3673_v56 = vsel %vm616_vm4, %v3672_v42, %v3671_v53  ;;  %v15902_v58 = vpop.permute.xlu1 %334  ;;  %v2905_v36 = vld [vmem:[%s22879_s0 + $0x10a] sm:$0x1]  ;;  %v2906_v51 = vld [vmem:[%s22879_s0 + $0x112] sm:$0x1] }
 0x171   :  { %12695 = vpow2.f32 %v11204_v0  ;;  %v1402_v11 = vadd.f32 %v15737_v29, %v1226_v1  ;;  %v3675_v62 = vsel %vm619_vm5, %v3674_v43, %v3673_v56  ;;  %v3678_v0 = vrot.slane %v3041_v6, 7 }
 0x172   :  { %v11207_v18 = vmul.f32 -1.442695, %v1228_v4  ;;  %v1231_v19 = vpop.f32.mrb[6].mxu0  ;;  %v15908_v4 = vsel %vm622_vm6, %v3676_v45, %v3675_v62  ;;  %v3688_v43 = vrot.slane %v3046_v20, 2  ;;  %v2904_v45 = vld [vmem:[%s22879_s0 + $0x102] sm:$0x1] }
 0x173   :  { %v11206_v29 = vmul.f32 -1.442695, %v1402_v11  ;;  %v1232_v24 = vadd.f32 %v1231_v19, %v15867_v17  ;;  %v1233_v25 = vpop.f32.mrb[7].mxu0  ;;  %v2915_v20 = vld [vmem:[%s22879_s0 + $0x15a] sm:$0x1] }
 0x174   :  { %12697 = vpow2.f32 %v11207_v18  ;;  %v1234_v30 = vadd.f32 %v1233_v25, %v15867_v17  ;;  %v3679_v18 = vsel %vm604_vm0, %v3678_v0, %v3040_v60  ;;  %v15924_v25 = vpop.permute.xlu0 %339  ;;  %v2907_v60 = vld [vmem:[%s22879_s0 + $0x11a] sm:$0x1] }
 0x175   :  { %12699 = vpow2.f32 %v11206_v29  ;;  %v1404_v35 = vadd.f32 %v15731_v23, %v1232_v24  ;;  %v3681_v22 = vsel %vm607_vm1, %v3680_v5, %v3679_v18  ;;  %v3682_v29 = vrot.slane %v3043_v61, 5  ;;  %v2908_v61 = vld [vmem:[%s22879_s0 + $0x122] sm:$0x1] }
 0x176   :  { %v12690_v38 = vpop.eup %12689  ;;  %v11209_v40 = vmul.f32 -1.442695, %v1234_v30  ;;  %v1237_v41 = vpop.f32.mrb[8].mxu0  ;;  %v3686_v30 = vrot.slane %v3045_v13, 3  ;;  %v3444_v18 = vrot.slane %v2907_v60, 5 }
 0x177   :  { %v12692_v47 = vpop.eup %12691  ;;  %v1451_v23 = vadd.f32 1.0, %v12690_v38  ;;  %v11208_v48 = vmul.f32 -1.442695, %v1404_v35  ;;  %v1238_v49 = vadd.f32 %v1237_v41, %v15883_v39  ;;  %v1239_v50 = vpop.f32.mrb[9].mxu0 }
 0x178   :  { %v1450_v54 = vadd.f32 1.0, %v12692_v47  ;;  %12701 = vpow2.f32 %v11209_v40  ;;  %v1240_v55 = vadd.f32 %v1239_v50, %v15883_v39  ;;  %v3683_v40 = vsel %vm610_vm2, %v3682_v29, %v3681_v22 }
 0x179   :  { %12703 = vrcp.f32 %v1451_v23  ;;  %v1406_v57 = vadd.f32 %v15765_v52, %v1238_v49  ;;  %v3044_v52 = vld [vmem:[%s22879_s0 + $0x562] sm:$0x1]  ;;  %v15937_v23 = vpop.permute.xlu1 %344  ;;  %v3690_v50 = vrot.slane %v3047_v21, 1 }
 0x17a   :  { %v12694_v1 = vpop.eup %12693  ;;  %12705 = vrcp.f32 %v1450_v54  ;;  %v11211_v2 = vmul.f32 -1.442695, %v1240_v55  ;;  %v1243_v3 = vpop.f32.mrb[10].mxu0  ;;  %v3684_v28 = vrot.slane %v3044_v52, 4 }
 0x17b   :  { %v12696_v8 = vpop.eup %12695  ;;  %v1453_v9 = vadd.f32 1.0, %v12694_v1  ;;  %12707 = vpow2.f32 %v11208_v48  ;;  %v11210_v10 = vmul.f32 -1.442695, %v1406_v57  ;;  %v1244_v11 = vadd.f32 %v1243_v3, %v15902_v58  ;;  %v1245_v12 = vpop.f32.mrb[11].mxu0  ;;  %v2910_v3 = vld [vmem:[%s22879_s0 + $0x132] sm:$0x1] }
 0x17c   :  { %v1452_v15 = vadd.f32 1.0, %v12696_v8  ;;  %12709 = vpow2.f32 %v11211_v2  ;;  %v1246_v16 = vadd.f32 %v1245_v12, %v15902_v58  ;;  %v3685_v42 = vsel %vm613_vm3, %v3684_v28, %v3683_v40  ;;  %v2909_v2 = vld [vmem:[%s22879_s0 + $0x12a] sm:$0x1] }
 0x17d   :  { %12711 = vrcp.f32 %v1453_v9  ;;  %v1408_v19 = vadd.f32 %v15753_v46, %v1244_v11  ;;  %v3687_v49 = vsel %vm616_vm4, %v3686_v30, %v3685_v42  ;;  %v2913_v11 = vld [vmem:[%s22879_s0 + $0x14a] sm:$0x1]  ;;  %v3442_v12 = vrot.slane %v2906_v51, 6  ;;  %v2918_v42 = vld [vmem:[%s22879_s0 + $0x172] sm:$0x1] }
 0x17e   :  { %v12698_v24 = vpop.eup %12697  ;;  %12713 = vrcp.f32 %v1452_v15  ;;  %v11213_v26 = vmul.f32 -1.442695, %v1246_v16  ;;  %v1249_v27 = vpop.f32.mrb[12].mxu0  ;;  %v3689_v57 = vsel %vm619_vm5, %v3688_v43, %v3687_v49  ;;  %v2914_v16 = vld [vmem:[%s22879_s0 + $0x152] sm:$0x1]  ;;  %v3448_v22 = vrot.slane %v2909_v2, 3 }
 0x17f   :  { %v12700_v46 = vpop.eup %12699  ;;  %v1455_v31 = vadd.f32 1.0, %v12698_v24  ;;  %12715 = vpow2.f32 %v11210_v10  ;;  %v11212_v34 = vmul.f32 -1.442695, %v1408_v19  ;;  %v1250_v35 = vadd.f32 %v1249_v27, %v15924_v25  ;;  %v1251_v6 = vpop.f32.mrb[13].mxu0  ;;  %v2911_v10 = vld [vmem:[%s22879_s0 + $0x13a] sm:$0x1] }
 0x180   :  { %v1454_v37 = vadd.f32 1.0, %v12700_v46  ;;  %12717 = vpow2.f32 %v11213_v26  ;;  %v1252_v38 = vadd.f32 %v1251_v6, %v15924_v25  ;;  %v3691_v1 = vsel %vm622_vm6, %v3690_v50, %v3689_v57  ;;  %v2912_v24 = vld [vmem:[%s22879_s0 + $0x142] sm:$0x1]  ;;  %v2919_v43 = vld [vmem:[%s22879_s0 + $0x17a] sm:$0x1] }
 0x181   :  { %12719 = vrcp.f32 %v1455_v31  ;;  %v1410_v41 = vadd.f32 %v15797_v14, %v1250_v35  ;;  %v3440_v14 = vrot.slane %v2905_v36, 7  ;;  %v12154_v9 = vpack.c.bf16 %v3691_v1, %v15908_v4  ;;  %v2916_v26 = vld [vmem:[%s22879_s0 + $0x162] sm:$0x1]  ;;  %v3051_v1 = vld [vmem:[%s22879_s0 + $0x59a] sm:$0x1] }
 0x182   :  { %v12702_v47 = vpop.eup %12701  ;;  %12721 = vrcp.f32 %v1454_v37  ;;  %v1255_v48 = vpop.f32.mrb[14].mxu0  ;;  %v3450_v28 = vrot.slane %v2910_v3, 2  ;;  %v3452_v31 = vrot.slane %v2911_v10, 1  ;;  %v3456_v35 = vrot.slane %v2914_v16, 6  ;;  %v2917_v37 = vld [vmem:[%s22879_s0 + $0x16a] sm:$0x1] }
 0x183   :  { %v15943_v53 = vpop.eup %12703  ;;  %v1457_v54 = vadd.f32 1.0, %v12702_v47  ;;  %12723 = vpow2.f32 %v11212_v34  ;;  %v1256_v55 = vadd.f32 %v1255_v48, %v15937_v23  ;;  %v1257_v56 = vpop.f32.mrb[15].mxu0  ;;  %v3441_v52 = vsel %vm604_vm0, %v3440_v14, %v2904_v45  ;;  %12156 = vmatprep.subr.msk.bf16.mxu0 %vm13442_vm8, %v12154_v9  ;;  %v3048_v9 = vld [vmem:[%s22879_s0 + $0x582] sm:$0x1] }
 0x184   :  { %v15953_v62 = vpop.eup %12705  ;;  %12725 = vtanh.f32 %v1252_v38  ;;  %v1258_v0 = vadd.f32 %v1257_v56, %v15937_v23  ;;  %v3443_v21 = vsel %vm607_vm1, %v3442_v12, %v3441_v52  ;;  %v3454_v34 = vrot.slane %v2913_v11, 7 }
 0x185   :  { %v12708_v5 = vpop.eup %12707  ;;  %12727 = vrcp.f32 %v1457_v54  ;;  %v1412_v8 = vadd.f32 %v15790_v7, %v1256_v55  ;;  %v3446_v7 = vrot.slane %v2908_v61, 4  ;;  %v3445_v27 = vsel %vm610_vm2, %v3444_v18, %v3443_v21  ;;  %v3049_v54 = vld [vmem:[%s22879_s0 + $0x58a] sm:$0x1]  ;;  %v3050_v55 = vld [vmem:[%s22879_s0 + $0x592] sm:$0x1] }
 0x186   :  { %v12710_v13 = vpop.eup %12709  ;;  %v1456_v15 = vadd.f32 1.0, %v12708_v5  ;;  %12729 = vtanh.f32 %v1410_v41  ;;  %v3458_v40 = vrot.slane %v2915_v20, 5  ;;  %v3455_v47 = vsel %vm604_vm0, %v3454_v34, %v2912_v24  ;;  %v3055_v34 = vld [vmem:[%s22879_s0 + $0x5ba] sm:$0x1] }
 0x187   :  { %v15975_v19 = vpop.eup %12711  ;;  %v1459_v4 = vadd.f32 1.0, %v12710_v13  ;;  %12731 = vtanh.f32 %v1412_v8  ;;  %v3447_v46 = vsel %vm613_vm3, %v3446_v7, %v3445_v27  ;;  %v3460_v48 = vrot.slane %v2916_v26, 4  ;;  %v3052_v13 = vld [vmem:[%s22879_s0 + $0x5a2] sm:$0x1]  ;;  %v3053_v26 = vld [vmem:[%s22879_s0 + $0x5aa] sm:$0x1] }
 0x188   :  { %v12714_v29 = vpop.eup %12713  ;;  %12733 = vrcp.f32 %v1456_v15  ;;  %v3449_v38 = vsel %vm616_vm4, %v3448_v22, %v3447_v46  ;;  %v3457_v14 = vsel %vm607_vm1, %v3456_v35, %v3455_v47  ;;  %v3464_v5 = vrot.slane %v2918_v42, 2  ;;  %v3054_v27 = vld [vmem:[%s22879_s0 + $0x5b2] sm:$0x1]  ;;  %v3057_v35 = vld [vmem:[%s22879_s0 + $0x5ca] sm:$0x1] }
 0x189   :  { %v12716_v30 = vpop.eup %12715  ;;  %12735 = vtanh.f32 %v1258_v0  ;;  %v3451_v45 = vsel %vm619_vm5, %v3450_v28, %v3449_v38  ;;  %v3459_v61 = vsel %vm610_vm2, %v3458_v40, %v3457_v14  ;;  %v3462_v0 = vrot.slane %v2917_v37, 3  ;;  %v3059_v40 = vld [vmem:[%s22879_s0 + $0x5da] sm:$0x1]  ;;  %v3062_v47 = vld [vmem:[%s22879_s0 + $0x5f2] sm:$0x1] }
 0x18a   :  { %v12718_v6 = vpop.eup %12717  ;;  %v1458_v36 = vadd.f32 1.0, %v12716_v30  ;;  %12737 = vrcp.f32 %v1459_v4  ;;  %v3453_v60 = vsel %vm622_vm6, %v3452_v31, %v3451_v45  ;;  %v3461_v52 = vsel %vm613_vm3, %v3460_v48, %v3459_v61  ;;  %v3061_v45 = vld [vmem:[%s22879_s0 + $0x5ea] sm:$0x1] }
 0x18b   :  { %v12720_v41 = vpop.eup %12719  ;;  %v1461_v51 = vadd.f32 1.0, %v12718_v6  ;;  %v3466_v8 = vrot.slane %v2919_v43, 1  ;;  %v3463_v12 = vsel %vm616_vm4, %v3462_v0, %v3461_v52  ;;  %v3692_v15 = vrot.slane %v3049_v54, 7  ;;  %v3058_v6 = vld [vmem:[%s22879_s0 + $0x5d2] sm:$0x1] }
 0x18c   :  { %v12722_v49 = vpop.eup %12721  ;;  %v1491_v50 = vmul.f32 0.0, %v12720_v41  ;;  %12739 = vrcp.f32 %v1458_v36  ;;  %v3694_v16 = vrot.slane %v3050_v55, 6  ;;  %v3465_v4 = vsel %vm619_vm5, %v3464_v5, %v3463_v12  ;;  %v3060_v41 = vld [vmem:[%s22879_s0 + $0x5e2] sm:$0x1]  ;;  %v3063_v55 = vld [vmem:[%s22879_s0 + $0x5fa] sm:$0x1] }
 0x18d   :  { %v12724_v56 = vpop.eup %12723  ;;  %v1490_v57 = vmul.f32 0.0, %v12722_v49  ;;  %12741 = vrcp.f32 %v1461_v51  ;;  %v3696_v20 = vrot.slane %v3051_v1, 5  ;;  %v3693_v28 = vsel %vm604_vm0, %v3692_v15, %v3048_v9  ;;  %v2923_v9 = vld [vmem:[%s22879_s0 + $0x19a] sm:$0x1] }
 0x18e   :  { %v12726_v2 = vpop.eup %12725  ;;  %v1460_v3 = vadd.f32 1.0, %v12724_v56  ;;  %v3695_v36 = vsel %vm607_vm1, %v3694_v16, %v3693_v28  ;;  %v3700_v49 = vrot.slane %v3053_v26, 3  ;;  %v3706_v56 = vrot.slane %v3057_v35, 7  ;;  %v2925_v16 = vld [vmem:[%s22879_s0 + $0x1aa] sm:$0x1] }
 0x18f   :  { %v12728_v10 = vpop.eup %12727  ;;  %v1495_v11 = vmul.f32 %v12726_v2, %v15943_v53  ;;  %v3467_v53 = vsel %vm622_vm6, %v3466_v8, %v3465_v4  ;;  %v3697_v42 = vsel %vm610_vm2, %v3696_v20, %v3695_v36  ;;  %v3708_v0 = vrot.slane %v3058_v6, 6  ;;  %v2929_v20 = vld [vmem:[%s22879_s0 + $0x1ca] sm:$0x1]  ;;  %v2928_v35 = vld [vmem:[%s22879_s0 + $0x1c2] sm:$0x1] }
 0x190   :  { %v12730_v18 = vpop.eup %12729  ;;  %v1493_v7 = vmul.f32 0.0, %v12728_v10  ;;  %v12157_v31 = vpack.c.bf16 %v3467_v53, %v3453_v60  ;;  %12743 = vrcp.f32 %v1460_v3  ;;  %v3710_v1 = vrot.slane %v3059_v40, 5  ;;  %v2922_v3 = vld [vmem:[%s22879_s0 + $0x192] sm:$0x1]  ;;  %v2924_v10 = vld [vmem:[%s22879_s0 + $0x1a2] sm:$0x1] }
 0x191   :  { %v12732_v21 = vpop.eup %12731  ;;  %v16025_v22 = vadd.f32 %v1495_v11, %v1491_v50  ;;  %v1494_v24 = vmul.f32 %v12730_v18, %v15953_v62  ;;  %v3056_v62 = vld [vmem:[%s22879_s0 + $0x5c2] sm:$0x1]  ;;  %v3702_v50 = vrot.slane %v3054_v27, 2  ;;  %v3712_v2 = vrot.slane %v3060_v41, 4  ;;  %v2926_v18 = vld [vmem:[%s22879_s0 + $0x1b2] sm:$0x1] }
 0x192   :  { %v12734_v30 = vpop.eup %12733  ;;  %v1496_v46 = vmul.f32 %v12732_v21, %v12714_v29  ;;  %v3698_v29 = vrot.slane %v3052_v13, 4  ;;  %12159 = vmatpush3.bf16.xpose.msk.msra.mxu0 %vm13442_vm8, %v12157_v31  ;;  %v3704_v5 = vrot.slane %v3055_v34, 1  ;;  %v3707_v8 = vsel %vm604_vm0, %v3706_v56, %v3056_v62  ;;  %v2930_v21 = vld [vmem:[%s22879_s0 + $0x1d2] sm:$0x1]  ;;  %v2931_v27 = vld [vmem:[%s22879_s0 + $0x1da] sm:$0x1] }
 0x193   :  { %v1492_v37 = vmul.f32 0.0, %v12734_v30  ;;  %v16049_v38 = vadd.f32 %v1494_v24, %v1490_v57  ;;  %v12736_v43 = vpop.eup %12735  ;;  %12745 = vtanh.f32 %v16025_v22  ;;  %v2921_v57 = vld [vmem:[%s22879_s0 + $0x18a] sm:$0x1]  ;;  %v3709_v12 = vsel %vm607_vm1, %v3708_v0, %v3707_v8  ;;  %v2927_v62 = vld [vmem:[%s22879_s0 + $0x1ba] sm:$0x1] }
 0x194   :  { %v3699_v48 = vsel %vm613_vm3, %v3698_v29, %v3697_v42  ;;  %v16068_v51 = vpop.eup %12737  ;;  %v1497_v54 = vmul.f32 %v12736_v43, %v15975_v19  ;;  %v2920_v19 = vld [vmem:[%s22879_s0 + $0x182] sm:$0x1]  ;;  %v3714_v13 = vrot.slane %v3061_v45, 3  ;;  %v3716_v15 = vrot.slane %v3062_v47, 2  ;;  %v2933_v40 = vld [vmem:[%s22879_s0 + $0x1ea] sm:$0x1] }
 0x195   :  { %12747 = vtanh.f32 %v16049_v38  ;;  %v16071_v14 = vadd.f32 %v1496_v46, %v1492_v37  ;;  %v3701_v61 = vsel %vm616_vm4, %v3700_v49, %v3699_v48  ;;  %v3718_v4 = vrot.slane %v3063_v55, 1  ;;  %v2932_v37 = vld [vmem:[%s22879_s0 + $0x1e2] sm:$0x1]  ;;  %v2934_v48 = vld [vmem:[%s22879_s0 + $0x1f2] sm:$0x1] }
 0x196   :  { %v16080_v60 = vpop.eup %12739  ;;  %v16090_v52 = vadd.f32 %v1497_v54, %v1493_v7  ;;  %v3703_v11 = vsel %vm619_vm5, %v3702_v50, %v3701_v61  ;;  %v3711_v7 = vsel %vm610_vm2, %v3710_v1, %v3709_v12  ;;  %v3468_v24 = vrot.slane %v2921_v57, 7  ;;  %v2935_v57 = vld [vmem:[%s22879_s0 + $0x1fa] sm:$0x1] }
 0x197   :  { %12749 = vtanh.f32 %v16071_v14  ;;  %v12742_v53 = vpop.eup %12741  ;;  %v3713_v26 = vsel %vm613_vm3, %v3712_v2, %v3711_v7  ;;  %v3470_v28 = vrot.slane %v2922_v3, 6  ;;  %v3472_v30 = vrot.slane %v2923_v9, 5 }
 0x198   :  { %12751 = vtanh.f32 %v16090_v52  ;;  %v3474_v46 = vrot.slane %v2924_v10, 4  ;;  %v3705_v31 = vsel %vm622_vm6, %v3704_v5, %v3703_v11  ;;  %v3715_v34 = vsel %vm616_vm4, %v3714_v13, %v3713_v26 }
 0x199   :  { %v3469_v6 = vsel %vm604_vm0, %v3468_v24, %v2920_v19  ;;  %v3476_v36 = vrot.slane %v2925_v16, 3  ;;  %v3717_v29 = vsel %vm619_vm5, %v3716_v15, %v3715_v34  ;;  %v3478_v42 = vrot.slane %v2926_v18, 2  ;;  %v13214_v34 = vld [vmem:[%s22882_s2 + $0x20] sm:$0xff] }
 0x19a   :  { %v3471_v41 = vsel %vm607_vm1, %v3470_v28, %v3469_v6  ;;  %v3482_v43 = vrot.slane %v2929_v20, 7  ;;  %v12744_v45 = vpop.eup %12743  ;;  %v3719_v47 = vsel %vm622_vm6, %v3718_v4, %v3717_v29  ;;  %v3484_v50 = vrot.slane %v2930_v21, 6  ;;  %v13217_v6 = vld [vmem:[%s22882_s2 + $0x38] sm:$0xff]  ;;  %v3065_v29 = vld [vmem:[%s22879_s0 + $0x60a] sm:$0x1] }
 0x19b   :  { %v3473_v49 = vsel %vm610_vm2, %v3472_v30, %v3471_v41  ;;  %v3486_v54 = vrot.slane %v2931_v27, 5  ;;  %v12160_v56 = vpack.c.bf16 %v3719_v47, %v3705_v31  ;;  %v3480_v0 = vrot.slane %v2927_v62, 1  ;;  %v13213_v31 = vld [vmem:[%s22882_s2 + $0x18] sm:$0xff]  ;;  %v13215_v62 = vld [vmem:[%s22882_s2 + $0x28] sm:$0xff]  ;;  %v3074_v41 = vld [vmem:[%s22879_s0 + $0x652] sm:$0x1] }
 0x19c   :  { %v3475_v61 = vsel %vm613_vm3, %v3474_v46, %v3473_v49  ;;  %v3483_v1 = vsel %vm604_vm0, %v3482_v43, %v2928_v35  ;;  %v3488_v5 = vrot.slane %v2932_v37, 4  ;;  %v3490_v8 = vrot.slane %v2933_v40, 3  ;;  %v13216_v35 = vld [vmem:[%s22882_s2 + $0x30] sm:$0xff]  ;;  %v3073_v37 = vld [vmem:[%s22879_s0 + $0x64a] sm:$0x1] }
 0x19d   :  { %v12746_v55 = vpop.eup %12745  ;;  %v3477_v19 = vsel %vm616_vm4, %v3476_v36, %v3475_v61  ;;  %v3485_v3 = vsel %vm607_vm1, %v3484_v50, %v3483_v1  ;;  %12162 = vmatprep.subr.msk.bf16.mxu0 %vm13442_vm8, %v12160_v56  ;;  %v3492_v11 = vrot.slane %v2934_v48, 2  ;;  %v3494_v15 = vrot.slane %v2935_v57, 1  ;;  %v16203_v36 = vld [vmem:[%s22880_s1] sm:$0xff]  ;;  %v3066_v40 = vld [vmem:[%s22879_s0 + $0x612] sm:$0x1] }
 0x19e   :  { %v3479_v9 = vsel %vm619_vm5, %v3478_v42, %v3477_v19  ;;  %v3487_v10 = vsel %vm610_vm2, %v3486_v54, %v3485_v3  ;;  %v1507_v24 = vmul.f32 %v12746_v55, %v16068_v51  ;;  %v13211_v51 = vld [vmem:[%s22882_s2 + $0x8] sm:$0xff]  ;;  %v3720_v42 = vrot.slane %v3065_v29, 7  ;;  %v3067_v47 = vld [vmem:[%s22879_s0 + $0x61a] sm:$0x1]  ;;  %v3072_v48 = vld [vmem:[%s22879_s0 + $0x642] sm:$0x1] }
 0x19f   :  { %v12748_v2 = vpop.eup %12747  ;;  %v3489_v13 = vsel %vm613_vm3, %v3488_v5, %v3487_v10  ;;  %v3481_v7 = vsel %vm622_vm6, %v3480_v0, %v3479_v9  ;;  %v3734_v43 = vrot.slane %v3073_v37, 7  ;;  %v3068_v49 = vld [vmem:[%s22879_s0 + $0x622] sm:$0x1]  ;;  %v3075_v50 = vld [vmem:[%s22879_s0 + $0x65a] sm:$0x1]  ;;  %v3722_v61 = vrot.slane %v3066_v40, 6 }
 0x1a0   :  { %v1506_v16 = vmul.f32 %v12748_v2, %v16080_v60  ;;  %v3491_v4 = vsel %vm616_vm4, %v3490_v8, %v3489_v13  ;;  %v13210_v60 = vld [vmem:[%s22882_s2] sm:$0xff]  ;;  %v3069_v56 = vld [vmem:[%s22879_s0 + $0x62a] sm:$0x1]  ;;  %v3724_v0 = vrot.slane %v3067_v47, 5  ;;  %v3070_v1 = vld [vmem:[%s22879_s0 + $0x632] sm:$0x1] }
 0x1a1   :  { %v12750_v12 = vpop.eup %12749  ;;  %v3493_v21 = vsel %vm619_vm5, %v3492_v11, %v3491_v4  ;;  %v3076_v54 = vld [vmem:[%s22879_s0 + $0x662] sm:$0x1]  ;;  %v3077_v57 = vld [vmem:[%s22879_s0 + $0x66a] sm:$0x1]  ;;  %v3078_v2 = vld [vmem:[%s22879_s0 + $0x672] sm:$0x1]  ;;  %v3735_v5 = vsel %vm604_vm0, %v3734_v43, %v3072_v48 }
 0x1a2   :  { %v1508_v18 = vmul.f32 %v12750_v12, %v12744_v45  ;;  %v12752_v20 = vpop.eup %12751  ;;  %v3495_v28 = vsel %vm622_vm6, %v3494_v15, %v3493_v21  ;;  %v3064_v45 = vld [vmem:[%s22879_s0 + $0x602] sm:$0x1]  ;;  %v3726_v19 = vrot.slane %v3068_v49, 4  ;;  %v3728_v3 = vrot.slane %v3069_v56, 3  ;;  %v3071_v8 = vld [vmem:[%s22879_s0 + $0x63a] sm:$0x1] }
 0x1a3   :  { %v1509_v26 = vmul.f32 %v12752_v20, %v12742_v53  ;;  %v12163_v30 = vpack.c.bf16 %v3495_v28, %v3481_v7  ;;  %v13212_v53 = vld [vmem:[%s22882_s2 + $0x10] sm:$0xff]  ;;  %v3721_v55 = vsel %vm604_vm0, %v3720_v42, %v3064_v45  ;;  %v3079_v9 = vld [vmem:[%s22879_s0 + $0x67a] sm:$0x1]  ;;  %v3730_v11 = vrot.slane %v3070_v1, 2  ;;  %v2945_v42 = vld [vmem:[%s22879_s0 + $0x24a] sm:$0x1] }
 0x1a4   :  { %v12140_v27 = vpack.c.bf16 %v1508_v18, %v1506_v16  ;;  %v3723_v10 = vsel %vm607_vm1, %v3722_v61, %v3721_v55  ;;  %v3736_v12 = vrot.slane %v3074_v41, 6  ;;  %v3732_v15 = vrot.slane %v3071_v8, 1  ;;  %v2942_v29 = vld [vmem:[%s22879_s0 + $0x232] sm:$0x1]  ;;  %v2943_v40 = vld [vmem:[%s22879_s0 + $0x23a] sm:$0x1] }
 0x1a5   :  { %v12138_v46 = vpack.c.bf16 %v1509_v26, %v1507_v24  ;;  %12165 = vmatpush3.bf16.xpose.msk.msra.mxu0 %vm13442_vm8, %v12163_v30  ;;  %v3725_v13 = vsel %vm610_vm2, %v3724_v0, %v3723_v10  ;;  %v3738_v16 = vrot.slane %v3075_v50, 5  ;;  %v3740_v18 = vrot.slane %v3076_v54, 4  ;;  %v2937_v24 = vld [vmem:[%s22879_s0 + $0x20a] sm:$0x1]  ;;  %v2936_v30 = vld [vmem:[%s22879_s0 + $0x202] sm:$0x1] }
 0x1a6   :  { %v3727_v7 = vsel %vm613_vm3, %v3726_v19, %v3725_v13  ;;  %v3737_v4 = vsel %vm607_vm1, %v3736_v12, %v3735_v5  ;;  %v3742_v20 = vrot.slane %v3077_v57, 3  ;;  %v3744_v21 = vrot.slane %v3078_v2, 2  ;;  %v2944_v41 = vld [vmem:[%s22879_s0 + $0x242] sm:$0x1]  ;;  %v2946_v43 = vld [vmem:[%s22879_s0 + $0x252] sm:$0x1] }
 0x1a7   :  { %12139 = vmatprep.subr.bf16.mxu1 %v12138_v46  ;;  %v3729_v26 = vsel %vm616_vm4, %v3728_v3, %v3727_v7  ;;  %v3746_v28 = vrot.slane %v3079_v9, 1  ;;  %v3496_v46 = vrot.slane %v2937_v24, 7  ;;  %v2947_v48 = vld [vmem:[%s22879_s0 + $0x25a] sm:$0x1]  ;;  %v2948_v49 = vld [vmem:[%s22879_s0 + $0x262] sm:$0x1] }
 0x1a8   :  { %12141 = vmatpush1.bf16.msra.mxu1 %v12140_v27  ;;  %v3739_v27 = vsel %vm610_vm2, %v3738_v16, %v3737_v4  ;;  %v2949_v56 = vld [vmem:[%s22879_s0 + $0x26a] sm:$0x1]  ;;  %v2950_v57 = vld [vmem:[%s22879_s0 + $0x272] sm:$0x1]  ;;  %v2951_v1 = vld [vmem:[%s22879_s0 + $0x27a] sm:$0x1] }
 0x1a9   :  { %v3497_v45 = vsel %vm604_vm0, %v3496_v46, %v2936_v30  ;;  %v3506_v19 = vrot.slane %v2942_v29, 2  ;;  %v3510_v3 = vrot.slane %v2945_v42, 7  ;;  %v3512_v5 = vrot.slane %v2946_v43, 6  ;;  %v3082_v24 = vld [vmem:[%s22879_s0 + $0x692] sm:$0x1] }
 0x1aa   :  { %v3514_v9 = vrot.slane %v2947_v48, 5  ;;  %v3516_v10 = vrot.slane %v2948_v49, 4  ;;  %v3508_v12 = vrot.slane %v2943_v40, 1  ;;  %v3520_v7 = vrot.slane %v2950_v57, 2  ;;  %v3084_v30 = vld [vmem:[%s22879_s0 + $0x6a2] sm:$0x1] }
 0x1ab   :  { %11254 = vmatmul.mubr.msk.f32.vlgmr.msra.gmra.mrb[8].mxu1 %vm1260_vm9, %v13210_v60  ;;  %v3731_v60 = vsel %vm619_vm5, %v3730_v11, %v3729_v26  ;;  %v3511_v13 = vsel %vm604_vm0, %v3510_v3, %v2944_v41  ;;  %v3522_v4 = vrot.slane %v2951_v1, 1  ;;  %v3085_v46 = vld [vmem:[%s22879_s0 + $0x6aa] sm:$0x1]  ;;  %v3092_v41 = vld [vmem:[%s22879_s0 + $0x6e2] sm:$0x1]  ;;  %v3754_v43 = vrot.slane %v3084_v30, 4 }
 0x1ac   :  { %2717 = vmatprep.mubr.f32.mxu1 %v22886_v33  ;;  %v3088_v48 = vld [vmem:[%s22879_s0 + $0x6c2] sm:$0x1]  ;;  %v3093_v49 = vld [vmem:[%s22879_s0 + $0x6ea] sm:$0x1]  ;;  %v3094_v57 = vld [vmem:[%s22879_s0 + $0x6f2] sm:$0x1] }
 0x1ad   :  { %v2961_v30 = vld [vmem:[%s22879_s0 + $0x2ca] sm:$0x1] }
 0x1af   :  { %11255 = vmatmul.mubr.msk.f32.gmra.mrb[10].mxu1 %vm1260_vm9, %v13211_v51  ;;  %v3741_v51 = vsel %vm613_vm3, %v3740_v18, %v3739_v27  ;;  %v3513_v18 = vsel %vm607_vm1, %v3512_v5, %v3511_v13  ;;  %v3768_v5 = vrot.slane %v3092_v41, 4  ;;  %v2952_v13 = vld [vmem:[%s22879_s0 + $0x282] sm:$0x1] }
 0x1b0   :  { %2723 = vmatprep.mubr.f32.mxu1 %v22886_v33  ;;  %v3515_v27 = vsel %vm610_vm2, %v3514_v9, %v3513_v18  ;;  %v2954_v9 = vld [vmem:[%s22879_s0 + $0x292] sm:$0x1] }
 0x1b3   :  { %11256 = vmatmul.mubr.msk.f32.gmra.mrb[12].mxu1 %vm1260_vm9, %v13212_v53  ;;  %v2938_v53 = vld [vmem:[%s22879_s0 + $0x212] sm:$0x1] }
 0x1b4   :  { %2729 = vmatprep.mubr.f32.mxu1 %v22886_v33  ;;  %v3498_v50 = vrot.slane %v2938_v53, 6  ;;  %v3087_v53 = vld [vmem:[%s22879_s0 + $0x6ba] sm:$0x1] }
 0x1b6   :  { %v3499_v2 = vsel %vm607_vm1, %v3498_v50, %v3497_v45  ;;  %v3756_v45 = vrot.slane %v3085_v46, 3  ;;  %v2962_v46 = vld [vmem:[%s22879_s0 + $0x2d2] sm:$0x1] }
 0x1b7   :  { %11257 = vmatmul.mubr.msk.f32.gmra.mrb[14].mxu1 %vm1260_vm9, %v13213_v31  ;;  %v2939_v31 = vld [vmem:[%s22879_s0 + $0x21a] sm:$0x1] }
 0x1b8   :  { %2735 = vmatprep.mubr.f32.mxu1 %v22886_v33  ;;  %v3500_v54 = vrot.slane %v2939_v31, 5  ;;  %v3089_v31 = vld [vmem:[%s22879_s0 + $0x6ca] sm:$0x1] }
 0x1b9   :  { %v3762_v1 = vrot.slane %v3089_v31, 7  ;;  %v2963_v31 = vld [vmem:[%s22879_s0 + $0x2da] sm:$0x1] }
 0x1ba   :  { %v3501_v8 = vsel %vm610_vm2, %v3500_v54, %v3499_v2 }
 0x1bb   :  { %11258 = vmatmul.mubr.msk.f32.gmra.mrb[16].mxu1 %vm1260_vm9, %v13214_v34  ;;  %v3733_v34 = vsel %vm622_vm6, %v3732_v15, %v3731_v60  ;;  %v3518_v15 = vrot.slane %v2949_v56, 3  ;;  %v3517_v60 = vsel %vm613_vm3, %v3516_v10, %v3515_v27 }
 0x1bc   :  { %2741 = vmatprep.mubr.f32.mxu1 %v22886_v33 }
 0x1bf   :  { %11259 = vmatmul.mubr.msk.f32.gmra.mrb[18].mxu1 %vm1260_vm9, %v13215_v62  ;;  %v3743_v62 = vsel %vm616_vm4, %v3742_v20, %v3741_v51  ;;  %v3080_v20 = vld [vmem:[%s22879_s0 + $0x682] sm:$0x1]  ;;  %v3086_v51 = vld [vmem:[%s22879_s0 + $0x6b2] sm:$0x1] }
 0x1c0   :  { %2747 = vmatprep.mubr.f32.mxu1 %v22886_v33  ;;  %v3745_v37 = vsel %vm619_vm5, %v3744_v21, %v3743_v62  ;;  %v3081_v21 = vld [vmem:[%s22879_s0 + $0x68a] sm:$0x1]  ;;  %v3519_v62 = vsel %vm616_vm4, %v3518_v15, %v3517_v60  ;;  %v3758_v54 = vrot.slane %v3086_v51, 2  ;;  %v2955_v15 = vld [vmem:[%s22879_s0 + $0x29a] sm:$0x1] }
 0x1c1   :  { %v3747_v47 = vsel %vm622_vm6, %v3746_v28, %v3745_v37  ;;  %v3083_v28 = vld [vmem:[%s22879_s0 + $0x69a] sm:$0x1]  ;;  %v3748_v29 = vrot.slane %v3081_v21, 7  ;;  %v3750_v37 = vrot.slane %v3082_v24, 6  ;;  %v3521_v40 = vsel %vm619_vm5, %v3520_v7, %v3519_v62  ;;  %v2957_v21 = vld [vmem:[%s22879_s0 + $0x2aa] sm:$0x1] }
 0x1c2   :  { %v12166_v55 = vpack.c.bf16 %v3747_v47, %v3733_v34  ;;  %v3752_v42 = vrot.slane %v3083_v28, 5  ;;  %v3523_v47 = vsel %vm622_vm6, %v3522_v4, %v3521_v40  ;;  %v3772_v4 = vrot.slane %v3094_v57, 2  ;;  %v2958_v24 = vld [vmem:[%s22879_s0 + $0x2b2] sm:$0x1]  ;;  %v2959_v28 = vld [vmem:[%s22879_s0 + $0x2ba] sm:$0x1] }
 0x1c3   :  { %11260 = vmatmul.mubr.msk.f32.gmra.mrb[20].mxu1 %vm1260_vm9, %v13216_v35  ;;  %v2940_v35 = vld [vmem:[%s22879_s0 + $0x222] sm:$0x1]  ;;  %v3749_v50 = vsel %vm604_vm0, %v3748_v29, %v3080_v20  ;;  %v2965_v29 = vld [vmem:[%s22879_s0 + $0x2ea] sm:$0x1]  ;;  %v3532_v41 = vrot.slane %v2957_v21, 3 }
 0x1c4   :  { %2753 = vmatprep.mubr.f32.mxu1 %v22886_v33  ;;  %v3502_v61 = vrot.slane %v2940_v35, 4  ;;  %12168 = vmatprep.subr.msk.bf16.mxu0 %vm13442_vm8, %v12166_v55  ;;  %v3090_v35 = vld [vmem:[%s22879_s0 + $0x6d2] sm:$0x1]  ;;  %v3760_v55 = vrot.slane %v3087_v53, 1  ;;  %v2960_v53 = vld [vmem:[%s22879_s0 + $0x2c2] sm:$0x1] }
 0x1c5   :  { %v3764_v2 = vrot.slane %v3090_v35, 6  ;;  %v3526_v35 = vrot.slane %v2954_v9, 6  ;;  %v3096_v57 = vld [vmem:[%s22879_s0 + $0x702] sm:$0x1] }
 0x1c6   :  { %v3503_v11 = vsel %vm613_vm3, %v3502_v61, %v3501_v8  ;;  %v3095_v61 = vld [vmem:[%s22879_s0 + $0x6fa] sm:$0x1]  ;;  %v2953_v8 = vld [vmem:[%s22879_s0 + $0x28a] sm:$0x1] }
 0x1c7   :  { %11261 = vmatmul.mubr.msk.f32.gmra.mrb[22].mxu1 %vm1260_vm9, %v13217_v6  ;;  %v2941_v6 = vld [vmem:[%s22879_s0 + $0x22a] sm:$0x1]  ;;  %v3774_v20 = vrot.slane %v3095_v61, 1  ;;  %v3524_v62 = vrot.slane %v2953_v8, 7 }
 0x1c8   :  { %11820 = vmatprep.mubr.msk.f32.mxu1 %vm1058_vm7, %v16203_v36  ;;  %v3504_v0 = vrot.slane %v2941_v6, 3  ;;  %v3091_v6 = vld [vmem:[%s22879_s0 + $0x6da] sm:$0x1]  ;;  %v3097_v61 = vld [vmem:[%s22879_s0 + $0x70a] sm:$0x1] }
 0x1c9   :  { %v3766_v3 = vrot.slane %v3091_v6, 5 }
 0x1ca   :  { %v3505_v16 = vsel %vm616_vm4, %v3504_v0, %v3503_v11  ;;  %v3751_v0 = vsel %vm607_vm1, %v3750_v37, %v3749_v50  ;;  %v3763_v11 = vsel %vm604_vm0, %v3762_v1, %v3088_v48  ;;  %v3528_v37 = vrot.slane %v2955_v15, 5 }
 0x1cb   :  { %v3507_v26 = vsel %vm619_vm5, %v3506_v19, %v3505_v16  ;;  %v3753_v19 = vsel %vm610_vm2, %v3752_v42, %v3751_v0  ;;  %v2956_v16 = vld [vmem:[%s22879_s0 + $0x2a2] sm:$0x1]  ;;  %v3765_v7 = vsel %vm607_vm1, %v3764_v2, %v3763_v11  ;;  %v3534_v48 = vrot.slane %v2958_v24, 2 }
 0x1cc   :  { %v3509_v34 = vsel %vm622_vm6, %v3508_v12, %v3507_v26  ;;  %v3755_v10 = vsel %vm613_vm3, %v3754_v43, %v3753_v19  ;;  %v3770_v12 = vrot.slane %v3093_v49, 3  ;;  %v3767_v27 = vsel %vm610_vm2, %v3766_v3, %v3765_v7  ;;  %v2966_v43 = vld [vmem:[%s22879_s0 + $0x2f2] sm:$0x1]  ;;  %v3100_v11 = vld [vmem:[%s22879_s0 + $0x722] sm:$0x1] }
 0x1cd   :  { %v12169_v56 = vpack.c.bf16 %v3523_v47, %v3509_v34  ;;  %v3757_v18 = vsel %vm616_vm4, %v3756_v45, %v3755_v10  ;;  %v3769_v51 = vsel %vm613_vm3, %v3768_v5, %v3767_v27  ;;  %v2964_v34 = vld [vmem:[%s22879_s0 + $0x2e2] sm:$0x1]  ;;  %v3530_v40 = vrot.slane %v2956_v16, 4  ;;  %v2967_v45 = vld [vmem:[%s22879_s0 + $0x2fa] sm:$0x1] }
 0x1ce   :  { %v3759_v26 = vsel %vm619_vm5, %v3758_v54, %v3757_v18  ;;  %v3771_v6 = vsel %vm616_vm4, %v3770_v12, %v3769_v51  ;;  %v3525_v47 = vsel %vm604_vm0, %v3524_v62, %v2952_v13  ;;  %v3536_v49 = vrot.slane %v2959_v28, 1  ;;  %v3098_v3 = vld [vmem:[%s22879_s0 + $0x712] sm:$0x1]  ;;  %v3099_v5 = vld [vmem:[%s22879_s0 + $0x71a] sm:$0x1] }
 0x1cf   :  { %12171 = vmatpush3.bf16.xpose.msk.msra.mxu0 %vm13442_vm8, %v12169_v56  ;;  %v3761_v60 = vsel %vm622_vm6, %v3760_v55, %v3759_v26  ;;  %v3773_v42 = vsel %vm619_vm5, %v3772_v4, %v3771_v6  ;;  %v3527_v54 = vsel %vm607_vm1, %v3526_v35, %v3525_v47  ;;  %v3538_v55 = vrot.slane %v2961_v30, 7  ;;  %v3101_v12 = vld [vmem:[%s22879_s0 + $0x72a] sm:$0x1]  ;;  %v3102_v18 = vld [vmem:[%s22879_s0 + $0x732] sm:$0x1] }
 0x1d0   :  { %v3775_v50 = vsel %vm622_vm6, %v3774_v20, %v3773_v42  ;;  %v3540_v56 = vrot.slane %v2962_v46, 6  ;;  %v3529_v1 = vsel %vm610_vm2, %v3528_v37, %v3527_v54  ;;  %v3542_v2 = vrot.slane %v2963_v31, 5  ;;  %v3103_v7 = vld [vmem:[%s22879_s0 + $0x73a] sm:$0x1]  ;;  %v3105_v26 = vld [vmem:[%s22879_s0 + $0x74a] sm:$0x1] }
 0x1d1   :  { %v12172_v0 = vpack.c.bf16 %v3775_v50, %v3761_v60  ;;  %v3544_v19 = vrot.slane %v2964_v34, 4  ;;  %v3531_v8 = vsel %vm613_vm3, %v3530_v40, %v3529_v1  ;;  %v3539_v9 = vsel %vm604_vm0, %v3538_v55, %v2960_v53  ;;  %v3106_v27 = vld [vmem:[%s22879_s0 + $0x752] sm:$0x1]  ;;  %v3104_v46 = vld [vmem:[%s22879_s0 + $0x742] sm:$0x1] }
 0x1d2   :  { %v3546_v10 = vrot.slane %v2965_v29, 3  ;;  %v3533_v13 = vsel %vm616_vm4, %v3532_v41, %v3531_v8  ;;  %v3541_v15 = vsel %vm607_vm1, %v3540_v56, %v3539_v9  ;;  %v3548_v16 = vrot.slane %v2966_v43, 2  ;;  %v3107_v60 = vld [vmem:[%s22879_s0 + $0x75a] sm:$0x1]  ;;  %v3108_v51 = vld [vmem:[%s22879_s0 + $0x762] sm:$0x1] }
 0x1d3   :  { %12174 = vmatprep.subr.msk.bf16.mxu0 %vm13442_vm8, %v12172_v0  ;;  %v3776_v4 = vrot.slane %v3097_v61, 7  ;;  %v3535_v20 = vsel %vm619_vm5, %v3534_v48, %v3533_v13  ;;  %v3543_v21 = vsel %vm610_vm2, %v3542_v2, %v3541_v15  ;;  %v3550_v24 = vrot.slane %v2967_v45, 1  ;;  %v3109_v62 = vld [vmem:[%s22879_s0 + $0x76a] sm:$0x1]  ;;  %v3110_v40 = vld [vmem:[%s22879_s0 + $0x772] sm:$0x1] }
 0x1d4   :  { %v3537_v28 = vsel %vm622_vm6, %v3536_v49, %v3535_v20  ;;  %v3545_v30 = vsel %vm613_vm3, %v3544_v19, %v3543_v21  ;;  %v3778_v31 = vrot.slane %v3098_v3, 6  ;;  %v3780_v35 = vrot.slane %v3099_v5, 5  ;;  %v3111_v41 = vld [vmem:[%s22879_s0 + $0x77a] sm:$0x1]  ;;  %v2968_v54 = vld [vmem:[%s22879_s0 + $0x302] sm:$0x1] }
 0x1d5   :  { %v3777_v53 = vsel %vm604_vm0, %v3776_v4, %v3096_v57  ;;  %v3547_v34 = vsel %vm616_vm4, %v3546_v10, %v3545_v30  ;;  %v3782_v6 = vrot.slane %v3100_v11, 4  ;;  %v3784_v29 = vrot.slane %v3101_v12, 3  ;;  %v2969_v55 = vld [vmem:[%s22879_s0 + $0x30a] sm:$0x1]  ;;  %v2970_v1 = vld [vmem:[%s22879_s0 + $0x312] sm:$0x1] }
 0x1d6   :  { %v3549_v37 = vsel %vm619_vm5, %v3548_v16, %v3547_v34  ;;  %v3779_v42 = vsel %vm607_vm1, %v3778_v31, %v3777_v53  ;;  %v3786_v43 = vrot.slane %v3102_v18, 2  ;;  %v3788_v45 = vrot.slane %v3103_v7, 1  ;;  %v2971_v2 = vld [vmem:[%s22879_s0 + $0x31a] sm:$0x1]  ;;  %v2972_v8 = vld [vmem:[%s22879_s0 + $0x322] sm:$0x1] }
 0x1d7   :  { %v3551_v47 = vsel %vm622_vm6, %v3550_v24, %v3549_v37  ;;  %v3781_v48 = vsel %vm610_vm2, %v3780_v35, %v3779_v42  ;;  %v3790_v49 = vrot.slane %v3105_v26, 7  ;;  %v3792_v50 = vrot.slane %v3106_v27, 6  ;;  %v2973_v9 = vld [vmem:[%s22879_s0 + $0x32a] sm:$0x1]  ;;  %v2974_v13 = vld [vmem:[%s22879_s0 + $0x332] sm:$0x1] }
 0x1d8   :  { %v12175_v56 = vpack.c.bf16 %v3551_v47, %v3537_v28  ;;  %v3783_v57 = vsel %vm613_vm3, %v3782_v6, %v3781_v48  ;;  %v3794_v61 = vrot.slane %v3107_v60, 5  ;;  %v3796_v0 = vrot.slane %v3108_v51, 4  ;;  %v2975_v15 = vld [vmem:[%s22879_s0 + $0x33a] sm:$0x1]  ;;  %v2976_v20 = vld [vmem:[%s22879_s0 + $0x342] sm:$0x1] }
 0x1d9   :  { %v3785_v19 = vsel %vm616_vm4, %v3784_v29, %v3783_v57  ;;  %v3791_v3 = vsel %vm604_vm0, %v3790_v49, %v3104_v46  ;;  %v3798_v5 = vrot.slane %v3109_v62, 3  ;;  %v3800_v12 = vrot.slane %v3110_v40, 2  ;;  %v2977_v21 = vld [vmem:[%s22879_s0 + $0x34a] sm:$0x1]  ;;  %v2978_v24 = vld [vmem:[%s22879_s0 + $0x352] sm:$0x1] }
 0x1da   :  { %12177 = vmatpush3.bf16.xpose.msk.msra.mxu0 %vm13442_vm8, %v12175_v56  ;;  %v3787_v10 = vsel %vm619_vm5, %v3786_v43, %v3785_v19  ;;  %v3793_v11 = vsel %vm607_vm1, %v3792_v50, %v3791_v3  ;;  %v3552_v16 = vrot.slane %v2969_v55, 7  ;;  %v3802_v4 = vrot.slane %v3111_v41, 1  ;;  %v2979_v27 = vld [vmem:[%s22879_s0 + $0x35a] sm:$0x1]  ;;  %v2980_v28 = vld [vmem:[%s22879_s0 + $0x362] sm:$0x1] }
 0x1db   :  { %v3789_v18 = vsel %vm622_vm6, %v3788_v45, %v3787_v10  ;;  %v3795_v7 = vsel %vm610_vm2, %v3794_v61, %v3793_v11  ;;  %v3554_v46 = vrot.slane %v2970_v1, 6  ;;  %v3556_v60 = vrot.slane %v2971_v2, 5  ;;  %v2981_v53 = vld [vmem:[%s22879_s0 + $0x36a] sm:$0x1]  ;;  %v2982_v6 = vld [vmem:[%s22879_s0 + $0x372] sm:$0x1] }
 0x1dc   :  { %v3797_v26 = vsel %vm613_vm3, %v3796_v0, %v3795_v7  ;;  %v3553_v30 = vsel %vm604_vm0, %v3552_v16, %v2968_v54  ;;  %v3558_v31 = vrot.slane %v2972_v8, 4  ;;  %v3560_v34 = vrot.slane %v2973_v9, 3  ;;  %v2983_v29 = vld [vmem:[%s22879_s0 + $0x37a] sm:$0x1]  ;;  %v3112_v48 = vld [vmem:[%s22879_s0 + $0x782] sm:$0x1] }
 0x1dd   :  { %v3799_v51 = vsel %vm616_vm4, %v3798_v5, %v3797_v26  ;;  %v3562_v62 = vrot.slane %v2974_v13, 2  ;;  %v3555_v37 = vsel %vm607_vm1, %v3554_v46, %v3553_v30  ;;  %v3564_v40 = vrot.slane %v2975_v15, 1  ;;  %v3113_v49 = vld [vmem:[%s22879_s0 + $0x78a] sm:$0x1]  ;;  %v3114_v57 = vld [vmem:[%s22879_s0 + $0x792] sm:$0x1] }
 0x1de   :  { %v3801_v35 = vsel %vm619_vm5, %v3800_v12, %v3799_v51  ;;  %v3566_v41 = vrot.slane %v2977_v21, 7  ;;  %v3557_v43 = vsel %vm610_vm2, %v3556_v60, %v3555_v37  ;;  %v3568_v45 = vrot.slane %v2978_v24, 6  ;;  %v3115_v61 = vld [vmem:[%s22879_s0 + $0x79a] sm:$0x1]  ;;  %v3116_v3 = vld [vmem:[%s22879_s0 + $0x7a2] sm:$0x1] }
 0x1df   :  { %v3803_v42 = vsel %vm622_vm6, %v3802_v4, %v3801_v35  ;;  %v3570_v47 = vrot.slane %v2979_v27, 5  ;;  %v3559_v54 = vsel %vm613_vm3, %v3558_v31, %v3557_v43  ;;  %v3572_v56 = vrot.slane %v2980_v28, 4  ;;  %v3117_v5 = vld [vmem:[%s22879_s0 + $0x7aa] sm:$0x1]  ;;  %v3118_v11 = vld [vmem:[%s22879_s0 + $0x7b2] sm:$0x1] }
 0x1e0   :  { %v12178_v50 = vpack.c.bf16 %v3803_v42, %v3789_v18  ;;  %v3567_v55 = vsel %vm604_vm0, %v3566_v41, %v2976_v20  ;;  %v3561_v0 = vsel %vm616_vm4, %v3560_v34, %v3559_v54  ;;  %v3574_v2 = vrot.slane %v2981_v53, 3  ;;  %v3119_v12 = vld [vmem:[%s22879_s0 + $0x7ba] sm:$0x1]  ;;  %v3120_v18 = vld [vmem:[%s22879_s0 + $0x7c2] sm:$0x1] }
 0x1e1   :  { %v3569_v1 = vsel %vm607_vm1, %v3568_v45, %v3567_v55  ;;  %v3576_v19 = vrot.slane %v2982_v6, 2  ;;  %v3563_v8 = vsel %vm619_vm5, %v3562_v62, %v3561_v0  ;;  %v3578_v10 = vrot.slane %v2983_v29, 1  ;;  %v3121_v7 = vld [vmem:[%s22879_s0 + $0x7ca] sm:$0x1]  ;;  %v3122_v4 = vld [vmem:[%s22879_s0 + $0x7d2] sm:$0x1] }
 0x1e2   :  { %12180 = vmatprep.subr.msk.bf16.mxu0 %vm13442_vm8, %v12178_v50  ;;  %v3571_v9 = vsel %vm610_vm2, %v3570_v47, %v3569_v1  ;;  %v3804_v13 = vrot.slane %v3113_v49, 7  ;;  %v3565_v15 = vsel %vm622_vm6, %v3564_v40, %v3563_v8  ;;  %v3123_v21 = vld [vmem:[%s22879_s0 + $0x7da] sm:$0x1]  ;;  %v3124_v24 = vld [vmem:[%s22879_s0 + $0x7e2] sm:$0x1]  ;;  %v3806_v27 = vrot.slane %v3114_v57, 6 }
 0x1e3   :  { %v3573_v16 = vsel %vm613_vm3, %v3572_v56, %v3571_v9  ;;  %v3808_v28 = vrot.slane %v3115_v61, 5  ;;  %v3125_v46 = vld [vmem:[%s22879_s0 + $0x7ea] sm:$0x1]  ;;  %v3810_v60 = vrot.slane %v3116_v3, 4  ;;  %v3812_v51 = vrot.slane %v3117_v5, 3 }
 0x1e4   :  { %v3575_v20 = vsel %vm616_vm4, %v3574_v2, %v3573_v16  ;;  %v3805_v26 = vsel %vm604_vm0, %v3804_v13, %v3112_v48  ;;  %v3814_v53 = vrot.slane %v3118_v11, 2  ;;  %v3126_v34 = vld [vmem:[%s22879_s0 + $0x7f2] sm:$0x1]  ;;  %v3816_v35 = vrot.slane %v3119_v12, 1  ;;  %v3127_v37 = vld [vmem:[%s22879_s0 + $0x7fa] sm:$0x1] }
 0x1e5   :  { %v3577_v30 = vsel %vm619_vm5, %v3576_v19, %v3575_v20  ;;  %v3807_v62 = vsel %vm607_vm1, %v3806_v27, %v3805_v26  ;;  %v3818_v6 = vrot.slane %v3121_v7, 7  ;;  %v3820_v41 = vrot.slane %v3122_v4, 6  ;;  %v2985_v43 = vld [vmem:[%s22879_s0 + $0x38a] sm:$0x1]  ;;  %v2986_v50 = vld [vmem:[%s22879_s0 + $0x392] sm:$0x1] }
 0x1e6   :  { %v3579_v31 = vsel %vm622_vm6, %v3578_v10, %v3577_v30  ;;  %v3809_v40 = vsel %vm610_vm2, %v3808_v28, %v3807_v62  ;;  %v3822_v42 = vrot.slane %v3123_v21, 5  ;;  %v3824_v48 = vrot.slane %v3124_v24, 4  ;;  %v2987_v54 = vld [vmem:[%s22879_s0 + $0x39a] sm:$0x1]  ;;  %v2984_v61 = vld [vmem:[%s22879_s0 + $0x382] sm:$0x1] }
 0x1e7   :  { %v12181_v29 = vpack.c.bf16 %v3579_v31, %v3565_v15  ;;  %v3811_v45 = vsel %vm613_vm3, %v3810_v60, %v3809_v40  ;;  %v3819_v47 = vsel %vm604_vm0, %v3818_v6, %v3120_v18  ;;  %v3826_v49 = vrot.slane %v3125_v46, 3  ;;  %v2988_v0 = vld [vmem:[%s22879_s0 + $0x3a2] sm:$0x1]  ;;  %v2989_v1 = vld [vmem:[%s22879_s0 + $0x3aa] sm:$0x1] }
 0x1e8   :  { %v3813_v55 = vsel %vm616_vm4, %v3812_v51, %v3811_v45  ;;  %v3821_v56 = vsel %vm607_vm1, %v3820_v41, %v3819_v47  ;;  %v3828_v57 = vrot.slane %v3126_v34, 2  ;;  %v3830_v3 = vrot.slane %v3127_v37, 1  ;;  %v2990_v5 = vld [vmem:[%s22879_s0 + $0x3b2] sm:$0x1]  ;;  %v2991_v8 = vld [vmem:[%s22879_s0 + $0x3ba] sm:$0x1] }
 0x1e9   :  { %12183 = vmatpush3.bf16.xpose.msk.msra.mxu0 %vm13442_vm8, %v12181_v29  ;;  %v3815_v2 = vsel %vm619_vm5, %v3814_v53, %v3813_v55  ;;  %v3823_v19 = vsel %vm610_vm2, %v3822_v42, %v3821_v56  ;;  %v2992_v11 = vld [vmem:[%s22879_s0 + $0x3c2] sm:$0x1]  ;;  %v2993_v12 = vld [vmem:[%s22879_s0 + $0x3ca] sm:$0x1]  ;;  %v2994_v13 = vld [vmem:[%s22879_s0 + $0x3d2] sm:$0x1] }
 0x1ea   :  { %v3817_v9 = vsel %vm622_vm6, %v3816_v35, %v3815_v2  ;;  %v3825_v10 = vsel %vm613_vm3, %v3824_v48, %v3823_v19  ;;  %v2995_v15 = vld [vmem:[%s22879_s0 + $0x3da] sm:$0x1]  ;;  %v2996_v18 = vld [vmem:[%s22879_s0 + $0x3e2] sm:$0x1]  ;;  %v3580_v7 = vrot.slane %v2985_v43, 7  ;;  %v3582_v4 = vrot.slane %v2986_v50, 6 }
 0x1eb   :  { %v3827_v16 = vsel %vm616_vm4, %v3826_v49, %v3825_v10  ;;  %v3584_v20 = vrot.slane %v2987_v54, 5  ;;  %v2997_v24 = vld [vmem:[%s22879_s0 + $0x3ea] sm:$0x1]  ;;  %v3586_v26 = vrot.slane %v2988_v0, 4  ;;  %v3588_v27 = vrot.slane %v2989_v1, 3  ;;  %v13220_v2 = vld [vmem:[%s22880_s1 + $0x10] sm:$0xff] }
 0x1ec   :  { %v3829_v21 = vsel %vm619_vm5, %v3828_v57, %v3827_v16  ;;  %v3590_v28 = vrot.slane %v2990_v5, 2  ;;  %v2998_v46 = vld [vmem:[%s22879_s0 + $0x3f2] sm:$0x1]  ;;  %v3581_v60 = vsel %vm604_vm0, %v3580_v7, %v2984_v61  ;;  %v3592_v51 = vrot.slane %v2991_v8, 1  ;;  %v2999_v34 = vld [vmem:[%s22879_s0 + $0x3fa] sm:$0x1] }
 0x1ed   :  { %v3831_v30 = vsel %vm622_vm6, %v3830_v3, %v3829_v21  ;;  %v3594_v53 = vrot.slane %v2993_v12, 7  ;;  %v3583_v62 = vsel %vm607_vm1, %v3582_v4, %v3581_v60  ;;  %v3596_v35 = vrot.slane %v2994_v13, 6  ;;  %v13219_v1 = vld [vmem:[%s22880_s1 + $0x8] sm:$0xff]  ;;  %v13222_v19 = vld [vmem:[%s22880_s1 + $0x20] sm:$0xff]  ;;  %v13224_v5 = vld [vmem:[%s22880_s1 + $0x30] sm:$0xff] }
 0x1ee   :  { %v12184_v31 = vpack.c.bf16 %v3831_v30, %v3817_v9  ;;  %v3598_v6 = vrot.slane %v2995_v15, 5  ;;  %v3585_v29 = vsel %vm610_vm2, %v3584_v20, %v3583_v62  ;;  %v3600_v40 = vrot.slane %v2996_v18, 4  ;;  %v13223_v3 = vld [vmem:[%s22880_s1 + $0x28] sm:$0xff]  ;;  %v13225_v8 = vld [vmem:[%s22880_s1 + $0x38] sm:$0xff]  ;;  %v4364_v10 = vld [vmem:[%s22879_s0 + $0x413] sm:$0x1] }
 0x1ef   :  { %v3595_v37 = vsel %vm604_vm0, %v3594_v53, %v2992_v11  ;;  %v3602_v41 = vrot.slane %v2997_v24, 3  ;;  %v3587_v42 = vsel %vm613_vm3, %v3586_v26, %v3585_v29  ;;  %v3604_v45 = vrot.slane %v2998_v46, 2  ;;  %v4363_v9 = vld [vmem:[%s22879_s0 + $0x40b] sm:$0x1]  ;;  %v4365_v11 = vld [vmem:[%s22879_s0 + $0x41b] sm:$0x1] }
 0x1f0   :  { %12186 = vmatprep.subr.msk.bf16.mxu0 %vm13442_vm8, %v12184_v31  ;;  %v3597_v43 = vsel %vm607_vm1, %v3596_v35, %v3595_v37  ;;  %v3589_v47 = vsel %vm616_vm4, %v3588_v27, %v3587_v42  ;;  %v3606_v49 = vrot.slane %v2999_v34, 1  ;;  %v4362_v12 = vld [vmem:[%s22879_s0 + $0x403] sm:$0x1]  ;;  %v4367_v15 = vld [vmem:[%s22879_s0 + $0x42b] sm:$0x1]  ;;  %v4972_v30 = vrot.slane %v4364_v10, 6 }
 0x1f1   :  { %v3599_v48 = vsel %vm610_vm2, %v3598_v6, %v3597_v43  ;;  %v3591_v50 = vsel %vm619_vm5, %v3590_v28, %v3589_v47  ;;  %v4366_v13 = vld [vmem:[%s22879_s0 + $0x423] sm:$0x1]  ;;  %v4368_v16 = vld [vmem:[%s22879_s0 + $0x433] sm:$0x1]  ;;  %v4369_v18 = vld [vmem:[%s22879_s0 + $0x43b] sm:$0x1] }
 0x1f2   :  { %v3601_v54 = vsel %vm613_vm3, %v3600_v40, %v3599_v48  ;;  %v3593_v55 = vsel %vm622_vm6, %v3592_v51, %v3591_v50  ;;  %v4370_v7 = vld [vmem:[%s22879_s0 + $0x443] sm:$0x1]  ;;  %v4371_v4 = vld [vmem:[%s22879_s0 + $0x44b] sm:$0x1]  ;;  %v4372_v20 = vld [vmem:[%s22879_s0 + $0x453] sm:$0x1] }
 0x1f3   :  { %v3603_v56 = vsel %vm616_vm4, %v3602_v41, %v3601_v54  ;;  %v4373_v21 = vld [vmem:[%s22879_s0 + $0x45b] sm:$0x1]  ;;  %v4374_v24 = vld [vmem:[%s22879_s0 + $0x463] sm:$0x1]  ;;  %v4375_v26 = vld [vmem:[%s22879_s0 + $0x46b] sm:$0x1] }
 0x1f4   :  { %v3605_v57 = vsel %vm619_vm5, %v3604_v45, %v3603_v56  ;;  %v4376_v27 = vld [vmem:[%s22879_s0 + $0x473] sm:$0x1]  ;;  %v4970_v28 = vrot.slane %v4363_v9, 7  ;;  %v4974_v46 = vrot.slane %v4365_v11, 5  ;;  %v4377_v60 = vld [vmem:[%s22879_s0 + $0x47b] sm:$0x1] }
 0x1f5   :  { %v3607_v61 = vsel %vm622_vm6, %v3606_v49, %v3605_v57  ;;  %v4976_v51 = vrot.slane %v4366_v13, 4  ;;  %v4978_v53 = vrot.slane %v4367_v15, 3  ;;  %v4980_v31 = vrot.slane %v4368_v16, 2  ;;  %v4235_v37 = vld [vmem:[%s22879_s0 + $0xb] sm:$0x1] }
 0x1f6   :  { %v12187_v0 = vpack.c.bf16 %v3607_v61, %v3593_v55  ;;  %v4984_v34 = vrot.slane %v4371_v4, 7  ;;  %v4971_v62 = vsel %vm604_vm0, %v4970_v28, %v4362_v12  ;;  %v4986_v35 = vrot.slane %v4372_v20, 6  ;;  %v4234_v49 = vld [vmem:[%s22879_s0 + $0x3] sm:$0x1]  ;;  %v4236_v50 = vld [vmem:[%s22879_s0 + $0x13] sm:$0x1] }
 0x1f7   :  { %v4988_v6 = vrot.slane %v4373_v21, 5  ;;  %v4990_v29 = vrot.slane %v4374_v24, 4  ;;  %v4973_v40 = vsel %vm607_vm1, %v4972_v30, %v4971_v62  ;;  %v4982_v41 = vrot.slane %v4369_v18, 1  ;;  %v4237_v61 = vld [vmem:[%s22879_s0 + $0x1b] sm:$0x1] }
 0x1f8   :  { %12189 = vmatpush3.bf16.xpose.msk.msra.mxu0 %vm13442_vm8, %v12187_v0  ;;  %v4985_v42 = vsel %vm604_vm0, %v4984_v34, %v4370_v7  ;;  %v4992_v43 = vrot.slane %v4375_v26, 3  ;;  %v4975_v45 = vsel %vm610_vm2, %v4974_v46, %v4973_v40  ;;  %v4994_v48 = vrot.slane %v4376_v27, 2  ;;  %v4238_v0 = vld [vmem:[%s22879_s0 + $0x23] sm:$0x1]  ;;  %v4243_v10 = vld [vmem:[%s22879_s0 + $0x4b] sm:$0x1] }
 0x1f9   :  { %v4987_v47 = vsel %vm607_vm1, %v4986_v35, %v4985_v42  ;;  %v4746_v54 = vrot.slane %v4235_v37, 7  ;;  %v4977_v55 = vsel %vm613_vm3, %v4976_v51, %v4975_v45  ;;  %v4996_v57 = vrot.slane %v4377_v60, 1  ;;  %v4242_v9 = vld [vmem:[%s22879_s0 + $0x43] sm:$0x1]  ;;  %v4244_v11 = vld [vmem:[%s22879_s0 + $0x53] sm:$0x1] }
 0x1fa   :  { %v4989_v56 = vsel %vm610_vm2, %v4988_v6, %v4987_v47  ;;  %v4245_v12 = vld [vmem:[%s22879_s0 + $0x5b] sm:$0x1]  ;;  %v4246_v18 = vld [vmem:[%s22879_s0 + $0x63] sm:$0x1]  ;;  %v4247_v7 = vld [vmem:[%s22879_s0 + $0x6b] sm:$0x1] }
 0x1fb   :  { %v4747_v13 = vsel %vm604_vm0, %v4746_v54, %v4234_v49  ;;  %v4748_v4 = vrot.slane %v4236_v50, 6  ;;  %v4750_v20 = vrot.slane %v4237_v61, 5  ;;  %v4248_v24 = vld [vmem:[%s22879_s0 + $0x73] sm:$0x1]  ;;  %v4752_v26 = vrot.slane %v4238_v0, 4 }
 0x1fc   :  { %v4249_v46 = vld [vmem:[%s22879_s0 + $0x7b] sm:$0x1]  ;;  %v4762_v62 = vrot.slane %v4244_v11, 6  ;;  %v4764_v35 = vrot.slane %v4245_v12, 5  ;;  %v4766_v6 = vrot.slane %v4246_v18, 4 }
 0x1fd   :  { %v4749_v60 = vsel %vm607_vm1, %v4748_v4, %v4747_v13  ;;  %v4380_v42 = vld [vmem:[%s22879_s0 + $0x493] sm:$0x1]  ;;  %v4382_v49 = vld [vmem:[%s22879_s0 + $0x4a3] sm:$0x1]  ;;  %v4383_v50 = vld [vmem:[%s22879_s0 + $0x4ab] sm:$0x1] }
 0x1fe   :  { %v4751_v34 = vsel %vm610_vm2, %v4750_v20, %v4749_v60  ;;  %v4384_v61 = vld [vmem:[%s22879_s0 + $0x4b3] sm:$0x1]  ;;  %v4385_v0 = vld [vmem:[%s22879_s0 + $0x4bb] sm:$0x1]  ;;  %v5000_v11 = vrot.slane %v4380_v42, 6  ;;  %v5004_v13 = vrot.slane %v4382_v49, 4 }
 0x1ff   :  { %11773 = vmatmul.mubr.msk.f32.vlgmr.msra.gmra.mrb[16].mxu0 %vm1058_vm7, %v16203_v36  ;;  %v13221_v36 = vld [vmem:[%s22880_s1 + $0x18] sm:$0xff]  ;;  %v4753_v37 = vsel %vm613_vm3, %v4752_v26, %v4751_v34  ;;  %v5006_v18 = vrot.slane %v4383_v50, 3  ;;  %v5010_v4 = vrot.slane %v4385_v0, 1  ;;  %v4254_v42 = vld [vmem:[%s22879_s0 + $0xa3] sm:$0x1] }
 0x200   :  { %11774 = vmatprep.mubr.msk.f32.mxu0 %vm1058_vm7, %v13219_v1  ;;  %v4256_v50 = vld [vmem:[%s22879_s0 + $0xb3] sm:$0x1] }
 0x201   :  { %v4260_v0 = vld [vmem:[%s22879_s0 + $0xd3] sm:$0x1] }
 0x203   :  { %11775 = vmatmul.mubr.msk.f32.gmra.mrb[18].mxu0 %vm1058_vm7, %v13219_v1  ;;  %v4979_v1 = vsel %vm616_vm4, %v4978_v53, %v4977_v55  ;;  %v4760_v53 = vrot.slane %v4243_v10, 7  ;;  %v4390_v10 = vld [vmem:[%s22879_s0 + $0x4e3] sm:$0x1] }
 0x204   :  { %11776 = vmatprep.mubr.msk.f32.mxu0 %vm1058_vm7, %v13220_v2 }
 0x205   :  { %v4761_v40 = vsel %vm604_vm0, %v4760_v53, %v4242_v9  ;;  %v5018_v53 = vrot.slane %v4390_v10, 4 }
 0x206   :  { %v4763_v47 = vsel %vm607_vm1, %v4762_v62, %v4761_v40 }
 0x207   :  { %11777 = vmatmul.mubr.msk.f32.gmra.mrb[20].mxu0 %vm1058_vm7, %v13220_v2  ;;  %v4991_v2 = vsel %vm613_vm3, %v4990_v29, %v4989_v56  ;;  %v4378_v29 = vld [vmem:[%s22879_s0 + $0x483] sm:$0x1]  ;;  %v4765_v56 = vsel %vm610_vm2, %v4764_v35, %v4763_v47 }
 0x208   :  { %11778 = vmatprep.mubr.msk.f32.mxu0 %vm1058_vm7, %v13221_v36 }
 0x20b   :  { %11779 = vmatmul.mubr.msk.f32.gmra.mrb[22].mxu0 %vm1058_vm7, %v13221_v36  ;;  %v4239_v36 = vld [vmem:[%s22879_s0 + $0x2b] sm:$0x1] }
 0x20c   :  { %11780 = vmatprep.mubr.msk.f32.mxu0 %vm1058_vm7, %v13222_v19  ;;  %v4754_v27 = vrot.slane %v4239_v36, 3  ;;  %v4386_v36 = vld [vmem:[%s22879_s0 + $0x4c3] sm:$0x1] }
 0x20e   :  { %v4755_v45 = vsel %vm616_vm4, %v4754_v27, %v4753_v37 }
 0x20f   :  { %11781 = vmatmul.mubr.msk.f32.gmra.mrb[24].mxu0 %vm1058_vm7, %v13222_v19  ;;  %v4240_v19 = vld [vmem:[%s22879_s0 + $0x33] sm:$0x1] }
 0x210   :  { %11782 = vmatprep.mubr.msk.f32.mxu0 %vm1058_vm7, %v13223_v3  ;;  %v4756_v28 = vrot.slane %v4240_v19, 2  ;;  %v4387_v19 = vld [vmem:[%s22879_s0 + $0x4cb] sm:$0x1] }
 0x211   :  { %v5012_v26 = vrot.slane %v4387_v19, 7 }
 0x212   :  { %v4757_v55 = vsel %vm619_vm5, %v4756_v28, %v4755_v45  ;;  %v4251_v28 = vld [vmem:[%s22879_s0 + $0x8b] sm:$0x1] }
 0x213   :  { %11783 = vmatmul.mubr.msk.f32.gmra.mrb[26].mxu0 %vm1058_vm7, %v13223_v3  ;;  %v4241_v3 = vld [vmem:[%s22879_s0 + $0x3b] sm:$0x1]  ;;  %v5013_v62 = vsel %vm604_vm0, %v5012_v26, %v4386_v36  ;;  %v4774_v45 = vrot.slane %v4251_v28, 7  ;;  %v4264_v26 = vld [vmem:[%s22879_s0 + $0xf3] sm:$0x1] }
 0x214   :  { %11784 = vmatprep.mubr.msk.f32.mxu0 %vm1058_vm7, %v13224_v5  ;;  %v4758_v51 = vrot.slane %v4241_v3, 1  ;;  %v4388_v3 = vld [vmem:[%s22879_s0 + $0x4d3] sm:$0x1]  ;;  %v4261_v36 = vld [vmem:[%s22879_s0 + $0xdb] sm:$0x1] }
 0x215   :  { %v5014_v27 = vrot.slane %v4388_v3, 6  ;;  %v4792_v28 = vrot.slane %v4261_v36, 5 }
 0x217   :  { %11785 = vmatmul.mubr.msk.f32.gmra.mrb[28].mxu0 %vm1058_vm7, %v13224_v5  ;;  %v4981_v5 = vsel %vm619_vm5, %v4980_v31, %v4979_v1  ;;  %v4379_v31 = vld [vmem:[%s22879_s0 + $0x48b] sm:$0x1]  ;;  %v4759_v1 = vsel %vm622_vm6, %v4758_v51, %v4757_v55  ;;  %v5015_v40 = vsel %vm607_vm1, %v5014_v27, %v5013_v62 }
 0x218   :  { %11786 = vmatprep.mubr.msk.f32.mxu0 %vm1058_vm7, %v13225_v8  ;;  %v4983_v15 = vsel %vm622_vm6, %v4982_v41, %v4981_v5  ;;  %v4768_v41 = vrot.slane %v4247_v7, 3  ;;  %v4998_v54 = vrot.slane %v4379_v31, 7  ;;  %v4389_v5 = vld [vmem:[%s22879_s0 + $0x4db] sm:$0x1]  ;;  %v5008_v7 = vrot.slane %v4384_v61, 2 }
 0x219   :  { %v5016_v51 = vrot.slane %v4389_v5, 5  ;;  %v4250_v31 = vld [vmem:[%s22879_s0 + $0x83] sm:$0x1]  ;;  %v4259_v61 = vld [vmem:[%s22879_s0 + $0xcb] sm:$0x1]  ;;  %v4780_v5 = vrot.slane %v4254_v42, 4 }
 0x21b   :  { %11787 = vmatmul.mubr.msk.f32.gmra.mrb[30].mxu0 %vm1058_vm7, %v13225_v8  ;;  %v4993_v8 = vsel %vm616_vm4, %v4992_v43, %v4991_v2  ;;  %v4381_v43 = vld [vmem:[%s22879_s0 + $0x49b] sm:$0x1]  ;;  %v4767_v2 = vsel %vm613_vm3, %v4766_v6, %v4765_v56  ;;  %v4252_v6 = vld [vmem:[%s22879_s0 + $0x93] sm:$0x1] }
 0x21c   :  { %4073 = vmatprep.mubr.f32.mxu0 %v22886_v33  ;;  %v4995_v16 = vsel %vm619_vm5, %v4994_v48, %v4993_v8  ;;  %v4770_v48 = vrot.slane %v4248_v24, 2  ;;  %v4999_v8 = vsel %vm604_vm0, %v4998_v54, %v4378_v29  ;;  %v4769_v9 = vsel %vm616_vm4, %v4768_v41, %v4767_v2  ;;  %v4253_v29 = vld [vmem:[%s22879_s0 + $0x9b] sm:$0x1] }
 0x21d   :  { %v4997_v21 = vsel %vm622_vm6, %v4996_v57, %v4995_v16  ;;  %v4772_v57 = vrot.slane %v4249_v46, 1  ;;  %v5002_v12 = vrot.slane %v4381_v43, 5  ;;  %v4391_v16 = vld [vmem:[%s22879_s0 + $0x4eb] sm:$0x1]  ;;  %v5001_v24 = vsel %vm607_vm1, %v5000_v11, %v4999_v8  ;;  %v4393_v46 = vld [vmem:[%s22879_s0 + $0x4fb] sm:$0x1] }
 0x21e   :  { %v12194_v30 = vpack.c.bf16 %v4997_v21, %v4983_v15  ;;  %v4771_v15 = vsel %vm619_vm5, %v4770_v48, %v4769_v9  ;;  %v4392_v21 = vld [vmem:[%s22879_s0 + $0x4f3] sm:$0x1]  ;;  %v5020_v35 = vrot.slane %v4391_v16, 3  ;;  %v4255_v43 = vld [vmem:[%s22879_s0 + $0xab] sm:$0x1]  ;;  %v5017_v48 = vsel %vm610_vm2, %v5016_v51, %v5015_v40 }
 0x21f   :  { %v4773_v20 = vsel %vm622_vm6, %v4772_v57, %v4771_v15  ;;  %v5003_v60 = vsel %vm610_vm2, %v5002_v12, %v5001_v24  ;;  %v5022_v41 = vrot.slane %v4392_v21, 2  ;;  %v5024_v49 = vrot.slane %v4393_v46, 1  ;;  %v4257_v54 = vld [vmem:[%s22879_s0 + $0xbb] sm:$0x1]  ;;  %v4258_v57 = vld [vmem:[%s22879_s0 + $0xc3] sm:$0x1] }
 0x220   :  { %12196 = vmatprep.subr.msk.bf16.mxu1 %vm13442_vm8, %v12194_v30  ;;  %v12197_v30 = vpack.c.bf16 %v4773_v20, %v4759_v1  ;;  %v5005_v34 = vsel %vm613_vm3, %v5004_v13, %v5003_v60  ;;  %v5019_v56 = vsel %vm613_vm3, %v5018_v53, %v5017_v48  ;;  %v4775_v1 = vsel %vm604_vm0, %v4774_v45, %v4250_v31  ;;  %v4262_v9 = vld [vmem:[%s22879_s0 + $0xe3] sm:$0x1]  ;;  %v4263_v16 = vld [vmem:[%s22879_s0 + $0xeb] sm:$0x1]  ;;  %v4265_v31 = vld [vmem:[%s22879_s0 + $0xfb] sm:$0x1] }
 0x221   :  { %v5007_v37 = vsel %vm616_vm4, %v5006_v18, %v5005_v34  ;;  %v5021_v2 = vsel %vm616_vm4, %v5020_v35, %v5019_v56  ;;  %v4776_v19 = vrot.slane %v4252_v6, 6  ;;  %v4778_v3 = vrot.slane %v4253_v29, 5  ;;  %v4395_v48 = vld [vmem:[%s22879_s0 + $0x50b] sm:$0x1]  ;;  %v4396_v56 = vld [vmem:[%s22879_s0 + $0x513] sm:$0x1] }
 0x222   :  { %12199 = vmatpush3.bf16.xpose.msk.msra.mxu1 %vm13442_vm8, %v12197_v30  ;;  %v5009_v47 = vsel %vm619_vm5, %v5008_v7, %v5007_v37  ;;  %v5023_v8 = vsel %vm619_vm5, %v5022_v41, %v5021_v2  ;;  %v4782_v10 = vrot.slane %v4255_v43, 3  ;;  %v4784_v11 = vrot.slane %v4256_v50, 2 }
 0x223   :  { %v5011_v55 = vsel %vm622_vm6, %v5010_v4, %v5009_v47  ;;  %v4786_v12 = vrot.slane %v4257_v54, 1  ;;  %v5025_v15 = vsel %vm622_vm6, %v5024_v49, %v5023_v8  ;;  %v4777_v18 = vsel %vm607_vm1, %v4776_v19, %v4775_v1  ;;  %v4398_v1 = vld [vmem:[%s22879_s0 + $0x523] sm:$0x1] }
 0x224   :  { %v4788_v7 = vrot.slane %v4259_v61, 7  ;;  %v4790_v4 = vrot.slane %v4260_v0, 6  ;;  %v12200_v24 = vpack.c.bf16 %v5025_v15, %v5011_v55  ;;  %v4779_v27 = vsel %vm610_vm2, %v4778_v3, %v4777_v18  ;;  %v4394_v55 = vld [vmem:[%s22879_s0 + $0x503] sm:$0x1]  ;;  %v4397_v0 = vld [vmem:[%s22879_s0 + $0x51b] sm:$0x1] }
 0x225   :  { %v4781_v46 = vsel %vm613_vm3, %v4780_v5, %v4779_v27  ;;  %v4794_v51 = vrot.slane %v4262_v9, 4  ;;  %v4796_v35 = vrot.slane %v4263_v16, 3  ;;  %v4798_v41 = vrot.slane %v4264_v26, 2  ;;  %v4399_v3 = vld [vmem:[%s22879_s0 + $0x52b] sm:$0x1] }
 0x226   :  { %v4789_v60 = vsel %vm604_vm0, %v4788_v7, %v4258_v57  ;;  %12202 = vmatprep.subr.msk.bf16.mxu1 %vm13442_vm8, %v12200_v24  ;;  %v4783_v34 = vsel %vm616_vm4, %v4782_v10, %v4781_v46  ;;  %v4800_v54 = vrot.slane %v4265_v31, 1  ;;  %v5026_v5 = vrot.slane %v4395_v48, 7  ;;  %v4402_v16 = vld [vmem:[%s22879_s0 + $0x543] sm:$0x1]  ;;  %v4403_v18 = vld [vmem:[%s22879_s0 + $0x54b] sm:$0x1] }
 0x227   :  { %v4791_v62 = vsel %vm607_vm1, %v4790_v4, %v4789_v60  ;;  %v4785_v37 = vsel %vm619_vm5, %v4784_v11, %v4783_v34  ;;  %v4400_v11 = vld [vmem:[%s22879_s0 + $0x533] sm:$0x1]  ;;  %v4405_v24 = vld [vmem:[%s22879_s0 + $0x55b] sm:$0x1]  ;;  %v5032_v27 = vrot.slane %v4398_v1, 4 }
 0x228   :  { %v4793_v40 = vsel %vm610_vm2, %v4792_v28, %v4791_v62  ;;  %v4787_v45 = vsel %vm622_vm6, %v4786_v12, %v4785_v37  ;;  %v4401_v12 = vld [vmem:[%s22879_s0 + $0x53b] sm:$0x1]  ;;  %v4404_v7 = vld [vmem:[%s22879_s0 + $0x553] sm:$0x1]  ;;  %v5027_v4 = vsel %vm604_vm0, %v5026_v5, %v4394_v55  ;;  %v5034_v28 = vrot.slane %v4399_v3, 3 }
 0x229   :  { %v4795_v47 = vsel %vm613_vm3, %v4794_v51, %v4793_v40  ;;  %v5036_v51 = vrot.slane %v4400_v11, 2  ;;  %v4407_v37 = vld [vmem:[%s22879_s0 + $0x56b] sm:$0x1] }
 0x22a   :  { %v4797_v50 = vsel %vm616_vm4, %v4796_v35, %v4795_v47  ;;  %v5040_v35 = vrot.slane %v4403_v18, 7 }
 0x22b   :  { %v4799_v61 = vsel %vm619_vm5, %v4798_v41, %v4797_v50  ;;  %v5042_v41 = vrot.slane %v4404_v7, 6 }
 0x22c   :  { %v4801_v19 = vsel %vm622_vm6, %v4800_v54, %v4799_v61  ;;  %v5041_v48 = vsel %vm604_vm0, %v5040_v35, %v4402_v16  ;;  %v4271_v35 = vld [vmem:[%s22879_s0 + $0x12b] sm:$0x1] }
 0x22d   :  { %v12203_v10 = vpack.c.bf16 %v4801_v19, %v4787_v45  ;;  %v4408_v45 = vld [vmem:[%s22879_s0 + $0x573] sm:$0x1] }
 0x22e   :  { %v5050_v11 = vrot.slane %v4408_v45, 2 }
 0x22f   :  { %12205 = vmatpush3.bf16.xpose.msk.msra.mxu1 %vm13442_vm8, %v12203_v10 }
 0x27e   :  { %v2713_v13 = vpop.f32.mrb[8].mxu1 }
 0x27f   :  { %v12460_v20 = vadd.f32 %v2713_v13, %v15772_v59  ;;  %v2715_v21 = vpop.f32.mrb[9].mxu1  ;;  %v5028_v13 = vrot.slane %v4396_v56, 6 }
 0x280   :  { %v12461_v30 = vadd.f32 %v2715_v21, %v15772_v59 }
 0x281   :  { %v11262_v53 = vmul.f32 -1.442695, %v12460_v20  ;;  %v5030_v20 = vrot.slane %v4397_v0, 5  ;;  %v5029_v26 = vsel %vm607_vm1, %v5028_v13, %v5027_v4  ;;  %v5043_v0 = vsel %vm607_vm1, %v5042_v41, %v5041_v48  ;;  %v4267_v13 = vld [vmem:[%s22879_s0 + $0x10b] sm:$0x1] }
 0x282   :  { %v11263_v6 = vmul.f32 -1.442695, %v12461_v30  ;;  %v2719_v29 = vpop.f32.mrb[10].mxu1 }
 0x283   :  { %12753 = vpow2.f32 %v11262_v53  ;;  %v12462_v42 = vadd.f32 %v2719_v29, %v15819_v32  ;;  %v2721_v43 = vpop.f32.mrb[11].mxu1  ;;  %v5031_v60 = vsel %vm610_vm2, %v5030_v20, %v5029_v26  ;;  %v5038_v53 = vrot.slane %v4401_v12, 1  ;;  %v4406_v29 = vld [vmem:[%s22879_s0 + $0x563] sm:$0x1]  ;;  %v4268_v20 = vld [vmem:[%s22879_s0 + $0x113] sm:$0x1] }
 0x284   :  { %12755 = vpow2.f32 %v11263_v6  ;;  %v12463_v49 = vadd.f32 %v2721_v43, %v15819_v32  ;;  %v5033_v62 = vsel %vm613_vm3, %v5032_v27, %v5031_v60  ;;  %v5046_v5 = vrot.slane %v4406_v29, 4  ;;  %v4269_v60 = vld [vmem:[%s22879_s0 + $0x11b] sm:$0x1] }
 0x285   :  { %v11264_v57 = vmul.f32 -1.442695, %v12462_v42  ;;  %v5035_v40 = vsel %vm616_vm4, %v5034_v28, %v5033_v62  ;;  %v4266_v28 = vld [vmem:[%s22879_s0 + $0x103] sm:$0x1] }
 0x286   :  { %v11265_v2 = vmul.f32 -1.442695, %v12463_v49  ;;  %v2725_v36 = vpop.f32.mrb[12].mxu1  ;;  %v5037_v47 = vsel %vm619_vm5, %v5036_v51, %v5035_v40  ;;  %v5044_v49 = vrot.slane %v4405_v24, 5  ;;  %v4270_v51 = vld [vmem:[%s22879_s0 + $0x123] sm:$0x1] }
 0x287   :  { %12757 = vpow2.f32 %v11264_v57  ;;  %v12464_v8 = vadd.f32 %v2725_v36, %v15830_v44  ;;  %v2727_v9 = vpop.f32.mrb[13].mxu1  ;;  %v4409_v57 = vld [vmem:[%s22879_s0 + $0x57b] sm:$0x1]  ;;  %v5039_v61 = vsel %vm622_vm6, %v5038_v53, %v5037_v47  ;;  %v4802_v53 = vrot.slane %v4267_v13, 7 }
 0x288   :  { %12759 = vpow2.f32 %v11265_v2  ;;  %v12465_v15 = vadd.f32 %v2727_v9, %v15830_v44  ;;  %v5045_v19 = vsel %vm610_vm2, %v5044_v49, %v5043_v0  ;;  %v5052_v12 = vrot.slane %v4409_v57, 1  ;;  %v4273_v49 = vld [vmem:[%s22879_s0 + $0x13b] sm:$0x1]  ;;  %v4276_v0 = vld [vmem:[%s22879_s0 + $0x153] sm:$0x1] }
 0x289   :  { %v11266_v21 = vmul.f32 -1.442695, %v12464_v8  ;;  %v5048_v8 = vrot.slane %v4407_v37, 3  ;;  %v5047_v4 = vsel %vm613_vm3, %v5046_v5, %v5045_v19  ;;  %v4806_v57 = vrot.slane %v4269_v60, 5 }
 0x28a   :  { %v11267_v30 = vmul.f32 -1.442695, %v12465_v15  ;;  %v2731_v46 = vpop.f32.mrb[14].mxu1 }
 0x28b   :  { %12761 = vpow2.f32 %v11266_v21  ;;  %v12466_v31 = vadd.f32 %v2731_v46, %v15867_v17  ;;  %v2733_v34 = vpop.f32.mrb[15].mxu1  ;;  %v5049_v27 = vsel %vm616_vm4, %v5048_v8, %v5047_v4  ;;  %v4274_v8 = vld [vmem:[%s22879_s0 + $0x143] sm:$0x1] }
 0x28c   :  { %12763 = vpow2.f32 %v11267_v30  ;;  %v12467_v6 = vadd.f32 %v2733_v34, %v15867_v17  ;;  %v5051_v46 = vsel %vm619_vm5, %v5050_v11, %v5049_v27  ;;  %v4818_v27 = vrot.slane %v4276_v0, 6 }
 0x28d   :  { %v12754_v42 = vpop.eup %12753  ;;  %v11268_v43 = vmul.f32 -1.442695, %v12466_v31  ;;  %v5053_v62 = vsel %vm622_vm6, %v5052_v12, %v5051_v46  ;;  %v4281_v46 = vld [vmem:[%s22879_s0 + $0x17b] sm:$0x1] }
 0x28e   :  { %v12756_v50 = vpop.eup %12755  ;;  %v2812_v54 = vadd.f32 1.0, %v12754_v42  ;;  %v11269_v55 = vmul.f32 -1.442695, %v12467_v6  ;;  %v2737_v56 = vpop.f32.mrb[16].mxu1  ;;  %v4804_v6 = vrot.slane %v4268_v20, 6  ;;  %v12206_v42 = vpack.c.bf16 %v5053_v62, %v5039_v61 }
 0x28f   :  { %v2813_v1 = vadd.f32 1.0, %v12756_v50  ;;  %12765 = vpow2.f32 %v11268_v43  ;;  %v12468_v2 = vadd.f32 %v2737_v56, %v15883_v39  ;;  %v2739_v36 = vpop.f32.mrb[17].mxu1  ;;  %v4272_v43 = vld [vmem:[%s22879_s0 + $0x133] sm:$0x1]  ;;  %v4803_v50 = vsel %vm604_vm0, %v4802_v53, %v4266_v28  ;;  %v4411_v53 = vld [vmem:[%s22879_s0 + $0x58b] sm:$0x1] }
 0x290   :  { %12767 = vrcp.f32 %v2812_v54  ;;  %v12469_v3 = vadd.f32 %v2739_v36, %v15883_v39  ;;  %12208 = vmatprep.subr.msk.bf16.mxu1 %vm13442_vm8, %v12206_v42  ;;  %v4805_v56 = vsel %vm607_vm1, %v4804_v6, %v4803_v50  ;;  %v4812_v36 = vrot.slane %v4272_v43, 2  ;;  %v4410_v6 = vld [vmem:[%s22879_s0 + $0x583] sm:$0x1]  ;;  %v4413_v43 = vld [vmem:[%s22879_s0 + $0x59b] sm:$0x1] }
 0x291   :  { %v12758_v9 = vpop.eup %12757  ;;  %12769 = vrcp.f32 %v2813_v1  ;;  %v11270_v10 = vmul.f32 -1.442695, %v12468_v2  ;;  %v4808_v1 = vrot.slane %v4270_v51, 4  ;;  %v4810_v2 = vrot.slane %v4271_v35, 3 }
 0x292   :  { %v12760_v15 = vpop.eup %12759  ;;  %v2814_v16 = vadd.f32 1.0, %v12758_v9  ;;  %12771 = vpow2.f32 %v11269_v55  ;;  %v11271_v18 = vmul.f32 -1.442695, %v12469_v3  ;;  %v2743_v7 = vpop.f32.mrb[18].mxu1  ;;  %v4275_v55 = vld [vmem:[%s22879_s0 + $0x14b] sm:$0x1]  ;;  %v4807_v9 = vsel %vm610_vm2, %v4806_v57, %v4805_v56 }
 0x293   :  { %v2815_v21 = vadd.f32 1.0, %v12760_v15  ;;  %12773 = vpow2.f32 %v11270_v10  ;;  %v12470_v24 = vadd.f32 %v2743_v7, %v15902_v58  ;;  %v2745_v26 = vpop.f32.mrb[19].mxu1  ;;  %v4814_v10 = vrot.slane %v4273_v49, 1  ;;  %v4277_v15 = vld [vmem:[%s22879_s0 + $0x15b] sm:$0x1] }
 0x294   :  { %12775 = vrcp.f32 %v2814_v16  ;;  %v12471_v30 = vadd.f32 %v2745_v26, %v15902_v58  ;;  %v4278_v16 = vld [vmem:[%s22879_s0 + $0x163] sm:$0x1]  ;;  %v4816_v7 = vrot.slane %v4275_v55, 7  ;;  %v5054_v49 = vrot.slane %v4411_v53, 7 }
 0x295   :  { %v12762_v31 = vpop.eup %12761  ;;  %12777 = vrcp.f32 %v2815_v21  ;;  %v11272_v34 = vmul.f32 -1.442695, %v12470_v24  ;;  %v4279_v21 = vld [vmem:[%s22879_s0 + $0x16b] sm:$0x1]  ;;  %v4280_v24 = vld [vmem:[%s22879_s0 + $0x173] sm:$0x1] }
 0x296   :  { %v12764_v29 = vpop.eup %12763  ;;  %v2816_v37 = vadd.f32 1.0, %v12762_v31  ;;  %12779 = vpow2.f32 %v11271_v18  ;;  %v11273_v40 = vmul.f32 -1.442695, %v12471_v30  ;;  %v2749_v41 = vpop.f32.mrb[20].mxu1  ;;  %v4809_v18 = vsel %vm613_vm3, %v4808_v1, %v4807_v9  ;;  %v4414_v1 = vld [vmem:[%s22879_s0 + $0x5a3] sm:$0x1] }
 0x297   :  { %v2817_v45 = vadd.f32 1.0, %v12764_v29  ;;  %12781 = vpow2.f32 %v11272_v34  ;;  %v12472_v47 = vadd.f32 %v2749_v41, %v15924_v25  ;;  %v2751_v48 = vpop.f32.mrb[21].mxu1  ;;  %v4811_v26 = vsel %vm616_vm4, %v4810_v2, %v4809_v18  ;;  %v4412_v29 = vld [vmem:[%s22879_s0 + $0x593] sm:$0x1]  ;;  %v4415_v2 = vld [vmem:[%s22879_s0 + $0x5ab] sm:$0x1] }
 0x298   :  { %12783 = vrcp.f32 %v2816_v37  ;;  %v12473_v54 = vadd.f32 %v2751_v48, %v15924_v25  ;;  %v4813_v60 = vsel %vm619_vm5, %v4812_v36, %v4811_v26  ;;  %v4817_v51 = vsel %vm604_vm0, %v4816_v7, %v4274_v8 }
 0x299   :  { %v12766_v61 = vpop.eup %12765  ;;  %12785 = vrcp.f32 %v2817_v45  ;;  %v4815_v62 = vsel %vm622_vm6, %v4814_v10, %v4813_v60  ;;  %v4819_v35 = vsel %vm607_vm1, %v4818_v27, %v4817_v51  ;;  %v4822_v41 = vrot.slane %v4278_v16, 4  ;;  %v4416_v10 = vld [vmem:[%s22879_s0 + $0x5b3] sm:$0x1]  ;;  %v4421_v60 = vld [vmem:[%s22879_s0 + $0x5db] sm:$0x1] }
 0x29a   :  { %v17123_v19 = vpop.eup %12767  ;;  %v2818_v3 = vadd.f32 1.0, %v12766_v61  ;;  %12787 = vpow2.f32 %v11273_v40  ;;  %v2755_v5 = vpop.f32.mrb[22].mxu1  ;;  %v4820_v40 = vrot.slane %v4277_v15, 5  ;;  %v4824_v42 = vrot.slane %v4279_v21, 3 }
 0x29b   :  { %v17129_v11 = vpop.eup %12769  ;;  %12789 = vtanh.f32 %v12472_v47  ;;  %v12474_v12 = vadd.f32 %v2755_v5, %v15937_v23  ;;  %v2757_v13 = vpop.f32.mrb[23].mxu1  ;;  %v4826_v47 = vrot.slane %v4280_v24, 2  ;;  %v4828_v48 = vrot.slane %v4281_v46, 1  ;;  %v4420_v24 = vld [vmem:[%s22879_s0 + $0x5d3] sm:$0x1] }
 0x29c   :  { %v12772_v4 = vpop.eup %12771  ;;  %12791 = vrcp.f32 %v2818_v3  ;;  %v12475_v20 = vadd.f32 %v2757_v13, %v15937_v23  ;;  %v4821_v55 = vsel %vm610_vm2, %v4820_v40, %v4819_v35  ;;  %v5056_v56 = vrot.slane %v4412_v29, 6  ;;  %v4418_v46 = vld [vmem:[%s22879_s0 + $0x5c3] sm:$0x1] }
 0x29d   :  { %v12774_v28 = vpop.eup %12773  ;;  %v2819_v30 = vadd.f32 1.0, %v12772_v4  ;;  %12793 = vtanh.f32 %v12473_v54  ;;  %v4823_v0 = vsel %vm613_vm3, %v4822_v41, %v4821_v55  ;;  %v5055_v36 = vsel %vm604_vm0, %v5054_v49, %v4410_v6  ;;  %v4422_v41 = vld [vmem:[%s22879_s0 + $0x5e3] sm:$0x1] }
 0x29e   :  { %v17155_v31 = vpop.eup %12775  ;;  %v2820_v34 = vadd.f32 1.0, %v12774_v28  ;;  %12795 = vtanh.f32 %v12474_v12  ;;  %v5058_v3 = vrot.slane %v4413_v43, 5  ;;  %v4825_v9 = vsel %vm616_vm4, %v4824_v42, %v4823_v0  ;;  %v4417_v12 = vld [vmem:[%s22879_s0 + $0x5bb] sm:$0x1]  ;;  %v4283_v0 = vld [vmem:[%s22879_s0 + $0x18b] sm:$0x1] }
 0x29f   :  { %v17165_v37 = vpop.eup %12777  ;;  %12797 = vrcp.f32 %v2819_v30  ;;  %v5057_v13 = vsel %vm607_vm1, %v5056_v56, %v5055_v36  ;;  %v4827_v18 = vsel %vm619_vm5, %v4826_v47, %v4825_v9  ;;  %v5060_v26 = vrot.slane %v4414_v1, 4 }
 0x2a0   :  { %v12780_v45 = vpop.eup %12779  ;;  %12799 = vrcp.f32 %v2820_v34  ;;  %v5059_v7 = vsel %vm610_vm2, %v5058_v3, %v5057_v13  ;;  %v4829_v21 = vsel %vm622_vm6, %v4828_v48, %v4827_v18  ;;  %v5062_v27 = vrot.slane %v4415_v2, 3  ;;  %v4286_v13 = vld [vmem:[%s22879_s0 + $0x1a3] sm:$0x1] }
 0x2a1   :  { %v12782_v50 = vpop.eup %12781  ;;  %v2821_v54 = vadd.f32 1.0, %v12780_v45  ;;  %12801 = vtanh.f32 %v12475_v20  ;;  %v12209_v30 = vpack.c.bf16 %v4829_v21, %v4815_v62  ;;  %v5064_v51 = vrot.slane %v4416_v10, 2 }
 0x2a2   :  { %v12784_v57 = vpop.eup %12783  ;;  %v2822_v61 = vadd.f32 1.0, %v12782_v50  ;;  %v5066_v53 = vrot.slane %v4417_v12, 1  ;;  %v5061_v6 = vsel %vm613_vm3, %v5060_v26, %v5059_v7  ;;  %v5070_v43 = vrot.slane %v4420_v24, 6  ;;  %v4289_v24 = vld [vmem:[%s22879_s0 + $0x1bb] sm:$0x1] }
 0x2a3   :  { %v12786_v5 = vpop.eup %12785  ;;  %v2852_v8 = vmul.f32 %v12784_v57, %v16049_v38  ;;  %12803 = vrcp.f32 %v2821_v54  ;;  %v4419_v38 = vld [vmem:[%s22879_s0 + $0x5cb] sm:$0x1]  ;;  %12211 = vmatpush3.bf16.xpose.msk.msra.mxu1 %vm13442_vm8, %v12209_v30  ;;  %v5063_v42 = vsel %vm616_vm4, %v5062_v27, %v5061_v6  ;;  %v5072_v50 = vrot.slane %v4421_v60, 5  ;;  %v4292_v27 = vld [vmem:[%s22879_s0 + $0x1d3] sm:$0x1] }
 0x2a4   :  { %v12788_v15 = vpop.eup %12787  ;;  %v2853_v16 = vmul.f32 %v12786_v5, %v16025_v22  ;;  %12805 = vrcp.f32 %v2822_v61  ;;  %v5068_v29 = vrot.slane %v4419_v38, 7  ;;  %v5065_v48 = vsel %vm619_vm5, %v5064_v51, %v5063_v42  ;;  %v4282_v61 = vld [vmem:[%s22879_s0 + $0x183] sm:$0x1]  ;;  %v4284_v5 = vld [vmem:[%s22879_s0 + $0x193] sm:$0x1] }
 0x2a5   :  { %v12790_v4 = vpop.eup %12789  ;;  %v2823_v20 = vadd.f32 1.0, %v12788_v15  ;;  %v5067_v57 = vsel %vm622_vm6, %v5066_v53, %v5065_v48  ;;  %v5074_v36 = vrot.slane %v4422_v41, 4  ;;  %v4287_v15 = vld [vmem:[%s22879_s0 + $0x1ab] sm:$0x1]  ;;  %v4830_v7 = vrot.slane %v4283_v0, 7 }
 0x2a6   :  { %v12792_v22 = vpop.eup %12791  ;;  %v2856_v28 = vmul.f32 %v12790_v4, %v17123_v19  ;;  %v5069_v49 = vsel %vm604_vm0, %v5068_v29, %v4418_v46  ;;  %v4291_v26 = vld [vmem:[%s22879_s0 + $0x1cb] sm:$0x1]  ;;  %v4293_v46 = vld [vmem:[%s22879_s0 + $0x1db] sm:$0x1]  ;;  %v4294_v60 = vld [vmem:[%s22879_s0 + $0x1e3] sm:$0x1] }
 0x2a7   :  { %v12794_v34 = vpop.eup %12793  ;;  %v2854_v35 = vmul.f32 %v12792_v22, %v16071_v14  ;;  %12807 = vrcp.f32 %v2823_v20  ;;  %v4423_v14 = vld [vmem:[%s22879_s0 + $0x5eb] sm:$0x1]  ;;  %v5071_v2 = vsel %vm607_vm1, %v5070_v43, %v5069_v49  ;;  %v4832_v22 = vrot.slane %v4284_v5, 6  ;;  %v4290_v6 = vld [vmem:[%s22879_s0 + $0x1c3] sm:$0x1] }
 0x2a8   :  { %v12796_v40 = vpop.eup %12795  ;;  %v17207_v19 = vadd.f32 %v2856_v28, %v2852_v8  ;;  %v2857_v62 = vmul.f32 %v12794_v34, %v17129_v11  ;;  %v4424_v11 = vld [vmem:[%s22879_s0 + $0x5f3] sm:$0x1]  ;;  %v5076_v3 = vrot.slane %v4423_v14, 3  ;;  %v4285_v8 = vld [vmem:[%s22879_s0 + $0x19b] sm:$0x1]  ;;  %v5073_v10 = vsel %vm610_vm2, %v5072_v50, %v5071_v2 }
 0x2a9   :  { %v12798_v45 = vpop.eup %12797  ;;  %v2858_v47 = vmul.f32 %v12796_v40, %v17155_v31  ;;  %v4425_v31 = vld [vmem:[%s22879_s0 + $0x5fb] sm:$0x1]  ;;  %v5078_v12 = vrot.slane %v4424_v11, 2  ;;  %v5075_v18 = vsel %vm613_vm3, %v5074_v36, %v5073_v10  ;;  %v4834_v28 = vrot.slane %v4285_v8, 5  ;;  %v4295_v29 = vld [vmem:[%s22879_s0 + $0x1eb] sm:$0x1] }
 0x2aa   :  { %v17225_v54 = vpop.eup %12799  ;;  %v2855_v55 = vmul.f32 %v12798_v45, %v16090_v52  ;;  %12809 = vtanh.f32 %v17207_v19  ;;  %v17229_v56 = vadd.f32 %v2857_v62, %v2853_v16  ;;  %v5080_v38 = vrot.slane %v4425_v31, 1  ;;  %v4296_v42 = vld [vmem:[%s22879_s0 + $0x1f3] sm:$0x1] }
 0x2ab   :  { %v12802_v1 = vpop.eup %12801  ;;  %v17241_v52 = vadd.f32 %v2858_v47, %v2854_v35  ;;  %v5077_v21 = vsel %vm616_vm4, %v5076_v3, %v5075_v18  ;;  %v4831_v51 = vsel %vm604_vm0, %v4830_v7, %v4282_v61  ;;  %v4836_v53 = vrot.slane %v4286_v13, 4  ;;  %v4297_v47 = vld [vmem:[%s22879_s0 + $0x1fb] sm:$0x1] }
 0x2ac   :  { %12811 = vtanh.f32 %v17229_v56  ;;  %v2859_v9 = vmul.f32 %v12802_v1, %v17165_v37  ;;  %v4288_v37 = vld [vmem:[%s22879_s0 + $0x1b3] sm:$0x1]  ;;  %v5079_v30 = vsel %vm619_vm5, %v5078_v12, %v5077_v21  ;;  %v4838_v34 = vrot.slane %v4287_v15, 3 }
 0x2ad   :  { %v12804_v16 = vpop.eup %12803  ;;  %12813 = vtanh.f32 %v17241_v52  ;;  %v5081_v35 = vsel %vm622_vm6, %v5080_v38, %v5079_v30  ;;  %v4833_v40 = vsel %vm607_vm1, %v4832_v22, %v4831_v51  ;;  %v4840_v62 = vrot.slane %v4288_v37, 2  ;;  %v13230_v30 = vld [vmem:[%s22882_s2 + $0x20] sm:$0xff]  ;;  %v13233_v51 = vld [vmem:[%s22882_s2 + $0x38] sm:$0xff] }
 0x2ae   :  { %v12806_v4 = vpop.eup %12805  ;;  %v17264_v20 = vadd.f32 %v2859_v9, %v2855_v55  ;;  %v12212_v14 = vpack.c.bf16 %v5081_v35, %v5067_v57  ;;  %v4835_v43 = vsel %vm610_vm2, %v4834_v28, %v4833_v40  ;;  %v4844_v45 = vrot.slane %v4291_v26, 7  ;;  %v13229_v28 = vld [vmem:[%s22882_s2 + $0x18] sm:$0xff]  ;;  %v4435_v35 = vld [vmem:[%s22879_s0 + $0x64b] sm:$0x1] }
 0x2af   :  { %v4837_v11 = vsel %vm613_vm3, %v4836_v53, %v4835_v43  ;;  %v4846_v48 = vrot.slane %v4292_v27, 6  ;;  %v4848_v49 = vrot.slane %v4293_v46, 5  ;;  %v4850_v50 = vrot.slane %v4294_v60, 4  ;;  %v13231_v46 = vld [vmem:[%s22882_s2 + $0x28] sm:$0xff]  ;;  %v13232_v60 = vld [vmem:[%s22882_s2 + $0x30] sm:$0xff]  ;;  %v17358_v53 = vld [vmem:[%s22880_s1] sm:$0xff] }
 0x2b0   :  { %12815 = vtanh.f32 %v17264_v20  ;;  %12214 = vmatprep.subr.msk.bf16.mxu1 %vm13442_vm8, %v12212_v14  ;;  %v4839_v55 = vsel %vm616_vm4, %v4838_v34, %v4837_v11  ;;  %v4842_v31 = vrot.slane %v4289_v24, 1  ;;  %v4845_v57 = vsel %vm604_vm0, %v4844_v45, %v4290_v6  ;;  %v4427_v34 = vld [vmem:[%s22879_s0 + $0x60b] sm:$0x1]  ;;  %v4428_v6 = vld [vmem:[%s22879_s0 + $0x613] sm:$0x1] }
 0x2b1   :  { %v12808_v41 = vpop.eup %12807  ;;  %v4852_v61 = vrot.slane %v4295_v29, 3  ;;  %v4841_v1 = vsel %vm619_vm5, %v4840_v62, %v4839_v55  ;;  %v4847_v2 = vsel %vm607_vm1, %v4846_v48, %v4845_v57  ;;  %v4854_v36 = vrot.slane %v4296_v42, 2  ;;  %v4436_v29 = vld [vmem:[%s22879_s0 + $0x653] sm:$0x1]  ;;  %v4429_v14 = vld [vmem:[%s22879_s0 + $0x61b] sm:$0x1] }
 0x2b2   :  { %v4849_v3 = vsel %vm610_vm2, %v4848_v49, %v4847_v2  ;;  %v4856_v5 = vrot.slane %v4297_v47, 1  ;;  %v4843_v12 = vsel %vm622_vm6, %v4842_v31, %v4841_v1  ;;  %v5082_v40 = vrot.slane %v4427_v34, 7  ;;  %v4434_v42 = vld [vmem:[%s22879_s0 + $0x643] sm:$0x1]  ;;  %v4437_v45 = vld [vmem:[%s22879_s0 + $0x65b] sm:$0x1] }
 0x2b3   :  { %v4851_v9 = vsel %vm613_vm3, %v4850_v50, %v4849_v3  ;;  %v5096_v62 = vrot.slane %v4435_v35, 7  ;;  %v4430_v43 = vld [vmem:[%s22879_s0 + $0x623] sm:$0x1]  ;;  %v4431_v48 = vld [vmem:[%s22879_s0 + $0x62b] sm:$0x1]  ;;  %v5084_v50 = vrot.slane %v4428_v6, 6 }
 0x2b4   :  { %v12810_v0 = vpop.eup %12809  ;;  %v4853_v13 = vsel %vm616_vm4, %v4852_v61, %v4851_v9  ;;  %v4438_v47 = vld [vmem:[%s22879_s0 + $0x663] sm:$0x1]  ;;  %v4439_v49 = vld [vmem:[%s22879_s0 + $0x66b] sm:$0x1]  ;;  %v5086_v55 = vrot.slane %v4429_v14, 5  ;;  %v5088_v61 = vrot.slane %v4430_v43, 4 }
 0x2b5   :  { %v2868_v15 = vmul.f32 %v12810_v0, %v17225_v54  ;;  %v4855_v38 = vsel %vm619_vm5, %v4854_v36, %v4853_v13  ;;  %v13226_v54 = vld [vmem:[%s22882_s2] sm:$0xff]  ;;  %v4432_v31 = vld [vmem:[%s22879_s0 + $0x633] sm:$0x1]  ;;  %v5090_v0 = vrot.slane %v4431_v48, 3  ;;  %v5097_v1 = vsel %vm604_vm0, %v5096_v62, %v4434_v42  ;;  %v4433_v2 = vld [vmem:[%s22879_s0 + $0x63b] sm:$0x1] }
 0x2b6   :  { %v12812_v8 = vpop.eup %12811  ;;  %v4857_v37 = vsel %vm622_vm6, %v4856_v5, %v4855_v38  ;;  %v4440_v57 = vld [vmem:[%s22879_s0 + $0x673] sm:$0x1]  ;;  %v4441_v36 = vld [vmem:[%s22879_s0 + $0x67b] sm:$0x1]  ;;  %v5092_v5 = vrot.slane %v4432_v31, 2  ;;  %v5102_v13 = vrot.slane %v4438_v47, 4 }
 0x2b7   :  { %v12814_v10 = vpop.eup %12813  ;;  %v12215_v24 = vpack.c.bf16 %v4857_v37, %v4843_v12  ;;  %v2869_v26 = vmul.f32 %v12812_v8, %v12804_v16  ;;  %v13228_v16 = vld [vmem:[%s22882_s2 + $0x10] sm:$0xff]  ;;  %v5098_v8 = vrot.slane %v4436_v29, 6  ;;  %v5100_v12 = vrot.slane %v4437_v45, 5  ;;  %v4305_v6 = vld [vmem:[%s22879_s0 + $0x23b] sm:$0x1] }
 0x2b8   :  { %v2870_v18 = vmul.f32 %v12814_v10, %v12806_v4  ;;  %v13227_v4 = vld [vmem:[%s22882_s2 + $0x8] sm:$0xff]  ;;  %v5094_v10 = vrot.slane %v4433_v2, 1  ;;  %v5104_v38 = vrot.slane %v4439_v49, 3  ;;  %v5106_v37 = vrot.slane %v4440_v57, 2  ;;  %v4304_v34 = vld [vmem:[%s22879_s0 + $0x233] sm:$0x1] }
 0x2b9   :  { %12217 = vmatpush3.bf16.xpose.msk.msra.mxu1 %vm13442_vm8, %v12215_v24  ;;  %v4306_v29 = vld [vmem:[%s22879_s0 + $0x243] sm:$0x1]  ;;  %v4308_v62 = vld [vmem:[%s22879_s0 + $0x253] sm:$0x1]  ;;  %v4309_v42 = vld [vmem:[%s22879_s0 + $0x25b] sm:$0x1] }
 0x2ba   :  { %v12816_v7 = vpop.eup %12815  ;;  %v12192_v21 = vpack.c.bf16 %v2870_v18, %v2868_v15  ;;  %v5099_v18 = vsel %vm607_vm1, %v5098_v8, %v5097_v1  ;;  %v4310_v43 = vld [vmem:[%s22879_s0 + $0x263] sm:$0x1]  ;;  %v4311_v48 = vld [vmem:[%s22879_s0 + $0x26b] sm:$0x1]  ;;  %v4312_v49 = vld [vmem:[%s22879_s0 + $0x273] sm:$0x1] }
 0x2bb   :  { %v2871_v27 = vmul.f32 %v12816_v7, %v12808_v41  ;;  %v4426_v41 = vld [vmem:[%s22879_s0 + $0x603] sm:$0x1]  ;;  %v4299_v7 = vld [vmem:[%s22879_s0 + $0x20b] sm:$0x1]  ;;  %v5101_v24 = vsel %vm610_vm2, %v5100_v12, %v5099_v18  ;;  %v4313_v31 = vld [vmem:[%s22879_s0 + $0x27b] sm:$0x1] }
 0x2bc   :  { %v5083_v11 = vsel %vm604_vm0, %v5082_v40, %v4426_v41  ;;  %v4307_v40 = vld [vmem:[%s22879_s0 + $0x24b] sm:$0x1]  ;;  %v4874_v1 = vrot.slane %v4308_v62, 6  ;;  %v4870_v8 = vrot.slane %v4305_v6, 1  ;;  %v4884_v18 = vrot.slane %v4313_v31, 1 }
 0x2bd   :  { %v12190_v22 = vpack.c.bf16 %v2871_v27, %v2869_v26  ;;  %v5085_v3 = vsel %vm607_vm1, %v5084_v50, %v5083_v11  ;;  %v5108_v26 = vrot.slane %v4441_v36, 1  ;;  %v4298_v27 = vld [vmem:[%s22879_s0 + $0x203] sm:$0x1]  ;;  %v4876_v36 = vrot.slane %v4309_v42, 5 }
 0x2be   :  { %v5087_v9 = vsel %vm610_vm2, %v5086_v55, %v5085_v3  ;;  %v4878_v3 = vrot.slane %v4310_v43, 4  ;;  %v4450_v42 = vld [vmem:[%s22879_s0 + $0x6c3] sm:$0x1]  ;;  %v4455_v43 = vld [vmem:[%s22879_s0 + $0x6eb] sm:$0x1] }
 0x2bf   :  { %12191 = vmatprep.subr.bf16.mxu0 %v12190_v22  ;;  %v5089_v15 = vsel %vm613_vm3, %v5088_v61, %v5087_v9  ;;  %v4858_v22 = vrot.slane %v4299_v7, 7  ;;  %v4868_v61 = vrot.slane %v4304_v34, 2  ;;  %v4444_v7 = vld [vmem:[%s22879_s0 + $0x693] sm:$0x1] }
 0x2c0   :  { %12193 = vmatpush1.bf16.msra.mxu0 %v12192_v21  ;;  %v5091_v21 = vsel %vm616_vm4, %v5090_v0, %v5089_v15  ;;  %v4872_v0 = vrot.slane %v4307_v40, 7  ;;  %v4882_v15 = vrot.slane %v4312_v49, 2  ;;  %v4456_v49 = vld [vmem:[%s22879_s0 + $0x6f3] sm:$0x1] }
 0x2c1   :  { %v4859_v41 = vsel %vm604_vm0, %v4858_v22, %v4298_v27  ;;  %v4446_v27 = vld [vmem:[%s22879_s0 + $0x6a3] sm:$0x1]  ;;  %v4447_v22 = vld [vmem:[%s22879_s0 + $0x6ab] sm:$0x1] }
 0x2c2   :  { %v4873_v9 = vsel %vm604_vm0, %v4872_v0, %v4306_v29  ;;  %v4454_v29 = vld [vmem:[%s22879_s0 + $0x6e3] sm:$0x1]  ;;  %v5116_v62 = vrot.slane %v4446_v27, 4  ;;  %v4323_v27 = vld [vmem:[%s22879_s0 + $0x2cb] sm:$0x1] }
 0x2c3   :  { %11314 = vmatmul.mubr.msk.f32.vlgmr.msra.gmra.mrb[16].mxu0 %vm1260_vm9, %v13226_v54  ;;  %v5093_v54 = vsel %vm619_vm5, %v5092_v5, %v5091_v21 }
 0x2c4   :  { %4079 = vmatprep.mubr.f32.mxu0 %v22886_v33 }
 0x2c7   :  { %11315 = vmatmul.mubr.msk.f32.gmra.mrb[18].mxu0 %vm1260_vm9, %v13227_v4  ;;  %v5103_v4 = vsel %vm613_vm3, %v5102_v13, %v5101_v24  ;;  %v4875_v13 = vsel %vm607_vm1, %v4874_v1, %v4873_v9  ;;  %v5130_v1 = vrot.slane %v4454_v29, 4  ;;  %v4314_v9 = vld [vmem:[%s22879_s0 + $0x283] sm:$0x1] }
 0x2c8   :  { %4085 = vmatprep.mubr.f32.mxu0 %v22886_v33  ;;  %v4877_v24 = vsel %vm610_vm2, %v4876_v36, %v4875_v13  ;;  %v4316_v36 = vld [vmem:[%s22879_s0 + $0x293] sm:$0x1] }
 0x2cb   :  { %11316 = vmatmul.mubr.msk.f32.gmra.mrb[20].mxu0 %vm1260_vm9, %v13228_v16  ;;  %v4300_v16 = vld [vmem:[%s22879_s0 + $0x213] sm:$0x1] }
 0x2cc   :  { %4091 = vmatprep.mubr.f32.mxu0 %v22886_v33  ;;  %v4860_v45 = vrot.slane %v4300_v16, 6  ;;  %v4449_v16 = vld [vmem:[%s22879_s0 + $0x6bb] sm:$0x1] }
 0x2ce   :  { %v4861_v57 = vsel %vm607_vm1, %v4860_v45, %v4859_v41  ;;  %v5118_v41 = vrot.slane %v4447_v22, 3  ;;  %v4324_v22 = vld [vmem:[%s22879_s0 + $0x2d3] sm:$0x1] }
 0x2cf   :  { %11317 = vmatmul.mubr.msk.f32.gmra.mrb[22].mxu0 %vm1260_vm9, %v13229_v28  ;;  %v4301_v28 = vld [vmem:[%s22879_s0 + $0x21b] sm:$0x1] }
 0x2d0   :  { %4097 = vmatprep.mubr.f32.mxu0 %v22886_v33  ;;  %v4862_v47 = vrot.slane %v4301_v28, 5  ;;  %v4451_v28 = vld [vmem:[%s22879_s0 + $0x6cb] sm:$0x1] }
 0x2d1   :  { %v5124_v31 = vrot.slane %v4451_v28, 7  ;;  %v4325_v28 = vld [vmem:[%s22879_s0 + $0x2db] sm:$0x1] }
 0x2d2   :  { %v4863_v2 = vsel %vm610_vm2, %v4862_v47, %v4861_v57 }
 0x2d3   :  { %11318 = vmatmul.mubr.msk.f32.gmra.mrb[24].mxu0 %vm1260_vm9, %v13230_v30  ;;  %v5095_v30 = vsel %vm622_vm6, %v5094_v10, %v5093_v54  ;;  %v4880_v10 = vrot.slane %v4311_v48, 3  ;;  %v4879_v54 = vsel %vm613_vm3, %v4878_v3, %v4877_v24 }
 0x2d4   :  { %4103 = vmatprep.mubr.f32.mxu0 %v22886_v33 }
 0x2d7   :  { %11319 = vmatmul.mubr.msk.f32.gmra.mrb[26].mxu0 %vm1260_vm9, %v13231_v46  ;;  %v5105_v46 = vsel %vm616_vm4, %v5104_v38, %v5103_v4  ;;  %v4442_v38 = vld [vmem:[%s22879_s0 + $0x683] sm:$0x1]  ;;  %v4448_v4 = vld [vmem:[%s22879_s0 + $0x6b3] sm:$0x1] }
 0x2d8   :  { %4109 = vmatprep.mubr.f32.mxu0 %v22886_v33  ;;  %v5107_v35 = vsel %vm619_vm5, %v5106_v37, %v5105_v46  ;;  %v4443_v37 = vld [vmem:[%s22879_s0 + $0x68b] sm:$0x1]  ;;  %v4881_v46 = vsel %vm616_vm4, %v4880_v10, %v4879_v54  ;;  %v5120_v47 = vrot.slane %v4448_v4, 2  ;;  %v4317_v10 = vld [vmem:[%s22879_s0 + $0x29b] sm:$0x1] }
 0x2d9   :  { %v5109_v14 = vsel %vm622_vm6, %v5108_v26, %v5107_v35  ;;  %v4445_v26 = vld [vmem:[%s22879_s0 + $0x69b] sm:$0x1]  ;;  %v5110_v34 = vrot.slane %v4443_v37, 7  ;;  %v5112_v35 = vrot.slane %v4444_v7, 6  ;;  %v4883_v6 = vsel %vm619_vm5, %v4882_v15, %v4881_v46  ;;  %v4319_v37 = vld [vmem:[%s22879_s0 + $0x2ab] sm:$0x1] }
 0x2da   :  { %v12218_v11 = vpack.c.bf16 %v5109_v14, %v5095_v30  ;;  %v5114_v40 = vrot.slane %v4445_v26, 5  ;;  %v4885_v14 = vsel %vm622_vm6, %v4884_v18, %v4883_v6  ;;  %v5134_v18 = vrot.slane %v4456_v49, 2  ;;  %v4320_v7 = vld [vmem:[%s22879_s0 + $0x2b3] sm:$0x1]  ;;  %v4321_v26 = vld [vmem:[%s22879_s0 + $0x2bb] sm:$0x1] }
 0x2db   :  { %11320 = vmatmul.mubr.msk.f32.gmra.mrb[28].mxu0 %vm1260_vm9, %v13232_v60  ;;  %v4302_v60 = vld [vmem:[%s22879_s0 + $0x223] sm:$0x1]  ;;  %v5111_v45 = vsel %vm604_vm0, %v5110_v34, %v4442_v38  ;;  %v4327_v34 = vld [vmem:[%s22879_s0 + $0x2eb] sm:$0x1]  ;;  %v4894_v29 = vrot.slane %v4319_v37, 3 }
 0x2dc   :  { %4115 = vmatprep.mubr.f32.mxu0 %v22886_v33  ;;  %v4864_v50 = vrot.slane %v4302_v60, 4  ;;  %12220 = vmatprep.subr.msk.bf16.mxu1 %vm13442_vm8, %v12218_v11  ;;  %v4452_v60 = vld [vmem:[%s22879_s0 + $0x6d3] sm:$0x1]  ;;  %v5122_v11 = vrot.slane %v4449_v16, 1  ;;  %v4322_v16 = vld [vmem:[%s22879_s0 + $0x2c3] sm:$0x1] }
 0x2dd   :  { %v5126_v57 = vrot.slane %v4452_v60, 6  ;;  %v4888_v60 = vrot.slane %v4316_v36, 6  ;;  %v4458_v49 = vld [vmem:[%s22879_s0 + $0x703] sm:$0x1] }
 0x2de   :  { %v4865_v5 = vsel %vm613_vm3, %v4864_v50, %v4863_v2  ;;  %v4457_v50 = vld [vmem:[%s22879_s0 + $0x6fb] sm:$0x1]  ;;  %v4315_v2 = vld [vmem:[%s22879_s0 + $0x28b] sm:$0x1] }
 0x2df   :  { %11321 = vmatmul.mubr.msk.f32.gmra.mrb[30].mxu0 %vm1260_vm9, %v13233_v51  ;;  %v4303_v51 = vld [vmem:[%s22879_s0 + $0x22b] sm:$0x1]  ;;  %v5136_v38 = vrot.slane %v4457_v50, 1  ;;  %v4886_v46 = vrot.slane %v4315_v2, 7 }
 0x2e0   :  { %11868 = vmatprep.mubr.msk.f32.mxu0 %vm1058_vm7, %v17358_v53  ;;  %v4866_v55 = vrot.slane %v4303_v51, 3  ;;  %v4453_v51 = vld [vmem:[%s22879_s0 + $0x6db] sm:$0x1]  ;;  %v4459_v50 = vld [vmem:[%s22879_s0 + $0x70b] sm:$0x1] }
 0x2e1   :  { %v5128_v0 = vrot.slane %v4453_v51, 5 }
 0x2e2   :  { %v4867_v12 = vsel %vm616_vm4, %v4866_v55, %v4865_v5  ;;  %v5113_v55 = vsel %vm607_vm1, %v5112_v35, %v5111_v45  ;;  %v5125_v5 = vsel %vm604_vm0, %v5124_v31, %v4450_v42  ;;  %v4890_v35 = vrot.slane %v4317_v10, 5 }
 0x2e3   :  { %v4869_v21 = vsel %vm619_vm5, %v4868_v61, %v4867_v12  ;;  %v5115_v61 = vsel %vm610_vm2, %v5114_v40, %v5113_v55  ;;  %v4318_v12 = vld [vmem:[%s22879_s0 + $0x2a3] sm:$0x1]  ;;  %v5127_v15 = vsel %vm607_vm1, %v5126_v57, %v5125_v5  ;;  %v4896_v42 = vrot.slane %v4320_v7, 2 }
 0x2e4   :  { %v4871_v30 = vsel %vm622_vm6, %v4870_v8, %v4869_v21  ;;  %v5117_v3 = vsel %vm613_vm3, %v5116_v62, %v5115_v61  ;;  %v5132_v8 = vrot.slane %v4455_v43, 3  ;;  %v5129_v24 = vsel %vm610_vm2, %v5128_v0, %v5127_v15  ;;  %v4328_v62 = vld [vmem:[%s22879_s0 + $0x2f3] sm:$0x1]  ;;  %v4462_v5 = vld [vmem:[%s22879_s0 + $0x723] sm:$0x1] }
 0x2e5   :  { %v12221_v48 = vpack.c.bf16 %v4885_v14, %v4871_v30  ;;  %v5119_v13 = vsel %vm616_vm4, %v5118_v41, %v5117_v3  ;;  %v5131_v4 = vsel %vm613_vm3, %v5130_v1, %v5129_v24  ;;  %v4326_v30 = vld [vmem:[%s22879_s0 + $0x2e3] sm:$0x1]  ;;  %v4892_v6 = vrot.slane %v4318_v12, 4  ;;  %v4329_v41 = vld [vmem:[%s22879_s0 + $0x2fb] sm:$0x1] }
 0x2e6   :  { %v5121_v21 = vsel %vm619_vm5, %v5120_v47, %v5119_v13  ;;  %v5133_v51 = vsel %vm616_vm4, %v5132_v8, %v5131_v4  ;;  %v4887_v14 = vsel %vm604_vm0, %v4886_v46, %v4314_v9  ;;  %v4898_v43 = vrot.slane %v4321_v26, 1  ;;  %v4460_v0 = vld [vmem:[%s22879_s0 + $0x713] sm:$0x1]  ;;  %v4461_v1 = vld [vmem:[%s22879_s0 + $0x71b] sm:$0x1] }
 0x2e7   :  { %12223 = vmatpush3.bf16.xpose.msk.msra.mxu1 %vm13442_vm8, %v12221_v48  ;;  %v5123_v54 = vsel %vm622_vm6, %v5122_v11, %v5121_v21  ;;  %v5135_v40 = vsel %vm619_vm5, %v5134_v18, %v5133_v51  ;;  %v4889_v47 = vsel %vm607_vm1, %v4888_v60, %v4887_v14  ;;  %v4900_v11 = vrot.slane %v4323_v27, 7  ;;  %v4463_v8 = vld [vmem:[%s22879_s0 + $0x72b] sm:$0x1]  ;;  %v4464_v13 = vld [vmem:[%s22879_s0 + $0x733] sm:$0x1] }
 0x2e8   :  { %v5137_v45 = vsel %vm622_vm6, %v5136_v38, %v5135_v40  ;;  %v4902_v48 = vrot.slane %v4324_v22, 6  ;;  %v4891_v31 = vsel %vm610_vm2, %v4890_v35, %v4889_v47  ;;  %v4904_v57 = vrot.slane %v4325_v28, 5  ;;  %v4465_v15 = vld [vmem:[%s22879_s0 + $0x73b] sm:$0x1]  ;;  %v4467_v21 = vld [vmem:[%s22879_s0 + $0x74b] sm:$0x1] }
 0x2e9   :  { %v12224_v55 = vpack.c.bf16 %v5137_v45, %v5123_v54  ;;  %v4906_v61 = vrot.slane %v4326_v30, 4  ;;  %v4893_v2 = vsel %vm613_vm3, %v4892_v6, %v4891_v31  ;;  %v4901_v36 = vsel %vm604_vm0, %v4900_v11, %v4322_v16  ;;  %v4468_v24 = vld [vmem:[%s22879_s0 + $0x753] sm:$0x1]  ;;  %v4466_v22 = vld [vmem:[%s22879_s0 + $0x743] sm:$0x1] }
 0x2ea   :  { %v4908_v3 = vrot.slane %v4327_v34, 3  ;;  %v4895_v9 = vsel %vm616_vm4, %v4894_v29, %v4893_v2  ;;  %v4903_v10 = vsel %vm607_vm1, %v4902_v48, %v4901_v36  ;;  %v4910_v12 = vrot.slane %v4328_v62, 2  ;;  %v4469_v54 = vld [vmem:[%s22879_s0 + $0x75b] sm:$0x1]  ;;  %v4470_v4 = vld [vmem:[%s22879_s0 + $0x763] sm:$0x1] }
 0x2eb   :  { %12226 = vmatprep.subr.msk.bf16.mxu1 %vm13442_vm8, %v12224_v55  ;;  %v5138_v18 = vrot.slane %v4459_v50, 7  ;;  %v4897_v38 = vsel %vm619_vm5, %v4896_v42, %v4895_v9  ;;  %v4905_v37 = vsel %vm610_vm2, %v4904_v57, %v4903_v10  ;;  %v4912_v7 = vrot.slane %v4329_v41, 1  ;;  %v4471_v46 = vld [vmem:[%s22879_s0 + $0x76b] sm:$0x1]  ;;  %v4472_v6 = vld [vmem:[%s22879_s0 + $0x773] sm:$0x1] }
 0x2ec   :  { %v4899_v26 = vsel %vm622_vm6, %v4898_v43, %v4897_v38  ;;  %v4907_v27 = vsel %vm613_vm3, %v4906_v61, %v4905_v37  ;;  %v5140_v28 = vrot.slane %v4460_v0, 6  ;;  %v5142_v60 = vrot.slane %v4461_v1, 5  ;;  %v4473_v29 = vld [vmem:[%s22879_s0 + $0x77b] sm:$0x1]  ;;  %v4330_v47 = vld [vmem:[%s22879_s0 + $0x303] sm:$0x1] }
 0x2ed   :  { %v5139_v16 = vsel %vm604_vm0, %v5138_v18, %v4458_v49  ;;  %v4909_v30 = vsel %vm616_vm4, %v4908_v3, %v4907_v27  ;;  %v5144_v51 = vrot.slane %v4462_v5, 4  ;;  %v5146_v34 = vrot.slane %v4463_v8, 3  ;;  %v4331_v11 = vld [vmem:[%s22879_s0 + $0x30b] sm:$0x1]  ;;  %v4332_v31 = vld [vmem:[%s22879_s0 + $0x313] sm:$0x1] }
 0x2ee   :  { %v4911_v35 = vsel %vm619_vm5, %v4910_v12, %v4909_v30  ;;  %v5141_v40 = vsel %vm607_vm1, %v5140_v28, %v5139_v16  ;;  %v5148_v62 = vrot.slane %v4464_v13, 2  ;;  %v5150_v41 = vrot.slane %v4465_v15, 1  ;;  %v4333_v57 = vld [vmem:[%s22879_s0 + $0x31b] sm:$0x1]  ;;  %v4334_v2 = vld [vmem:[%s22879_s0 + $0x323] sm:$0x1] }
 0x2ef   :  { %v4913_v14 = vsel %vm622_vm6, %v4912_v7, %v4911_v35  ;;  %v5143_v42 = vsel %vm610_vm2, %v5142_v60, %v5141_v40  ;;  %v5152_v43 = vrot.slane %v4467_v21, 7  ;;  %v5154_v45 = vrot.slane %v4468_v24, 6  ;;  %v4335_v36 = vld [vmem:[%s22879_s0 + $0x32b] sm:$0x1]  ;;  %v4336_v9 = vld [vmem:[%s22879_s0 + $0x333] sm:$0x1] }
 0x2f0   :  { %v12227_v48 = vpack.c.bf16 %v4913_v14, %v4899_v26  ;;  %v5145_v49 = vsel %vm613_vm3, %v5144_v51, %v5143_v42  ;;  %v5156_v50 = vrot.slane %v4469_v54, 5  ;;  %v5158_v55 = vrot.slane %v4470_v4, 4  ;;  %v4337_v10 = vld [vmem:[%s22879_s0 + $0x33b] sm:$0x1]  ;;  %v4338_v38 = vld [vmem:[%s22879_s0 + $0x343] sm:$0x1] }
 0x2f1   :  { %v5147_v61 = vsel %vm616_vm4, %v5146_v34, %v5145_v49  ;;  %v5153_v0 = vsel %vm604_vm0, %v5152_v43, %v4466_v22  ;;  %v5160_v1 = vrot.slane %v4471_v46, 3  ;;  %v5162_v8 = vrot.slane %v4472_v6, 2  ;;  %v4339_v37 = vld [vmem:[%s22879_s0 + $0x34b] sm:$0x1]  ;;  %v4340_v7 = vld [vmem:[%s22879_s0 + $0x353] sm:$0x1] }
 0x2f2   :  { %12229 = vmatpush3.bf16.xpose.msk.msra.mxu1 %vm13442_vm8, %v12227_v48  ;;  %v5149_v3 = vsel %vm619_vm5, %v5148_v62, %v5147_v61  ;;  %v5155_v5 = vsel %vm607_vm1, %v5154_v45, %v5153_v0  ;;  %v4914_v12 = vrot.slane %v4331_v11, 7  ;;  %v5164_v18 = vrot.slane %v4473_v29, 1  ;;  %v4341_v24 = vld [vmem:[%s22879_s0 + $0x35b] sm:$0x1]  ;;  %v4342_v26 = vld [vmem:[%s22879_s0 + $0x363] sm:$0x1] }
 0x2f3   :  { %v5151_v13 = vsel %vm622_vm6, %v5150_v41, %v5149_v3  ;;  %v5157_v15 = vsel %vm610_vm2, %v5156_v50, %v5155_v5  ;;  %v4916_v22 = vrot.slane %v4332_v31, 6  ;;  %v4918_v54 = vrot.slane %v4333_v57, 5  ;;  %v4343_v16 = vld [vmem:[%s22879_s0 + $0x36b] sm:$0x1]  ;;  %v4344_v51 = vld [vmem:[%s22879_s0 + $0x373] sm:$0x1] }
 0x2f4   :  { %v5159_v21 = vsel %vm613_vm3, %v5158_v55, %v5157_v15  ;;  %v4915_v27 = vsel %vm604_vm0, %v4914_v12, %v4330_v47  ;;  %v4920_v28 = vrot.slane %v4334_v2, 4  ;;  %v4922_v30 = vrot.slane %v4335_v36, 3  ;;  %v4345_v34 = vld [vmem:[%s22879_s0 + $0x37b] sm:$0x1]  ;;  %v4474_v42 = vld [vmem:[%s22879_s0 + $0x783] sm:$0x1] }
 0x2f5   :  { %v5161_v4 = vsel %vm616_vm4, %v5160_v1, %v5159_v21  ;;  %v4924_v46 = vrot.slane %v4336_v9, 2  ;;  %v4917_v35 = vsel %vm607_vm1, %v4916_v22, %v4915_v27  ;;  %v4926_v6 = vrot.slane %v4337_v10, 1  ;;  %v4475_v43 = vld [vmem:[%s22879_s0 + $0x78b] sm:$0x1]  ;;  %v4476_v49 = vld [vmem:[%s22879_s0 + $0x793] sm:$0x1] }
 0x2f6   :  { %v5163_v60 = vsel %vm619_vm5, %v5162_v8, %v5161_v4  ;;  %v4928_v29 = vrot.slane %v4339_v37, 7  ;;  %v4919_v62 = vsel %vm610_vm2, %v4918_v54, %v4917_v35  ;;  %v4930_v41 = vrot.slane %v4340_v7, 6  ;;  %v4477_v50 = vld [vmem:[%s22879_s0 + $0x79b] sm:$0x1]  ;;  %v4478_v0 = vld [vmem:[%s22879_s0 + $0x7a3] sm:$0x1] }
 0x2f7   :  { %v5165_v40 = vsel %vm622_vm6, %v5164_v18, %v5163_v60  ;;  %v4932_v14 = vrot.slane %v4341_v24, 5  ;;  %v4921_v47 = vsel %vm613_vm3, %v4920_v28, %v4919_v62  ;;  %v4934_v48 = vrot.slane %v4342_v26, 4  ;;  %v4479_v1 = vld [vmem:[%s22879_s0 + $0x7ab] sm:$0x1]  ;;  %v4480_v5 = vld [vmem:[%s22879_s0 + $0x7b3] sm:$0x1] }
 0x2f8   :  { %v12230_v45 = vpack.c.bf16 %v5165_v40, %v5151_v13  ;;  %v4929_v11 = vsel %vm604_vm0, %v4928_v29, %v4338_v38  ;;  %v4923_v55 = vsel %vm616_vm4, %v4922_v30, %v4921_v47  ;;  %v4936_v57 = vrot.slane %v4343_v16, 3  ;;  %v4481_v8 = vld [vmem:[%s22879_s0 + $0x7bb] sm:$0x1]  ;;  %v4482_v13 = vld [vmem:[%s22879_s0 + $0x7c3] sm:$0x1] }
 0x2f9   :  { %v4931_v31 = vsel %vm607_vm1, %v4930_v41, %v4929_v11  ;;  %v4938_v61 = vrot.slane %v4344_v51, 2  ;;  %v4925_v2 = vsel %vm619_vm5, %v4924_v46, %v4923_v55  ;;  %v4940_v3 = vrot.slane %v4345_v34, 1  ;;  %v4483_v15 = vld [vmem:[%s22879_s0 + $0x7cb] sm:$0x1]  ;;  %v4484_v18 = vld [vmem:[%s22879_s0 + $0x7d3] sm:$0x1] }
 0x2fa   :  { %12232 = vmatprep.subr.msk.bf16.mxu1 %vm13442_vm8, %v12230_v45  ;;  %v4933_v36 = vsel %vm610_vm2, %v4932_v14, %v4931_v31  ;;  %v5166_v9 = vrot.slane %v4475_v43, 7  ;;  %v4927_v10 = vsel %vm622_vm6, %v4926_v6, %v4925_v2  ;;  %v4485_v37 = vld [vmem:[%s22879_s0 + $0x7db] sm:$0x1]  ;;  %v4486_v7 = vld [vmem:[%s22879_s0 + $0x7e3] sm:$0x1]  ;;  %v5168_v24 = vrot.slane %v4476_v49, 6 }
 0x2fb   :  { %v4935_v12 = vsel %vm613_vm3, %v4934_v48, %v4933_v36  ;;  %v5170_v26 = vrot.slane %v4477_v50, 5  ;;  %v4487_v22 = vld [vmem:[%s22879_s0 + $0x7eb] sm:$0x1]  ;;  %v5172_v54 = vrot.slane %v4478_v0, 4  ;;  %v5174_v4 = vrot.slane %v4479_v1, 3 }
 0x2fc   :  { %v4937_v38 = vsel %vm616_vm4, %v4936_v57, %v4935_v12  ;;  %v5167_v21 = vsel %vm604_vm0, %v5166_v9, %v4474_v42  ;;  %v5176_v16 = vrot.slane %v4480_v5, 2  ;;  %v4488_v30 = vld [vmem:[%s22879_s0 + $0x7f3] sm:$0x1]  ;;  %v5178_v60 = vrot.slane %v4481_v8, 1  ;;  %v4489_v35 = vld [vmem:[%s22879_s0 + $0x7fb] sm:$0x1] }
 0x2fd   :  { %v4939_v27 = vsel %vm619_vm5, %v4938_v61, %v4937_v38  ;;  %v5169_v46 = vsel %vm607_vm1, %v5168_v24, %v5167_v21  ;;  %v5180_v51 = vrot.slane %v4483_v15, 7  ;;  %v5182_v29 = vrot.slane %v4484_v18, 6  ;;  %v4347_v62 = vld [vmem:[%s22879_s0 + $0x38b] sm:$0x1]  ;;  %v4348_v45 = vld [vmem:[%s22879_s0 + $0x393] sm:$0x1] }
 0x2fe   :  { %v4941_v28 = vsel %vm622_vm6, %v4940_v3, %v4939_v27  ;;  %v5171_v6 = vsel %vm610_vm2, %v5170_v26, %v5169_v46  ;;  %v5184_v40 = vrot.slane %v4485_v37, 5  ;;  %v5186_v42 = vrot.slane %v4486_v7, 4  ;;  %v4349_v47 = vld [vmem:[%s22879_s0 + $0x39b] sm:$0x1]  ;;  %v4346_v50 = vld [vmem:[%s22879_s0 + $0x383] sm:$0x1] }
 0x2ff   :  { %v12233_v34 = vpack.c.bf16 %v4941_v28, %v4927_v10  ;;  %v5173_v41 = vsel %vm613_vm3, %v5172_v54, %v5171_v6  ;;  %v5181_v14 = vsel %vm604_vm0, %v5180_v51, %v4482_v13  ;;  %v5188_v43 = vrot.slane %v4487_v22, 3  ;;  %v4350_v55 = vld [vmem:[%s22879_s0 + $0x3a3] sm:$0x1]  ;;  %v4351_v31 = vld [vmem:[%s22879_s0 + $0x3ab] sm:$0x1] }
 0x300   :  { %v5175_v11 = vsel %vm616_vm4, %v5174_v4, %v5173_v41  ;;  %v5183_v48 = vsel %vm607_vm1, %v5182_v29, %v5181_v14  ;;  %v5190_v49 = vrot.slane %v4488_v30, 2  ;;  %v5192_v0 = vrot.slane %v4489_v35, 1  ;;  %v4352_v1 = vld [vmem:[%s22879_s0 + $0x3b3] sm:$0x1]  ;;  %v4353_v2 = vld [vmem:[%s22879_s0 + $0x3bb] sm:$0x1] }
 0x301   :  { %12235 = vmatpush3.bf16.xpose.msk.msra.mxu1 %vm13442_vm8, %v12233_v34  ;;  %v5177_v57 = vsel %vm619_vm5, %v5176_v16, %v5175_v11  ;;  %v5185_v61 = vsel %vm610_vm2, %v5184_v40, %v5183_v48  ;;  %v4354_v5 = vld [vmem:[%s22879_s0 + $0x3c3] sm:$0x1]  ;;  %v4355_v8 = vld [vmem:[%s22879_s0 + $0x3cb] sm:$0x1]  ;;  %v4356_v9 = vld [vmem:[%s22879_s0 + $0x3d3] sm:$0x1] }
 0x302   :  { %v5179_v36 = vsel %vm622_vm6, %v5178_v60, %v5177_v57  ;;  %v5187_v3 = vsel %vm613_vm3, %v5186_v42, %v5185_v61  ;;  %v4357_v10 = vld [vmem:[%s22879_s0 + $0x3db] sm:$0x1]  ;;  %v4358_v13 = vld [vmem:[%s22879_s0 + $0x3e3] sm:$0x1]  ;;  %v4942_v15 = vrot.slane %v4347_v62, 7  ;;  %v4944_v18 = vrot.slane %v4348_v45, 6 }
 0x303   :  { %v5189_v12 = vsel %vm616_vm4, %v5188_v43, %v5187_v3  ;;  %v4946_v38 = vrot.slane %v4349_v47, 5  ;;  %v4359_v7 = vld [vmem:[%s22879_s0 + $0x3eb] sm:$0x1]  ;;  %v4948_v21 = vrot.slane %v4350_v55, 4  ;;  %v4950_v24 = vrot.slane %v4351_v31, 3  ;;  %v13236_v57 = vld [vmem:[%s22880_s1 + $0x10] sm:$0xff] }
 0x304   :  { %v5191_v37 = vsel %vm619_vm5, %v5190_v49, %v5189_v12  ;;  %v4952_v26 = vrot.slane %v4352_v1, 2  ;;  %v4360_v22 = vld [vmem:[%s22879_s0 + $0x3f3] sm:$0x1]  ;;  %v4943_v54 = vsel %vm604_vm0, %v4942_v15, %v4346_v50  ;;  %v4954_v4 = vrot.slane %v4353_v2, 1  ;;  %v4361_v30 = vld [vmem:[%s22879_s0 + $0x3fb] sm:$0x1] }
 0x305   :  { %v5193_v27 = vsel %vm622_vm6, %v5192_v0, %v5191_v37  ;;  %v4956_v16 = vrot.slane %v4355_v8, 7  ;;  %v4945_v46 = vsel %vm607_vm1, %v4944_v18, %v4943_v54  ;;  %v4958_v60 = vrot.slane %v4356_v9, 6  ;;  %v13235_v31 = vld [vmem:[%s22880_s1 + $0x8] sm:$0xff]  ;;  %v13238_v61 = vld [vmem:[%s22880_s1 + $0x20] sm:$0xff]  ;;  %v13240_v1 = vld [vmem:[%s22880_s1 + $0x30] sm:$0xff] }
 0x306   :  { %v12236_v28 = vpack.c.bf16 %v5193_v27, %v5179_v36  ;;  %v4960_v51 = vrot.slane %v4357_v10, 5  ;;  %v4947_v34 = vsel %vm610_vm2, %v4946_v38, %v4945_v46  ;;  %v4962_v6 = vrot.slane %v4358_v13, 4  ;;  %v13239_v0 = vld [vmem:[%s22880_s1 + $0x28] sm:$0xff]  ;;  %v13241_v2 = vld [vmem:[%s22880_s1 + $0x38] sm:$0xff]  ;;  %v5726_v3 = vld [vmem:[%s22879_s0 + $0x414] sm:$0x1] }
 0x307   :  { %v4957_v35 = vsel %vm604_vm0, %v4956_v16, %v4354_v5  ;;  %v4964_v29 = vrot.slane %v4359_v7, 3  ;;  %v4949_v40 = vsel %vm613_vm3, %v4948_v21, %v4947_v34  ;;  %v4966_v41 = vrot.slane %v4360_v22, 2  ;;  %v5725_v36 = vld [vmem:[%s22879_s0 + $0x40c] sm:$0x1]  ;;  %v5727_v5 = vld [vmem:[%s22879_s0 + $0x41c] sm:$0x1] }
 0x308   :  { %12238 = vmatprep.subr.msk.bf16.mxu1 %vm13442_vm8, %v12236_v28  ;;  %v4959_v62 = vsel %vm607_vm1, %v4958_v60, %v4957_v35  ;;  %v4951_v14 = vsel %vm616_vm4, %v4950_v24, %v4949_v40  ;;  %v4968_v43 = vrot.slane %v4361_v30, 1  ;;  %v5724_v8 = vld [vmem:[%s22879_s0 + $0x404] sm:$0x1]  ;;  %v5729_v10 = vld [vmem:[%s22879_s0 + $0x42c] sm:$0x1]  ;;  %v6334_v27 = vrot.slane %v5726_v3, 6 }
 0x309   :  { %v4961_v42 = vsel %vm610_vm2, %v4960_v51, %v4959_v62  ;;  %v4953_v45 = vsel %vm619_vm5, %v4952_v26, %v4951_v14  ;;  %v5728_v9 = vld [vmem:[%s22879_s0 + $0x424] sm:$0x1]  ;;  %v5730_v12 = vld [vmem:[%s22879_s0 + $0x434] sm:$0x1]  ;;  %v5731_v13 = vld [vmem:[%s22879_s0 + $0x43c] sm:$0x1] }
 0x30a   :  { %v4963_v47 = vsel %vm613_vm3, %v4962_v6, %v4961_v42  ;;  %v4955_v11 = vsel %vm622_vm6, %v4954_v4, %v4953_v45  ;;  %v5732_v15 = vld [vmem:[%s22879_s0 + $0x444] sm:$0x1]  ;;  %v5733_v18 = vld [vmem:[%s22879_s0 + $0x44c] sm:$0x1]  ;;  %v5734_v38 = vld [vmem:[%s22879_s0 + $0x454] sm:$0x1] }
 0x30b   :  { %v4965_v48 = vsel %vm616_vm4, %v4964_v29, %v4963_v47  ;;  %v5735_v37 = vld [vmem:[%s22879_s0 + $0x45c] sm:$0x1]  ;;  %v5736_v7 = vld [vmem:[%s22879_s0 + $0x464] sm:$0x1]  ;;  %v5737_v21 = vld [vmem:[%s22879_s0 + $0x46c] sm:$0x1] }
 0x30c   :  { %v4967_v49 = vsel %vm619_vm5, %v4966_v41, %v4965_v48  ;;  %v5738_v24 = vld [vmem:[%s22879_s0 + $0x474] sm:$0x1]  ;;  %v6332_v26 = vrot.slane %v5725_v36, 7  ;;  %v6336_v22 = vrot.slane %v5727_v5, 5  ;;  %v5739_v54 = vld [vmem:[%s22879_s0 + $0x47c] sm:$0x1] }
 0x30d   :  { %v4969_v50 = vsel %vm622_vm6, %v4968_v43, %v4967_v49  ;;  %v6338_v4 = vrot.slane %v5728_v9, 4  ;;  %v6340_v16 = vrot.slane %v5729_v10, 3  ;;  %v6342_v28 = vrot.slane %v5730_v12, 2  ;;  %v5597_v35 = vld [vmem:[%s22879_s0 + $0xc] sm:$0x1] }
 0x30e   :  { %v12239_v55 = vpack.c.bf16 %v4969_v50, %v4955_v11  ;;  %v6346_v30 = vrot.slane %v5733_v18, 7  ;;  %v6333_v46 = vsel %vm604_vm0, %v6332_v26, %v5724_v8  ;;  %v6348_v60 = vrot.slane %v5734_v38, 6  ;;  %v5596_v43 = vld [vmem:[%s22879_s0 + $0x4] sm:$0x1]  ;;  %v5598_v45 = vld [vmem:[%s22879_s0 + $0x14] sm:$0x1] }
 0x30f   :  { %v6350_v51 = vrot.slane %v5735_v37, 5  ;;  %v6352_v34 = vrot.slane %v5736_v7, 4  ;;  %v6335_v6 = vsel %vm607_vm1, %v6334_v27, %v6333_v46  ;;  %v6344_v29 = vrot.slane %v5731_v13, 1  ;;  %v5599_v50 = vld [vmem:[%s22879_s0 + $0x1c] sm:$0x1] }
 0x310   :  { %12241 = vmatpush3.bf16.xpose.msk.msra.mxu1 %vm13442_vm8, %v12239_v55  ;;  %v6347_v40 = vsel %vm604_vm0, %v6346_v30, %v5732_v15  ;;  %v6354_v62 = vrot.slane %v5737_v21, 3  ;;  %v6337_v41 = vsel %vm610_vm2, %v6336_v22, %v6335_v6  ;;  %v6356_v42 = vrot.slane %v5738_v24, 2  ;;  %v5600_v55 = vld [vmem:[%s22879_s0 + $0x24] sm:$0x1]  ;;  %v5605_v3 = vld [vmem:[%s22879_s0 + $0x4c] sm:$0x1] }
 0x311   :  { %v6349_v14 = vsel %vm607_vm1, %v6348_v60, %v6347_v40  ;;  %v6108_v47 = vrot.slane %v5597_v35, 7  ;;  %v6339_v11 = vsel %vm613_vm3, %v6338_v4, %v6337_v41  ;;  %v6358_v49 = vrot.slane %v5739_v54, 1  ;;  %v5604_v36 = vld [vmem:[%s22879_s0 + $0x44] sm:$0x1]  ;;  %v5606_v5 = vld [vmem:[%s22879_s0 + $0x54] sm:$0x1] }
 0x312   :  { %v6351_v48 = vsel %vm610_vm2, %v6350_v51, %v6349_v14  ;;  %v5607_v8 = vld [vmem:[%s22879_s0 + $0x5c] sm:$0x1]  ;;  %v5608_v13 = vld [vmem:[%s22879_s0 + $0x64] sm:$0x1]  ;;  %v5609_v15 = vld [vmem:[%s22879_s0 + $0x6c] sm:$0x1] }
 0x313   :  { %v6109_v9 = vsel %vm604_vm0, %v6108_v47, %v5596_v43  ;;  %v6110_v18 = vrot.slane %v5598_v45, 6  ;;  %v6112_v38 = vrot.slane %v5599_v50, 5  ;;  %v5610_v7 = vld [vmem:[%s22879_s0 + $0x74] sm:$0x1]  ;;  %v6114_v21 = vrot.slane %v5600_v55, 4 }
 0x314   :  { %v5611_v22 = vld [vmem:[%s22879_s0 + $0x7c] sm:$0x1]  ;;  %v6124_v46 = vrot.slane %v5606_v5, 6  ;;  %v6126_v60 = vrot.slane %v5607_v8, 5  ;;  %v6128_v51 = vrot.slane %v5608_v13, 4 }
 0x315   :  { %v6111_v54 = vsel %vm607_vm1, %v6110_v18, %v6109_v9  ;;  %v5742_v40 = vld [vmem:[%s22879_s0 + $0x494] sm:$0x1]  ;;  %v5744_v43 = vld [vmem:[%s22879_s0 + $0x4a4] sm:$0x1]  ;;  %v5745_v45 = vld [vmem:[%s22879_s0 + $0x4ac] sm:$0x1] }
 0x316   :  { %v6113_v30 = vsel %vm610_vm2, %v6112_v38, %v6111_v54  ;;  %v5746_v50 = vld [vmem:[%s22879_s0 + $0x4b4] sm:$0x1]  ;;  %v5747_v55 = vld [vmem:[%s22879_s0 + $0x4bc] sm:$0x1]  ;;  %v6362_v5 = vrot.slane %v5742_v40, 6  ;;  %v6366_v9 = vrot.slane %v5744_v43, 4 }
 0x317   :  { %11821 = vmatmul.mubr.msk.f32.vlgmr.msra.gmra.mrb[24].mxu1 %vm1058_vm7, %v17358_v53  ;;  %v13237_v53 = vld [vmem:[%s22880_s1 + $0x18] sm:$0xff]  ;;  %v6115_v35 = vsel %vm613_vm3, %v6114_v21, %v6113_v30  ;;  %v6368_v13 = vrot.slane %v5745_v45, 3  ;;  %v6372_v18 = vrot.slane %v5747_v55, 1  ;;  %v5616_v40 = vld [vmem:[%s22879_s0 + $0xa4] sm:$0x1] }
 0x318   :  { %11822 = vmatprep.mubr.msk.f32.mxu1 %vm1058_vm7, %v13235_v31  ;;  %v5618_v45 = vld [vmem:[%s22879_s0 + $0xb4] sm:$0x1] }
 0x319   :  { %v5622_v55 = vld [vmem:[%s22879_s0 + $0xd4] sm:$0x1] }
 0x31b   :  { %11823 = vmatmul.mubr.msk.f32.gmra.mrb[26].mxu1 %vm1058_vm7, %v13235_v31  ;;  %v6341_v31 = vsel %vm616_vm4, %v6340_v16, %v6339_v11  ;;  %v6122_v16 = vrot.slane %v5605_v3, 7  ;;  %v5752_v3 = vld [vmem:[%s22879_s0 + $0x4e4] sm:$0x1] }
 0x31c   :  { %11824 = vmatprep.mubr.msk.f32.mxu1 %vm1058_vm7, %v13236_v57 }
 0x31d   :  { %v6123_v6 = vsel %vm604_vm0, %v6122_v16, %v5604_v36  ;;  %v6380_v16 = vrot.slane %v5752_v3, 4 }
 0x31e   :  { %v6125_v14 = vsel %vm607_vm1, %v6124_v46, %v6123_v6 }
 0x31f   :  { %11825 = vmatmul.mubr.msk.f32.gmra.mrb[28].mxu1 %vm1058_vm7, %v13236_v57  ;;  %v6353_v57 = vsel %vm613_vm3, %v6352_v34, %v6351_v48  ;;  %v5740_v34 = vld [vmem:[%s22879_s0 + $0x484] sm:$0x1]  ;;  %v6127_v48 = vsel %vm610_vm2, %v6126_v60, %v6125_v14 }
 0x320   :  { %11826 = vmatprep.mubr.msk.f32.mxu1 %vm1058_vm7, %v13237_v53 }
 0x323   :  { %11827 = vmatmul.mubr.msk.f32.gmra.mrb[30].mxu1 %vm1058_vm7, %v13237_v53  ;;  %v5601_v53 = vld [vmem:[%s22879_s0 + $0x2c] sm:$0x1] }
 0x324   :  { %11828 = vmatprep.mubr.msk.f32.mxu1 %vm1058_vm7, %v13238_v61  ;;  %v6116_v24 = vrot.slane %v5601_v53, 3  ;;  %v5748_v53 = vld [vmem:[%s22879_s0 + $0x4c4] sm:$0x1] }
 0x326   :  { %v6117_v41 = vsel %vm616_vm4, %v6116_v24, %v6115_v35 }
 0x327   :  { %11829 = vmatmul.mubr.msk.f32.gmra.mrb[32].mxu1 %vm1058_vm7, %v13238_v61  ;;  %v5602_v61 = vld [vmem:[%s22879_s0 + $0x34] sm:$0x1] }
 0x328   :  { %11830 = vmatprep.mubr.msk.f32.mxu1 %vm1058_vm7, %v13239_v0  ;;  %v6118_v26 = vrot.slane %v5602_v61, 2  ;;  %v5749_v61 = vld [vmem:[%s22879_s0 + $0x4cc] sm:$0x1] }
 0x329   :  { %v6374_v21 = vrot.slane %v5749_v61, 7 }
 0x32a   :  { %v6119_v11 = vsel %vm619_vm5, %v6118_v26, %v6117_v41  ;;  %v5613_v26 = vld [vmem:[%s22879_s0 + $0x8c] sm:$0x1] }
 0x32b   :  { %11831 = vmatmul.mubr.msk.f32.gmra.mrb[34].mxu1 %vm1058_vm7, %v13239_v0  ;;  %v5603_v0 = vld [vmem:[%s22879_s0 + $0x3c] sm:$0x1]  ;;  %v6375_v46 = vsel %vm604_vm0, %v6374_v21, %v5748_v53  ;;  %v6136_v41 = vrot.slane %v5613_v26, 7  ;;  %v5626_v21 = vld [vmem:[%s22879_s0 + $0xf4] sm:$0x1] }
 0x32c   :  { %11832 = vmatprep.mubr.msk.f32.mxu1 %vm1058_vm7, %v13240_v1  ;;  %v6120_v4 = vrot.slane %v5603_v0, 1  ;;  %v5750_v0 = vld [vmem:[%s22879_s0 + $0x4d4] sm:$0x1]  ;;  %v5623_v53 = vld [vmem:[%s22879_s0 + $0xdc] sm:$0x1] }
 0x32d   :  { %v6376_v24 = vrot.slane %v5750_v0, 6  ;;  %v6154_v26 = vrot.slane %v5623_v53, 5 }
 0x32f   :  { %11833 = vmatmul.mubr.msk.f32.gmra.mrb[36].mxu1 %vm1058_vm7, %v13240_v1  ;;  %v6343_v1 = vsel %vm619_vm5, %v6342_v28, %v6341_v31  ;;  %v5741_v28 = vld [vmem:[%s22879_s0 + $0x48c] sm:$0x1]  ;;  %v6121_v31 = vsel %vm622_vm6, %v6120_v4, %v6119_v11  ;;  %v6377_v6 = vsel %vm607_vm1, %v6376_v24, %v6375_v46 }
 0x330   :  { %11834 = vmatprep.mubr.msk.f32.mxu1 %vm1058_vm7, %v13241_v2  ;;  %v6345_v10 = vsel %vm622_vm6, %v6344_v29, %v6343_v1  ;;  %v6130_v29 = vrot.slane %v5609_v15, 3  ;;  %v6360_v47 = vrot.slane %v5741_v28, 7  ;;  %v5751_v1 = vld [vmem:[%s22879_s0 + $0x4dc] sm:$0x1]  ;;  %v6370_v15 = vrot.slane %v5746_v50, 2 }
 0x331   :  { %v6378_v4 = vrot.slane %v5751_v1, 5  ;;  %v5612_v28 = vld [vmem:[%s22879_s0 + $0x84] sm:$0x1]  ;;  %v5621_v50 = vld [vmem:[%s22879_s0 + $0xcc] sm:$0x1]  ;;  %v6142_v1 = vrot.slane %v5616_v40, 4 }
 0x333   :  { %11835 = vmatmul.mubr.msk.f32.gmra.mrb[38].mxu1 %vm1058_vm7, %v13241_v2  ;;  %v6355_v2 = vsel %vm616_vm4, %v6354_v62, %v6353_v57  ;;  %v5743_v62 = vld [vmem:[%s22879_s0 + $0x49c] sm:$0x1]  ;;  %v6129_v57 = vsel %vm613_vm3, %v6128_v51, %v6127_v48  ;;  %v5614_v51 = vld [vmem:[%s22879_s0 + $0x94] sm:$0x1] }
 0x334   :  { %5435 = vmatprep.mubr.f32.mxu1 %v22886_v33  ;;  %v6357_v12 = vsel %vm619_vm5, %v6356_v42, %v6355_v2  ;;  %v6132_v42 = vrot.slane %v5610_v7, 2  ;;  %v6361_v2 = vsel %vm604_vm0, %v6360_v47, %v5740_v34  ;;  %v6131_v36 = vsel %vm616_vm4, %v6130_v29, %v6129_v57  ;;  %v5615_v34 = vld [vmem:[%s22879_s0 + $0x9c] sm:$0x1] }
 0x335   :  { %v6359_v37 = vsel %vm622_vm6, %v6358_v49, %v6357_v12  ;;  %v6134_v49 = vrot.slane %v5611_v22, 1  ;;  %v6364_v8 = vrot.slane %v5743_v62, 5  ;;  %v5753_v12 = vld [vmem:[%s22879_s0 + $0x4ec] sm:$0x1]  ;;  %v6363_v7 = vsel %vm607_vm1, %v6362_v5, %v6361_v2  ;;  %v5755_v22 = vld [vmem:[%s22879_s0 + $0x4fc] sm:$0x1] }
 0x336   :  { %v12246_v27 = vpack.c.bf16 %v6359_v37, %v6345_v10  ;;  %v6133_v10 = vsel %vm619_vm5, %v6132_v42, %v6131_v36  ;;  %v5754_v37 = vld [vmem:[%s22879_s0 + $0x4f4] sm:$0x1]  ;;  %v6382_v60 = vrot.slane %v5753_v12, 3  ;;  %v5617_v62 = vld [vmem:[%s22879_s0 + $0xac] sm:$0x1]  ;;  %v6379_v42 = vsel %vm610_vm2, %v6378_v4, %v6377_v6 }
 0x337   :  { %v6135_v38 = vsel %vm622_vm6, %v6134_v49, %v6133_v10  ;;  %v6365_v54 = vsel %vm610_vm2, %v6364_v8, %v6363_v7  ;;  %v6384_v29 = vrot.slane %v5754_v37, 2  ;;  %v6386_v43 = vrot.slane %v5755_v22, 1  ;;  %v5619_v47 = vld [vmem:[%s22879_s0 + $0xbc] sm:$0x1]  ;;  %v5620_v49 = vld [vmem:[%s22879_s0 + $0xc4] sm:$0x1] }
 0x338   :  { %12248 = vmatprep.subr.msk.bf16.mxu0 %vm13442_vm8, %v12246_v27  ;;  %v12249_v27 = vpack.c.bf16 %v6135_v38, %v6121_v31  ;;  %v6367_v30 = vsel %vm613_vm3, %v6366_v9, %v6365_v54  ;;  %v6381_v48 = vsel %vm613_vm3, %v6380_v16, %v6379_v42  ;;  %v6137_v31 = vsel %vm604_vm0, %v6136_v41, %v5612_v28  ;;  %v5624_v36 = vld [vmem:[%s22879_s0 + $0xe4] sm:$0x1]  ;;  %v5625_v12 = vld [vmem:[%s22879_s0 + $0xec] sm:$0x1]  ;;  %v5627_v28 = vld [vmem:[%s22879_s0 + $0xfc] sm:$0x1] }
 0x339   :  { %v6369_v35 = vsel %vm616_vm4, %v6368_v13, %v6367_v30  ;;  %v6383_v57 = vsel %vm616_vm4, %v6382_v60, %v6381_v48  ;;  %v6138_v61 = vrot.slane %v5614_v51, 6  ;;  %v6140_v0 = vrot.slane %v5615_v34, 5  ;;  %v5757_v42 = vld [vmem:[%s22879_s0 + $0x50c] sm:$0x1]  ;;  %v5758_v48 = vld [vmem:[%s22879_s0 + $0x514] sm:$0x1] }
 0x33a   :  { %12251 = vmatpush3.bf16.xpose.msk.msra.mxu0 %vm13442_vm8, %v12249_v27  ;;  %v6371_v14 = vsel %vm619_vm5, %v6370_v15, %v6369_v35  ;;  %v6385_v2 = vsel %vm619_vm5, %v6384_v29, %v6383_v57  ;;  %v6144_v3 = vrot.slane %v5617_v62, 3  ;;  %v6146_v5 = vrot.slane %v5618_v45, 2 }
 0x33b   :  { %v6373_v11 = vsel %vm622_vm6, %v6372_v18, %v6371_v14  ;;  %v6148_v8 = vrot.slane %v5619_v47, 1  ;;  %v6387_v10 = vsel %vm622_vm6, %v6386_v43, %v6385_v2  ;;  %v6139_v13 = vsel %vm607_vm1, %v6138_v61, %v6137_v31  ;;  %v5760_v31 = vld [vmem:[%s22879_s0 + $0x524] sm:$0x1] }
 0x33c   :  { %v6150_v15 = vrot.slane %v5621_v50, 7  ;;  %v6152_v18 = vrot.slane %v5622_v55, 6  ;;  %v12252_v7 = vpack.c.bf16 %v6387_v10, %v6373_v11  ;;  %v6141_v24 = vsel %vm610_vm2, %v6140_v0, %v6139_v13  ;;  %v5756_v11 = vld [vmem:[%s22879_s0 + $0x504] sm:$0x1]  ;;  %v5759_v55 = vld [vmem:[%s22879_s0 + $0x51c] sm:$0x1] }
 0x33d   :  { %v6143_v22 = vsel %vm613_vm3, %v6142_v1, %v6141_v24  ;;  %v6156_v4 = vrot.slane %v5624_v36, 4  ;;  %v6158_v60 = vrot.slane %v5625_v12, 3  ;;  %v6160_v29 = vrot.slane %v5626_v21, 2  ;;  %v5761_v0 = vld [vmem:[%s22879_s0 + $0x52c] sm:$0x1] }
 0x33e   :  { %v6151_v54 = vsel %vm604_vm0, %v6150_v15, %v5620_v49  ;;  %12254 = vmatprep.subr.msk.bf16.mxu0 %vm13442_vm8, %v12252_v7  ;;  %v6145_v30 = vsel %vm616_vm4, %v6144_v3, %v6143_v22  ;;  %v6162_v47 = vrot.slane %v5627_v28, 1  ;;  %v6388_v1 = vrot.slane %v5757_v42, 7  ;;  %v5764_v12 = vld [vmem:[%s22879_s0 + $0x544] sm:$0x1]  ;;  %v5765_v13 = vld [vmem:[%s22879_s0 + $0x54c] sm:$0x1] }
 0x33f   :  { %v6153_v46 = vsel %vm607_vm1, %v6152_v18, %v6151_v54  ;;  %v6147_v35 = vsel %vm619_vm5, %v6146_v5, %v6145_v30  ;;  %v5762_v5 = vld [vmem:[%s22879_s0 + $0x534] sm:$0x1]  ;;  %v5767_v7 = vld [vmem:[%s22879_s0 + $0x55c] sm:$0x1]  ;;  %v6394_v24 = vrot.slane %v5760_v31, 4 }
 0x340   :  { %v6155_v6 = vsel %vm610_vm2, %v6154_v26, %v6153_v46  ;;  %v6149_v41 = vsel %vm622_vm6, %v6148_v8, %v6147_v35  ;;  %v5763_v8 = vld [vmem:[%s22879_s0 + $0x53c] sm:$0x1]  ;;  %v5766_v15 = vld [vmem:[%s22879_s0 + $0x554] sm:$0x1]  ;;  %v6389_v18 = vsel %vm604_vm0, %v6388_v1, %v5756_v11  ;;  %v6396_v26 = vrot.slane %v5761_v0, 3 }
 0x341   :  { %v6157_v14 = vsel %vm613_vm3, %v6156_v4, %v6155_v6  ;;  %v6398_v4 = vrot.slane %v5762_v5, 2  ;;  %v5769_v35 = vld [vmem:[%s22879_s0 + $0x56c] sm:$0x1] }
 0x342   :  { %v6159_v45 = vsel %vm616_vm4, %v6158_v60, %v6157_v14  ;;  %v6402_v60 = vrot.slane %v5765_v13, 7 }
 0x343   :  { %v6161_v50 = vsel %vm619_vm5, %v6160_v29, %v6159_v45  ;;  %v6404_v29 = vrot.slane %v5766_v15, 6 }
 0x344   :  { %v6163_v61 = vsel %vm622_vm6, %v6162_v47, %v6161_v50  ;;  %v6403_v42 = vsel %vm604_vm0, %v6402_v60, %v5764_v12  ;;  %v5633_v60 = vld [vmem:[%s22879_s0 + $0x12c] sm:$0x1] }
 0x345   :  { %v12255_v3 = vpack.c.bf16 %v6163_v61, %v6149_v41  ;;  %v5770_v41 = vld [vmem:[%s22879_s0 + $0x574] sm:$0x1] }
 0x346   :  { %v6412_v5 = vrot.slane %v5770_v41, 2 }
 0x347   :  { %12257 = vmatpush3.bf16.xpose.msk.msra.mxu0 %vm13442_vm8, %v12255_v3 }
 0x396   :  { %v4075_v9 = vpop.f32.mrb[16].mxu0 }
 0x397   :  { %v12476_v38 = vadd.f32 %v4075_v9, %v15772_v59  ;;  %v4077_v37 = vpop.f32.mrb[17].mxu0  ;;  %v6390_v9 = vrot.slane %v5758_v48, 6 }
 0x398   :  { %v12477_v27 = vadd.f32 %v4077_v37, %v15772_v59 }
 0x399   :  { %v11322_v16 = vmul.f32 -1.442695, %v12476_v38  ;;  %v6392_v38 = vrot.slane %v5759_v55, 5  ;;  %v6391_v21 = vsel %vm607_vm1, %v6390_v9, %v6389_v18  ;;  %v6405_v55 = vsel %vm607_vm1, %v6404_v29, %v6403_v42  ;;  %v5629_v9 = vld [vmem:[%s22879_s0 + $0x10c] sm:$0x1] }
 0x39a   :  { %v11323_v51 = vmul.f32 -1.442695, %v12477_v27  ;;  %v4081_v34 = vpop.f32.mrb[18].mxu0 }
 0x39b   :  { %12817 = vpow2.f32 %v11322_v16  ;;  %v12478_v40 = vadd.f32 %v4081_v34, %v15819_v32  ;;  %v4083_v62 = vpop.f32.mrb[19].mxu0  ;;  %v6393_v54 = vsel %vm610_vm2, %v6392_v38, %v6391_v21  ;;  %v6400_v16 = vrot.slane %v5763_v8, 1  ;;  %v5768_v34 = vld [vmem:[%s22879_s0 + $0x564] sm:$0x1]  ;;  %v5630_v38 = vld [vmem:[%s22879_s0 + $0x114] sm:$0x1] }
 0x39c   :  { %12819 = vpow2.f32 %v11323_v51  ;;  %v12479_v43 = vadd.f32 %v4083_v62, %v15819_v32  ;;  %v6395_v46 = vsel %vm613_vm3, %v6394_v24, %v6393_v54  ;;  %v6408_v1 = vrot.slane %v5768_v34, 4  ;;  %v5631_v54 = vld [vmem:[%s22879_s0 + $0x11c] sm:$0x1] }
 0x39d   :  { %v11324_v49 = vmul.f32 -1.442695, %v12478_v40  ;;  %v6397_v6 = vsel %vm616_vm4, %v6396_v26, %v6395_v46  ;;  %v5628_v26 = vld [vmem:[%s22879_s0 + $0x104] sm:$0x1] }
 0x39e   :  { %v11325_v57 = vmul.f32 -1.442695, %v12479_v43  ;;  %v4087_v53 = vpop.f32.mrb[20].mxu0  ;;  %v6399_v14 = vsel %vm619_vm5, %v6398_v4, %v6397_v6  ;;  %v6406_v43 = vrot.slane %v5767_v7, 5  ;;  %v5632_v4 = vld [vmem:[%s22879_s0 + $0x124] sm:$0x1] }
 0x39f   :  { %12821 = vpow2.f32 %v11324_v49  ;;  %v12480_v2 = vadd.f32 %v4087_v53, %v15830_v44  ;;  %v4089_v36 = vpop.f32.mrb[21].mxu0  ;;  %v5771_v49 = vld [vmem:[%s22879_s0 + $0x57c] sm:$0x1]  ;;  %v6401_v50 = vsel %vm622_vm6, %v6400_v16, %v6399_v14  ;;  %v6164_v16 = vrot.slane %v5629_v9, 7 }
 0x3a0   :  { %12823 = vpow2.f32 %v11325_v57  ;;  %v12481_v10 = vadd.f32 %v4089_v36, %v15830_v44  ;;  %v6407_v61 = vsel %vm610_vm2, %v6406_v43, %v6405_v55  ;;  %v6414_v8 = vrot.slane %v5771_v49, 1  ;;  %v5635_v43 = vld [vmem:[%s22879_s0 + $0x13c] sm:$0x1]  ;;  %v5638_v55 = vld [vmem:[%s22879_s0 + $0x154] sm:$0x1] }
 0x3a1   :  { %v11326_v37 = vmul.f32 -1.442695, %v12480_v2  ;;  %v6410_v2 = vrot.slane %v5769_v35, 3  ;;  %v6409_v18 = vsel %vm613_vm3, %v6408_v1, %v6407_v61  ;;  %v6168_v49 = vrot.slane %v5631_v54, 5 }
 0x3a2   :  { %v11327_v27 = vmul.f32 -1.442695, %v12481_v10  ;;  %v4093_v22 = vpop.f32.mrb[22].mxu0 }
 0x3a3   :  { %12825 = vpow2.f32 %v11326_v37  ;;  %v12482_v28 = vadd.f32 %v4093_v22, %v15867_v17  ;;  %v4095_v30 = vpop.f32.mrb[23].mxu0  ;;  %v6411_v24 = vsel %vm616_vm4, %v6410_v2, %v6409_v18  ;;  %v5636_v2 = vld [vmem:[%s22879_s0 + $0x144] sm:$0x1] }
 0x3a4   :  { %12827 = vpow2.f32 %v11327_v27  ;;  %v12483_v51 = vadd.f32 %v4095_v30, %v15867_v17  ;;  %v6413_v22 = vsel %vm619_vm5, %v6412_v5, %v6411_v24  ;;  %v6180_v24 = vrot.slane %v5638_v55, 6 }
 0x3a5   :  { %v12818_v40 = vpop.eup %12817  ;;  %v11328_v62 = vmul.f32 -1.442695, %v12482_v28  ;;  %v6415_v46 = vsel %vm622_vm6, %v6414_v8, %v6413_v22  ;;  %v5643_v22 = vld [vmem:[%s22879_s0 + $0x17c] sm:$0x1] }
 0x3a6   :  { %v12820_v45 = vpop.eup %12819  ;;  %v4174_v47 = vadd.f32 1.0, %v12818_v40  ;;  %v11329_v11 = vmul.f32 -1.442695, %v12483_v51  ;;  %v4099_v48 = vpop.f32.mrb[24].mxu0  ;;  %v6166_v51 = vrot.slane %v5630_v38, 6  ;;  %v12258_v40 = vpack.c.bf16 %v6415_v46, %v6401_v50 }
 0x3a7   :  { %v4175_v31 = vadd.f32 1.0, %v12820_v45  ;;  %12829 = vpow2.f32 %v11328_v62  ;;  %v12484_v57 = vadd.f32 %v4099_v48, %v15883_v39  ;;  %v4101_v53 = vpop.f32.mrb[25].mxu0  ;;  %v5634_v62 = vld [vmem:[%s22879_s0 + $0x134] sm:$0x1]  ;;  %v6165_v45 = vsel %vm604_vm0, %v6164_v16, %v5628_v26  ;;  %v5773_v16 = vld [vmem:[%s22879_s0 + $0x58c] sm:$0x1] }
 0x3a8   :  { %12831 = vrcp.f32 %v4174_v47  ;;  %v12485_v0 = vadd.f32 %v4101_v53, %v15883_v39  ;;  %12260 = vmatprep.subr.msk.bf16.mxu0 %vm13442_vm8, %v12258_v40  ;;  %v6167_v48 = vsel %vm607_vm1, %v6166_v51, %v6165_v45  ;;  %v6174_v53 = vrot.slane %v5634_v62, 2  ;;  %v5772_v51 = vld [vmem:[%s22879_s0 + $0x584] sm:$0x1]  ;;  %v5775_v62 = vld [vmem:[%s22879_s0 + $0x59c] sm:$0x1] }
 0x3a9   :  { %v12822_v36 = vpop.eup %12821  ;;  %12833 = vrcp.f32 %v4175_v31  ;;  %v11330_v3 = vmul.f32 -1.442695, %v12484_v57  ;;  %v6170_v31 = vrot.slane %v5632_v4, 4  ;;  %v6172_v57 = vrot.slane %v5633_v60, 3 }
 0x3aa   :  { %v12824_v10 = vpop.eup %12823  ;;  %v4176_v12 = vadd.f32 1.0, %v12822_v36  ;;  %12835 = vpow2.f32 %v11329_v11  ;;  %v11331_v13 = vmul.f32 -1.442695, %v12485_v0  ;;  %v4105_v15 = vpop.f32.mrb[26].mxu0  ;;  %v5637_v11 = vld [vmem:[%s22879_s0 + $0x14c] sm:$0x1]  ;;  %v6169_v36 = vsel %vm610_vm2, %v6168_v49, %v6167_v48 }
 0x3ab   :  { %v4177_v37 = vadd.f32 1.0, %v12824_v10  ;;  %12837 = vpow2.f32 %v11330_v3  ;;  %v12486_v7 = vadd.f32 %v4105_v15, %v15902_v58  ;;  %v4107_v21 = vpop.f32.mrb[27].mxu0  ;;  %v6176_v3 = vrot.slane %v5635_v43, 1  ;;  %v5639_v10 = vld [vmem:[%s22879_s0 + $0x15c] sm:$0x1] }
 0x3ac   :  { %12839 = vrcp.f32 %v4176_v12  ;;  %v12487_v27 = vadd.f32 %v4107_v21, %v15902_v58  ;;  %v5640_v12 = vld [vmem:[%s22879_s0 + $0x164] sm:$0x1]  ;;  %v6178_v15 = vrot.slane %v5637_v11, 7  ;;  %v6416_v43 = vrot.slane %v5773_v16, 7 }
 0x3ad   :  { %v12826_v28 = vpop.eup %12825  ;;  %12841 = vrcp.f32 %v4177_v37  ;;  %v11332_v30 = vmul.f32 -1.442695, %v12486_v7  ;;  %v5641_v37 = vld [vmem:[%s22879_s0 + $0x16c] sm:$0x1]  ;;  %v5642_v7 = vld [vmem:[%s22879_s0 + $0x174] sm:$0x1] }
 0x3ae   :  { %v12828_v34 = vpop.eup %12827  ;;  %v4178_v35 = vadd.f32 1.0, %v12826_v28  ;;  %12843 = vpow2.f32 %v11331_v13  ;;  %v11333_v6 = vmul.f32 -1.442695, %v12487_v27  ;;  %v4111_v29 = vpop.f32.mrb[28].mxu0  ;;  %v6171_v13 = vsel %vm613_vm3, %v6170_v31, %v6169_v36  ;;  %v5776_v31 = vld [vmem:[%s22879_s0 + $0x5a4] sm:$0x1] }
 0x3af   :  { %v4179_v41 = vadd.f32 1.0, %v12828_v34  ;;  %12845 = vpow2.f32 %v11332_v30  ;;  %v12488_v14 = vadd.f32 %v4111_v29, %v15924_v25  ;;  %v4113_v42 = vpop.f32.mrb[29].mxu0  ;;  %v6173_v21 = vsel %vm616_vm4, %v6172_v57, %v6171_v13  ;;  %v5774_v34 = vld [vmem:[%s22879_s0 + $0x594] sm:$0x1]  ;;  %v5777_v57 = vld [vmem:[%s22879_s0 + $0x5ac] sm:$0x1] }
 0x3b0   :  { %12847 = vrcp.f32 %v4178_v35  ;;  %v12489_v47 = vadd.f32 %v4113_v42, %v15924_v25  ;;  %v6175_v54 = vsel %vm619_vm5, %v6174_v53, %v6173_v21  ;;  %v6179_v4 = vsel %vm604_vm0, %v6178_v15, %v5636_v2 }
 0x3b1   :  { %v12830_v50 = vpop.eup %12829  ;;  %12849 = vrcp.f32 %v4179_v41  ;;  %v6177_v46 = vsel %vm622_vm6, %v6176_v3, %v6175_v54  ;;  %v6181_v60 = vsel %vm607_vm1, %v6180_v24, %v6179_v4  ;;  %v6184_v29 = vrot.slane %v5640_v12, 4  ;;  %v5778_v3 = vld [vmem:[%s22879_s0 + $0x5b4] sm:$0x1]  ;;  %v5783_v54 = vld [vmem:[%s22879_s0 + $0x5dc] sm:$0x1] }
 0x3b2   :  { %v18278_v61 = vpop.eup %12831  ;;  %v4180_v0 = vadd.f32 1.0, %v12830_v50  ;;  %12851 = vpow2.f32 %v11333_v6  ;;  %v4117_v1 = vpop.f32.mrb[30].mxu0  ;;  %v6182_v6 = vrot.slane %v5639_v10, 5  ;;  %v6186_v40 = vrot.slane %v5641_v37, 3 }
 0x3b3   :  { %v18284_v5 = vpop.eup %12833  ;;  %12853 = vtanh.f32 %v12488_v14  ;;  %v12490_v8 = vadd.f32 %v4117_v1, %v15937_v23  ;;  %v4119_v9 = vpop.f32.mrb[31].mxu0  ;;  %v6188_v14 = vrot.slane %v5642_v7, 2  ;;  %v6190_v42 = vrot.slane %v5643_v22, 1  ;;  %v5782_v7 = vld [vmem:[%s22879_s0 + $0x5d4] sm:$0x1] }
 0x3b4   :  { %v12836_v18 = vpop.eup %12835  ;;  %12855 = vrcp.f32 %v4180_v0  ;;  %v12491_v38 = vadd.f32 %v4119_v9, %v15937_v23  ;;  %v6183_v11 = vsel %vm610_vm2, %v6182_v6, %v6181_v60  ;;  %v6418_v48 = vrot.slane %v5774_v34, 6  ;;  %v5780_v22 = vld [vmem:[%s22879_s0 + $0x5c4] sm:$0x1] }
 0x3b5   :  { %v12838_v26 = vpop.eup %12837  ;;  %v4181_v27 = vadd.f32 1.0, %v12836_v18  ;;  %12857 = vtanh.f32 %v12489_v47  ;;  %v6185_v55 = vsel %vm613_vm3, %v6184_v29, %v6183_v11  ;;  %v6417_v53 = vsel %vm604_vm0, %v6416_v43, %v5772_v51  ;;  %v5784_v29 = vld [vmem:[%s22879_s0 + $0x5e4] sm:$0x1] }
 0x3b6   :  { %v18310_v28 = vpop.eup %12839  ;;  %v4182_v30 = vadd.f32 1.0, %v12838_v26  ;;  %12859 = vtanh.f32 %v12490_v8  ;;  %v6420_v0 = vrot.slane %v5775_v62, 5  ;;  %v6187_v36 = vsel %vm616_vm4, %v6186_v40, %v6185_v55  ;;  %v5779_v8 = vld [vmem:[%s22879_s0 + $0x5bc] sm:$0x1]  ;;  %v5645_v55 = vld [vmem:[%s22879_s0 + $0x18c] sm:$0x1] }
 0x3b7   :  { %v18320_v35 = vpop.eup %12841  ;;  %12861 = vrcp.f32 %v4181_v27  ;;  %v6419_v9 = vsel %vm607_vm1, %v6418_v48, %v6417_v53  ;;  %v6189_v13 = vsel %vm619_vm5, %v6188_v14, %v6187_v36  ;;  %v6422_v21 = vrot.slane %v5776_v31, 4 }
 0x3b8   :  { %v12844_v41 = vpop.eup %12843  ;;  %12863 = vrcp.f32 %v4182_v30  ;;  %v6421_v15 = vsel %vm610_vm2, %v6420_v0, %v6419_v9  ;;  %v6191_v37 = vsel %vm622_vm6, %v6190_v42, %v6189_v13  ;;  %v6424_v24 = vrot.slane %v5777_v57, 3  ;;  %v5648_v9 = vld [vmem:[%s22879_s0 + $0x1a4] sm:$0x1] }
 0x3b9   :  { %v12846_v45 = vpop.eup %12845  ;;  %v4183_v47 = vadd.f32 1.0, %v12844_v41  ;;  %12865 = vtanh.f32 %v12491_v38  ;;  %v12261_v27 = vpack.c.bf16 %v6191_v37, %v6177_v46  ;;  %v6426_v4 = vrot.slane %v5778_v3, 2 }
 0x3ba   :  { %v12848_v49 = vpop.eup %12847  ;;  %v4184_v50 = vadd.f32 1.0, %v12846_v45  ;;  %v6428_v16 = vrot.slane %v5779_v8, 1  ;;  %v6423_v51 = vsel %vm613_vm3, %v6422_v21, %v6421_v15  ;;  %v6432_v62 = vrot.slane %v5782_v7, 6  ;;  %v5651_v7 = vld [vmem:[%s22879_s0 + $0x1bc] sm:$0x1] }
 0x3bb   :  { %v12850_v1 = vpop.eup %12849  ;;  %v4214_v2 = vmul.f32 %v12848_v49, %v17207_v19  ;;  %12867 = vrcp.f32 %v4183_v47  ;;  %v5781_v19 = vld [vmem:[%s22879_s0 + $0x5cc] sm:$0x1]  ;;  %12263 = vmatpush3.bf16.xpose.msk.msra.mxu0 %vm13442_vm8, %v12261_v27  ;;  %v6425_v40 = vsel %vm616_vm4, %v6424_v24, %v6423_v51  ;;  %v6434_v45 = vrot.slane %v5783_v54, 5  ;;  %v5654_v24 = vld [vmem:[%s22879_s0 + $0x1d4] sm:$0x1] }
 0x3bc   :  { %v12852_v10 = vpop.eup %12851  ;;  %v4215_v12 = vmul.f32 %v12850_v1, %v17229_v56  ;;  %12869 = vrcp.f32 %v4184_v50  ;;  %v6430_v34 = vrot.slane %v5781_v19, 7  ;;  %v6427_v42 = vsel %vm619_vm5, %v6426_v4, %v6425_v40  ;;  %v5644_v50 = vld [vmem:[%s22879_s0 + $0x184] sm:$0x1]  ;;  %v5646_v1 = vld [vmem:[%s22879_s0 + $0x194] sm:$0x1] }
 0x3bd   :  { %v12854_v18 = vpop.eup %12853  ;;  %v4185_v38 = vadd.f32 1.0, %v12852_v10  ;;  %v6429_v49 = vsel %vm622_vm6, %v6428_v16, %v6427_v42  ;;  %v6436_v53 = vrot.slane %v5784_v29, 4  ;;  %v5649_v10 = vld [vmem:[%s22879_s0 + $0x1ac] sm:$0x1]  ;;  %v6192_v15 = vrot.slane %v5645_v55, 7 }
 0x3be   :  { %v12856_v56 = vpop.eup %12855  ;;  %v4218_v26 = vmul.f32 %v12854_v18, %v18278_v61  ;;  %v6431_v43 = vsel %vm604_vm0, %v6430_v34, %v5780_v22  ;;  %v5653_v21 = vld [vmem:[%s22879_s0 + $0x1cc] sm:$0x1]  ;;  %v5655_v22 = vld [vmem:[%s22879_s0 + $0x1dc] sm:$0x1]  ;;  %v5656_v54 = vld [vmem:[%s22879_s0 + $0x1e4] sm:$0x1] }
 0x3bf   :  { %v12858_v30 = vpop.eup %12857  ;;  %v4216_v60 = vmul.f32 %v12856_v56, %v17241_v52  ;;  %12871 = vrcp.f32 %v4185_v38  ;;  %v5785_v52 = vld [vmem:[%s22879_s0 + $0x5ec] sm:$0x1]  ;;  %v6433_v57 = vsel %vm607_vm1, %v6432_v62, %v6431_v43  ;;  %v6194_v56 = vrot.slane %v5646_v1, 6  ;;  %v5652_v51 = vld [vmem:[%s22879_s0 + $0x1c4] sm:$0x1] }
 0x3c0   :  { %v12860_v6 = vpop.eup %12859  ;;  %v18362_v61 = vadd.f32 %v4218_v26, %v4214_v2  ;;  %v4219_v46 = vmul.f32 %v12858_v30, %v18284_v5  ;;  %v5786_v5 = vld [vmem:[%s22879_s0 + $0x5f4] sm:$0x1]  ;;  %v6438_v0 = vrot.slane %v5785_v52, 3  ;;  %v5647_v2 = vld [vmem:[%s22879_s0 + $0x19c] sm:$0x1]  ;;  %v6435_v3 = vsel %vm610_vm2, %v6434_v45, %v6433_v57 }
 0x3c1   :  { %v12862_v41 = vpop.eup %12861  ;;  %v4220_v14 = vmul.f32 %v12860_v6, %v18310_v28  ;;  %v5787_v28 = vld [vmem:[%s22879_s0 + $0x5fc] sm:$0x1]  ;;  %v6440_v8 = vrot.slane %v5786_v5, 2  ;;  %v6437_v13 = vsel %vm613_vm3, %v6436_v53, %v6435_v3  ;;  %v6196_v26 = vrot.slane %v5647_v2, 5  ;;  %v5657_v34 = vld [vmem:[%s22879_s0 + $0x1ec] sm:$0x1] }
 0x3c2   :  { %v18380_v47 = vpop.eup %12863  ;;  %v4217_v11 = vmul.f32 %v12862_v41, %v17264_v20  ;;  %12873 = vtanh.f32 %v18362_v61  ;;  %v18384_v48 = vadd.f32 %v4219_v46, %v4215_v12  ;;  %v6442_v19 = vrot.slane %v5787_v28, 1  ;;  %v5658_v40 = vld [vmem:[%s22879_s0 + $0x1f4] sm:$0x1] }
 0x3c3   :  { %v12866_v31 = vpop.eup %12865  ;;  %v18396_v20 = vadd.f32 %v4220_v14, %v4216_v60  ;;  %v6439_v37 = vsel %vm616_vm4, %v6438_v0, %v6437_v13  ;;  %v6193_v4 = vsel %vm604_vm0, %v6192_v15, %v5644_v50  ;;  %v6198_v16 = vrot.slane %v5648_v9, 4  ;;  %v5659_v14 = vld [vmem:[%s22879_s0 + $0x1fc] sm:$0x1] }
 0x3c4   :  { %12875 = vtanh.f32 %v18384_v48  ;;  %v4221_v36 = vmul.f32 %v12866_v31, %v18320_v35  ;;  %v5650_v35 = vld [vmem:[%s22879_s0 + $0x1b4] sm:$0x1]  ;;  %v6441_v27 = vsel %vm619_vm5, %v6440_v8, %v6439_v37  ;;  %v6200_v30 = vrot.slane %v5649_v10, 3 }
 0x3c5   :  { %v12868_v12 = vpop.eup %12867  ;;  %12877 = vtanh.f32 %v18396_v20  ;;  %v6443_v60 = vsel %vm622_vm6, %v6442_v19, %v6441_v27  ;;  %v6195_v6 = vsel %vm607_vm1, %v6194_v56, %v6193_v4  ;;  %v6202_v46 = vrot.slane %v5650_v35, 2  ;;  %v13246_v27 = vld [vmem:[%s22882_s2 + $0x20] sm:$0xff]  ;;  %v13249_v4 = vld [vmem:[%s22882_s2 + $0x38] sm:$0xff] }
 0x3c6   :  { %v12870_v18 = vpop.eup %12869  ;;  %v18419_v38 = vadd.f32 %v4221_v36, %v4217_v11  ;;  %v12264_v52 = vpack.c.bf16 %v6443_v60, %v6429_v49  ;;  %v6197_v62 = vsel %vm610_vm2, %v6196_v26, %v6195_v6  ;;  %v6206_v41 = vrot.slane %v5653_v21, 7  ;;  %v13245_v26 = vld [vmem:[%s22882_s2 + $0x18] sm:$0xff]  ;;  %v5797_v60 = vld [vmem:[%s22879_s0 + $0x64c] sm:$0x1] }
 0x3c7   :  { %v6199_v5 = vsel %vm613_vm3, %v6198_v16, %v6197_v62  ;;  %v6208_v42 = vrot.slane %v5654_v24, 6  ;;  %v6210_v43 = vrot.slane %v5655_v22, 5  ;;  %v6212_v45 = vrot.slane %v5656_v54, 4  ;;  %v13247_v22 = vld [vmem:[%s22882_s2 + $0x28] sm:$0xff]  ;;  %v13248_v54 = vld [vmem:[%s22882_s2 + $0x30] sm:$0xff]  ;;  %v18513_v16 = vld [vmem:[%s22880_s1] sm:$0xff] }
 0x3c8   :  { %12879 = vtanh.f32 %v18419_v38  ;;  %12266 = vmatprep.subr.msk.bf16.mxu0 %vm13442_vm8, %v12264_v52  ;;  %v6201_v11 = vsel %vm616_vm4, %v6200_v30, %v6199_v5  ;;  %v6204_v28 = vrot.slane %v5651_v7, 1  ;;  %v6207_v49 = vsel %vm604_vm0, %v6206_v41, %v5652_v51  ;;  %v5789_v30 = vld [vmem:[%s22879_s0 + $0x60c] sm:$0x1]  ;;  %v5790_v51 = vld [vmem:[%s22879_s0 + $0x614] sm:$0x1] }
 0x3c9   :  { %v12872_v29 = vpop.eup %12871  ;;  %v6214_v50 = vrot.slane %v5657_v34, 3  ;;  %v6203_v31 = vsel %vm619_vm5, %v6202_v46, %v6201_v11  ;;  %v6209_v57 = vsel %vm607_vm1, %v6208_v42, %v6207_v49  ;;  %v6216_v53 = vrot.slane %v5658_v40, 2  ;;  %v5798_v34 = vld [vmem:[%s22879_s0 + $0x654] sm:$0x1]  ;;  %v5791_v52 = vld [vmem:[%s22879_s0 + $0x61c] sm:$0x1] }
 0x3ca   :  { %v6211_v0 = vsel %vm610_vm2, %v6210_v43, %v6209_v57  ;;  %v6218_v1 = vrot.slane %v5659_v14, 1  ;;  %v6205_v8 = vsel %vm622_vm6, %v6204_v28, %v6203_v31  ;;  %v6444_v6 = vrot.slane %v5789_v30, 7  ;;  %v5796_v40 = vld [vmem:[%s22879_s0 + $0x644] sm:$0x1]  ;;  %v5799_v41 = vld [vmem:[%s22879_s0 + $0x65c] sm:$0x1] }
 0x3cb   :  { %v6213_v36 = vsel %vm613_vm3, %v6212_v45, %v6211_v0  ;;  %v6458_v46 = vrot.slane %v5797_v60, 7  ;;  %v5792_v62 = vld [vmem:[%s22879_s0 + $0x624] sm:$0x1]  ;;  %v5793_v42 = vld [vmem:[%s22879_s0 + $0x62c] sm:$0x1]  ;;  %v6446_v45 = vrot.slane %v5790_v51, 6 }
 0x3cc   :  { %v12874_v55 = vpop.eup %12873  ;;  %v6215_v9 = vsel %vm616_vm4, %v6214_v50, %v6213_v36  ;;  %v5800_v14 = vld [vmem:[%s22879_s0 + $0x664] sm:$0x1]  ;;  %v5801_v43 = vld [vmem:[%s22879_s0 + $0x66c] sm:$0x1]  ;;  %v6448_v11 = vrot.slane %v5791_v52, 5  ;;  %v6450_v50 = vrot.slane %v5792_v62, 4 }
 0x3cd   :  { %v4230_v10 = vmul.f32 %v12874_v55, %v18380_v47  ;;  %v6217_v19 = vsel %vm619_vm5, %v6216_v53, %v6215_v9  ;;  %v13242_v47 = vld [vmem:[%s22882_s2] sm:$0xff]  ;;  %v5794_v28 = vld [vmem:[%s22879_s0 + $0x634] sm:$0x1]  ;;  %v6452_v55 = vrot.slane %v5793_v42, 3  ;;  %v6459_v31 = vsel %vm604_vm0, %v6458_v46, %v5796_v40  ;;  %v5795_v57 = vld [vmem:[%s22879_s0 + $0x63c] sm:$0x1] }
 0x3ce   :  { %v12876_v2 = vpop.eup %12875  ;;  %v6219_v35 = vsel %vm622_vm6, %v6218_v1, %v6217_v19  ;;  %v5802_v49 = vld [vmem:[%s22879_s0 + $0x674] sm:$0x1]  ;;  %v5803_v53 = vld [vmem:[%s22879_s0 + $0x67c] sm:$0x1]  ;;  %v6454_v1 = vrot.slane %v5794_v28, 2  ;;  %v6464_v9 = vrot.slane %v5800_v14, 4 }
 0x3cf   :  { %v12878_v3 = vpop.eup %12877  ;;  %v12267_v7 = vpack.c.bf16 %v6219_v35, %v6205_v8  ;;  %v4231_v21 = vmul.f32 %v12876_v2, %v12868_v12  ;;  %v13244_v12 = vld [vmem:[%s22882_s2 + $0x10] sm:$0xff]  ;;  %v6460_v2 = vrot.slane %v5798_v34, 6  ;;  %v6462_v8 = vrot.slane %v5799_v41, 5  ;;  %v5667_v51 = vld [vmem:[%s22879_s0 + $0x23c] sm:$0x1] }
 0x3d0   :  { %v4232_v13 = vmul.f32 %v12878_v3, %v12870_v18  ;;  %v13243_v18 = vld [vmem:[%s22882_s2 + $0x8] sm:$0xff]  ;;  %v6456_v3 = vrot.slane %v5795_v57, 1  ;;  %v6466_v19 = vrot.slane %v5801_v43, 3  ;;  %v6468_v35 = vrot.slane %v5802_v49, 2  ;;  %v5666_v30 = vld [vmem:[%s22879_s0 + $0x234] sm:$0x1] }
 0x3d1   :  { %12269 = vmatpush3.bf16.xpose.msk.msra.mxu0 %vm13442_vm8, %v12267_v7  ;;  %v5668_v34 = vld [vmem:[%s22879_s0 + $0x244] sm:$0x1]  ;;  %v5670_v46 = vld [vmem:[%s22879_s0 + $0x254] sm:$0x1]  ;;  %v5671_v40 = vld [vmem:[%s22879_s0 + $0x25c] sm:$0x1] }
 0x3d2   :  { %v12880_v15 = vpop.eup %12879  ;;  %v12244_v37 = vpack.c.bf16 %v4232_v13, %v4230_v10  ;;  %v6461_v13 = vsel %vm607_vm1, %v6460_v2, %v6459_v31  ;;  %v5672_v62 = vld [vmem:[%s22879_s0 + $0x264] sm:$0x1]  ;;  %v5673_v42 = vld [vmem:[%s22879_s0 + $0x26c] sm:$0x1]  ;;  %v5674_v43 = vld [vmem:[%s22879_s0 + $0x274] sm:$0x1] }
 0x3d3   :  { %v4233_v24 = vmul.f32 %v12880_v15, %v12872_v29  ;;  %v5788_v29 = vld [vmem:[%s22879_s0 + $0x604] sm:$0x1]  ;;  %v5661_v15 = vld [vmem:[%s22879_s0 + $0x20c] sm:$0x1]  ;;  %v6463_v7 = vsel %vm610_vm2, %v6462_v8, %v6461_v13  ;;  %v5675_v28 = vld [vmem:[%s22879_s0 + $0x27c] sm:$0x1] }
 0x3d4   :  { %v6445_v5 = vsel %vm604_vm0, %v6444_v6, %v5788_v29  ;;  %v5669_v6 = vld [vmem:[%s22879_s0 + $0x24c] sm:$0x1]  ;;  %v6236_v31 = vrot.slane %v5670_v46, 6  ;;  %v6232_v2 = vrot.slane %v5667_v51, 1  ;;  %v6246_v13 = vrot.slane %v5675_v28, 1 }
 0x3d5   :  { %v12242_v56 = vpack.c.bf16 %v4233_v24, %v4231_v21  ;;  %v6447_v0 = vsel %vm607_vm1, %v6446_v45, %v6445_v5  ;;  %v6470_v21 = vrot.slane %v5803_v53, 1  ;;  %v5660_v24 = vld [vmem:[%s22879_s0 + $0x204] sm:$0x1]  ;;  %v6238_v53 = vrot.slane %v5671_v40, 5 }
 0x3d6   :  { %v6449_v36 = vsel %vm610_vm2, %v6448_v11, %v6447_v0  ;;  %v6240_v0 = vrot.slane %v5672_v62, 4  ;;  %v5812_v40 = vld [vmem:[%s22879_s0 + $0x6c4] sm:$0x1]  ;;  %v5817_v62 = vld [vmem:[%s22879_s0 + $0x6ec] sm:$0x1] }
 0x3d7   :  { %12243 = vmatprep.subr.bf16.mxu1 %v12242_v56  ;;  %v6451_v10 = vsel %vm613_vm3, %v6450_v50, %v6449_v36  ;;  %v6220_v56 = vrot.slane %v5661_v15, 7  ;;  %v6230_v50 = vrot.slane %v5666_v30, 2  ;;  %v5806_v15 = vld [vmem:[%s22879_s0 + $0x694] sm:$0x1] }
 0x3d8   :  { %12245 = vmatpush1.bf16.msra.mxu1 %v12244_v37  ;;  %v6453_v37 = vsel %vm616_vm4, %v6452_v55, %v6451_v10  ;;  %v6234_v55 = vrot.slane %v5669_v6, 7  ;;  %v6244_v10 = vrot.slane %v5674_v43, 2  ;;  %v5818_v43 = vld [vmem:[%s22879_s0 + $0x6f4] sm:$0x1] }
 0x3d9   :  { %v6221_v29 = vsel %vm604_vm0, %v6220_v56, %v5660_v24  ;;  %v5808_v24 = vld [vmem:[%s22879_s0 + $0x6a4] sm:$0x1]  ;;  %v5809_v56 = vld [vmem:[%s22879_s0 + $0x6ac] sm:$0x1] }
 0x3da   :  { %v6235_v36 = vsel %vm604_vm0, %v6234_v55, %v5668_v34  ;;  %v5816_v34 = vld [vmem:[%s22879_s0 + $0x6e4] sm:$0x1]  ;;  %v6478_v46 = vrot.slane %v5808_v24, 4  ;;  %v5685_v24 = vld [vmem:[%s22879_s0 + $0x2cc] sm:$0x1] }
 0x3db   :  { %11374 = vmatmul.mubr.msk.f32.vlgmr.msra.gmra.mrb[24].mxu1 %vm1260_vm9, %v13242_v47  ;;  %v6455_v47 = vsel %vm619_vm5, %v6454_v1, %v6453_v37 }
 0x3dc   :  { %5441 = vmatprep.mubr.f32.mxu1 %v22886_v33 }
 0x3df   :  { %11375 = vmatmul.mubr.msk.f32.gmra.mrb[26].mxu1 %vm1260_vm9, %v13243_v18  ;;  %v6465_v18 = vsel %vm613_vm3, %v6464_v9, %v6463_v7  ;;  %v6237_v9 = vsel %vm607_vm1, %v6236_v31, %v6235_v36  ;;  %v6492_v31 = vrot.slane %v5816_v34, 4  ;;  %v5676_v36 = vld [vmem:[%s22879_s0 + $0x284] sm:$0x1] }
 0x3e0   :  { %5447 = vmatprep.mubr.f32.mxu1 %v22886_v33  ;;  %v6239_v7 = vsel %vm610_vm2, %v6238_v53, %v6237_v9  ;;  %v5678_v53 = vld [vmem:[%s22879_s0 + $0x294] sm:$0x1] }
 0x3e3   :  { %11376 = vmatmul.mubr.msk.f32.gmra.mrb[28].mxu1 %vm1260_vm9, %v13244_v12  ;;  %v5662_v12 = vld [vmem:[%s22879_s0 + $0x214] sm:$0x1] }
 0x3e4   :  { %5453 = vmatprep.mubr.f32.mxu1 %v22886_v33  ;;  %v6222_v41 = vrot.slane %v5662_v12, 6  ;;  %v5811_v12 = vld [vmem:[%s22879_s0 + $0x6bc] sm:$0x1] }
 0x3e6   :  { %v6223_v49 = vsel %vm607_vm1, %v6222_v41, %v6221_v29  ;;  %v6480_v29 = vrot.slane %v5809_v56, 3  ;;  %v5686_v56 = vld [vmem:[%s22879_s0 + $0x2d4] sm:$0x1] }
 0x3e7   :  { %11377 = vmatmul.mubr.msk.f32.gmra.mrb[30].mxu1 %vm1260_vm9, %v13245_v26  ;;  %v5663_v26 = vld [vmem:[%s22879_s0 + $0x21c] sm:$0x1] }
 0x3e8   :  { %5459 = vmatprep.mubr.f32.mxu1 %v22886_v33  ;;  %v6224_v14 = vrot.slane %v5663_v26, 5  ;;  %v5813_v26 = vld [vmem:[%s22879_s0 + $0x6cc] sm:$0x1] }
 0x3e9   :  { %v6486_v28 = vrot.slane %v5813_v26, 7  ;;  %v5687_v26 = vld [vmem:[%s22879_s0 + $0x2dc] sm:$0x1] }
 0x3ea   :  { %v6225_v57 = vsel %vm610_vm2, %v6224_v14, %v6223_v49 }
 0x3eb   :  { %11378 = vmatmul.mubr.msk.f32.gmra.mrb[32].mxu1 %vm1260_vm9, %v13246_v27  ;;  %v6457_v27 = vsel %vm622_vm6, %v6456_v3, %v6455_v47  ;;  %v6242_v3 = vrot.slane %v5673_v42, 3  ;;  %v6241_v47 = vsel %vm613_vm3, %v6240_v0, %v6239_v7 }
 0x3ec   :  { %5465 = vmatprep.mubr.f32.mxu1 %v22886_v33 }
 0x3ef   :  { %11379 = vmatmul.mubr.msk.f32.gmra.mrb[34].mxu1 %vm1260_vm9, %v13247_v22  ;;  %v6467_v22 = vsel %vm616_vm4, %v6466_v19, %v6465_v18  ;;  %v5804_v19 = vld [vmem:[%s22879_s0 + $0x684] sm:$0x1]  ;;  %v5810_v18 = vld [vmem:[%s22879_s0 + $0x6b4] sm:$0x1] }
 0x3f0   :  { %5471 = vmatprep.mubr.f32.mxu1 %v22886_v33  ;;  %v6469_v60 = vsel %vm619_vm5, %v6468_v35, %v6467_v22  ;;  %v5805_v35 = vld [vmem:[%s22879_s0 + $0x68c] sm:$0x1]  ;;  %v6243_v22 = vsel %vm616_vm4, %v6242_v3, %v6241_v47  ;;  %v6482_v14 = vrot.slane %v5810_v18, 2  ;;  %v5679_v3 = vld [vmem:[%s22879_s0 + $0x29c] sm:$0x1] }
 0x3f1   :  { %v6471_v52 = vsel %vm622_vm6, %v6470_v21, %v6469_v60  ;;  %v5807_v21 = vld [vmem:[%s22879_s0 + $0x69c] sm:$0x1]  ;;  %v6472_v30 = vrot.slane %v5805_v35, 7  ;;  %v6474_v60 = vrot.slane %v5806_v15, 6  ;;  %v6245_v51 = vsel %vm619_vm5, %v6244_v10, %v6243_v22  ;;  %v5681_v35 = vld [vmem:[%s22879_s0 + $0x2ac] sm:$0x1] }
 0x3f2   :  { %v12270_v5 = vpack.c.bf16 %v6471_v52, %v6457_v27  ;;  %v6476_v6 = vrot.slane %v5807_v21, 5  ;;  %v6247_v52 = vsel %vm622_vm6, %v6246_v13, %v6245_v51  ;;  %v6496_v13 = vrot.slane %v5818_v43, 2  ;;  %v5682_v15 = vld [vmem:[%s22879_s0 + $0x2b4] sm:$0x1]  ;;  %v5683_v21 = vld [vmem:[%s22879_s0 + $0x2bc] sm:$0x1] }
 0x3f3   :  { %11380 = vmatmul.mubr.msk.f32.gmra.mrb[36].mxu1 %vm1260_vm9, %v13248_v54  ;;  %v5664_v54 = vld [vmem:[%s22879_s0 + $0x224] sm:$0x1]  ;;  %v6473_v41 = vsel %vm604_vm0, %v6472_v30, %v5804_v19  ;;  %v5689_v30 = vld [vmem:[%s22879_s0 + $0x2ec] sm:$0x1]  ;;  %v6256_v34 = vrot.slane %v5681_v35, 3 }
 0x3f4   :  { %5477 = vmatprep.mubr.f32.mxu1 %v22886_v33  ;;  %v6226_v45 = vrot.slane %v5664_v54, 4  ;;  %12272 = vmatprep.subr.msk.bf16.mxu0 %vm13442_vm8, %v12270_v5  ;;  %v5814_v54 = vld [vmem:[%s22879_s0 + $0x6d4] sm:$0x1]  ;;  %v6484_v5 = vrot.slane %v5811_v12, 1  ;;  %v5684_v12 = vld [vmem:[%s22879_s0 + $0x2c4] sm:$0x1] }
 0x3f5   :  { %v6488_v49 = vrot.slane %v5814_v54, 6  ;;  %v6250_v54 = vrot.slane %v5678_v53, 6  ;;  %v5820_v43 = vld [vmem:[%s22879_s0 + $0x704] sm:$0x1] }
 0x3f6   :  { %v6227_v1 = vsel %vm613_vm3, %v6226_v45, %v6225_v57  ;;  %v5819_v45 = vld [vmem:[%s22879_s0 + $0x6fc] sm:$0x1]  ;;  %v5677_v57 = vld [vmem:[%s22879_s0 + $0x28c] sm:$0x1] }
 0x3f7   :  { %11381 = vmatmul.mubr.msk.f32.gmra.mrb[38].mxu1 %vm1260_vm9, %v13249_v4  ;;  %v5665_v4 = vld [vmem:[%s22879_s0 + $0x22c] sm:$0x1]  ;;  %v6498_v19 = vrot.slane %v5819_v45, 1  ;;  %v6248_v22 = vrot.slane %v5677_v57, 7 }
 0x3f8   :  { %11916 = vmatprep.mubr.msk.f32.mxu1 %vm1058_vm7, %v18513_v16  ;;  %v6228_v11 = vrot.slane %v5665_v4, 3  ;;  %v5815_v4 = vld [vmem:[%s22879_s0 + $0x6dc] sm:$0x1]  ;;  %v5821_v45 = vld [vmem:[%s22879_s0 + $0x70c] sm:$0x1] }
 0x3f9   :  { %v6490_v55 = vrot.slane %v5815_v4, 5 }
 0x3fa   :  { %v6229_v8 = vsel %vm616_vm4, %v6228_v11, %v6227_v1  ;;  %v6475_v11 = vsel %vm607_vm1, %v6474_v60, %v6473_v41  ;;  %v6487_v1 = vsel %vm604_vm0, %v6486_v28, %v5812_v40  ;;  %v6252_v60 = vrot.slane %v5679_v3, 5 }
 0x3fb   :  { %v6231_v37 = vsel %vm619_vm5, %v6230_v50, %v6229_v8  ;;  %v6477_v50 = vsel %vm610_vm2, %v6476_v6, %v6475_v11  ;;  %v5680_v8 = vld [vmem:[%s22879_s0 + $0x2a4] sm:$0x1]  ;;  %v6489_v10 = vsel %vm607_vm1, %v6488_v49, %v6487_v1  ;;  %v6258_v40 = vrot.slane %v5682_v15, 2 }
 0x3fc   :  { %v6233_v27 = vsel %vm622_vm6, %v6232_v2, %v6231_v37  ;;  %v6479_v0 = vsel %vm613_vm3, %v6478_v46, %v6477_v50  ;;  %v6494_v2 = vrot.slane %v5817_v62, 3  ;;  %v6491_v7 = vsel %vm610_vm2, %v6490_v55, %v6489_v10  ;;  %v5690_v46 = vld [vmem:[%s22879_s0 + $0x2f4] sm:$0x1]  ;;  %v5824_v1 = vld [vmem:[%s22879_s0 + $0x724] sm:$0x1] }
 0x3fd   :  { %v12273_v42 = vpack.c.bf16 %v6247_v52, %v6233_v27  ;;  %v6481_v9 = vsel %vm616_vm4, %v6480_v29, %v6479_v0  ;;  %v6493_v18 = vsel %vm613_vm3, %v6492_v31, %v6491_v7  ;;  %v5688_v27 = vld [vmem:[%s22879_s0 + $0x2e4] sm:$0x1]  ;;  %v6254_v51 = vrot.slane %v5680_v8, 4  ;;  %v5691_v29 = vld [vmem:[%s22879_s0 + $0x2fc] sm:$0x1] }
 0x3fe   :  { %v6483_v37 = vsel %vm619_vm5, %v6482_v14, %v6481_v9  ;;  %v6495_v4 = vsel %vm616_vm4, %v6494_v2, %v6493_v18  ;;  %v6249_v52 = vsel %vm604_vm0, %v6248_v22, %v5676_v36  ;;  %v6260_v62 = vrot.slane %v5683_v21, 1  ;;  %v5822_v55 = vld [vmem:[%s22879_s0 + $0x714] sm:$0x1]  ;;  %v5823_v31 = vld [vmem:[%s22879_s0 + $0x71c] sm:$0x1] }
 0x3ff   :  { %12275 = vmatpush3.bf16.xpose.msk.msra.mxu0 %vm13442_vm8, %v12273_v42  ;;  %v6485_v47 = vsel %vm622_vm6, %v6484_v5, %v6483_v37  ;;  %v6497_v6 = vsel %vm619_vm5, %v6496_v13, %v6495_v4  ;;  %v6251_v14 = vsel %vm607_vm1, %v6250_v54, %v6249_v52  ;;  %v6262_v5 = vrot.slane %v5685_v24, 7  ;;  %v5825_v2 = vld [vmem:[%s22879_s0 + $0x72c] sm:$0x1]  ;;  %v5826_v9 = vld [vmem:[%s22879_s0 + $0x734] sm:$0x1] }
 0x400   :  { %v6499_v41 = vsel %vm622_vm6, %v6498_v19, %v6497_v6  ;;  %v6264_v42 = vrot.slane %v5686_v56, 6  ;;  %v6253_v28 = vsel %vm610_vm2, %v6252_v60, %v6251_v14  ;;  %v6266_v49 = vrot.slane %v5687_v26, 5  ;;  %v5827_v10 = vld [vmem:[%s22879_s0 + $0x73c] sm:$0x1]  ;;  %v5829_v37 = vld [vmem:[%s22879_s0 + $0x74c] sm:$0x1] }
 0x401   :  { %v12276_v11 = vpack.c.bf16 %v6499_v41, %v6485_v47  ;;  %v6268_v50 = vrot.slane %v5688_v27, 4  ;;  %v6255_v57 = vsel %vm613_vm3, %v6254_v51, %v6253_v28  ;;  %v6263_v53 = vsel %vm604_vm0, %v6262_v5, %v5684_v12  ;;  %v5830_v7 = vld [vmem:[%s22879_s0 + $0x754] sm:$0x1]  ;;  %v5828_v56 = vld [vmem:[%s22879_s0 + $0x744] sm:$0x1] }
 0x402   :  { %v6270_v0 = vrot.slane %v5689_v30, 3  ;;  %v6257_v36 = vsel %vm616_vm4, %v6256_v34, %v6255_v57  ;;  %v6265_v3 = vsel %vm607_vm1, %v6264_v42, %v6263_v53  ;;  %v6272_v8 = vrot.slane %v5690_v46, 2  ;;  %v5831_v47 = vld [vmem:[%s22879_s0 + $0x75c] sm:$0x1]  ;;  %v5832_v18 = vld [vmem:[%s22879_s0 + $0x764] sm:$0x1] }
 0x403   :  { %12278 = vmatprep.subr.msk.bf16.mxu0 %vm13442_vm8, %v12276_v11  ;;  %v6500_v13 = vrot.slane %v5821_v45, 7  ;;  %v6259_v19 = vsel %vm619_vm5, %v6258_v40, %v6257_v36  ;;  %v6267_v35 = vsel %vm610_vm2, %v6266_v49, %v6265_v3  ;;  %v6274_v15 = vrot.slane %v5691_v29, 1  ;;  %v5833_v22 = vld [vmem:[%s22879_s0 + $0x76c] sm:$0x1]  ;;  %v5834_v51 = vld [vmem:[%s22879_s0 + $0x774] sm:$0x1] }
 0x404   :  { %v6261_v21 = vsel %vm622_vm6, %v6260_v62, %v6259_v19  ;;  %v6269_v24 = vsel %vm613_vm3, %v6268_v50, %v6267_v35  ;;  %v6502_v26 = vrot.slane %v5822_v55, 6  ;;  %v6504_v54 = vrot.slane %v5823_v31, 5  ;;  %v5835_v34 = vld [vmem:[%s22879_s0 + $0x77c] sm:$0x1]  ;;  %v5692_v14 = vld [vmem:[%s22879_s0 + $0x304] sm:$0x1] }
 0x405   :  { %v6501_v12 = vsel %vm604_vm0, %v6500_v13, %v5820_v43  ;;  %v6271_v27 = vsel %vm616_vm4, %v6270_v0, %v6269_v24  ;;  %v6506_v4 = vrot.slane %v5824_v1, 4  ;;  %v6508_v30 = vrot.slane %v5825_v2, 3  ;;  %v5693_v5 = vld [vmem:[%s22879_s0 + $0x30c] sm:$0x1]  ;;  %v5694_v28 = vld [vmem:[%s22879_s0 + $0x314] sm:$0x1] }
 0x406   :  { %v6273_v60 = vsel %vm619_vm5, %v6272_v8, %v6271_v27  ;;  %v6503_v6 = vsel %vm607_vm1, %v6502_v26, %v6501_v12  ;;  %v6510_v46 = vrot.slane %v5826_v9, 2  ;;  %v6512_v29 = vrot.slane %v5827_v10, 1  ;;  %v5695_v49 = vld [vmem:[%s22879_s0 + $0x31c] sm:$0x1]  ;;  %v5696_v57 = vld [vmem:[%s22879_s0 + $0x324] sm:$0x1] }
 0x407   :  { %v6275_v52 = vsel %vm622_vm6, %v6274_v15, %v6273_v60  ;;  %v6505_v40 = vsel %vm610_vm2, %v6504_v54, %v6503_v6  ;;  %v6514_v62 = vrot.slane %v5829_v37, 7  ;;  %v6516_v41 = vrot.slane %v5830_v7, 6  ;;  %v5697_v53 = vld [vmem:[%s22879_s0 + $0x32c] sm:$0x1]  ;;  %v5698_v36 = vld [vmem:[%s22879_s0 + $0x334] sm:$0x1] }
 0x408   :  { %v12279_v42 = vpack.c.bf16 %v6275_v52, %v6261_v21  ;;  %v6507_v43 = vsel %vm613_vm3, %v6506_v4, %v6505_v40  ;;  %v6518_v45 = vrot.slane %v5831_v47, 5  ;;  %v6520_v11 = vrot.slane %v5832_v18, 4  ;;  %v5699_v3 = vld [vmem:[%s22879_s0 + $0x33c] sm:$0x1]  ;;  %v5700_v19 = vld [vmem:[%s22879_s0 + $0x344] sm:$0x1] }
 0x409   :  { %v6509_v50 = vsel %vm616_vm4, %v6508_v30, %v6507_v43  ;;  %v6515_v55 = vsel %vm604_vm0, %v6514_v62, %v5828_v56  ;;  %v6522_v31 = vrot.slane %v5833_v22, 3  ;;  %v6524_v2 = vrot.slane %v5834_v51, 2  ;;  %v5701_v35 = vld [vmem:[%s22879_s0 + $0x34c] sm:$0x1]  ;;  %v5702_v15 = vld [vmem:[%s22879_s0 + $0x354] sm:$0x1] }
 0x40a   :  { %12281 = vmatpush3.bf16.xpose.msk.msra.mxu0 %vm13442_vm8, %v12279_v42  ;;  %v6511_v0 = vsel %vm619_vm5, %v6510_v46, %v6509_v50  ;;  %v6517_v1 = vsel %vm607_vm1, %v6516_v41, %v6515_v55  ;;  %v6276_v8 = vrot.slane %v5693_v5, 7  ;;  %v6526_v13 = vrot.slane %v5835_v34, 1  ;;  %v5703_v7 = vld [vmem:[%s22879_s0 + $0x35c] sm:$0x1]  ;;  %v5704_v21 = vld [vmem:[%s22879_s0 + $0x364] sm:$0x1] }
 0x40b   :  { %v6513_v9 = vsel %vm622_vm6, %v6512_v29, %v6511_v0  ;;  %v6519_v10 = vsel %vm610_vm2, %v6518_v45, %v6517_v1  ;;  %v6278_v56 = vrot.slane %v5694_v28, 6  ;;  %v6280_v47 = vrot.slane %v5695_v49, 5  ;;  %v5705_v12 = vld [vmem:[%s22879_s0 + $0x36c] sm:$0x1]  ;;  %v5706_v4 = vld [vmem:[%s22879_s0 + $0x374] sm:$0x1] }
 0x40c   :  { %v6521_v37 = vsel %vm613_vm3, %v6520_v11, %v6519_v10  ;;  %v6277_v24 = vsel %vm604_vm0, %v6276_v8, %v5692_v14  ;;  %v6282_v26 = vrot.slane %v5696_v57, 4  ;;  %v6284_v27 = vrot.slane %v5697_v53, 3  ;;  %v5707_v30 = vld [vmem:[%s22879_s0 + $0x37c] sm:$0x1]  ;;  %v5836_v40 = vld [vmem:[%s22879_s0 + $0x784] sm:$0x1] }
 0x40d   :  { %v6523_v18 = vsel %vm616_vm4, %v6522_v31, %v6521_v37  ;;  %v6286_v22 = vrot.slane %v5698_v36, 2  ;;  %v6279_v60 = vsel %vm607_vm1, %v6278_v56, %v6277_v24  ;;  %v6288_v51 = vrot.slane %v5699_v3, 1  ;;  %v5837_v62 = vld [vmem:[%s22879_s0 + $0x78c] sm:$0x1]  ;;  %v5838_v43 = vld [vmem:[%s22879_s0 + $0x794] sm:$0x1] }
 0x40e   :  { %v6525_v54 = vsel %vm619_vm5, %v6524_v2, %v6523_v18  ;;  %v6290_v34 = vrot.slane %v5701_v35, 7  ;;  %v6281_v46 = vsel %vm610_vm2, %v6280_v47, %v6279_v60  ;;  %v6292_v29 = vrot.slane %v5702_v15, 6  ;;  %v5839_v45 = vld [vmem:[%s22879_s0 + $0x79c] sm:$0x1]  ;;  %v5840_v55 = vld [vmem:[%s22879_s0 + $0x7a4] sm:$0x1] }
 0x40f   :  { %v6527_v6 = vsel %vm622_vm6, %v6526_v13, %v6525_v54  ;;  %v6294_v52 = vrot.slane %v5703_v7, 5  ;;  %v6283_v14 = vsel %vm613_vm3, %v6282_v26, %v6281_v46  ;;  %v6296_v42 = vrot.slane %v5704_v21, 4  ;;  %v5841_v31 = vld [vmem:[%s22879_s0 + $0x7ac] sm:$0x1]  ;;  %v5842_v1 = vld [vmem:[%s22879_s0 + $0x7b4] sm:$0x1] }
 0x410   :  { %v12282_v41 = vpack.c.bf16 %v6527_v6, %v6513_v9  ;;  %v6291_v5 = vsel %vm604_vm0, %v6290_v34, %v5700_v19  ;;  %v6285_v11 = vsel %vm616_vm4, %v6284_v27, %v6283_v14  ;;  %v6298_v49 = vrot.slane %v5705_v12, 3  ;;  %v5843_v2 = vld [vmem:[%s22879_s0 + $0x7bc] sm:$0x1]  ;;  %v5844_v9 = vld [vmem:[%s22879_s0 + $0x7c4] sm:$0x1] }
 0x411   :  { %v6293_v28 = vsel %vm607_vm1, %v6292_v29, %v6291_v5  ;;  %v6300_v50 = vrot.slane %v5706_v4, 2  ;;  %v6287_v57 = vsel %vm619_vm5, %v6286_v22, %v6285_v11  ;;  %v6302_v0 = vrot.slane %v5707_v30, 1  ;;  %v5845_v10 = vld [vmem:[%s22879_s0 + $0x7cc] sm:$0x1]  ;;  %v5846_v13 = vld [vmem:[%s22879_s0 + $0x7d4] sm:$0x1] }
 0x412   :  { %12284 = vmatprep.subr.msk.bf16.mxu0 %vm13442_vm8, %v12282_v41  ;;  %v6295_v53 = vsel %vm610_vm2, %v6294_v52, %v6293_v28  ;;  %v6528_v36 = vrot.slane %v5837_v62, 7  ;;  %v6289_v3 = vsel %vm622_vm6, %v6288_v51, %v6287_v57  ;;  %v5847_v35 = vld [vmem:[%s22879_s0 + $0x7dc] sm:$0x1]  ;;  %v5848_v15 = vld [vmem:[%s22879_s0 + $0x7e4] sm:$0x1]  ;;  %v6530_v7 = vrot.slane %v5838_v43, 6 }
 0x413   :  { %v6297_v8 = vsel %vm613_vm3, %v6296_v42, %v6295_v53  ;;  %v6532_v21 = vrot.slane %v5839_v45, 5  ;;  %v5849_v56 = vld [vmem:[%s22879_s0 + $0x7ec] sm:$0x1]  ;;  %v6534_v47 = vrot.slane %v5840_v55, 4  ;;  %v6536_v18 = vrot.slane %v5841_v31, 3 }
 0x414   :  { %v6299_v19 = vsel %vm616_vm4, %v6298_v49, %v6297_v8  ;;  %v6529_v37 = vsel %vm604_vm0, %v6528_v36, %v5836_v40  ;;  %v6538_v12 = vrot.slane %v5842_v1, 2  ;;  %v5850_v27 = vld [vmem:[%s22879_s0 + $0x7f4] sm:$0x1]  ;;  %v6540_v54 = vrot.slane %v5843_v2, 1  ;;  %v5851_v60 = vld [vmem:[%s22879_s0 + $0x7fc] sm:$0x1] }
 0x415   :  { %v6301_v24 = vsel %vm619_vm5, %v6300_v50, %v6299_v19  ;;  %v6531_v22 = vsel %vm607_vm1, %v6530_v7, %v6529_v37  ;;  %v6542_v4 = vrot.slane %v5845_v10, 7  ;;  %v6544_v34 = vrot.slane %v5846_v13, 6  ;;  %v5709_v46 = vld [vmem:[%s22879_s0 + $0x38c] sm:$0x1]  ;;  %v5710_v41 = vld [vmem:[%s22879_s0 + $0x394] sm:$0x1] }
 0x416   :  { %v6303_v26 = vsel %vm622_vm6, %v6302_v0, %v6301_v24  ;;  %v6533_v51 = vsel %vm610_vm2, %v6532_v21, %v6531_v22  ;;  %v6546_v6 = vrot.slane %v5847_v35, 5  ;;  %v6548_v40 = vrot.slane %v5848_v15, 4  ;;  %v5711_v14 = vld [vmem:[%s22879_s0 + $0x39c] sm:$0x1]  ;;  %v5708_v45 = vld [vmem:[%s22879_s0 + $0x384] sm:$0x1] }
 0x417   :  { %v12285_v30 = vpack.c.bf16 %v6303_v26, %v6289_v3  ;;  %v6535_v29 = vsel %vm613_vm3, %v6534_v47, %v6533_v51  ;;  %v6543_v52 = vsel %vm604_vm0, %v6542_v4, %v5844_v9  ;;  %v6550_v62 = vrot.slane %v5849_v56, 3  ;;  %v5712_v11 = vld [vmem:[%s22879_s0 + $0x3a4] sm:$0x1]  ;;  %v5713_v28 = vld [vmem:[%s22879_s0 + $0x3ac] sm:$0x1] }
 0x418   :  { %v6537_v5 = vsel %vm616_vm4, %v6536_v18, %v6535_v29  ;;  %v6545_v42 = vsel %vm607_vm1, %v6544_v34, %v6543_v52  ;;  %v6552_v43 = vrot.slane %v5850_v27, 2  ;;  %v6554_v55 = vrot.slane %v5851_v60, 1  ;;  %v5714_v31 = vld [vmem:[%s22879_s0 + $0x3b4] sm:$0x1]  ;;  %v5715_v57 = vld [vmem:[%s22879_s0 + $0x3bc] sm:$0x1] }
 0x419   :  { %12287 = vmatpush3.bf16.xpose.msk.msra.mxu0 %vm13442_vm8, %v12285_v30  ;;  %v6539_v49 = vsel %vm619_vm5, %v6538_v12, %v6537_v5  ;;  %v6547_v50 = vsel %vm610_vm2, %v6546_v6, %v6545_v42  ;;  %v5716_v1 = vld [vmem:[%s22879_s0 + $0x3c4] sm:$0x1]  ;;  %v5717_v2 = vld [vmem:[%s22879_s0 + $0x3cc] sm:$0x1]  ;;  %v5718_v36 = vld [vmem:[%s22879_s0 + $0x3d4] sm:$0x1] }
 0x41a   :  { %v6541_v53 = vsel %vm622_vm6, %v6540_v54, %v6539_v49  ;;  %v6549_v0 = vsel %vm613_vm3, %v6548_v40, %v6547_v50  ;;  %v5719_v3 = vld [vmem:[%s22879_s0 + $0x3dc] sm:$0x1]  ;;  %v5720_v9 = vld [vmem:[%s22879_s0 + $0x3e4] sm:$0x1]  ;;  %v6304_v10 = vrot.slane %v5709_v46, 7  ;;  %v6306_v13 = vrot.slane %v5710_v41, 6 }
 0x41b   :  { %v6551_v8 = vsel %vm616_vm4, %v6550_v62, %v6549_v0  ;;  %v6308_v19 = vrot.slane %v5711_v14, 5  ;;  %v5721_v15 = vld [vmem:[%s22879_s0 + $0x3ec] sm:$0x1]  ;;  %v6310_v37 = vrot.slane %v5712_v11, 4  ;;  %v6312_v7 = vrot.slane %v5713_v28, 3  ;;  %v13252_v49 = vld [vmem:[%s22880_s1 + $0x10] sm:$0xff] }
 0x41c   :  { %v6553_v35 = vsel %vm619_vm5, %v6552_v43, %v6551_v8  ;;  %v6314_v21 = vrot.slane %v5714_v31, 2  ;;  %v5722_v56 = vld [vmem:[%s22879_s0 + $0x3f4] sm:$0x1]  ;;  %v6305_v47 = vsel %vm604_vm0, %v6304_v10, %v5708_v45  ;;  %v6316_v18 = vrot.slane %v5715_v57, 1  ;;  %v5723_v27 = vld [vmem:[%s22879_s0 + $0x3fc] sm:$0x1] }
 0x41d   :  { %v6555_v24 = vsel %vm622_vm6, %v6554_v55, %v6553_v35  ;;  %v6318_v12 = vrot.slane %v5717_v2, 7  ;;  %v6307_v22 = vsel %vm607_vm1, %v6306_v13, %v6305_v47  ;;  %v6320_v54 = vrot.slane %v5718_v36, 6  ;;  %v13251_v28 = vld [vmem:[%s22880_s1 + $0x8] sm:$0xff]  ;;  %v13254_v50 = vld [vmem:[%s22880_s1 + $0x20] sm:$0xff]  ;;  %v13256_v31 = vld [vmem:[%s22880_s1 + $0x30] sm:$0xff] }
 0x41e   :  { %v12288_v26 = vpack.c.bf16 %v6555_v24, %v6541_v53  ;;  %v6322_v4 = vrot.slane %v5719_v3, 5  ;;  %v6309_v30 = vsel %vm610_vm2, %v6308_v19, %v6307_v22  ;;  %v6324_v51 = vrot.slane %v5720_v9, 4  ;;  %v13255_v55 = vld [vmem:[%s22880_s1 + $0x28] sm:$0xff]  ;;  %v13257_v57 = vld [vmem:[%s22880_s1 + $0x38] sm:$0xff]  ;;  %v7088_v0 = vld [vmem:[%s22879_s0 + $0x415] sm:$0x1] }
 0x41f   :  { %v6319_v60 = vsel %vm604_vm0, %v6318_v12, %v5716_v1  ;;  %v6326_v34 = vrot.slane %v5721_v15, 3  ;;  %v6311_v6 = vsel %vm613_vm3, %v6310_v37, %v6309_v30  ;;  %v6328_v29 = vrot.slane %v5722_v56, 2  ;;  %v7087_v53 = vld [vmem:[%s22879_s0 + $0x40d] sm:$0x1]  ;;  %v7089_v1 = vld [vmem:[%s22879_s0 + $0x41d] sm:$0x1] }
 0x420   :  { %12290 = vmatprep.subr.msk.bf16.mxu0 %vm13442_vm8, %v12288_v26  ;;  %v6321_v46 = vsel %vm607_vm1, %v6320_v54, %v6319_v60  ;;  %v6313_v52 = vsel %vm616_vm4, %v6312_v7, %v6311_v6  ;;  %v6330_v62 = vrot.slane %v5723_v27, 1  ;;  %v7086_v2 = vld [vmem:[%s22879_s0 + $0x405] sm:$0x1]  ;;  %v7091_v3 = vld [vmem:[%s22879_s0 + $0x42d] sm:$0x1]  ;;  %v7696_v24 = vrot.slane %v7088_v0, 6 }
 0x421   :  { %v6323_v40 = vsel %vm610_vm2, %v6322_v4, %v6321_v46  ;;  %v6315_v41 = vsel %vm619_vm5, %v6314_v21, %v6313_v52  ;;  %v7090_v36 = vld [vmem:[%s22879_s0 + $0x425] sm:$0x1]  ;;  %v7092_v8 = vld [vmem:[%s22879_s0 + $0x435] sm:$0x1]  ;;  %v7093_v9 = vld [vmem:[%s22879_s0 + $0x43d] sm:$0x1] }
 0x422   :  { %v6325_v14 = vsel %vm613_vm3, %v6324_v51, %v6323_v40  ;;  %v6317_v5 = vsel %vm622_vm6, %v6316_v18, %v6315_v41  ;;  %v7094_v10 = vld [vmem:[%s22879_s0 + $0x445] sm:$0x1]  ;;  %v7095_v13 = vld [vmem:[%s22879_s0 + $0x44d] sm:$0x1]  ;;  %v7096_v19 = vld [vmem:[%s22879_s0 + $0x455] sm:$0x1] }
 0x423   :  { %v6327_v42 = vsel %vm616_vm4, %v6326_v34, %v6325_v14  ;;  %v7097_v35 = vld [vmem:[%s22879_s0 + $0x45d] sm:$0x1]  ;;  %v7098_v15 = vld [vmem:[%s22879_s0 + $0x465] sm:$0x1]  ;;  %v7099_v37 = vld [vmem:[%s22879_s0 + $0x46d] sm:$0x1] }
 0x424   :  { %v6329_v43 = vsel %vm619_vm5, %v6328_v29, %v6327_v42  ;;  %v7100_v7 = vld [vmem:[%s22879_s0 + $0x475] sm:$0x1]  ;;  %v7694_v21 = vrot.slane %v7087_v53, 7  ;;  %v7698_v56 = vrot.slane %v7089_v1, 5  ;;  %v7101_v47 = vld [vmem:[%s22879_s0 + $0x47d] sm:$0x1] }
 0x425   :  { %v6331_v45 = vsel %vm622_vm6, %v6330_v62, %v6329_v43  ;;  %v7700_v18 = vrot.slane %v7090_v36, 4  ;;  %v7702_v12 = vrot.slane %v7091_v3, 3  ;;  %v7704_v26 = vrot.slane %v7092_v8, 2  ;;  %v6959_v60 = vld [vmem:[%s22879_s0 + $0xd] sm:$0x1] }
 0x426   :  { %v12291_v11 = vpack.c.bf16 %v6331_v45, %v6317_v5  ;;  %v7708_v27 = vrot.slane %v7095_v13, 7  ;;  %v7695_v22 = vsel %vm604_vm0, %v7694_v21, %v7086_v2  ;;  %v7710_v54 = vrot.slane %v7096_v19, 6  ;;  %v6958_v62 = vld [vmem:[%s22879_s0 + $0x5] sm:$0x1]  ;;  %v6960_v41 = vld [vmem:[%s22879_s0 + $0x15] sm:$0x1] }
 0x427   :  { %v7712_v4 = vrot.slane %v7097_v35, 5  ;;  %v7714_v30 = vrot.slane %v7098_v15, 4  ;;  %v7697_v51 = vsel %vm607_vm1, %v7696_v24, %v7695_v22  ;;  %v7706_v34 = vrot.slane %v7093_v9, 1  ;;  %v6961_v45 = vld [vmem:[%s22879_s0 + $0x1d] sm:$0x1] }
 0x428   :  { %12293 = vmatpush3.bf16.xpose.msk.msra.mxu0 %vm13442_vm8, %v12291_v11  ;;  %v7709_v6 = vsel %vm604_vm0, %v7708_v27, %v7094_v10  ;;  %v7716_v46 = vrot.slane %v7099_v37, 3  ;;  %v7699_v29 = vsel %vm610_vm2, %v7698_v56, %v7697_v51  ;;  %v7718_v40 = vrot.slane %v7100_v7, 2  ;;  %v6962_v11 = vld [vmem:[%s22879_s0 + $0x25] sm:$0x1]  ;;  %v6967_v0 = vld [vmem:[%s22879_s0 + $0x4d] sm:$0x1] }
 0x429   :  { %v7711_v52 = vsel %vm607_vm1, %v7710_v54, %v7709_v6  ;;  %v7470_v14 = vrot.slane %v6959_v60, 7  ;;  %v7701_v5 = vsel %vm613_vm3, %v7700_v18, %v7699_v29  ;;  %v7720_v43 = vrot.slane %v7101_v47, 1  ;;  %v6966_v53 = vld [vmem:[%s22879_s0 + $0x45] sm:$0x1]  ;;  %v6968_v1 = vld [vmem:[%s22879_s0 + $0x55] sm:$0x1] }
 0x42a   :  { %v7713_v42 = vsel %vm610_vm2, %v7712_v4, %v7711_v52  ;;  %v6969_v2 = vld [vmem:[%s22879_s0 + $0x5d] sm:$0x1]  ;;  %v6970_v9 = vld [vmem:[%s22879_s0 + $0x65] sm:$0x1]  ;;  %v6971_v10 = vld [vmem:[%s22879_s0 + $0x6d] sm:$0x1] }
 0x42b   :  { %v7471_v36 = vsel %vm604_vm0, %v7470_v14, %v6958_v62  ;;  %v7472_v13 = vrot.slane %v6960_v41, 6  ;;  %v7474_v19 = vrot.slane %v6961_v45, 5  ;;  %v6972_v15 = vld [vmem:[%s22879_s0 + $0x75] sm:$0x1]  ;;  %v7476_v37 = vrot.slane %v6962_v11, 4 }
 0x42c   :  { %v6973_v56 = vld [vmem:[%s22879_s0 + $0x7d] sm:$0x1]  ;;  %v7486_v22 = vrot.slane %v6968_v1, 6  ;;  %v7488_v54 = vrot.slane %v6969_v2, 5  ;;  %v7490_v4 = vrot.slane %v6970_v9, 4 }
 0x42d   :  { %v7473_v47 = vsel %vm607_vm1, %v7472_v13, %v7471_v36  ;;  %v7104_v6 = vld [vmem:[%s22879_s0 + $0x495] sm:$0x1]  ;;  %v7106_v62 = vld [vmem:[%s22879_s0 + $0x4a5] sm:$0x1]  ;;  %v7107_v41 = vld [vmem:[%s22879_s0 + $0x4ad] sm:$0x1] }
 0x42e   :  { %v7475_v27 = vsel %vm610_vm2, %v7474_v19, %v7473_v47  ;;  %v7108_v45 = vld [vmem:[%s22879_s0 + $0x4b5] sm:$0x1]  ;;  %v7109_v11 = vld [vmem:[%s22879_s0 + $0x4bd] sm:$0x1]  ;;  %v7724_v1 = vrot.slane %v7104_v6, 6  ;;  %v7728_v36 = vrot.slane %v7106_v62, 4 }
 0x42f   :  { %11869 = vmatmul.mubr.msk.f32.vlgmr.msra.gmra.mrb[32].mxu0 %vm1058_vm7, %v18513_v16  ;;  %v13253_v16 = vld [vmem:[%s22880_s1 + $0x18] sm:$0xff]  ;;  %v7477_v60 = vsel %vm613_vm3, %v7476_v37, %v7475_v27  ;;  %v7730_v9 = vrot.slane %v7107_v41, 3  ;;  %v7734_v13 = vrot.slane %v7109_v11, 1  ;;  %v6978_v6 = vld [vmem:[%s22879_s0 + $0xa5] sm:$0x1] }
 0x430   :  { %11870 = vmatprep.mubr.msk.f32.mxu0 %vm1058_vm7, %v13251_v28  ;;  %v6980_v41 = vld [vmem:[%s22879_s0 + $0xb5] sm:$0x1] }
 0x431   :  { %v6984_v11 = vld [vmem:[%s22879_s0 + $0xd5] sm:$0x1] }
 0x433   :  { %11871 = vmatmul.mubr.msk.f32.gmra.mrb[34].mxu0 %vm1058_vm7, %v13251_v28  ;;  %v7703_v28 = vsel %vm616_vm4, %v7702_v12, %v7701_v5  ;;  %v7484_v12 = vrot.slane %v6967_v0, 7  ;;  %v7114_v0 = vld [vmem:[%s22879_s0 + $0x4e5] sm:$0x1] }
 0x434   :  { %11872 = vmatprep.mubr.msk.f32.mxu0 %vm1058_vm7, %v13252_v49 }
 0x435   :  { %v7485_v51 = vsel %vm604_vm0, %v7484_v12, %v6966_v53  ;;  %v7742_v12 = vrot.slane %v7114_v0, 4 }
 0x436   :  { %v7487_v52 = vsel %vm607_vm1, %v7486_v22, %v7485_v51 }
 0x437   :  { %11873 = vmatmul.mubr.msk.f32.gmra.mrb[36].mxu0 %vm1058_vm7, %v13252_v49  ;;  %v7715_v49 = vsel %vm613_vm3, %v7714_v30, %v7713_v42  ;;  %v7102_v30 = vld [vmem:[%s22879_s0 + $0x485] sm:$0x1]  ;;  %v7489_v42 = vsel %vm610_vm2, %v7488_v54, %v7487_v52 }
 0x438   :  { %11874 = vmatprep.mubr.msk.f32.mxu0 %vm1058_vm7, %v13253_v16 }
 0x43b   :  { %11875 = vmatmul.mubr.msk.f32.gmra.mrb[38].mxu0 %vm1058_vm7, %v13253_v16  ;;  %v6963_v16 = vld [vmem:[%s22879_s0 + $0x2d] sm:$0x1] }
 0x43c   :  { %11876 = vmatprep.mubr.msk.f32.mxu0 %vm1058_vm7, %v13254_v50  ;;  %v7478_v7 = vrot.slane %v6963_v16, 3  ;;  %v7110_v16 = vld [vmem:[%s22879_s0 + $0x4c5] sm:$0x1] }
 0x43e   :  { %v7479_v29 = vsel %vm616_vm4, %v7478_v7, %v7477_v60 }
 0x43f   :  { %11877 = vmatmul.mubr.msk.f32.gmra.mrb[40].mxu0 %vm1058_vm7, %v13254_v50  ;;  %v6964_v50 = vld [vmem:[%s22879_s0 + $0x35] sm:$0x1] }
 0x440   :  { %11878 = vmatprep.mubr.msk.f32.mxu0 %vm1058_vm7, %v13255_v55  ;;  %v7480_v21 = vrot.slane %v6964_v50, 2  ;;  %v7111_v50 = vld [vmem:[%s22879_s0 + $0x4cd] sm:$0x1] }
 0x441   :  { %v7736_v37 = vrot.slane %v7111_v50, 7 }
 0x442   :  { %v7481_v5 = vsel %vm619_vm5, %v7480_v21, %v7479_v29  ;;  %v6975_v21 = vld [vmem:[%s22879_s0 + $0x8d] sm:$0x1] }
 0x443   :  { %11879 = vmatmul.mubr.msk.f32.gmra.mrb[42].mxu0 %vm1058_vm7, %v13255_v55  ;;  %v6965_v55 = vld [vmem:[%s22879_s0 + $0x3d] sm:$0x1]  ;;  %v7737_v22 = vsel %vm604_vm0, %v7736_v37, %v7110_v16  ;;  %v7498_v29 = vrot.slane %v6975_v21, 7  ;;  %v6988_v37 = vld [vmem:[%s22879_s0 + $0xf5] sm:$0x1] }
 0x444   :  { %11880 = vmatprep.mubr.msk.f32.mxu0 %vm1058_vm7, %v13256_v31  ;;  %v7482_v18 = vrot.slane %v6965_v55, 1  ;;  %v7112_v55 = vld [vmem:[%s22879_s0 + $0x4d5] sm:$0x1]  ;;  %v6985_v16 = vld [vmem:[%s22879_s0 + $0xdd] sm:$0x1] }
 0x445   :  { %v7738_v7 = vrot.slane %v7112_v55, 6  ;;  %v7516_v21 = vrot.slane %v6985_v16, 5 }
 0x447   :  { %11881 = vmatmul.mubr.msk.f32.gmra.mrb[44].mxu0 %vm1058_vm7, %v13256_v31  ;;  %v7705_v31 = vsel %vm619_vm5, %v7704_v26, %v7703_v28  ;;  %v7103_v26 = vld [vmem:[%s22879_s0 + $0x48d] sm:$0x1]  ;;  %v7483_v28 = vsel %vm622_vm6, %v7482_v18, %v7481_v5  ;;  %v7739_v51 = vsel %vm607_vm1, %v7738_v7, %v7737_v22 }
 0x448   :  { %11882 = vmatprep.mubr.msk.f32.mxu0 %vm1058_vm7, %v13257_v57  ;;  %v7707_v3 = vsel %vm622_vm6, %v7706_v34, %v7705_v31  ;;  %v7492_v34 = vrot.slane %v6971_v10, 3  ;;  %v7722_v14 = vrot.slane %v7103_v26, 7  ;;  %v7113_v31 = vld [vmem:[%s22879_s0 + $0x4dd] sm:$0x1]  ;;  %v7732_v10 = vrot.slane %v7108_v45, 2 }
 0x449   :  { %v7740_v18 = vrot.slane %v7113_v31, 5  ;;  %v6974_v26 = vld [vmem:[%s22879_s0 + $0x85] sm:$0x1]  ;;  %v6983_v45 = vld [vmem:[%s22879_s0 + $0xcd] sm:$0x1]  ;;  %v7504_v31 = vrot.slane %v6978_v6, 4 }
 0x44b   :  { %11883 = vmatmul.mubr.msk.f32.gmra.mrb[46].mxu0 %vm1058_vm7, %v13257_v57  ;;  %v7717_v57 = vsel %vm616_vm4, %v7716_v46, %v7715_v49  ;;  %v7105_v46 = vld [vmem:[%s22879_s0 + $0x49d] sm:$0x1]  ;;  %v7491_v49 = vsel %vm613_vm3, %v7490_v4, %v7489_v42  ;;  %v6976_v4 = vld [vmem:[%s22879_s0 + $0x95] sm:$0x1] }
 0x44c   :  { %6797 = vmatprep.mubr.f32.mxu0 %v22886_v33  ;;  %v7719_v8 = vsel %vm619_vm5, %v7718_v40, %v7717_v57  ;;  %v7494_v40 = vrot.slane %v6972_v15, 2  ;;  %v7723_v57 = vsel %vm604_vm0, %v7722_v14, %v7102_v30  ;;  %v7493_v53 = vsel %vm616_vm4, %v7492_v34, %v7491_v49  ;;  %v6977_v30 = vld [vmem:[%s22879_s0 + $0x9d] sm:$0x1] }
 0x44d   :  { %v7721_v35 = vsel %vm622_vm6, %v7720_v43, %v7719_v8  ;;  %v7496_v43 = vrot.slane %v6973_v56, 1  ;;  %v7726_v2 = vrot.slane %v7105_v46, 5  ;;  %v7115_v8 = vld [vmem:[%s22879_s0 + $0x4ed] sm:$0x1]  ;;  %v7725_v15 = vsel %vm607_vm1, %v7724_v1, %v7723_v57  ;;  %v7117_v56 = vld [vmem:[%s22879_s0 + $0x4fd] sm:$0x1] }
 0x44e   :  { %v12298_v24 = vpack.c.bf16 %v7721_v35, %v7707_v3  ;;  %v7495_v3 = vsel %vm619_vm5, %v7494_v40, %v7493_v53  ;;  %v7116_v35 = vld [vmem:[%s22879_s0 + $0x4f5] sm:$0x1]  ;;  %v7744_v54 = vrot.slane %v7115_v8, 3  ;;  %v6979_v46 = vld [vmem:[%s22879_s0 + $0xad] sm:$0x1]  ;;  %v7741_v40 = vsel %vm610_vm2, %v7740_v18, %v7739_v51 }
 0x44f   :  { %v7497_v19 = vsel %vm622_vm6, %v7496_v43, %v7495_v3  ;;  %v7727_v47 = vsel %vm610_vm2, %v7726_v2, %v7725_v15  ;;  %v7746_v34 = vrot.slane %v7116_v35, 2  ;;  %v7748_v62 = vrot.slane %v7117_v56, 1  ;;  %v6981_v14 = vld [vmem:[%s22879_s0 + $0xbd] sm:$0x1]  ;;  %v6982_v43 = vld [vmem:[%s22879_s0 + $0xc5] sm:$0x1] }
 0x450   :  { %12300 = vmatprep.subr.msk.bf16.mxu1 %vm13442_vm8, %v12298_v24  ;;  %v12301_v24 = vpack.c.bf16 %v7497_v19, %v7483_v28  ;;  %v7729_v27 = vsel %vm613_vm3, %v7728_v36, %v7727_v47  ;;  %v7743_v42 = vsel %vm613_vm3, %v7742_v12, %v7741_v40  ;;  %v7499_v28 = vsel %vm604_vm0, %v7498_v29, %v6974_v26  ;;  %v6986_v53 = vld [vmem:[%s22879_s0 + $0xe5] sm:$0x1]  ;;  %v6987_v8 = vld [vmem:[%s22879_s0 + $0xed] sm:$0x1]  ;;  %v6989_v26 = vld [vmem:[%s22879_s0 + $0xfd] sm:$0x1] }
 0x451   :  { %v7731_v60 = vsel %vm616_vm4, %v7730_v9, %v7729_v27  ;;  %v7745_v49 = vsel %vm616_vm4, %v7744_v54, %v7743_v42  ;;  %v7500_v50 = vrot.slane %v6976_v4, 6  ;;  %v7502_v55 = vrot.slane %v6977_v30, 5  ;;  %v7119_v40 = vld [vmem:[%s22879_s0 + $0x50d] sm:$0x1]  ;;  %v7120_v42 = vld [vmem:[%s22879_s0 + $0x515] sm:$0x1] }
 0x452   :  { %12303 = vmatpush3.bf16.xpose.msk.msra.mxu1 %vm13442_vm8, %v12301_v24  ;;  %v7733_v52 = vsel %vm619_vm5, %v7732_v10, %v7731_v60  ;;  %v7747_v57 = vsel %vm619_vm5, %v7746_v34, %v7745_v49  ;;  %v7506_v0 = vrot.slane %v6979_v46, 3  ;;  %v7508_v1 = vrot.slane %v6980_v41, 2 }
 0x453   :  { %v7735_v5 = vsel %vm622_vm6, %v7734_v13, %v7733_v52  ;;  %v7510_v2 = vrot.slane %v6981_v14, 1  ;;  %v7749_v3 = vsel %vm622_vm6, %v7748_v62, %v7747_v57  ;;  %v7501_v9 = vsel %vm607_vm1, %v7500_v50, %v7499_v28  ;;  %v7122_v28 = vld [vmem:[%s22879_s0 + $0x525] sm:$0x1] }
 0x454   :  { %v7512_v10 = vrot.slane %v6983_v45, 7  ;;  %v7514_v13 = vrot.slane %v6984_v11, 6  ;;  %v12304_v15 = vpack.c.bf16 %v7749_v3, %v7735_v5  ;;  %v7503_v7 = vsel %vm610_vm2, %v7502_v55, %v7501_v9  ;;  %v7118_v5 = vld [vmem:[%s22879_s0 + $0x505] sm:$0x1]  ;;  %v7121_v11 = vld [vmem:[%s22879_s0 + $0x51d] sm:$0x1] }
 0x455   :  { %v7505_v56 = vsel %vm613_vm3, %v7504_v31, %v7503_v7  ;;  %v7518_v18 = vrot.slane %v6986_v53, 4  ;;  %v7520_v54 = vrot.slane %v6987_v8, 3  ;;  %v7522_v34 = vrot.slane %v6988_v37, 2  ;;  %v7123_v55 = vld [vmem:[%s22879_s0 + $0x52d] sm:$0x1] }
 0x456   :  { %v7513_v47 = vsel %vm604_vm0, %v7512_v10, %v6982_v43  ;;  %12306 = vmatprep.subr.msk.bf16.mxu1 %vm13442_vm8, %v12304_v15  ;;  %v7507_v27 = vsel %vm616_vm4, %v7506_v0, %v7505_v56  ;;  %v7524_v14 = vrot.slane %v6989_v26, 1  ;;  %v7750_v31 = vrot.slane %v7119_v40, 7  ;;  %v7126_v8 = vld [vmem:[%s22879_s0 + $0x545] sm:$0x1]  ;;  %v7127_v9 = vld [vmem:[%s22879_s0 + $0x54d] sm:$0x1] }
 0x457   :  { %v7515_v22 = vsel %vm607_vm1, %v7514_v13, %v7513_v47  ;;  %v7509_v60 = vsel %vm619_vm5, %v7508_v1, %v7507_v27  ;;  %v7124_v1 = vld [vmem:[%s22879_s0 + $0x535] sm:$0x1]  ;;  %v7129_v15 = vld [vmem:[%s22879_s0 + $0x55d] sm:$0x1]  ;;  %v7756_v7 = vrot.slane %v7122_v28, 4 }
 0x458   :  { %v7517_v51 = vsel %vm610_vm2, %v7516_v21, %v7515_v22  ;;  %v7511_v29 = vsel %vm622_vm6, %v7510_v2, %v7509_v60  ;;  %v7125_v2 = vld [vmem:[%s22879_s0 + $0x53d] sm:$0x1]  ;;  %v7128_v10 = vld [vmem:[%s22879_s0 + $0x555] sm:$0x1]  ;;  %v7751_v13 = vsel %vm604_vm0, %v7750_v31, %v7118_v5  ;;  %v7758_v21 = vrot.slane %v7123_v55, 3 }
 0x459   :  { %v7519_v52 = vsel %vm613_vm3, %v7518_v18, %v7517_v51  ;;  %v7760_v18 = vrot.slane %v7124_v1, 2  ;;  %v7131_v60 = vld [vmem:[%s22879_s0 + $0x56d] sm:$0x1] }
 0x45a   :  { %v7521_v41 = vsel %vm616_vm4, %v7520_v54, %v7519_v52  ;;  %v7764_v54 = vrot.slane %v7127_v9, 7 }
 0x45b   :  { %v7523_v45 = vsel %vm619_vm5, %v7522_v34, %v7521_v41  ;;  %v7766_v34 = vrot.slane %v7128_v10, 6 }
 0x45c   :  { %v7525_v50 = vsel %vm622_vm6, %v7524_v14, %v7523_v45  ;;  %v7765_v40 = vsel %vm604_vm0, %v7764_v54, %v7126_v8  ;;  %v6995_v54 = vld [vmem:[%s22879_s0 + $0x12d] sm:$0x1] }
 0x45d   :  { %v12307_v0 = vpack.c.bf16 %v7525_v50, %v7511_v29  ;;  %v7132_v29 = vld [vmem:[%s22879_s0 + $0x575] sm:$0x1] }
 0x45e   :  { %v7774_v1 = vrot.slane %v7132_v29, 2 }
 0x45f   :  { %12309 = vmatpush3.bf16.xpose.msk.msra.mxu1 %vm13442_vm8, %v12307_v0 }
 0x4ae   :  { %v5437_v36 = vpop.f32.mrb[24].mxu1 }
 0x4af   :  { %v12492_v19 = vadd.f32 %v5437_v36, %v15772_v59  ;;  %v5439_v35 = vpop.f32.mrb[25].mxu1  ;;  %v7752_v36 = vrot.slane %v7120_v42, 6 }
 0x4b0   :  { %v12493_v24 = vadd.f32 %v5439_v35, %v15772_v59 }
 0x4b1   :  { %v11382_v12 = vmul.f32 -1.442695, %v12492_v19  ;;  %v7754_v19 = vrot.slane %v7121_v11, 5  ;;  %v7753_v37 = vsel %vm607_vm1, %v7752_v36, %v7751_v13  ;;  %v7767_v11 = vsel %vm607_vm1, %v7766_v34, %v7765_v40  ;;  %v6991_v36 = vld [vmem:[%s22879_s0 + $0x10d] sm:$0x1] }
 0x4b2   :  { %v11383_v4 = vmul.f32 -1.442695, %v12493_v24  ;;  %v5443_v30 = vpop.f32.mrb[26].mxu1 }
 0x4b3   :  { %12881 = vpow2.f32 %v11382_v12  ;;  %v12494_v6 = vadd.f32 %v5443_v30, %v15819_v32  ;;  %v5445_v46 = vpop.f32.mrb[27].mxu1  ;;  %v7755_v47 = vsel %vm610_vm2, %v7754_v19, %v7753_v37  ;;  %v7762_v12 = vrot.slane %v7125_v2, 1  ;;  %v7130_v30 = vld [vmem:[%s22879_s0 + $0x565] sm:$0x1]  ;;  %v6992_v19 = vld [vmem:[%s22879_s0 + $0x115] sm:$0x1] }
 0x4b4   :  { %12883 = vpow2.f32 %v11383_v4  ;;  %v12495_v62 = vadd.f32 %v5445_v46, %v15819_v32  ;;  %v7757_v22 = vsel %vm613_vm3, %v7756_v7, %v7755_v47  ;;  %v7770_v31 = vrot.slane %v7130_v30, 4  ;;  %v6993_v47 = vld [vmem:[%s22879_s0 + $0x11d] sm:$0x1] }
 0x4b5   :  { %v11384_v43 = vmul.f32 -1.442695, %v12494_v6  ;;  %v7759_v51 = vsel %vm616_vm4, %v7758_v21, %v7757_v22  ;;  %v6990_v21 = vld [vmem:[%s22879_s0 + $0x105] sm:$0x1] }
 0x4b6   :  { %v11385_v49 = vmul.f32 -1.442695, %v12495_v62  ;;  %v5449_v16 = vpop.f32.mrb[28].mxu1  ;;  %v7761_v52 = vsel %vm619_vm5, %v7760_v18, %v7759_v51  ;;  %v7768_v62 = vrot.slane %v7129_v15, 5  ;;  %v6994_v18 = vld [vmem:[%s22879_s0 + $0x125] sm:$0x1] }
 0x4b7   :  { %12885 = vpow2.f32 %v11384_v43  ;;  %v12496_v57 = vadd.f32 %v5449_v16, %v15830_v44  ;;  %v5451_v53 = vpop.f32.mrb[29].mxu1  ;;  %v7133_v43 = vld [vmem:[%s22879_s0 + $0x57d] sm:$0x1]  ;;  %v7763_v45 = vsel %vm622_vm6, %v7762_v12, %v7761_v52  ;;  %v7526_v12 = vrot.slane %v6991_v36, 7 }
 0x4b8   :  { %12887 = vpow2.f32 %v11385_v49  ;;  %v12497_v3 = vadd.f32 %v5451_v53, %v15830_v44  ;;  %v7769_v50 = vsel %vm610_vm2, %v7768_v62, %v7767_v11  ;;  %v7776_v2 = vrot.slane %v7133_v43, 1  ;;  %v6997_v62 = vld [vmem:[%s22879_s0 + $0x13d] sm:$0x1]  ;;  %v7000_v11 = vld [vmem:[%s22879_s0 + $0x155] sm:$0x1] }
 0x4b9   :  { %v11386_v35 = vmul.f32 -1.442695, %v12496_v57  ;;  %v7772_v57 = vrot.slane %v7131_v60, 3  ;;  %v7771_v13 = vsel %vm613_vm3, %v7770_v31, %v7769_v50  ;;  %v7530_v43 = vrot.slane %v6993_v47, 5 }
 0x4ba   :  { %v11387_v24 = vmul.f32 -1.442695, %v12497_v3  ;;  %v5455_v56 = vpop.f32.mrb[30].mxu1 }
 0x4bb   :  { %12889 = vpow2.f32 %v11386_v35  ;;  %v12498_v26 = vadd.f32 %v5455_v56, %v15867_v17  ;;  %v5457_v27 = vpop.f32.mrb[31].mxu1  ;;  %v7773_v7 = vsel %vm616_vm4, %v7772_v57, %v7771_v13  ;;  %v6998_v57 = vld [vmem:[%s22879_s0 + $0x145] sm:$0x1] }
 0x4bc   :  { %12891 = vpow2.f32 %v11387_v24  ;;  %v12499_v4 = vadd.f32 %v5457_v27, %v15867_v17  ;;  %v7775_v56 = vsel %vm619_vm5, %v7774_v1, %v7773_v7  ;;  %v7542_v7 = vrot.slane %v7000_v11, 6 }
 0x4bd   :  { %v12882_v6 = vpop.eup %12881  ;;  %v11388_v46 = vmul.f32 -1.442695, %v12498_v26  ;;  %v7777_v22 = vsel %vm622_vm6, %v7776_v2, %v7775_v56  ;;  %v7005_v56 = vld [vmem:[%s22879_s0 + $0x17d] sm:$0x1] }
 0x4be   :  { %v12884_v41 = vpop.eup %12883  ;;  %v5536_v14 = vadd.f32 1.0, %v12882_v6  ;;  %v11389_v5 = vmul.f32 -1.442695, %v12499_v4  ;;  %v5461_v42 = vpop.f32.mrb[32].mxu1  ;;  %v7528_v4 = vrot.slane %v6992_v19, 6  ;;  %v12310_v6 = vpack.c.bf16 %v7777_v22, %v7763_v45 }
 0x4bf   :  { %v5537_v28 = vadd.f32 1.0, %v12884_v41  ;;  %12893 = vpow2.f32 %v11388_v46  ;;  %v12500_v49 = vadd.f32 %v5461_v42, %v15883_v39  ;;  %v5463_v16 = vpop.f32.mrb[33].mxu1  ;;  %v6996_v46 = vld [vmem:[%s22879_s0 + $0x135] sm:$0x1]  ;;  %v7527_v41 = vsel %vm604_vm0, %v7526_v12, %v6990_v21  ;;  %v7135_v12 = vld [vmem:[%s22879_s0 + $0x58d] sm:$0x1] }
 0x4c0   :  { %12895 = vrcp.f32 %v5536_v14  ;;  %v12501_v55 = vadd.f32 %v5463_v16, %v15883_v39  ;;  %12312 = vmatprep.subr.msk.bf16.mxu1 %vm13442_vm8, %v12310_v6  ;;  %v7529_v42 = vsel %vm607_vm1, %v7528_v4, %v7527_v41  ;;  %v7536_v16 = vrot.slane %v6996_v46, 2  ;;  %v7134_v4 = vld [vmem:[%s22879_s0 + $0x585] sm:$0x1]  ;;  %v7137_v46 = vld [vmem:[%s22879_s0 + $0x59d] sm:$0x1] }
 0x4c1   :  { %v12886_v53 = vpop.eup %12885  ;;  %12897 = vrcp.f32 %v5537_v28  ;;  %v11390_v0 = vmul.f32 -1.442695, %v12500_v49  ;;  %v7532_v28 = vrot.slane %v6994_v18, 4  ;;  %v7534_v49 = vrot.slane %v6995_v54, 3 }
 0x4c2   :  { %v12888_v3 = vpop.eup %12887  ;;  %v5538_v8 = vadd.f32 1.0, %v12886_v53  ;;  %12899 = vpow2.f32 %v11389_v5  ;;  %v11391_v9 = vmul.f32 -1.442695, %v12501_v55  ;;  %v5467_v10 = vpop.f32.mrb[34].mxu1  ;;  %v6999_v5 = vld [vmem:[%s22879_s0 + $0x14d] sm:$0x1]  ;;  %v7531_v53 = vsel %vm610_vm2, %v7530_v43, %v7529_v42 }
 0x4c3   :  { %v5539_v35 = vadd.f32 1.0, %v12888_v3  ;;  %12901 = vpow2.f32 %v11390_v0  ;;  %v12502_v15 = vadd.f32 %v5467_v10, %v15902_v58  ;;  %v5469_v37 = vpop.f32.mrb[35].mxu1  ;;  %v7538_v0 = vrot.slane %v6997_v62, 1  ;;  %v7001_v3 = vld [vmem:[%s22879_s0 + $0x15d] sm:$0x1] }
 0x4c4   :  { %12903 = vrcp.f32 %v5538_v8  ;;  %v12503_v24 = vadd.f32 %v5469_v37, %v15902_v58  ;;  %v7002_v8 = vld [vmem:[%s22879_s0 + $0x165] sm:$0x1]  ;;  %v7540_v10 = vrot.slane %v6999_v5, 7  ;;  %v7778_v62 = vrot.slane %v7135_v12, 7 }
 0x4c5   :  { %v12890_v26 = vpop.eup %12889  ;;  %12905 = vrcp.f32 %v5539_v35  ;;  %v11392_v27 = vmul.f32 -1.442695, %v12502_v15  ;;  %v7003_v35 = vld [vmem:[%s22879_s0 + $0x16d] sm:$0x1]  ;;  %v7004_v15 = vld [vmem:[%s22879_s0 + $0x175] sm:$0x1] }
 0x4c6   :  { %v12892_v30 = vpop.eup %12891  ;;  %v5540_v60 = vadd.f32 1.0, %v12890_v26  ;;  %12907 = vpow2.f32 %v11391_v9  ;;  %v11393_v51 = vmul.f32 -1.442695, %v12503_v24  ;;  %v5473_v34 = vpop.f32.mrb[36].mxu1  ;;  %v7533_v9 = vsel %vm613_vm3, %v7532_v28, %v7531_v53  ;;  %v7138_v28 = vld [vmem:[%s22879_s0 + $0x5a5] sm:$0x1] }
 0x4c7   :  { %v5541_v29 = vadd.f32 1.0, %v12892_v30  ;;  %12909 = vpow2.f32 %v11392_v27  ;;  %v12504_v52 = vadd.f32 %v5473_v34, %v15924_v25  ;;  %v5475_v40 = vpop.f32.mrb[37].mxu1  ;;  %v7535_v37 = vsel %vm616_vm4, %v7534_v49, %v7533_v9  ;;  %v7136_v30 = vld [vmem:[%s22879_s0 + $0x595] sm:$0x1]  ;;  %v7139_v49 = vld [vmem:[%s22879_s0 + $0x5ad] sm:$0x1] }
 0x4c8   :  { %12911 = vrcp.f32 %v5540_v60  ;;  %v12505_v14 = vadd.f32 %v5475_v40, %v15924_v25  ;;  %v7537_v47 = vsel %vm619_vm5, %v7536_v16, %v7535_v37  ;;  %v7541_v18 = vsel %vm604_vm0, %v7540_v10, %v6998_v57 }
 0x4c9   :  { %v12894_v45 = vpop.eup %12893  ;;  %12913 = vrcp.f32 %v5541_v29  ;;  %v7539_v22 = vsel %vm622_vm6, %v7538_v0, %v7537_v47  ;;  %v7543_v54 = vsel %vm607_vm1, %v7542_v7, %v7541_v18  ;;  %v7546_v34 = vrot.slane %v7002_v8, 4  ;;  %v7140_v0 = vld [vmem:[%s22879_s0 + $0x5b5] sm:$0x1]  ;;  %v7145_v47 = vld [vmem:[%s22879_s0 + $0x5dd] sm:$0x1] }
 0x4ca   :  { %v19433_v50 = vpop.eup %12895  ;;  %v5542_v55 = vadd.f32 1.0, %v12894_v45  ;;  %12915 = vpow2.f32 %v11393_v51  ;;  %v5479_v31 = vpop.f32.mrb[38].mxu1  ;;  %v7544_v51 = vrot.slane %v7001_v3, 5  ;;  %v7548_v6 = vrot.slane %v7003_v35, 3 }
 0x4cb   :  { %v19439_v1 = vpop.eup %12897  ;;  %12917 = vtanh.f32 %v12504_v52  ;;  %v12506_v2 = vadd.f32 %v5479_v31, %v15937_v23  ;;  %v5481_v36 = vpop.f32.mrb[39].mxu1  ;;  %v7550_v52 = vrot.slane %v7004_v15, 2  ;;  %v7552_v40 = vrot.slane %v7005_v56, 1  ;;  %v7144_v15 = vld [vmem:[%s22879_s0 + $0x5d5] sm:$0x1] }
 0x4cc   :  { %v12900_v13 = vpop.eup %12899  ;;  %12919 = vrcp.f32 %v5542_v55  ;;  %v12507_v19 = vadd.f32 %v5481_v36, %v15937_v23  ;;  %v7545_v5 = vsel %vm610_vm2, %v7544_v51, %v7543_v54  ;;  %v7780_v42 = vrot.slane %v7136_v30, 6  ;;  %v7142_v56 = vld [vmem:[%s22879_s0 + $0x5c5] sm:$0x1] }
 0x4cd   :  { %v12902_v21 = vpop.eup %12901  ;;  %v5543_v24 = vadd.f32 1.0, %v12900_v13  ;;  %12921 = vtanh.f32 %v12505_v14  ;;  %v7547_v11 = vsel %vm613_vm3, %v7546_v34, %v7545_v5  ;;  %v7779_v16 = vsel %vm604_vm0, %v7778_v62, %v7134_v4  ;;  %v7146_v34 = vld [vmem:[%s22879_s0 + $0x5e5] sm:$0x1] }
 0x4ce   :  { %v19465_v26 = vpop.eup %12903  ;;  %v5544_v27 = vadd.f32 1.0, %v12902_v21  ;;  %12923 = vtanh.f32 %v12506_v2  ;;  %v7782_v55 = vrot.slane %v7137_v46, 5  ;;  %v7549_v53 = vsel %vm616_vm4, %v7548_v6, %v7547_v11  ;;  %v7141_v2 = vld [vmem:[%s22879_s0 + $0x5bd] sm:$0x1]  ;;  %v7007_v11 = vld [vmem:[%s22879_s0 + $0x18d] sm:$0x1] }
 0x4cf   :  { %v19475_v60 = vpop.eup %12905  ;;  %12925 = vrcp.f32 %v5543_v24  ;;  %v7781_v36 = vsel %vm607_vm1, %v7780_v42, %v7779_v16  ;;  %v7551_v9 = vsel %vm619_vm5, %v7550_v52, %v7549_v53  ;;  %v7784_v37 = vrot.slane %v7138_v28, 4 }
 0x4d0   :  { %v12908_v29 = vpop.eup %12907  ;;  %12927 = vrcp.f32 %v5544_v27  ;;  %v7783_v10 = vsel %vm610_vm2, %v7782_v55, %v7781_v36  ;;  %v7553_v35 = vsel %vm622_vm6, %v7552_v40, %v7551_v9  ;;  %v7786_v7 = vrot.slane %v7139_v49, 3  ;;  %v7010_v36 = vld [vmem:[%s22879_s0 + $0x1a5] sm:$0x1] }
 0x4d1   :  { %v12910_v41 = vpop.eup %12909  ;;  %v5545_v14 = vadd.f32 1.0, %v12908_v29  ;;  %12929 = vtanh.f32 %v12507_v19  ;;  %v12313_v24 = vpack.c.bf16 %v7553_v35, %v7539_v22  ;;  %v7788_v18 = vrot.slane %v7140_v0, 2 }
 0x4d2   :  { %v12912_v43 = vpop.eup %12911  ;;  %v5546_v45 = vadd.f32 1.0, %v12910_v41  ;;  %v7790_v12 = vrot.slane %v7141_v2, 1  ;;  %v7785_v4 = vsel %vm613_vm3, %v7784_v37, %v7783_v10  ;;  %v7794_v46 = vrot.slane %v7144_v15, 6  ;;  %v7013_v15 = vld [vmem:[%s22879_s0 + $0x1bd] sm:$0x1] }
 0x4d3   :  { %v12914_v31 = vpop.eup %12913  ;;  %v5576_v57 = vmul.f32 %v12912_v43, %v18362_v61  ;;  %12931 = vrcp.f32 %v5545_v14  ;;  %v7143_v61 = vld [vmem:[%s22879_s0 + $0x5cd] sm:$0x1]  ;;  %12315 = vmatpush3.bf16.xpose.msk.msra.mxu1 %vm13442_vm8, %v12313_v24  ;;  %v7787_v6 = vsel %vm616_vm4, %v7786_v7, %v7785_v4  ;;  %v7796_v41 = vrot.slane %v7145_v47, 5  ;;  %v7016_v7 = vld [vmem:[%s22879_s0 + $0x1d5] sm:$0x1] }
 0x4d4   :  { %v12916_v3 = vpop.eup %12915  ;;  %v5577_v8 = vmul.f32 %v12914_v31, %v18384_v48  ;;  %12933 = vrcp.f32 %v5546_v45  ;;  %v7792_v30 = vrot.slane %v7143_v61, 7  ;;  %v7789_v40 = vsel %vm619_vm5, %v7788_v18, %v7787_v6  ;;  %v7006_v45 = vld [vmem:[%s22879_s0 + $0x185] sm:$0x1]  ;;  %v7008_v31 = vld [vmem:[%s22879_s0 + $0x195] sm:$0x1] }
 0x4d5   :  { %v12918_v13 = vpop.eup %12917  ;;  %v5547_v19 = vadd.f32 1.0, %v12916_v3  ;;  %v7791_v43 = vsel %vm622_vm6, %v7790_v12, %v7789_v40  ;;  %v7798_v16 = vrot.slane %v7146_v34, 4  ;;  %v7011_v3 = vld [vmem:[%s22879_s0 + $0x1ad] sm:$0x1]  ;;  %v7554_v10 = vrot.slane %v7007_v11, 7 }
 0x4d6   :  { %v12920_v48 = vpop.eup %12919  ;;  %v5580_v21 = vmul.f32 %v12918_v13, %v19433_v50  ;;  %v7793_v62 = vsel %vm604_vm0, %v7792_v30, %v7142_v56  ;;  %v7015_v37 = vld [vmem:[%s22879_s0 + $0x1cd] sm:$0x1]  ;;  %v7017_v56 = vld [vmem:[%s22879_s0 + $0x1dd] sm:$0x1]  ;;  %v7018_v47 = vld [vmem:[%s22879_s0 + $0x1e5] sm:$0x1] }
 0x4d7   :  { %v12922_v27 = vpop.eup %12921  ;;  %v5578_v54 = vmul.f32 %v12920_v48, %v18396_v20  ;;  %12935 = vrcp.f32 %v5547_v19  ;;  %v7147_v20 = vld [vmem:[%s22879_s0 + $0x5ed] sm:$0x1]  ;;  %v7795_v49 = vsel %vm607_vm1, %v7794_v46, %v7793_v62  ;;  %v7556_v48 = vrot.slane %v7008_v31, 6  ;;  %v7014_v4 = vld [vmem:[%s22879_s0 + $0x1c5] sm:$0x1] }
 0x4d8   :  { %v12924_v51 = vpop.eup %12923  ;;  %v19517_v50 = vadd.f32 %v5580_v21, %v5576_v57  ;;  %v5581_v22 = vmul.f32 %v12922_v27, %v19439_v1  ;;  %v7148_v1 = vld [vmem:[%s22879_s0 + $0x5f5] sm:$0x1]  ;;  %v7800_v55 = vrot.slane %v7147_v20, 3  ;;  %v7009_v57 = vld [vmem:[%s22879_s0 + $0x19d] sm:$0x1]  ;;  %v7797_v0 = vsel %vm610_vm2, %v7796_v41, %v7795_v49 }
 0x4d9   :  { %v12926_v29 = vpop.eup %12925  ;;  %v5582_v52 = vmul.f32 %v12924_v51, %v19465_v26  ;;  %v7149_v26 = vld [vmem:[%s22879_s0 + $0x5fd] sm:$0x1]  ;;  %v7802_v2 = vrot.slane %v7148_v1, 2  ;;  %v7799_v9 = vsel %vm613_vm3, %v7798_v16, %v7797_v0  ;;  %v7558_v21 = vrot.slane %v7009_v57, 5  ;;  %v7019_v30 = vld [vmem:[%s22879_s0 + $0x1ed] sm:$0x1] }
 0x4da   :  { %v19535_v14 = vpop.eup %12927  ;;  %v5579_v5 = vmul.f32 %v12926_v29, %v18419_v38  ;;  %12937 = vtanh.f32 %v19517_v50  ;;  %v19539_v42 = vadd.f32 %v5581_v22, %v5577_v8  ;;  %v7804_v61 = vrot.slane %v7149_v26, 1  ;;  %v7020_v6 = vld [vmem:[%s22879_s0 + $0x1f5] sm:$0x1] }
 0x4db   :  { %v12930_v28 = vpop.eup %12929  ;;  %v19551_v38 = vadd.f32 %v5582_v52, %v5578_v54  ;;  %v7801_v35 = vsel %vm616_vm4, %v7800_v55, %v7799_v9  ;;  %v7555_v18 = vsel %vm604_vm0, %v7554_v10, %v7006_v45  ;;  %v7560_v12 = vrot.slane %v7010_v36, 4  ;;  %v7021_v52 = vld [vmem:[%s22879_s0 + $0x1fd] sm:$0x1] }
 0x4dc   :  { %12939 = vtanh.f32 %v19539_v42  ;;  %v5583_v53 = vmul.f32 %v12930_v28, %v19475_v60  ;;  %v7012_v60 = vld [vmem:[%s22879_s0 + $0x1b5] sm:$0x1]  ;;  %v7803_v24 = vsel %vm619_vm5, %v7802_v2, %v7801_v35  ;;  %v7562_v27 = vrot.slane %v7011_v3, 3 }
 0x4dd   :  { %v12932_v8 = vpop.eup %12931  ;;  %12941 = vtanh.f32 %v19551_v38  ;;  %v7805_v54 = vsel %vm622_vm6, %v7804_v61, %v7803_v24  ;;  %v7557_v51 = vsel %vm607_vm1, %v7556_v48, %v7555_v18  ;;  %v7564_v22 = vrot.slane %v7012_v60, 2  ;;  %v13262_v24 = vld [vmem:[%s22882_s2 + $0x20] sm:$0xff]  ;;  %v13265_v18 = vld [vmem:[%s22882_s2 + $0x38] sm:$0xff] }
 0x4de   :  { %v12934_v13 = vpop.eup %12933  ;;  %v19574_v19 = vadd.f32 %v5583_v53, %v5579_v5  ;;  %v12316_v20 = vpack.c.bf16 %v7805_v54, %v7791_v43  ;;  %v7559_v46 = vsel %vm610_vm2, %v7558_v21, %v7557_v51  ;;  %v7568_v29 = vrot.slane %v7015_v37, 7  ;;  %v13261_v21 = vld [vmem:[%s22882_s2 + $0x18] sm:$0xff]  ;;  %v7159_v54 = vld [vmem:[%s22879_s0 + $0x64d] sm:$0x1] }
 0x4df   :  { %v7561_v1 = vsel %vm613_vm3, %v7560_v12, %v7559_v46  ;;  %v7570_v40 = vrot.slane %v7016_v7, 6  ;;  %v7572_v62 = vrot.slane %v7017_v56, 5  ;;  %v7574_v41 = vrot.slane %v7018_v47, 4  ;;  %v13263_v56 = vld [vmem:[%s22882_s2 + $0x28] sm:$0xff]  ;;  %v13264_v47 = vld [vmem:[%s22882_s2 + $0x30] sm:$0xff]  ;;  %v19668_v12 = vld [vmem:[%s22880_s1] sm:$0xff] }
 0x4e0   :  { %12943 = vtanh.f32 %v19574_v19  ;;  %12318 = vmatprep.subr.msk.bf16.mxu1 %vm13442_vm8, %v12316_v20  ;;  %v7563_v5 = vsel %vm616_vm4, %v7562_v27, %v7561_v1  ;;  %v7566_v26 = vrot.slane %v7013_v15, 1  ;;  %v7569_v43 = vsel %vm604_vm0, %v7568_v29, %v7014_v4  ;;  %v7151_v27 = vld [vmem:[%s22879_s0 + $0x60d] sm:$0x1]  ;;  %v7152_v4 = vld [vmem:[%s22879_s0 + $0x615] sm:$0x1] }
 0x4e1   :  { %v12936_v34 = vpop.eup %12935  ;;  %v7576_v45 = vrot.slane %v7019_v30, 3  ;;  %v7565_v28 = vsel %vm619_vm5, %v7564_v22, %v7563_v5  ;;  %v7571_v49 = vsel %vm607_vm1, %v7570_v40, %v7569_v43  ;;  %v7578_v16 = vrot.slane %v7020_v6, 2  ;;  %v7160_v30 = vld [vmem:[%s22879_s0 + $0x655] sm:$0x1]  ;;  %v7153_v20 = vld [vmem:[%s22879_s0 + $0x61d] sm:$0x1] }
 0x4e2   :  { %v7573_v55 = vsel %vm610_vm2, %v7572_v62, %v7571_v49  ;;  %v7580_v31 = vrot.slane %v7021_v52, 1  ;;  %v7567_v2 = vsel %vm622_vm6, %v7566_v26, %v7565_v28  ;;  %v7806_v51 = vrot.slane %v7151_v27, 7  ;;  %v7158_v6 = vld [vmem:[%s22879_s0 + $0x645] sm:$0x1]  ;;  %v7161_v29 = vld [vmem:[%s22879_s0 + $0x65d] sm:$0x1] }
 0x4e3   :  { %v7575_v53 = vsel %vm613_vm3, %v7574_v41, %v7573_v55  ;;  %v7820_v22 = vrot.slane %v7159_v54, 7  ;;  %v7154_v46 = vld [vmem:[%s22879_s0 + $0x625] sm:$0x1]  ;;  %v7155_v40 = vld [vmem:[%s22879_s0 + $0x62d] sm:$0x1]  ;;  %v7808_v41 = vrot.slane %v7152_v4, 6 }
 0x4e4   :  { %v12938_v11 = vpop.eup %12937  ;;  %v7577_v36 = vsel %vm616_vm4, %v7576_v45, %v7575_v53  ;;  %v7162_v52 = vld [vmem:[%s22879_s0 + $0x665] sm:$0x1]  ;;  %v7163_v62 = vld [vmem:[%s22879_s0 + $0x66d] sm:$0x1]  ;;  %v7810_v5 = vrot.slane %v7153_v20, 5  ;;  %v7812_v45 = vrot.slane %v7154_v46, 4 }
 0x4e5   :  { %v5592_v3 = vmul.f32 %v12938_v11, %v19535_v14  ;;  %v7579_v61 = vsel %vm619_vm5, %v7578_v16, %v7577_v36  ;;  %v13258_v14 = vld [vmem:[%s22882_s2] sm:$0xff]  ;;  %v7156_v26 = vld [vmem:[%s22879_s0 + $0x635] sm:$0x1]  ;;  %v7814_v11 = vrot.slane %v7155_v40, 3  ;;  %v7821_v28 = vsel %vm604_vm0, %v7820_v22, %v7158_v6  ;;  %v7157_v49 = vld [vmem:[%s22879_s0 + $0x63d] sm:$0x1] }
 0x4e6   :  { %v12940_v57 = vpop.eup %12939  ;;  %v7581_v60 = vsel %vm622_vm6, %v7580_v31, %v7579_v61  ;;  %v7164_v43 = vld [vmem:[%s22879_s0 + $0x675] sm:$0x1]  ;;  %v7165_v16 = vld [vmem:[%s22879_s0 + $0x67d] sm:$0x1]  ;;  %v7816_v31 = vrot.slane %v7156_v26, 2  ;;  %v7826_v36 = vrot.slane %v7162_v52, 4 }
 0x4e7   :  { %v12942_v0 = vpop.eup %12941  ;;  %v12319_v15 = vpack.c.bf16 %v7581_v60, %v7567_v2  ;;  %v5593_v37 = vmul.f32 %v12940_v57, %v12932_v8  ;;  %v13260_v8 = vld [vmem:[%s22882_s2 + $0x10] sm:$0xff]  ;;  %v7822_v57 = vrot.slane %v7160_v30, 6  ;;  %v7824_v2 = vrot.slane %v7161_v29, 5  ;;  %v7029_v4 = vld [vmem:[%s22879_s0 + $0x23d] sm:$0x1] }
 0x4e8   :  { %v5594_v9 = vmul.f32 %v12942_v0, %v12934_v13  ;;  %v13259_v13 = vld [vmem:[%s22882_s2 + $0x8] sm:$0xff]  ;;  %v7818_v0 = vrot.slane %v7157_v49, 1  ;;  %v7828_v61 = vrot.slane %v7163_v62, 3  ;;  %v7830_v60 = vrot.slane %v7164_v43, 2  ;;  %v7028_v27 = vld [vmem:[%s22879_s0 + $0x235] sm:$0x1] }
 0x4e9   :  { %12321 = vmatpush3.bf16.xpose.msk.msra.mxu1 %vm13442_vm8, %v12319_v15  ;;  %v7030_v30 = vld [vmem:[%s22879_s0 + $0x245] sm:$0x1]  ;;  %v7032_v22 = vld [vmem:[%s22879_s0 + $0x255] sm:$0x1]  ;;  %v7033_v6 = vld [vmem:[%s22879_s0 + $0x25d] sm:$0x1] }
 0x4ea   :  { %v12944_v10 = vpop.eup %12943  ;;  %v12296_v35 = vpack.c.bf16 %v5594_v9, %v5592_v3  ;;  %v7823_v9 = vsel %vm607_vm1, %v7822_v57, %v7821_v28  ;;  %v7034_v46 = vld [vmem:[%s22879_s0 + $0x265] sm:$0x1]  ;;  %v7035_v40 = vld [vmem:[%s22879_s0 + $0x26d] sm:$0x1]  ;;  %v7036_v62 = vld [vmem:[%s22879_s0 + $0x275] sm:$0x1] }
 0x4eb   :  { %v5595_v7 = vmul.f32 %v12944_v10, %v12936_v34  ;;  %v7150_v34 = vld [vmem:[%s22879_s0 + $0x605] sm:$0x1]  ;;  %v7023_v10 = vld [vmem:[%s22879_s0 + $0x20d] sm:$0x1]  ;;  %v7825_v15 = vsel %vm610_vm2, %v7824_v2, %v7823_v9  ;;  %v7037_v26 = vld [vmem:[%s22879_s0 + $0x27d] sm:$0x1] }
 0x4ec   :  { %v7807_v1 = vsel %vm604_vm0, %v7806_v51, %v7150_v34  ;;  %v7031_v51 = vld [vmem:[%s22879_s0 + $0x24d] sm:$0x1]  ;;  %v7598_v28 = vrot.slane %v7032_v22, 6  ;;  %v7594_v57 = vrot.slane %v7029_v4, 1  ;;  %v7608_v9 = vrot.slane %v7037_v26, 1 }
 0x4ed   :  { %v12294_v48 = vpack.c.bf16 %v5595_v7, %v5593_v37  ;;  %v7809_v55 = vsel %vm607_vm1, %v7808_v41, %v7807_v1  ;;  %v7832_v37 = vrot.slane %v7165_v16, 1  ;;  %v7022_v7 = vld [vmem:[%s22879_s0 + $0x205] sm:$0x1]  ;;  %v7600_v16 = vrot.slane %v7033_v6, 5 }
 0x4ee   :  { %v7811_v53 = vsel %vm610_vm2, %v7810_v5, %v7809_v55  ;;  %v7602_v55 = vrot.slane %v7034_v46, 4  ;;  %v7174_v6 = vld [vmem:[%s22879_s0 + $0x6c5] sm:$0x1]  ;;  %v7179_v46 = vld [vmem:[%s22879_s0 + $0x6ed] sm:$0x1] }
 0x4ef   :  { %12295 = vmatprep.subr.bf16.mxu0 %v12294_v48  ;;  %v7813_v3 = vsel %vm613_vm3, %v7812_v45, %v7811_v53  ;;  %v7582_v48 = vrot.slane %v7023_v10, 7  ;;  %v7592_v45 = vrot.slane %v7028_v27, 2  ;;  %v7168_v10 = vld [vmem:[%s22879_s0 + $0x695] sm:$0x1] }
 0x4f0   :  { %12297 = vmatpush1.bf16.msra.mxu0 %v12296_v35  ;;  %v7815_v35 = vsel %vm616_vm4, %v7814_v11, %v7813_v3  ;;  %v7596_v11 = vrot.slane %v7031_v51, 7  ;;  %v7606_v3 = vrot.slane %v7036_v62, 2  ;;  %v7180_v62 = vld [vmem:[%s22879_s0 + $0x6f5] sm:$0x1] }
 0x4f1   :  { %v7583_v34 = vsel %vm604_vm0, %v7582_v48, %v7022_v7  ;;  %v7170_v7 = vld [vmem:[%s22879_s0 + $0x6a5] sm:$0x1]  ;;  %v7171_v48 = vld [vmem:[%s22879_s0 + $0x6ad] sm:$0x1] }
 0x4f2   :  { %v7597_v53 = vsel %vm604_vm0, %v7596_v11, %v7030_v30  ;;  %v7178_v30 = vld [vmem:[%s22879_s0 + $0x6e5] sm:$0x1]  ;;  %v7840_v22 = vrot.slane %v7170_v7, 4  ;;  %v7047_v7 = vld [vmem:[%s22879_s0 + $0x2cd] sm:$0x1] }
 0x4f3   :  { %11434 = vmatmul.mubr.msk.f32.vlgmr.msra.gmra.mrb[32].mxu0 %vm1260_vm9, %v13258_v14  ;;  %v7817_v14 = vsel %vm619_vm5, %v7816_v31, %v7815_v35 }
 0x4f4   :  { %6803 = vmatprep.mubr.f32.mxu0 %v22886_v33 }
 0x4f7   :  { %11435 = vmatmul.mubr.msk.f32.gmra.mrb[34].mxu0 %vm1260_vm9, %v13259_v13  ;;  %v7827_v13 = vsel %vm613_vm3, %v7826_v36, %v7825_v15  ;;  %v7599_v36 = vsel %vm607_vm1, %v7598_v28, %v7597_v53  ;;  %v7854_v28 = vrot.slane %v7178_v30, 4  ;;  %v7038_v53 = vld [vmem:[%s22879_s0 + $0x285] sm:$0x1] }
 0x4f8   :  { %6809 = vmatprep.mubr.f32.mxu0 %v22886_v33  ;;  %v7601_v15 = vsel %vm610_vm2, %v7600_v16, %v7599_v36  ;;  %v7040_v16 = vld [vmem:[%s22879_s0 + $0x295] sm:$0x1] }
 0x4fb   :  { %11436 = vmatmul.mubr.msk.f32.gmra.mrb[36].mxu0 %vm1260_vm9, %v13260_v8  ;;  %v7024_v8 = vld [vmem:[%s22879_s0 + $0x215] sm:$0x1] }
 0x4fc   :  { %6815 = vmatprep.mubr.f32.mxu0 %v22886_v33  ;;  %v7584_v29 = vrot.slane %v7024_v8, 6  ;;  %v7173_v8 = vld [vmem:[%s22879_s0 + $0x6bd] sm:$0x1] }
 0x4fe   :  { %v7585_v43 = vsel %vm607_vm1, %v7584_v29, %v7583_v34  ;;  %v7842_v34 = vrot.slane %v7171_v48, 3  ;;  %v7048_v48 = vld [vmem:[%s22879_s0 + $0x2d5] sm:$0x1] }
 0x4ff   :  { %11437 = vmatmul.mubr.msk.f32.gmra.mrb[38].mxu0 %vm1260_vm9, %v13261_v21  ;;  %v7025_v21 = vld [vmem:[%s22879_s0 + $0x21d] sm:$0x1] }
 0x500   :  { %6821 = vmatprep.mubr.f32.mxu0 %v22886_v33  ;;  %v7586_v52 = vrot.slane %v7025_v21, 5  ;;  %v7175_v21 = vld [vmem:[%s22879_s0 + $0x6cd] sm:$0x1] }
 0x501   :  { %v7848_v26 = vrot.slane %v7175_v21, 7  ;;  %v7049_v21 = vld [vmem:[%s22879_s0 + $0x2dd] sm:$0x1] }
 0x502   :  { %v7587_v49 = vsel %vm610_vm2, %v7586_v52, %v7585_v43 }
 0x503   :  { %11438 = vmatmul.mubr.msk.f32.gmra.mrb[40].mxu0 %vm1260_vm9, %v13262_v24  ;;  %v7819_v24 = vsel %vm622_vm6, %v7818_v0, %v7817_v14  ;;  %v7604_v0 = vrot.slane %v7035_v40, 3  ;;  %v7603_v14 = vsel %vm613_vm3, %v7602_v55, %v7601_v15 }
 0x504   :  { %6827 = vmatprep.mubr.f32.mxu0 %v22886_v33 }
 0x507   :  { %11439 = vmatmul.mubr.msk.f32.gmra.mrb[42].mxu0 %vm1260_vm9, %v13263_v56  ;;  %v7829_v56 = vsel %vm616_vm4, %v7828_v61, %v7827_v13  ;;  %v7166_v61 = vld [vmem:[%s22879_s0 + $0x685] sm:$0x1]  ;;  %v7172_v13 = vld [vmem:[%s22879_s0 + $0x6b5] sm:$0x1] }
 0x508   :  { %6833 = vmatprep.mubr.f32.mxu0 %v22886_v33  ;;  %v7831_v54 = vsel %vm619_vm5, %v7830_v60, %v7829_v56  ;;  %v7167_v60 = vld [vmem:[%s22879_s0 + $0x68d] sm:$0x1]  ;;  %v7605_v56 = vsel %vm616_vm4, %v7604_v0, %v7603_v14  ;;  %v7844_v52 = vrot.slane %v7172_v13, 2  ;;  %v7041_v0 = vld [vmem:[%s22879_s0 + $0x29d] sm:$0x1] }
 0x509   :  { %v7833_v20 = vsel %vm622_vm6, %v7832_v37, %v7831_v54  ;;  %v7169_v37 = vld [vmem:[%s22879_s0 + $0x69d] sm:$0x1]  ;;  %v7834_v27 = vrot.slane %v7167_v60, 7  ;;  %v7836_v54 = vrot.slane %v7168_v10, 6  ;;  %v7607_v4 = vsel %vm619_vm5, %v7606_v3, %v7605_v56  ;;  %v7043_v60 = vld [vmem:[%s22879_s0 + $0x2ad] sm:$0x1] }
 0x50a   :  { %v12322_v1 = vpack.c.bf16 %v7833_v20, %v7819_v24  ;;  %v7838_v51 = vrot.slane %v7169_v37, 5  ;;  %v7609_v20 = vsel %vm622_vm6, %v7608_v9, %v7607_v4  ;;  %v7858_v9 = vrot.slane %v7180_v62, 2  ;;  %v7044_v10 = vld [vmem:[%s22879_s0 + $0x2b5] sm:$0x1]  ;;  %v7045_v37 = vld [vmem:[%s22879_s0 + $0x2bd] sm:$0x1] }
 0x50b   :  { %11440 = vmatmul.mubr.msk.f32.gmra.mrb[44].mxu0 %vm1260_vm9, %v13264_v47  ;;  %v7026_v47 = vld [vmem:[%s22879_s0 + $0x225] sm:$0x1]  ;;  %v7835_v29 = vsel %vm604_vm0, %v7834_v27, %v7166_v61  ;;  %v7051_v27 = vld [vmem:[%s22879_s0 + $0x2ed] sm:$0x1]  ;;  %v7618_v30 = vrot.slane %v7043_v60, 3 }
 0x50c   :  { %6839 = vmatprep.mubr.f32.mxu0 %v22886_v33  ;;  %v7588_v41 = vrot.slane %v7026_v47, 4  ;;  %12324 = vmatprep.subr.msk.bf16.mxu1 %vm13442_vm8, %v12322_v1  ;;  %v7176_v47 = vld [vmem:[%s22879_s0 + $0x6d5] sm:$0x1]  ;;  %v7846_v1 = vrot.slane %v7173_v8, 1  ;;  %v7046_v8 = vld [vmem:[%s22879_s0 + $0x2c5] sm:$0x1] }
 0x50d   :  { %v7850_v43 = vrot.slane %v7176_v47, 6  ;;  %v7612_v47 = vrot.slane %v7040_v16, 6  ;;  %v7182_v62 = vld [vmem:[%s22879_s0 + $0x705] sm:$0x1] }
 0x50e   :  { %v7589_v31 = vsel %vm613_vm3, %v7588_v41, %v7587_v49  ;;  %v7181_v41 = vld [vmem:[%s22879_s0 + $0x6fd] sm:$0x1]  ;;  %v7039_v49 = vld [vmem:[%s22879_s0 + $0x28d] sm:$0x1] }
 0x50f   :  { %11441 = vmatmul.mubr.msk.f32.gmra.mrb[46].mxu0 %vm1260_vm9, %v13265_v18  ;;  %v7027_v18 = vld [vmem:[%s22879_s0 + $0x22d] sm:$0x1]  ;;  %v7860_v61 = vrot.slane %v7181_v41, 1  ;;  %v7610_v56 = vrot.slane %v7039_v49, 7 }
 0x510   :  { %11964 = vmatprep.mubr.msk.f32.mxu0 %vm1058_vm7, %v19668_v12  ;;  %v7590_v5 = vrot.slane %v7027_v18, 3  ;;  %v7177_v18 = vld [vmem:[%s22879_s0 + $0x6dd] sm:$0x1]  ;;  %v7183_v41 = vld [vmem:[%s22879_s0 + $0x70d] sm:$0x1] }
 0x511   :  { %v7852_v11 = vrot.slane %v7177_v18, 5 }
 0x512   :  { %v7591_v2 = vsel %vm616_vm4, %v7590_v5, %v7589_v31  ;;  %v7837_v5 = vsel %vm607_vm1, %v7836_v54, %v7835_v29  ;;  %v7849_v31 = vsel %vm604_vm0, %v7848_v26, %v7174_v6  ;;  %v7614_v54 = vrot.slane %v7041_v0, 5 }
 0x513   :  { %v7593_v35 = vsel %vm619_vm5, %v7592_v45, %v7591_v2  ;;  %v7839_v45 = vsel %vm610_vm2, %v7838_v51, %v7837_v5  ;;  %v7042_v2 = vld [vmem:[%s22879_s0 + $0x2a5] sm:$0x1]  ;;  %v7851_v3 = vsel %vm607_vm1, %v7850_v43, %v7849_v31  ;;  %v7620_v6 = vrot.slane %v7044_v10, 2 }
 0x514   :  { %v7595_v24 = vsel %vm622_vm6, %v7594_v57, %v7593_v35  ;;  %v7841_v55 = vsel %vm613_vm3, %v7840_v22, %v7839_v45  ;;  %v7856_v57 = vrot.slane %v7179_v46, 3  ;;  %v7853_v15 = vsel %vm610_vm2, %v7852_v11, %v7851_v3  ;;  %v7052_v22 = vld [vmem:[%s22879_s0 + $0x2f5] sm:$0x1]  ;;  %v7186_v31 = vld [vmem:[%s22879_s0 + $0x725] sm:$0x1] }
 0x515   :  { %v12325_v40 = vpack.c.bf16 %v7609_v20, %v7595_v24  ;;  %v7843_v36 = vsel %vm616_vm4, %v7842_v34, %v7841_v55  ;;  %v7855_v13 = vsel %vm613_vm3, %v7854_v28, %v7853_v15  ;;  %v7050_v24 = vld [vmem:[%s22879_s0 + $0x2e5] sm:$0x1]  ;;  %v7616_v4 = vrot.slane %v7042_v2, 4  ;;  %v7053_v34 = vld [vmem:[%s22879_s0 + $0x2fd] sm:$0x1] }
 0x516   :  { %v7845_v35 = vsel %vm619_vm5, %v7844_v52, %v7843_v36  ;;  %v7857_v18 = vsel %vm616_vm4, %v7856_v57, %v7855_v13  ;;  %v7611_v20 = vsel %vm604_vm0, %v7610_v56, %v7038_v53  ;;  %v7622_v46 = vrot.slane %v7045_v37, 1  ;;  %v7184_v11 = vld [vmem:[%s22879_s0 + $0x715] sm:$0x1]  ;;  %v7185_v28 = vld [vmem:[%s22879_s0 + $0x71d] sm:$0x1] }
 0x517   :  { %12327 = vmatpush3.bf16.xpose.msk.msra.mxu1 %vm13442_vm8, %v12325_v40  ;;  %v7847_v14 = vsel %vm622_vm6, %v7846_v1, %v7845_v35  ;;  %v7859_v51 = vsel %vm619_vm5, %v7858_v9, %v7857_v18  ;;  %v7613_v52 = vsel %vm607_vm1, %v7612_v47, %v7611_v20  ;;  %v7624_v1 = vrot.slane %v7047_v7, 7  ;;  %v7187_v57 = vld [vmem:[%s22879_s0 + $0x72d] sm:$0x1]  ;;  %v7188_v36 = vld [vmem:[%s22879_s0 + $0x735] sm:$0x1] }
 0x518   :  { %v7861_v29 = vsel %vm622_vm6, %v7860_v61, %v7859_v51  ;;  %v7626_v40 = vrot.slane %v7048_v48, 6  ;;  %v7615_v26 = vsel %vm610_vm2, %v7614_v54, %v7613_v52  ;;  %v7628_v43 = vrot.slane %v7049_v21, 5  ;;  %v7189_v3 = vld [vmem:[%s22879_s0 + $0x73d] sm:$0x1]  ;;  %v7191_v35 = vld [vmem:[%s22879_s0 + $0x74d] sm:$0x1] }
 0x519   :  { %v12328_v5 = vpack.c.bf16 %v7861_v29, %v7847_v14  ;;  %v7630_v45 = vrot.slane %v7050_v24, 4  ;;  %v7617_v49 = vsel %vm613_vm3, %v7616_v4, %v7615_v26  ;;  %v7625_v16 = vsel %vm604_vm0, %v7624_v1, %v7046_v8  ;;  %v7192_v15 = vld [vmem:[%s22879_s0 + $0x755] sm:$0x1]  ;;  %v7190_v48 = vld [vmem:[%s22879_s0 + $0x745] sm:$0x1] }
 0x51a   :  { %v7632_v55 = vrot.slane %v7051_v27, 3  ;;  %v7619_v53 = vsel %vm616_vm4, %v7618_v30, %v7617_v49  ;;  %v7627_v0 = vsel %vm607_vm1, %v7626_v40, %v7625_v16  ;;  %v7634_v2 = vrot.slane %v7052_v22, 2  ;;  %v7193_v14 = vld [vmem:[%s22879_s0 + $0x75d] sm:$0x1]  ;;  %v7194_v13 = vld [vmem:[%s22879_s0 + $0x765] sm:$0x1] }
 0x51b   :  { %12330 = vmatprep.subr.msk.bf16.mxu1 %vm13442_vm8, %v12328_v5  ;;  %v7862_v9 = vrot.slane %v7183_v41, 7  ;;  %v7621_v61 = vsel %vm619_vm5, %v7620_v6, %v7619_v53  ;;  %v7629_v60 = vsel %vm610_vm2, %v7628_v43, %v7627_v0  ;;  %v7636_v10 = vrot.slane %v7053_v34, 1  ;;  %v7195_v56 = vld [vmem:[%s22879_s0 + $0x76d] sm:$0x1]  ;;  %v7196_v4 = vld [vmem:[%s22879_s0 + $0x775] sm:$0x1] }
 0x51c   :  { %v7623_v37 = vsel %vm622_vm6, %v7622_v46, %v7621_v61  ;;  %v7631_v7 = vsel %vm613_vm3, %v7630_v45, %v7629_v60  ;;  %v7864_v21 = vrot.slane %v7184_v11, 6  ;;  %v7866_v47 = vrot.slane %v7185_v28, 5  ;;  %v7197_v30 = vld [vmem:[%s22879_s0 + $0x77d] sm:$0x1]  ;;  %v7054_v52 = vld [vmem:[%s22879_s0 + $0x305] sm:$0x1] }
 0x51d   :  { %v7863_v8 = vsel %vm604_vm0, %v7862_v9, %v7182_v62  ;;  %v7633_v24 = vsel %vm616_vm4, %v7632_v55, %v7631_v7  ;;  %v7868_v18 = vrot.slane %v7186_v31, 4  ;;  %v7870_v27 = vrot.slane %v7187_v57, 3  ;;  %v7055_v1 = vld [vmem:[%s22879_s0 + $0x30d] sm:$0x1]  ;;  %v7056_v26 = vld [vmem:[%s22879_s0 + $0x315] sm:$0x1] }
 0x51e   :  { %v7635_v54 = vsel %vm619_vm5, %v7634_v2, %v7633_v24  ;;  %v7865_v51 = vsel %vm607_vm1, %v7864_v21, %v7863_v8  ;;  %v7872_v22 = vrot.slane %v7188_v36, 2  ;;  %v7874_v34 = vrot.slane %v7189_v3, 1  ;;  %v7057_v43 = vld [vmem:[%s22879_s0 + $0x31d] sm:$0x1]  ;;  %v7058_v49 = vld [vmem:[%s22879_s0 + $0x325] sm:$0x1] }
 0x51f   :  { %v7637_v20 = vsel %vm622_vm6, %v7636_v10, %v7635_v54  ;;  %v7867_v6 = vsel %vm610_vm2, %v7866_v47, %v7865_v51  ;;  %v7876_v46 = vrot.slane %v7191_v35, 7  ;;  %v7878_v29 = vrot.slane %v7192_v15, 6  ;;  %v7059_v16 = vld [vmem:[%s22879_s0 + $0x32d] sm:$0x1]  ;;  %v7060_v53 = vld [vmem:[%s22879_s0 + $0x335] sm:$0x1] }
 0x520   :  { %v12331_v40 = vpack.c.bf16 %v7637_v20, %v7623_v37  ;;  %v7869_v62 = vsel %vm613_vm3, %v7868_v18, %v7867_v6  ;;  %v7880_v41 = vrot.slane %v7193_v14, 5  ;;  %v7882_v5 = vrot.slane %v7194_v13, 4  ;;  %v7061_v0 = vld [vmem:[%s22879_s0 + $0x33d] sm:$0x1]  ;;  %v7062_v61 = vld [vmem:[%s22879_s0 + $0x345] sm:$0x1] }
 0x521   :  { %v7871_v45 = vsel %vm616_vm4, %v7870_v27, %v7869_v62  ;;  %v7877_v11 = vsel %vm604_vm0, %v7876_v46, %v7190_v48  ;;  %v7884_v28 = vrot.slane %v7195_v56, 3  ;;  %v7886_v57 = vrot.slane %v7196_v4, 2  ;;  %v7063_v60 = vld [vmem:[%s22879_s0 + $0x34d] sm:$0x1]  ;;  %v7064_v10 = vld [vmem:[%s22879_s0 + $0x355] sm:$0x1] }
 0x522   :  { %12333 = vmatpush3.bf16.xpose.msk.msra.mxu1 %vm13442_vm8, %v12331_v40  ;;  %v7873_v55 = vsel %vm619_vm5, %v7872_v22, %v7871_v45  ;;  %v7879_v31 = vsel %vm607_vm1, %v7878_v29, %v7877_v11  ;;  %v7638_v2 = vrot.slane %v7055_v1, 7  ;;  %v7888_v9 = vrot.slane %v7197_v30, 1  ;;  %v7065_v15 = vld [vmem:[%s22879_s0 + $0x35d] sm:$0x1]  ;;  %v7066_v37 = vld [vmem:[%s22879_s0 + $0x365] sm:$0x1] }
 0x523   :  { %v7875_v36 = vsel %vm622_vm6, %v7874_v34, %v7873_v55  ;;  %v7881_v3 = vsel %vm610_vm2, %v7880_v41, %v7879_v31  ;;  %v7640_v48 = vrot.slane %v7056_v26, 6  ;;  %v7642_v14 = vrot.slane %v7057_v43, 5  ;;  %v7067_v8 = vld [vmem:[%s22879_s0 + $0x36d] sm:$0x1]  ;;  %v7068_v18 = vld [vmem:[%s22879_s0 + $0x375] sm:$0x1] }
 0x524   :  { %v7883_v35 = vsel %vm613_vm3, %v7882_v5, %v7881_v3  ;;  %v7639_v7 = vsel %vm604_vm0, %v7638_v2, %v7054_v52  ;;  %v7644_v21 = vrot.slane %v7058_v49, 4  ;;  %v7646_v24 = vrot.slane %v7059_v16, 3  ;;  %v7069_v27 = vld [vmem:[%s22879_s0 + $0x37d] sm:$0x1]  ;;  %v7198_v6 = vld [vmem:[%s22879_s0 + $0x785] sm:$0x1] }
 0x525   :  { %v7885_v13 = vsel %vm616_vm4, %v7884_v28, %v7883_v35  ;;  %v7648_v56 = vrot.slane %v7060_v53, 2  ;;  %v7641_v54 = vsel %vm607_vm1, %v7640_v48, %v7639_v7  ;;  %v7650_v4 = vrot.slane %v7061_v0, 1  ;;  %v7199_v46 = vld [vmem:[%s22879_s0 + $0x78d] sm:$0x1]  ;;  %v7200_v62 = vld [vmem:[%s22879_s0 + $0x795] sm:$0x1] }
 0x526   :  { %v7887_v47 = vsel %vm619_vm5, %v7886_v57, %v7885_v13  ;;  %v7652_v30 = vrot.slane %v7063_v60, 7  ;;  %v7643_v22 = vsel %vm610_vm2, %v7642_v14, %v7641_v54  ;;  %v7654_v34 = vrot.slane %v7064_v10, 6  ;;  %v7201_v41 = vld [vmem:[%s22879_s0 + $0x79d] sm:$0x1]  ;;  %v7202_v11 = vld [vmem:[%s22879_s0 + $0x7a5] sm:$0x1] }
 0x527   :  { %v7889_v51 = vsel %vm622_vm6, %v7888_v9, %v7887_v47  ;;  %v7656_v20 = vrot.slane %v7065_v15, 5  ;;  %v7645_v52 = vsel %vm613_vm3, %v7644_v21, %v7643_v22  ;;  %v7658_v40 = vrot.slane %v7066_v37, 4  ;;  %v7203_v28 = vld [vmem:[%s22879_s0 + $0x7ad] sm:$0x1]  ;;  %v7204_v31 = vld [vmem:[%s22879_s0 + $0x7b5] sm:$0x1] }
 0x528   :  { %v12334_v29 = vpack.c.bf16 %v7889_v51, %v7875_v36  ;;  %v7653_v1 = vsel %vm604_vm0, %v7652_v30, %v7062_v61  ;;  %v7647_v5 = vsel %vm616_vm4, %v7646_v24, %v7645_v52  ;;  %v7660_v43 = vrot.slane %v7067_v8, 3  ;;  %v7205_v57 = vld [vmem:[%s22879_s0 + $0x7bd] sm:$0x1]  ;;  %v7206_v36 = vld [vmem:[%s22879_s0 + $0x7c5] sm:$0x1] }
 0x529   :  { %v7655_v26 = vsel %vm607_vm1, %v7654_v34, %v7653_v1  ;;  %v7662_v45 = vrot.slane %v7068_v18, 2  ;;  %v7649_v49 = vsel %vm619_vm5, %v7648_v56, %v7647_v5  ;;  %v7664_v55 = vrot.slane %v7069_v27, 1  ;;  %v7207_v3 = vld [vmem:[%s22879_s0 + $0x7cd] sm:$0x1]  ;;  %v7208_v9 = vld [vmem:[%s22879_s0 + $0x7d5] sm:$0x1] }
 0x52a   :  { %12336 = vmatprep.subr.msk.bf16.mxu1 %vm13442_vm8, %v12334_v29  ;;  %v7657_v16 = vsel %vm610_vm2, %v7656_v20, %v7655_v26  ;;  %v7890_v53 = vrot.slane %v7199_v46, 7  ;;  %v7651_v0 = vsel %vm622_vm6, %v7650_v4, %v7649_v49  ;;  %v7209_v60 = vld [vmem:[%s22879_s0 + $0x7dd] sm:$0x1]  ;;  %v7210_v10 = vld [vmem:[%s22879_s0 + $0x7e5] sm:$0x1]  ;;  %v7892_v15 = vrot.slane %v7200_v62, 6 }
 0x52b   :  { %v7659_v2 = vsel %vm613_vm3, %v7658_v40, %v7657_v16  ;;  %v7894_v37 = vrot.slane %v7201_v41, 5  ;;  %v7211_v48 = vld [vmem:[%s22879_s0 + $0x7ed] sm:$0x1]  ;;  %v7896_v14 = vrot.slane %v7202_v11, 4  ;;  %v7898_v13 = vrot.slane %v7203_v28, 3 }
 0x52c   :  { %v7661_v61 = vsel %vm616_vm4, %v7660_v43, %v7659_v2  ;;  %v7891_v35 = vsel %vm604_vm0, %v7890_v53, %v7198_v6  ;;  %v7900_v8 = vrot.slane %v7204_v31, 2  ;;  %v7212_v24 = vld [vmem:[%s22879_s0 + $0x7f5] sm:$0x1]  ;;  %v7902_v47 = vrot.slane %v7205_v57, 1  ;;  %v7213_v54 = vld [vmem:[%s22879_s0 + $0x7fd] sm:$0x1] }
 0x52d   :  { %v7663_v7 = vsel %vm619_vm5, %v7662_v45, %v7661_v61  ;;  %v7893_v56 = vsel %vm607_vm1, %v7892_v15, %v7891_v35  ;;  %v7904_v18 = vrot.slane %v7207_v3, 7  ;;  %v7906_v30 = vrot.slane %v7208_v9, 6  ;;  %v7071_v22 = vld [vmem:[%s22879_s0 + $0x38d] sm:$0x1]  ;;  %v7072_v29 = vld [vmem:[%s22879_s0 + $0x395] sm:$0x1] }
 0x52e   :  { %v7665_v21 = vsel %vm622_vm6, %v7664_v55, %v7663_v7  ;;  %v7895_v4 = vsel %vm610_vm2, %v7894_v37, %v7893_v56  ;;  %v7908_v51 = vrot.slane %v7209_v60, 5  ;;  %v7910_v6 = vrot.slane %v7210_v10, 4  ;;  %v7073_v52 = vld [vmem:[%s22879_s0 + $0x39d] sm:$0x1]  ;;  %v7070_v41 = vld [vmem:[%s22879_s0 + $0x385] sm:$0x1] }
 0x52f   :  { %v12337_v27 = vpack.c.bf16 %v7665_v21, %v7651_v0  ;;  %v7897_v34 = vsel %vm613_vm3, %v7896_v14, %v7895_v4  ;;  %v7905_v20 = vsel %vm604_vm0, %v7904_v18, %v7206_v36  ;;  %v7912_v46 = vrot.slane %v7211_v48, 3  ;;  %v7074_v5 = vld [vmem:[%s22879_s0 + $0x3a5] sm:$0x1]  ;;  %v7075_v26 = vld [vmem:[%s22879_s0 + $0x3ad] sm:$0x1] }
 0x530   :  { %v7899_v1 = vsel %vm616_vm4, %v7898_v13, %v7897_v34  ;;  %v7907_v40 = vsel %vm607_vm1, %v7906_v30, %v7905_v20  ;;  %v7914_v62 = vrot.slane %v7212_v24, 2  ;;  %v7916_v11 = vrot.slane %v7213_v54, 1  ;;  %v7076_v28 = vld [vmem:[%s22879_s0 + $0x3b5] sm:$0x1]  ;;  %v7077_v49 = vld [vmem:[%s22879_s0 + $0x3bd] sm:$0x1] }
 0x531   :  { %12339 = vmatpush3.bf16.xpose.msk.msra.mxu1 %vm13442_vm8, %v12337_v27  ;;  %v7901_v43 = vsel %vm619_vm5, %v7900_v8, %v7899_v1  ;;  %v7909_v45 = vsel %vm610_vm2, %v7908_v51, %v7907_v40  ;;  %v7078_v31 = vld [vmem:[%s22879_s0 + $0x3c5] sm:$0x1]  ;;  %v7079_v57 = vld [vmem:[%s22879_s0 + $0x3cd] sm:$0x1]  ;;  %v7080_v53 = vld [vmem:[%s22879_s0 + $0x3d5] sm:$0x1] }
 0x532   :  { %v7903_v16 = vsel %vm622_vm6, %v7902_v47, %v7901_v43  ;;  %v7911_v55 = vsel %vm613_vm3, %v7910_v6, %v7909_v45  ;;  %v7081_v0 = vld [vmem:[%s22879_s0 + $0x3dd] sm:$0x1]  ;;  %v7082_v36 = vld [vmem:[%s22879_s0 + $0x3e5] sm:$0x1]  ;;  %v7666_v3 = vrot.slane %v7071_v22, 7  ;;  %v7668_v9 = vrot.slane %v7072_v29, 6 }
 0x533   :  { %v7913_v2 = vsel %vm616_vm4, %v7912_v46, %v7911_v55  ;;  %v7670_v61 = vrot.slane %v7073_v52, 5  ;;  %v7083_v10 = vld [vmem:[%s22879_s0 + $0x3ed] sm:$0x1]  ;;  %v7672_v35 = vrot.slane %v7074_v5, 4  ;;  %v7674_v15 = vrot.slane %v7075_v26, 3 }
 0x534   :  { %v7915_v60 = vsel %vm619_vm5, %v7914_v62, %v7913_v2  ;;  %v7676_v37 = vrot.slane %v7076_v28, 2  ;;  %v7084_v48 = vld [vmem:[%s22879_s0 + $0x3f5] sm:$0x1]  ;;  %v7667_v14 = vsel %vm604_vm0, %v7666_v3, %v7070_v41  ;;  %v7678_v13 = vrot.slane %v7077_v49, 1  ;;  %v7085_v24 = vld [vmem:[%s22879_s0 + $0x3fd] sm:$0x1] }
 0x535   :  { %v7917_v7 = vsel %vm622_vm6, %v7916_v11, %v7915_v60  ;;  %v7680_v8 = vrot.slane %v7079_v57, 7  ;;  %v7669_v56 = vsel %vm607_vm1, %v7668_v9, %v7667_v14  ;;  %v7682_v47 = vrot.slane %v7080_v53, 6  ;;  %v9811_v26 = vld [vmem:[%s22879_s0 + $0x40f] sm:$0x1]  ;;  %v9812_v45 = vld [vmem:[%s22879_s0 + $0x417] sm:$0x1] }
 0x536   :  { %v12340_v21 = vpack.c.bf16 %v7917_v7, %v7903_v16  ;;  %v7684_v18 = vrot.slane %v7081_v0, 5  ;;  %v7671_v27 = vsel %vm610_vm2, %v7670_v61, %v7669_v56  ;;  %v7686_v4 = vrot.slane %v7082_v36, 4  ;;  %v9819_v43 = vld [vmem:[%s22879_s0 + $0x44f] sm:$0x1]  ;;  %v9810_v28 = vld [vmem:[%s22879_s0 + $0x407] sm:$0x1] }
 0x537   :  { %v7681_v54 = vsel %vm604_vm0, %v7680_v8, %v7078_v31  ;;  %v7688_v30 = vrot.slane %v7083_v10, 3  ;;  %v7673_v51 = vsel %vm613_vm3, %v7672_v35, %v7671_v27  ;;  %v7690_v34 = vrot.slane %v7084_v48, 2  ;;  %v9813_v49 = vld [vmem:[%s22879_s0 + $0x41f] sm:$0x1]  ;;  %v9820_v16 = vld [vmem:[%s22879_s0 + $0x457] sm:$0x1] }
 0x538   :  { %12342 = vmatprep.subr.msk.bf16.mxu1 %vm13442_vm8, %v12340_v21  ;;  %v7683_v22 = vsel %vm607_vm1, %v7682_v47, %v7681_v54  ;;  %v7675_v20 = vsel %vm616_vm4, %v7674_v15, %v7673_v51  ;;  %v7692_v46 = vrot.slane %v7085_v24, 1  ;;  %v10418_v11 = vrot.slane %v9811_v26, 7  ;;  %v9818_v57 = vld [vmem:[%s22879_s0 + $0x447] sm:$0x1]  ;;  %v9821_v36 = vld [vmem:[%s22879_s0 + $0x45f] sm:$0x1] }
 0x539   :  { %v7685_v6 = vsel %vm610_vm2, %v7684_v18, %v7683_v22  ;;  %v7677_v29 = vsel %vm619_vm5, %v7676_v37, %v7675_v20  ;;  %v10432_v31 = vrot.slane %v9819_v43, 7  ;;  %v10420_v53 = vrot.slane %v9812_v45, 6  ;;  %v9814_v0 = vld [vmem:[%s22879_s0 + $0x427] sm:$0x1]  ;;  %v9815_v60 = vld [vmem:[%s22879_s0 + $0x42f] sm:$0x1] }
 0x53a   :  { %v7687_v52 = vsel %vm613_vm3, %v7686_v4, %v7685_v6  ;;  %v7679_v1 = vsel %vm622_vm6, %v7678_v13, %v7677_v29  ;;  %v10419_v55 = vsel %vm604_vm0, %v10418_v11, %v9810_v28  ;;  %v10422_v2 = vrot.slane %v9813_v49, 5  ;;  %v9683_v35 = vld [vmem:[%s22879_s0 + $0xf] sm:$0x1]  ;;  %v9822_v15 = vld [vmem:[%s22879_s0 + $0x467] sm:$0x1]  ;;  %v13268_v20 = vld [vmem:[%s22880_s1 + $0x10] sm:$0xff] }
 0x53b   :  { %v7689_v40 = vsel %vm616_vm4, %v7688_v30, %v7687_v52  ;;  %v10421_v3 = vsel %vm607_vm1, %v10420_v53, %v10419_v55  ;;  %v10434_v9 = vrot.slane %v9820_v16, 6  ;;  %v10433_v61 = vsel %vm604_vm0, %v10432_v31, %v9818_v57  ;;  %v13267_v14 = vld [vmem:[%s22880_s1 + $0x8] sm:$0xff]  ;;  %v9684_v8 = vld [vmem:[%s22879_s0 + $0x17] sm:$0x1]  ;;  %v9685_v27 = vld [vmem:[%s22879_s0 + $0x1f] sm:$0x1] }
 0x53c   :  { %v7691_v62 = vsel %vm619_vm5, %v7690_v34, %v7689_v40  ;;  %v10424_v10 = vrot.slane %v9814_v0, 4  ;;  %v10423_v37 = vsel %vm610_vm2, %v10422_v2, %v10421_v3  ;;  %v10436_v7 = vrot.slane %v9821_v36, 5  ;;  %v9816_v21 = vld [vmem:[%s22879_s0 + $0x437] sm:$0x1]  ;;  %v9823_v24 = vld [vmem:[%s22879_s0 + $0x46f] sm:$0x1] }
 0x53d   :  { %v7693_v41 = vsel %vm622_vm6, %v7692_v46, %v7691_v62  ;;  %v10194_v48 = vrot.slane %v9683_v35, 7  ;;  %v10435_v13 = vsel %vm607_vm1, %v10434_v9, %v10433_v61  ;;  %v10426_v56 = vrot.slane %v9815_v60, 3  ;;  %v9691_v54 = vld [vmem:[%s22879_s0 + $0x4f] sm:$0x1]  ;;  %v9817_v4 = vld [vmem:[%s22879_s0 + $0x43f] sm:$0x1] }
 0x53e   :  { %v12343_v5 = vpack.c.bf16 %v7693_v41, %v7679_v1  ;;  %v10425_v47 = vsel %vm613_vm3, %v10424_v10, %v10423_v37  ;;  %v10438_v18 = vrot.slane %v9822_v15, 4  ;;  %v10437_v30 = vsel %vm610_vm2, %v10436_v7, %v10435_v13  ;;  %v9692_v51 = vld [vmem:[%s22879_s0 + $0x57] sm:$0x1]  ;;  %v9690_v29 = vld [vmem:[%s22879_s0 + $0x47] sm:$0x1]  ;;  %v13269_v57 = vld [vmem:[%s22880_s1 + $0x18] sm:$0xff] }
 0x53f   :  { %v10196_v34 = vrot.slane %v9684_v8, 6  ;;  %v9824_v6 = vld [vmem:[%s22879_s0 + $0x477] sm:$0x1]  ;;  %v10428_v46 = vrot.slane %v9816_v21, 2  ;;  %v10427_v52 = vsel %vm616_vm4, %v10426_v56, %v10425_v47  ;;  %v10440_v1 = vrot.slane %v9823_v24, 3 }
 0x540   :  { %12345 = vmatpush3.bf16.xpose.msk.msra.mxu1 %vm13442_vm8, %v12343_v5  ;;  %v9686_v40 = vld [vmem:[%s22879_s0 + $0x27] sm:$0x1]  ;;  %v10198_v62 = vrot.slane %v9685_v27, 5  ;;  %v10208_v41 = vrot.slane %v9691_v54, 7  ;;  %v20276_v5 = vld [vmem:[%s22879_s0 + $0x47f] sm:$0x1]  ;;  %v10439_v43 = vsel %vm613_vm3, %v10438_v18, %v10437_v30 }
 0x541   :  { %v10430_v26 = vrot.slane %v9817_v4, 1  ;;  %v9693_v45 = vld [vmem:[%s22879_s0 + $0x5f] sm:$0x1]  ;;  %v10210_v28 = vrot.slane %v9692_v51, 6  ;;  %v9687_v49 = vld [vmem:[%s22879_s0 + $0x2f] sm:$0x1]  ;;  %v10429_v53 = vsel %vm619_vm5, %v10428_v46, %v10427_v52  ;;  %v10441_v61 = vsel %vm616_vm4, %v10440_v1, %v10439_v43 }
 0x542   :  { %v20290_v16 = vld [vmem:[%s22879_s0 + $0x37] sm:$0x1]  ;;  %v20295_v55 = vld [vmem:[%s22879_s0 + $0x3f] sm:$0x1]  ;;  %v10209_v31 = vsel %vm604_vm0, %v10208_v41, %v9690_v29  ;;  %v10442_v0 = vrot.slane %v9824_v6, 2  ;;  %v10200_v36 = vrot.slane %v9686_v40, 4 }
 0x543   :  { %v9694_v2 = vld [vmem:[%s22879_s0 + $0x67] sm:$0x1]  ;;  %v9827_v3 = vld [vmem:[%s22879_s0 + $0x48f] sm:$0x1]  ;;  %v9828_v9 = vld [vmem:[%s22879_s0 + $0x497] sm:$0x1]  ;;  %v20333_v8 = vsel %vm622_vm6, %v10430_v26, %v10429_v53 }
 0x544   :  { %v10444_v60 = vrot.slane %v20276_v5, 1  ;;  %v20317_v10 = vld [vmem:[%s22879_s0 + $0x6f] sm:$0x1]  ;;  %v10212_v15 = vrot.slane %v9693_v45, 5  ;;  %v9829_v37 = vld [vmem:[%s22879_s0 + $0x49f] sm:$0x1]  ;;  %v10443_v4 = vsel %vm619_vm5, %v10442_v0, %v10441_v61 }
 0x545   :  { %v10202_v7 = vrot.slane %v9687_v49, 3  ;;  %v9826_v13 = vld [vmem:[%s22879_s0 + $0x487] sm:$0x1]  ;;  %v20338_v21 = vld [vmem:[%s22879_s0 + $0x77] sm:$0x1]  ;;  %v10446_v18 = vrot.slane %v9827_v3, 7 }
 0x546   :  { %v20343_v24 = vld [vmem:[%s22879_s0 + $0x7f] sm:$0x1]  ;;  %v9835_v56 = vld [vmem:[%s22879_s0 + $0x4cf] sm:$0x1]  ;;  %v9836_v47 = vld [vmem:[%s22879_s0 + $0x4d7] sm:$0x1] }
 0x547   :  { %11917 = vmatmul.mubr.msk.f32.vlgmr.msra.gmra.mrb[40].mxu1 %vm1058_vm7, %v19668_v12  ;;  %v9682_v12 = vld [vmem:[%s22879_s0 + $0x7] sm:$0x1]  ;;  %v10448_v27 = vrot.slane %v9828_v9, 6  ;;  %v10206_v51 = vrot.slane %v20295_v55, 1  ;;  %v10214_v46 = vrot.slane %v9694_v2, 4  ;;  %v10216_v29 = vrot.slane %v20317_v10, 3 }
 0x548   :  { %11918 = vmatprep.mubr.msk.f32.mxu1 %vm1058_vm7, %v13267_v14  ;;  %v10195_v22 = vsel %vm604_vm0, %v10194_v48, %v9682_v12  ;;  %v10204_v48 = vrot.slane %v20290_v16, 2  ;;  %v9830_v12 = vld [vmem:[%s22879_s0 + $0x4a7] sm:$0x1]  ;;  %v9831_v52 = vld [vmem:[%s22879_s0 + $0x4af] sm:$0x1]  ;;  %v10447_v40 = vsel %vm604_vm0, %v10446_v18, %v9826_v13  ;;  %v10460_v26 = vrot.slane %v9835_v56, 7 }
 0x549   :  { %v10197_v11 = vsel %vm607_vm1, %v10196_v34, %v10195_v22  ;;  %v13270_v54 = vld [vmem:[%s22880_s1 + $0x20] sm:$0xff]  ;;  %v9837_v22 = vld [vmem:[%s22879_s0 + $0x4df] sm:$0x1]  ;;  %v10449_v41 = vsel %vm607_vm1, %v10448_v27, %v10447_v40  ;;  %v10452_v5 = vrot.slane %v9830_v12, 4  ;;  %v10462_v43 = vrot.slane %v9836_v47, 6  ;;  %v13271_v55 = vld [vmem:[%s22880_s1 + $0x28] sm:$0xff] }
 0x54a   :  { %v10199_v35 = vsel %vm610_vm2, %v10198_v62, %v10197_v11  ;;  %v9838_v34 = vld [vmem:[%s22879_s0 + $0x4e7] sm:$0x1]  ;;  %v9839_v62 = vld [vmem:[%s22879_s0 + $0x4ef] sm:$0x1]  ;;  %v20382_v11 = vld [vmem:[%s22879_s0 + $0x4b7] sm:$0x1] }
 0x54b   :  { %11919 = vmatmul.mubr.msk.f32.gmra.mrb[42].mxu1 %vm1058_vm7, %v13267_v14  ;;  %v10211_v14 = vsel %vm607_vm1, %v10210_v28, %v10209_v31  ;;  %v10201_v30 = vsel %vm613_vm3, %v10200_v36, %v10199_v35  ;;  %v9834_v1 = vld [vmem:[%s22879_s0 + $0x4c7] sm:$0x1]  ;;  %v10464_v49 = vrot.slane %v9837_v22, 5  ;;  %v10466_v16 = vrot.slane %v9838_v34, 4  ;;  %v9699_v2 = vld [vmem:[%s22879_s0 + $0x8f] sm:$0x1] }
 0x54c   :  { %11920 = vmatprep.mubr.msk.f32.mxu1 %vm1058_vm7, %v13268_v20  ;;  %v10213_v6 = vsel %vm610_vm2, %v10212_v15, %v10211_v14  ;;  %v10203_v45 = vsel %vm616_vm4, %v10202_v7, %v10201_v30  ;;  %v20390_v31 = vsel %vm622_vm6, %v10444_v60, %v10443_v4  ;;  %v10220_v53 = vrot.slane %v20343_v24, 1  ;;  %v9700_v36 = vld [vmem:[%s22879_s0 + $0x97] sm:$0x1]  ;;  %v9701_v35 = vld [vmem:[%s22879_s0 + $0x9f] sm:$0x1] }
 0x54d   :  { %v10461_v0 = vsel %vm604_vm0, %v10460_v26, %v9834_v1  ;;  %v10215_v3 = vsel %vm613_vm3, %v10214_v46, %v10213_v6  ;;  %v9840_v9 = vld [vmem:[%s22879_s0 + $0x4f7] sm:$0x1]  ;;  %v10454_v61 = vrot.slane %v9831_v52, 3  ;;  %v10468_v10 = vrot.slane %v9839_v62, 3  ;;  %v9698_v12 = vld [vmem:[%s22879_s0 + $0x87] sm:$0x1] }
 0x54e   :  { %v10463_v60 = vsel %vm607_vm1, %v10462_v43, %v10461_v0  ;;  %v10205_v15 = vsel %vm619_vm5, %v10204_v48, %v10203_v45  ;;  %v10456_v14 = vrot.slane %v20382_v11, 2  ;;  %v20428_v48 = vld [vmem:[%s22879_s0 + $0x4ff] sm:$0x1]  ;;  %v9707_v47 = vld [vmem:[%s22879_s0 + $0xcf] sm:$0x1]  ;;  %v10222_v27 = vrot.slane %v9699_v2, 7 }
 0x54f   :  { %11921 = vmatmul.mubr.msk.f32.gmra.mrb[44].mxu1 %vm1058_vm7, %v13268_v20  ;;  %v10450_v20 = vrot.slane %v9829_v37, 5  ;;  %v20413_v37 = vld [vmem:[%s22879_s0 + $0x4bf] sm:$0x1]  ;;  %v10465_v13 = vsel %vm610_vm2, %v10464_v49, %v10463_v60  ;;  %v9708_v18 = vld [vmem:[%s22879_s0 + $0xd7] sm:$0x1]  ;;  %v10217_v22 = vsel %vm616_vm4, %v10216_v29, %v10215_v3  ;;  %v10470_v34 = vrot.slane %v9840_v9, 2 }
 0x550   :  { %11922 = vmatprep.mubr.msk.f32.mxu1 %vm1058_vm7, %v13269_v57  ;;  %v10467_v56 = vsel %vm613_vm3, %v10466_v16, %v10465_v13  ;;  %v13272_v4 = vld [vmem:[%s22880_s1 + $0x30] sm:$0xff]  ;;  %v9709_v6 = vld [vmem:[%s22879_s0 + $0xdf] sm:$0x1]  ;;  %v10226_v46 = vrot.slane %v9701_v35, 5  ;;  %v20451_v52 = vsel %vm622_vm6, %v10206_v51, %v10205_v15  ;;  %v9706_v62 = vld [vmem:[%s22879_s0 + $0xc7] sm:$0x1]  ;;  %v10223_v51 = vsel %vm604_vm0, %v10222_v27, %v9698_v12 }
 0x551   :  { %v10451_v28 = vsel %vm610_vm2, %v10450_v20, %v10449_v41  ;;  %v9703_v20 = vld [vmem:[%s22879_s0 + $0xaf] sm:$0x1]  ;;  %v10469_v40 = vsel %vm616_vm4, %v10468_v10, %v10467_v56  ;;  %v20458_v29 = vld [vmem:[%s22879_s0 + $0xb7] sm:$0x1]  ;;  %v9710_v41 = vld [vmem:[%s22879_s0 + $0xe7] sm:$0x1] }
 0x552   :  { %v10453_v7 = vsel %vm613_vm3, %v10452_v5, %v10451_v28  ;;  %v10236_v43 = vrot.slane %v9707_v47, 7  ;;  %v10238_v45 = vrot.slane %v9708_v18, 6  ;;  %v9843_v11 = vld [vmem:[%s22879_s0 + $0x50f] sm:$0x1]  ;;  %v10458_v49 = vrot.slane %v20413_v37, 1 }
 0x553   :  { %11923 = vmatmul.mubr.msk.f32.gmra.mrb[46].mxu1 %vm1058_vm7, %v13269_v57  ;;  %v10218_v57 = vrot.slane %v20338_v21, 2  ;;  %v9702_v21 = vld [vmem:[%s22879_s0 + $0xa7] sm:$0x1]  ;;  %v10455_v1 = vsel %vm616_vm4, %v10454_v61, %v10453_v7  ;;  %v20477_v16 = vld [vmem:[%s22879_s0 + $0xbf] sm:$0x1]  ;;  %v10240_v2 = vrot.slane %v9709_v6, 5  ;;  %v10471_v15 = vsel %vm619_vm5, %v10470_v34, %v10469_v40 }
 0x554   :  { %11924 = vmatprep.mubr.msk.f32.mxu1 %vm1058_vm7, %v13270_v54  ;;  %v10228_v26 = vrot.slane %v9702_v21, 4  ;;  %v10472_v3 = vrot.slane %v20428_v48, 1  ;;  %v20494_v9 = vld [vmem:[%s22879_s0 + $0xf7] sm:$0x1]  ;;  %v10230_v61 = vrot.slane %v9703_v20, 3  ;;  %v10237_v60 = vsel %vm604_vm0, %v10236_v43, %v9706_v62 }
 0x555   :  { %v10219_v28 = vsel %vm619_vm5, %v10218_v57, %v10217_v22  ;;  %v10457_v57 = vsel %vm619_vm5, %v10456_v14, %v10455_v1  ;;  %v9842_v10 = vld [vmem:[%s22879_s0 + $0x507] sm:$0x1]  ;;  %v9844_v35 = vld [vmem:[%s22879_s0 + $0x517] sm:$0x1]  ;;  %v10239_v37 = vsel %vm607_vm1, %v10238_v45, %v10237_v60  ;;  %v10242_v7 = vrot.slane %v9710_v41, 4 }
 0x556   :  { %v9845_v14 = vld [vmem:[%s22879_s0 + $0x51f] sm:$0x1]  ;;  %v9846_v13 = vld [vmem:[%s22879_s0 + $0x527] sm:$0x1]  ;;  %v10474_v12 = vrot.slane %v9843_v11, 7  ;;  %v10232_v56 = vrot.slane %v20458_v29, 2  ;;  %v10241_v18 = vsel %vm610_vm2, %v10240_v2, %v10239_v37  ;;  %v20539_v24 = vsel %vm622_vm6, %v10458_v49, %v10457_v57 }
 0x557   :  { %11925 = vmatmul.mubr.msk.f32.gmra.mrb[48].mxu1 %vm1058_vm7, %v13270_v54  ;;  %v10224_v54 = vrot.slane %v9700_v36, 6  ;;  %v13273_v36 = vld [vmem:[%s22880_s1 + $0x38] sm:$0xff]  ;;  %v10234_v47 = vrot.slane %v20477_v16, 1  ;;  %v9847_v27 = vld [vmem:[%s22879_s0 + $0x52f] sm:$0x1]  ;;  %v10476_v6 = vrot.slane %v9844_v35, 6 }
 0x558   :  { %11926 = vmatprep.mubr.msk.f32.mxu1 %vm1058_vm7, %v13271_v55  ;;  %v20514_v21 = vld [vmem:[%s22879_s0 + $0xff] sm:$0x1]  ;;  %v9851_v22 = vld [vmem:[%s22879_s0 + $0x54f] sm:$0x1]  ;;  %v9852_v34 = vld [vmem:[%s22879_s0 + $0x557] sm:$0x1]  ;;  %v10475_v20 = vsel %vm604_vm0, %v10474_v12, %v9842_v10 }
 0x559   :  { %v10225_v5 = vsel %vm607_vm1, %v10224_v54, %v10223_v51  ;;  %v20527_v54 = vsel %vm622_vm6, %v10220_v53, %v10219_v28  ;;  %v20542_v53 = vsel %vm622_vm6, %v10472_v3, %v10471_v15  ;;  %v9853_v1 = vld [vmem:[%s22879_s0 + $0x55f] sm:$0x1]  ;;  %v9854_v40 = vld [vmem:[%s22879_s0 + $0x567] sm:$0x1]  ;;  %v10478_v29 = vrot.slane %v9845_v14, 5 }
 0x55a   :  { %v10227_v0 = vsel %vm610_vm2, %v10226_v46, %v10225_v5  ;;  %v9848_v46 = vld [vmem:[%s22879_s0 + $0x537] sm:$0x1]  ;;  %v10480_v62 = vrot.slane %v9846_v13, 4  ;;  %v10243_v51 = vsel %vm613_vm3, %v10242_v7, %v10241_v18  ;;  %v10246_v5 = vrot.slane %v20494_v9, 2  ;;  %v9850_v43 = vld [vmem:[%s22879_s0 + $0x547] sm:$0x1] }
 0x55b   :  { %11927 = vmatmul.mubr.msk.f32.gmra.mrb[50].mxu1 %vm1058_vm7, %v13271_v55  ;;  %v20482_v55 = vld [vmem:[%s22879_s0 + $0xef] sm:$0x1]  ;;  %v10229_v48 = vsel %vm613_vm3, %v10228_v26, %v10227_v0  ;;  %v20559_v26 = vld [vmem:[%s22879_s0 + $0x53f] sm:$0x1]  ;;  %v10477_v45 = vsel %vm607_vm1, %v10476_v6, %v10475_v20  ;;  %v10482_v28 = vrot.slane %v9847_v27, 3  ;;  %v10488_v49 = vrot.slane %v9851_v22, 7 }
 0x55c   :  { %11928 = vmatprep.mubr.msk.f32.mxu1 %vm1058_vm7, %v13272_v4  ;;  %v10231_v41 = vsel %vm616_vm4, %v10230_v61, %v10229_v48  ;;  %v10479_v11 = vsel %vm610_vm2, %v10478_v29, %v10477_v45  ;;  %v10490_v16 = vrot.slane %v9852_v34, 6  ;;  %v10248_v0 = vrot.slane %v20514_v21, 1  ;;  %v9855_v2 = vld [vmem:[%s22879_s0 + $0x56f] sm:$0x1]  ;;  %v9714_v35 = vld [vmem:[%s22879_s0 + $0x107] sm:$0x1] }
 0x55d   :  { %v10492_v57 = vrot.slane %v9853_v1, 5  ;;  %v10494_v3 = vrot.slane %v9854_v40, 4  ;;  %v10233_v60 = vsel %vm619_vm5, %v10232_v56, %v10231_v41  ;;  %v10489_v10 = vsel %vm604_vm0, %v10488_v49, %v9850_v43  ;;  %v9716_v15 = vld [vmem:[%s22879_s0 + $0x117] sm:$0x1]  ;;  %v9717_v37 = vld [vmem:[%s22879_s0 + $0x11f] sm:$0x1] }
 0x55e   :  { %v9856_v14 = vld [vmem:[%s22879_s0 + $0x577] sm:$0x1]  ;;  %v10484_v13 = vrot.slane %v9848_v46, 2  ;;  %v10491_v12 = vsel %vm607_vm1, %v10490_v16, %v10489_v10  ;;  %v9718_v21 = vld [vmem:[%s22879_s0 + $0x127] sm:$0x1]  ;;  %v10486_v27 = vrot.slane %v20559_v26, 1 }
 0x55f   :  { %11929 = vmatmul.mubr.msk.f32.gmra.mrb[52].mxu1 %vm1058_vm7, %v13272_v4  ;;  %v10244_v4 = vrot.slane %v20482_v55, 3  ;;  %v9715_v55 = vld [vmem:[%s22879_s0 + $0x10f] sm:$0x1]  ;;  %v20600_v56 = vld [vmem:[%s22879_s0 + $0x57f] sm:$0x1]  ;;  %v10496_v22 = vrot.slane %v9855_v2, 3 }
 0x560   :  { %11930 = vmatprep.mubr.msk.f32.mxu1 %vm1058_vm7, %v13273_v36  ;;  %v10250_v48 = vrot.slane %v9715_v55, 7  ;;  %v9719_v34 = vld [vmem:[%s22879_s0 + $0x12f] sm:$0x1]  ;;  %v9720_v46 = vld [vmem:[%s22879_s0 + $0x137] sm:$0x1]  ;;  %v10254_v41 = vrot.slane %v9717_v37, 5 }
 0x561   :  { %v10245_v7 = vsel %vm616_vm4, %v10244_v4, %v10243_v51  ;;  %v10493_v4 = vsel %vm610_vm2, %v10492_v57, %v10491_v12  ;;  %v9723_v20 = vld [vmem:[%s22879_s0 + $0x14f] sm:$0x1]  ;;  %v9724_v1 = vld [vmem:[%s22879_s0 + $0x157] sm:$0x1]  ;;  %v9725_v40 = vld [vmem:[%s22879_s0 + $0x15f] sm:$0x1]  ;;  %v20623_v51 = vsel %vm622_vm6, %v10234_v47, %v10233_v60 }
 0x562   :  { %v10495_v6 = vsel %vm613_vm3, %v10494_v3, %v10493_v4  ;;  %v10251_v29 = vsel %vm604_vm0, %v10250_v48, %v9714_v35  ;;  %v10247_v26 = vsel %vm619_vm5, %v10246_v5, %v10245_v7  ;;  %v10498_v43 = vrot.slane %v9856_v14, 2  ;;  %v9722_v45 = vld [vmem:[%s22879_s0 + $0x147] sm:$0x1]  ;;  %v20636_v16 = vld [vmem:[%s22879_s0 + $0x13f] sm:$0x1] }
 0x563   :  { %11931 = vmatmul.mubr.msk.f32.gmra.mrb[54].mxu1 %vm1058_vm7, %v13273_v36  ;;  %v10481_v36 = vsel %vm613_vm3, %v10480_v62, %v10479_v11  ;;  %v10252_v62 = vrot.slane %v9716_v15, 6  ;;  %v9726_v11 = vld [vmem:[%s22879_s0 + $0x167] sm:$0x1]  ;;  %v9727_v47 = vld [vmem:[%s22879_s0 + $0x16f] sm:$0x1]  ;;  %v10258_v55 = vrot.slane %v9719_v34, 3 }
 0x564   :  { %8159 = vmatprep.mubr.f32.mxu1 %v22886_v33  ;;  %v10483_v18 = vsel %vm616_vm4, %v10482_v28, %v10481_v36  ;;  %v10256_v28 = vrot.slane %v9718_v21, 4  ;;  %v10264_v2 = vrot.slane %v9723_v20, 7  ;;  %v10497_v36 = vsel %vm616_vm4, %v10496_v22, %v10495_v6  ;;  %v9728_v57 = vld [vmem:[%s22879_s0 + $0x177] sm:$0x1]  ;;  %v9859_v35 = vld [vmem:[%s22879_s0 + $0x58f] sm:$0x1] }
 0x565   :  { %v10485_v49 = vsel %vm619_vm5, %v10484_v13, %v10483_v18  ;;  %v10253_v5 = vsel %vm607_vm1, %v10252_v62, %v10251_v29  ;;  %v10266_v60 = vrot.slane %v9724_v1, 6  ;;  %v10268_v10 = vrot.slane %v9725_v40, 5  ;;  %v9858_v13 = vld [vmem:[%s22879_s0 + $0x587] sm:$0x1]  ;;  %v9860_v12 = vld [vmem:[%s22879_s0 + $0x597] sm:$0x1] }
 0x566   :  { %v10255_v3 = vsel %vm610_vm2, %v10254_v41, %v10253_v5  ;;  %v10500_v15 = vrot.slane %v20600_v56, 1  ;;  %v10265_v7 = vsel %vm604_vm0, %v10264_v2, %v9722_v45  ;;  %v10270_v14 = vrot.slane %v9726_v11, 4  ;;  %v20665_v48 = vld [vmem:[%s22879_s0 + $0x17f] sm:$0x1]  ;;  %v9862_v34 = vld [vmem:[%s22879_s0 + $0x5a7] sm:$0x1] }
 0x567   :  { %v10257_v37 = vsel %vm613_vm3, %v10256_v28, %v10255_v3  ;;  %v20660_v21 = vsel %vm622_vm6, %v10248_v0, %v10247_v26  ;;  %v10260_v56 = vrot.slane %v9720_v46, 2  ;;  %v10267_v18 = vsel %vm607_vm1, %v10266_v60, %v10265_v7  ;;  %v9861_v22 = vld [vmem:[%s22879_s0 + $0x59f] sm:$0x1]  ;;  %v9863_v46 = vld [vmem:[%s22879_s0 + $0x5af] sm:$0x1] }
 0x568   :  { %v10272_v4 = vrot.slane %v9727_v47, 3  ;;  %v10499_v0 = vsel %vm619_vm5, %v10498_v43, %v10497_v36  ;;  %v10259_v20 = vsel %vm616_vm4, %v10258_v55, %v10257_v37  ;;  %v10269_v6 = vsel %vm610_vm2, %v10268_v10, %v10267_v18  ;;  %v9864_v1 = vld [vmem:[%s22879_s0 + $0x5b7] sm:$0x1]  ;;  %v9866_v43 = vld [vmem:[%s22879_s0 + $0x5c7] sm:$0x1] }
 0x569   :  { %v10502_v40 = vrot.slane %v9859_v35, 7  ;;  %v20684_v29 = vsel %vm622_vm6, %v10486_v27, %v10485_v49  ;;  %v10262_v62 = vrot.slane %v20636_v16, 1  ;;  %v10271_v41 = vsel %vm613_vm3, %v10270_v14, %v10269_v6  ;;  %v9867_v45 = vld [vmem:[%s22879_s0 + $0x5cf] sm:$0x1]  ;;  %v9865_v27 = vld [vmem:[%s22879_s0 + $0x5bf] sm:$0x1] }
 0x56a   :  { %v10274_v26 = vrot.slane %v9728_v57, 2  ;;  %v10273_v11 = vsel %vm616_vm4, %v10272_v4, %v10271_v41  ;;  %v9868_v28 = vld [vmem:[%s22879_s0 + $0x5d7] sm:$0x1]  ;;  %v9869_v49 = vld [vmem:[%s22879_s0 + $0x5df] sm:$0x1]  ;;  %v10504_v47 = vrot.slane %v9860_v12, 6  ;;  %v20706_v55 = vsel %vm622_vm6, %v10500_v15, %v10499_v0 }
 0x56b   :  { %v10503_v16 = vsel %vm604_vm0, %v10502_v40, %v9858_v13  ;;  %v10506_v5 = vrot.slane %v9861_v22, 5  ;;  %v10261_v2 = vsel %vm619_vm5, %v10260_v56, %v10259_v20  ;;  %v9870_v36 = vld [vmem:[%s22879_s0 + $0x5e7] sm:$0x1]  ;;  %v9871_v57 = vld [vmem:[%s22879_s0 + $0x5ef] sm:$0x1]  ;;  %v10508_v3 = vrot.slane %v9862_v34, 4 }
 0x56c   :  { %v10510_v60 = vrot.slane %v9863_v46, 3  ;;  %v10276_v10 = vrot.slane %v20665_v48, 1  ;;  %v9872_v35 = vld [vmem:[%s22879_s0 + $0x5f7] sm:$0x1]  ;;  %v10505_v15 = vsel %vm607_vm1, %v10504_v47, %v10503_v16  ;;  %v10512_v37 = vrot.slane %v9864_v1, 2 }
 0x56d   :  { %v10516_v7 = vrot.slane %v9867_v45, 7  ;;  %v10275_v14 = vsel %vm619_vm5, %v10274_v26, %v10273_v11  ;;  %v9873_v13 = vld [vmem:[%s22879_s0 + $0x5ff] sm:$0x1]  ;;  %v10507_v12 = vsel %vm610_vm2, %v10506_v5, %v10505_v15  ;;  %v10518_v56 = vrot.slane %v9868_v28, 6  ;;  %v9731_v48 = vld [vmem:[%s22879_s0 + $0x18f] sm:$0x1] }
 0x56e   :  { %v10520_v18 = vrot.slane %v9869_v49, 5  ;;  %v10509_v4 = vsel %vm613_vm3, %v10508_v3, %v10507_v12  ;;  %v10522_v34 = vrot.slane %v9870_v36, 4  ;;  %v10524_v0 = vrot.slane %v9871_v57, 3  ;;  %v9732_v20 = vld [vmem:[%s22879_s0 + $0x197] sm:$0x1] }
 0x56f   :  { %v10517_v22 = vsel %vm604_vm0, %v10516_v7, %v9866_v43  ;;  %v9733_v6 = vld [vmem:[%s22879_s0 + $0x19f] sm:$0x1]  ;;  %v10511_v46 = vsel %vm616_vm4, %v10510_v60, %v10509_v4  ;;  %v10514_v1 = vrot.slane %v9865_v27, 1  ;;  %v10526_v41 = vrot.slane %v9872_v35, 2  ;;  %v9730_v26 = vld [vmem:[%s22879_s0 + $0x187] sm:$0x1] }
 0x570   :  { %v10519_v40 = vsel %vm607_vm1, %v10518_v56, %v10517_v22  ;;  %v9734_v43 = vld [vmem:[%s22879_s0 + $0x1a7] sm:$0x1]  ;;  %v9735_v45 = vld [vmem:[%s22879_s0 + $0x1af] sm:$0x1]  ;;  %v10513_v27 = vsel %vm619_vm5, %v10512_v37, %v10511_v46  ;;  %v10528_v49 = vrot.slane %v9873_v13, 1  ;;  %v20760_v36 = vsel %vm622_vm6, %v10262_v62, %v10261_v2 }
 0x571   :  { %v10521_v28 = vsel %vm610_vm2, %v10520_v18, %v10519_v40  ;;  %v9736_v16 = vld [vmem:[%s22879_s0 + $0x1b7] sm:$0x1]  ;;  %v9737_v47 = vld [vmem:[%s22879_s0 + $0x1bf] sm:$0x1]  ;;  %v20763_v57 = vsel %vm622_vm6, %v10276_v10, %v10275_v14  ;;  %v9738_v60 = vld [vmem:[%s22879_s0 + $0x1c7] sm:$0x1]  ;;  %v20780_v14 = vsel %vm622_vm6, %v10514_v1, %v10513_v27 }
 0x572   :  { %v10523_v3 = vsel %vm613_vm3, %v10522_v34, %v10521_v28  ;;  %v9739_v35 = vld [vmem:[%s22879_s0 + $0x1cf] sm:$0x1]  ;;  %v9740_v15 = vld [vmem:[%s22879_s0 + $0x1d7] sm:$0x1]  ;;  %v9741_v2 = vld [vmem:[%s22879_s0 + $0x1df] sm:$0x1] }
 0x573   :  { %v10525_v62 = vsel %vm616_vm4, %v10524_v0, %v10523_v3  ;;  %v10278_v10 = vrot.slane %v9731_v48, 7  ;;  %v10280_v37 = vrot.slane %v9732_v20, 6  ;;  %v10282_v7 = vrot.slane %v9733_v6, 5  ;;  %v9742_v12 = vld [vmem:[%s22879_s0 + $0x1e7] sm:$0x1] }
 0x574   :  { %v10527_v13 = vsel %vm619_vm5, %v10526_v41, %v10525_v62  ;;  %v9743_v56 = vld [vmem:[%s22879_s0 + $0x1ef] sm:$0x1]  ;;  %v10284_v18 = vrot.slane %v9734_v43, 4  ;;  %v10286_v4 = vrot.slane %v9735_v45, 3  ;;  %v9744_v48 = vld [vmem:[%s22879_s0 + $0x1f7] sm:$0x1] }
 0x575   :  { %v20790_v22 = vsel %vm622_vm6, %v10528_v49, %v10527_v13  ;;  %v9745_v34 = vld [vmem:[%s22879_s0 + $0x1ff] sm:$0x1]  ;;  %v10279_v0 = vsel %vm604_vm0, %v10278_v10, %v9730_v26  ;;  %v10288_v20 = vrot.slane %v9736_v16, 2  ;;  %v10292_v6 = vrot.slane %v9739_v35, 7  ;;  %v9875_v43 = vld [vmem:[%s22879_s0 + $0x60f] sm:$0x1] }
 0x576   :  { %v10281_v46 = vsel %vm607_vm1, %v10280_v37, %v10279_v0  ;;  %v10290_v1 = vrot.slane %v9737_v47, 1  ;;  %v10294_v40 = vrot.slane %v9740_v15, 6  ;;  %v10296_v41 = vrot.slane %v9741_v2, 5  ;;  %v9874_v47 = vld [vmem:[%s22879_s0 + $0x607] sm:$0x1] }
 0x577   :  { %v10283_v45 = vsel %vm610_vm2, %v10282_v7, %v10281_v46  ;;  %v10293_v27 = vsel %vm604_vm0, %v10292_v6, %v9738_v60  ;;  %v10298_v28 = vrot.slane %v9742_v12, 4  ;;  %v10300_v49 = vrot.slane %v9743_v56, 3  ;;  %v9876_v37 = vld [vmem:[%s22879_s0 + $0x617] sm:$0x1]  ;;  %v9878_v6 = vld [vmem:[%s22879_s0 + $0x627] sm:$0x1] }
 0x578   :  { %v10285_v26 = vsel %vm613_vm3, %v10284_v18, %v10283_v45  ;;  %v10295_v16 = vsel %vm607_vm1, %v10294_v40, %v10293_v27  ;;  %v10302_v35 = vrot.slane %v9744_v48, 2  ;;  %v10304_v62 = vrot.slane %v9745_v34, 1  ;;  %v9880_v45 = vld [vmem:[%s22879_s0 + $0x637] sm:$0x1]  ;;  %v9902_v12 = vld [vmem:[%s22879_s0 + $0x6e7] sm:$0x1] }
 0x579   :  { %v10287_v10 = vsel %vm616_vm4, %v10286_v4, %v10285_v26  ;;  %v10297_v60 = vsel %vm610_vm2, %v10296_v41, %v10295_v16  ;;  %v10530_v7 = vrot.slane %v9875_v43, 7  ;;  %v9877_v4 = vld [vmem:[%s22879_s0 + $0x61f] sm:$0x1]  ;;  %v10532_v27 = vrot.slane %v9876_v37, 6  ;;  %v9883_v16 = vld [vmem:[%s22879_s0 + $0x64f] sm:$0x1] }
 0x57a   :  { %v10289_v56 = vsel %vm619_vm5, %v10288_v20, %v10287_v10  ;;  %v10299_v18 = vsel %vm613_vm3, %v10298_v28, %v10297_v60  ;;  %v9879_v20 = vld [vmem:[%s22879_s0 + $0x62f] sm:$0x1]  ;;  %v9881_v26 = vld [vmem:[%s22879_s0 + $0x63f] sm:$0x1]  ;;  %v10578_v11 = vrot.slane %v9902_v12, 4 }
 0x57b   :  { %v20825_v34 = vsel %vm622_vm6, %v10290_v1, %v10289_v56  ;;  %v10301_v0 = vsel %vm616_vm4, %v10300_v49, %v10299_v18  ;;  %v10531_v46 = vsel %vm604_vm0, %v10530_v7, %v9874_v47  ;;  %v9885_v37 = vld [vmem:[%s22879_s0 + $0x65f] sm:$0x1]  ;;  %v10538_v56 = vrot.slane %v9879_v20, 3  ;;  %v9908_v9 = vld [vmem:[%s22879_s0 + $0x717] sm:$0x1] }
 0x57c   :  { %v10303_v1 = vsel %vm619_vm5, %v10302_v35, %v10301_v0  ;;  %v10534_v35 = vrot.slane %v9877_v4, 5  ;;  %v10533_v10 = vsel %vm607_vm1, %v10532_v27, %v10531_v46  ;;  %v10542_v0 = vrot.slane %v9881_v26, 1  ;;  %v9886_v46 = vld [vmem:[%s22879_s0 + $0x667] sm:$0x1]  ;;  %v9887_v27 = vld [vmem:[%s22879_s0 + $0x66f] sm:$0x1] }
 0x57e   :  { %v10535_v7 = vsel %vm610_vm2, %v10534_v35, %v10533_v10  ;;  %v9747_v35 = vld [vmem:[%s22879_s0 + $0x20f] sm:$0x1] }
 0x5c6   :  { %v6799_v3 = vpop.f32.mrb[32].mxu0 }
 0x5c7   :  { %v12508_v15 = vadd.f32 %v6799_v3, %v15772_v59  ;;  %v6801_v2 = vpop.f32.mrb[33].mxu0  ;;  %v20843_v3 = vsel %vm622_vm6, %v10304_v62, %v10303_v1  ;;  %v9882_v62 = vld [vmem:[%s22879_s0 + $0x647] sm:$0x1] }
 0x5c8   :  { %v12509_v13 = vadd.f32 %v6801_v2, %v15772_v59  ;;  %v9884_v2 = vld [vmem:[%s22879_s0 + $0x657] sm:$0x1] }
 0x5c9   :  { %v11442_v48 = vmul.f32 -1.442695, %v12508_v15  ;;  %v10546_v20 = vrot.slane %v9884_v2, 6 }
 0x5ca   :  { %v11443_v40 = vmul.f32 -1.442695, %v12509_v13  ;;  %v6805_v41 = vpop.f32.mrb[34].mxu0  ;;  %v10536_v13 = vrot.slane %v9878_v6, 4 }
 0x5cb   :  { %12945 = vpow2.f32 %v11442_v48  ;;  %v12510_v28 = vadd.f32 %v6805_v41, %v15819_v32  ;;  %v6807_v49 = vpop.f32.mrb[35].mxu0  ;;  %v10540_v48 = vrot.slane %v9880_v45, 2 }
 0x5cc   :  { %12947 = vpow2.f32 %v11443_v40  ;;  %v12511_v47 = vadd.f32 %v6807_v49, %v15819_v32  ;;  %v10544_v40 = vrot.slane %v9883_v16, 7  ;;  %v10537_v6 = vsel %vm613_vm3, %v10536_v13, %v10535_v7  ;;  %v9889_v49 = vld [vmem:[%s22879_s0 + $0x67f] sm:$0x1]  ;;  %v9748_v7 = vld [vmem:[%s22879_s0 + $0x217] sm:$0x1] }
 0x5cd   :  { %v11444_v60 = vmul.f32 -1.442695, %v12510_v28  ;;  %v9888_v28 = vld [vmem:[%s22879_s0 + $0x677] sm:$0x1]  ;;  %v10539_v26 = vsel %vm616_vm4, %v10538_v56, %v10537_v6 }
 0x5ce   :  { %v11445_v18 = vmul.f32 -1.442695, %v12511_v47  ;;  %v6811_v4 = vpop.f32.mrb[36].mxu0  ;;  %v10545_v16 = vsel %vm604_vm0, %v10544_v40, %v9882_v62  ;;  %v10541_v2 = vsel %vm619_vm5, %v10540_v48, %v10539_v26  ;;  %v10550_v62 = vrot.slane %v9886_v46, 4  ;;  %v9746_v46 = vld [vmem:[%s22879_s0 + $0x207] sm:$0x1] }
 0x5cf   :  { %12949 = vpow2.f32 %v11444_v60  ;;  %v12512_v41 = vadd.f32 %v6811_v4, %v15830_v44  ;;  %v6813_v1 = vpop.f32.mrb[37].mxu0  ;;  %v10547_v10 = vsel %vm607_vm1, %v10546_v20, %v10545_v16  ;;  %v10548_v60 = vrot.slane %v9885_v37, 5  ;;  %v9749_v37 = vld [vmem:[%s22879_s0 + $0x21f] sm:$0x1] }
 0x5d0   :  { %12951 = vpow2.f32 %v11445_v18  ;;  %v12513_v45 = vadd.f32 %v6813_v1, %v15830_v44  ;;  %v20891_v56 = vsel %vm622_vm6, %v10542_v0, %v10541_v2  ;;  %v10552_v4 = vrot.slane %v9887_v27, 3 }
 0x5d1   :  { %v11446_v47 = vmul.f32 -1.442695, %v12512_v41  ;;  %v10549_v48 = vsel %vm610_vm2, %v10548_v60, %v10547_v10  ;;  %v10554_v1 = vrot.slane %v9888_v28, 2  ;;  %v10556_v0 = vrot.slane %v9889_v49, 1  ;;  %v9750_v28 = vld [vmem:[%s22879_s0 + $0x227] sm:$0x1] }
 0x5d2   :  { %v11447_v13 = vmul.f32 -1.442695, %v12513_v45  ;;  %v6817_v18 = vpop.f32.mrb[38].mxu0  ;;  %v10551_v20 = vsel %vm613_vm3, %v10550_v62, %v10549_v48  ;;  %v10306_v16 = vrot.slane %v9747_v35, 7 }
 0x5d3   :  { %12953 = vpow2.f32 %v11446_v47  ;;  %v12514_v40 = vadd.f32 %v6817_v18, %v15867_v17  ;;  %v6819_v41 = vpop.f32.mrb[39].mxu0  ;;  %v10553_v26 = vsel %vm616_vm4, %v10552_v4, %v10551_v20  ;;  %v10308_v47 = vrot.slane %v9748_v7, 6  ;;  %v9751_v7 = vld [vmem:[%s22879_s0 + $0x22f] sm:$0x1] }
 0x5d4   :  { %12955 = vpow2.f32 %v11447_v13  ;;  %v12515_v6 = vadd.f32 %v6819_v41, %v15867_v17  ;;  %v10555_v49 = vsel %vm619_vm5, %v10554_v1, %v10553_v26  ;;  %v10310_v18 = vrot.slane %v9749_v37, 5  ;;  %v9752_v1 = vld [vmem:[%s22879_s0 + $0x237] sm:$0x1] }
 0x5d5   :  { %v12946_v27 = vpop.eup %12945  ;;  %v11448_v45 = vmul.f32 -1.442695, %v12514_v40  ;;  %v20910_v4 = vsel %vm622_vm6, %v10556_v0, %v10555_v49  ;;  %v10307_v37 = vsel %vm604_vm0, %v10306_v16, %v9746_v46  ;;  %v9753_v0 = vld [vmem:[%s22879_s0 + $0x23f] sm:$0x1]  ;;  %v9755_v49 = vld [vmem:[%s22879_s0 + $0x24f] sm:$0x1] }
 0x5d6   :  { %v12948_v2 = vpop.eup %12947  ;;  %v6898_v10 = vadd.f32 1.0, %v12946_v27  ;;  %v11449_v60 = vmul.f32 -1.442695, %v12515_v6  ;;  %v6823_v13 = vpop.f32.mrb[40].mxu0  ;;  %v10309_v27 = vsel %vm607_vm1, %v10308_v47, %v10307_v37  ;;  %v9754_v47 = vld [vmem:[%s22879_s0 + $0x247] sm:$0x1] }
 0x5d7   :  { %v6899_v62 = vadd.f32 1.0, %v12948_v2  ;;  %12957 = vpow2.f32 %v11448_v45  ;;  %v12516_v41 = vadd.f32 %v6823_v13, %v15883_v39  ;;  %v6825_v40 = vpop.f32.mrb[41].mxu0  ;;  %v10312_v45 = vrot.slane %v9750_v28, 4 }
 0x5d8   :  { %12959 = vrcp.f32 %v6898_v10  ;;  %v12517_v48 = vadd.f32 %v6825_v40, %v15883_v39  ;;  %v10311_v46 = vsel %vm610_vm2, %v10310_v18, %v10309_v27  ;;  %v10316_v18 = vrot.slane %v9752_v1, 2 }
 0x5d9   :  { %v12950_v6 = vpop.eup %12949  ;;  %12961 = vrcp.f32 %v6899_v62  ;;  %v11450_v20 = vmul.f32 -1.442695, %v12516_v41  ;;  %v10313_v40 = vsel %vm613_vm3, %v10312_v45, %v10311_v46  ;;  %v10318_v27 = vrot.slane %v9753_v0, 1  ;;  %v9759_v0 = vld [vmem:[%s22879_s0 + $0x26f] sm:$0x1] }
 0x5da   :  { %v12952_v26 = vpop.eup %12951  ;;  %v6900_v2 = vadd.f32 1.0, %v12950_v6  ;;  %12963 = vpow2.f32 %v11449_v60  ;;  %v11451_v10 = vmul.f32 -1.442695, %v12517_v48  ;;  %v6829_v13 = vpop.f32.mrb[42].mxu0  ;;  %v9756_v60 = vld [vmem:[%s22879_s0 + $0x257] sm:$0x1] }
 0x5db   :  { %v6901_v16 = vadd.f32 1.0, %v12952_v26  ;;  %12965 = vpow2.f32 %v11450_v20  ;;  %v12518_v62 = vadd.f32 %v6829_v13, %v15902_v58  ;;  %v6831_v41 = vpop.f32.mrb[43].mxu0  ;;  %v10314_v48 = vrot.slane %v9751_v7, 3  ;;  %v9757_v20 = vld [vmem:[%s22879_s0 + $0x25f] sm:$0x1] }
 0x5dc   :  { %12967 = vrcp.f32 %v6900_v2  ;;  %v12519_v28 = vadd.f32 %v6831_v41, %v15902_v58  ;;  %v10320_v45 = vrot.slane %v9755_v49, 7  ;;  %v9758_v41 = vld [vmem:[%s22879_s0 + $0x267] sm:$0x1]  ;;  %v10328_v15 = vrot.slane %v9759_v0, 3 }
 0x5dd   :  { %v12954_v37 = vpop.eup %12953  ;;  %12969 = vrcp.f32 %v6901_v16  ;;  %v11452_v6 = vmul.f32 -1.442695, %v12518_v62  ;;  %v10315_v7 = vsel %vm616_vm4, %v10314_v48, %v10313_v40  ;;  %v9761_v40 = vld [vmem:[%s22879_s0 + $0x27f] sm:$0x1]  ;;  %v10326_v35 = vrot.slane %v9758_v41, 4 }
 0x5de   :  { %v12956_v26 = vpop.eup %12955  ;;  %v6902_v2 = vadd.f32 1.0, %v12954_v37  ;;  %12971 = vpow2.f32 %v11451_v10  ;;  %v11453_v13 = vmul.f32 -1.442695, %v12519_v28  ;;  %v6835_v46 = vpop.f32.mrb[44].mxu0  ;;  %v9760_v10 = vld [vmem:[%s22879_s0 + $0x277] sm:$0x1]  ;;  %v10317_v49 = vsel %vm619_vm5, %v10316_v18, %v10315_v7 }
 0x5df   :  { %v6903_v1 = vadd.f32 1.0, %v12956_v26  ;;  %12973 = vpow2.f32 %v11452_v6  ;;  %v12520_v16 = vadd.f32 %v6835_v46, %v15924_v25  ;;  %v6837_v62 = vpop.f32.mrb[45].mxu0  ;;  %v20959_v48 = vsel %vm622_vm6, %v10318_v27, %v10317_v49  ;;  %v9891_v18 = vld [vmem:[%s22879_s0 + $0x68f] sm:$0x1] }
 0x5e0   :  { %12975 = vrcp.f32 %v6902_v2  ;;  %v12521_v28 = vadd.f32 %v6837_v62, %v15924_v25  ;;  %v10321_v37 = vsel %vm604_vm0, %v10320_v45, %v9754_v47  ;;  %v10322_v26 = vrot.slane %v9756_v60, 6  ;;  %v9892_v47 = vld [vmem:[%s22879_s0 + $0x697] sm:$0x1] }
 0x5e1   :  { %v12958_v6 = vpop.eup %12957  ;;  %12977 = vrcp.f32 %v6903_v1  ;;  %v10324_v46 = vrot.slane %v9757_v20, 5  ;;  %v10330_v43 = vrot.slane %v9760_v10, 2  ;;  %v10332_v41 = vrot.slane %v9761_v40, 1 }
 0x5e2   :  { %v20965_v2 = vpop.eup %12959  ;;  %v6904_v7 = vadd.f32 1.0, %v12958_v6  ;;  %12979 = vpow2.f32 %v11453_v13  ;;  %v6841_v62 = vpop.f32.mrb[46].mxu0  ;;  %v10323_v45 = vsel %vm607_vm1, %v10322_v26, %v10321_v37  ;;  %v9890_v13 = vld [vmem:[%s22879_s0 + $0x687] sm:$0x1]  ;;  %v10558_v49 = vrot.slane %v9891_v18, 7 }
 0x5e3   :  { %v20970_v27 = vpop.eup %12961  ;;  %12981 = vtanh.f32 %v12520_v16  ;;  %v12522_v60 = vadd.f32 %v6841_v62, %v15937_v23  ;;  %v6843_v20 = vpop.f32.mrb[47].mxu0  ;;  %v10325_v10 = vsel %vm610_vm2, %v10324_v46, %v10323_v45  ;;  %v9893_v16 = vld [vmem:[%s22879_s0 + $0x69f] sm:$0x1]  ;;  %v9894_v37 = vld [vmem:[%s22879_s0 + $0x6a7] sm:$0x1] }
 0x5e4   :  { %v12964_v1 = vpop.eup %12963  ;;  %12983 = vrcp.f32 %v6904_v7  ;;  %v12523_v0 = vadd.f32 %v6843_v20, %v15937_v23  ;;  %v10327_v40 = vsel %vm613_vm3, %v10326_v35, %v10325_v10  ;;  %v9895_v26 = vld [vmem:[%s22879_s0 + $0x6af] sm:$0x1]  ;;  %v10560_v7 = vrot.slane %v9892_v47, 6  ;;  %v9897_v47 = vld [vmem:[%s22879_s0 + $0x6bf] sm:$0x1] }
 0x5e5   :  { %v12966_v6 = vpop.eup %12965  ;;  %v6905_v62 = vadd.f32 1.0, %v12964_v1  ;;  %12985 = vtanh.f32 %v12521_v28  ;;  %v10329_v18 = vsel %vm616_vm4, %v10328_v15, %v10327_v40  ;;  %v10559_v45 = vsel %vm604_vm0, %v10558_v49, %v9890_v13  ;;  %v9896_v1 = vld [vmem:[%s22879_s0 + $0x6b7] sm:$0x1] }
 0x5e6   :  { %v20989_v46 = vpop.eup %12967  ;;  %v6906_v20 = vadd.f32 1.0, %v12966_v6  ;;  %12987 = vtanh.f32 %v12522_v60  ;;  %v10331_v35 = vsel %vm619_vm5, %v10330_v43, %v10329_v18  ;;  %v10561_v10 = vsel %vm607_vm1, %v10560_v7, %v10559_v45  ;;  %v9899_v43 = vld [vmem:[%s22879_s0 + $0x6cf] sm:$0x1] }
 0x5e7   :  { %v20993_v28 = vpop.eup %12969  ;;  %12989 = vrcp.f32 %v6905_v62  ;;  %v10562_v60 = vrot.slane %v9893_v16, 5  ;;  %v21004_v15 = vsel %vm622_vm6, %v10332_v41, %v10331_v35  ;;  %v10564_v13 = vrot.slane %v9894_v37, 4  ;;  %v9898_v16 = vld [vmem:[%s22879_s0 + $0x6c7] sm:$0x1]  ;;  %v9900_v41 = vld [vmem:[%s22879_s0 + $0x6d7] sm:$0x1] }
 0x5e8   :  { %v12972_v6 = vpop.eup %12971  ;;  %12991 = vrcp.f32 %v6906_v20  ;;  %v10566_v49 = vrot.slane %v9895_v26, 3  ;;  %v9901_v37 = vld [vmem:[%s22879_s0 + $0x6df] sm:$0x1]  ;;  %v10568_v26 = vrot.slane %v9896_v1, 2  ;;  %v10570_v35 = vrot.slane %v9897_v47, 1 }
 0x5e9   :  { %v12974_v62 = vpop.eup %12973  ;;  %v6907_v40 = vadd.f32 1.0, %v12972_v6  ;;  %12993 = vtanh.f32 %v12523_v0  ;;  %v10563_v7 = vsel %vm610_vm2, %v10562_v60, %v10561_v10  ;;  %v9903_v10 = vld [vmem:[%s22879_s0 + $0x6ef] sm:$0x1]  ;;  %v10574_v47 = vrot.slane %v9900_v41, 6  ;;  %v9764_v41 = vld [vmem:[%s22879_s0 + $0x297] sm:$0x1] }
 0x5ea   :  { %v12976_v20 = vpop.eup %12975  ;;  %v6908_v45 = vadd.f32 1.0, %v12974_v62  ;;  %v10565_v0 = vsel %vm613_vm3, %v10564_v13, %v10563_v7  ;;  %v10572_v62 = vrot.slane %v9899_v43, 7 }
 0x5eb   :  { %v12978_v6 = vpop.eup %12977  ;;  %v6938_v18 = vmul.f32 %v12976_v20, %v19517_v50  ;;  %12995 = vrcp.f32 %v6907_v40  ;;  %v10567_v60 = vsel %vm616_vm4, %v10566_v49, %v10565_v0  ;;  %v9904_v50 = vld [vmem:[%s22879_s0 + $0x6f7] sm:$0x1]  ;;  %v9905_v20 = vld [vmem:[%s22879_s0 + $0x6ff] sm:$0x1] }
 0x5ec   :  { %v12980_v5 = vpop.eup %12979  ;;  %v6939_v13 = vmul.f32 %v12978_v6, %v19539_v42  ;;  %12997 = vrcp.f32 %v6908_v45  ;;  %v10569_v1 = vsel %vm619_vm5, %v10568_v26, %v10567_v60  ;;  %v10573_v43 = vsel %vm604_vm0, %v10572_v62, %v9898_v16 }
 0x5ed   :  { %v12982_v40 = vpop.eup %12981  ;;  %v6909_v7 = vadd.f32 1.0, %v12980_v5  ;;  %v21039_v49 = vsel %vm622_vm6, %v10570_v35, %v10569_v1  ;;  %v10576_v42 = vrot.slane %v9901_v37, 5  ;;  %v10575_v6 = vsel %vm607_vm1, %v10574_v47, %v10573_v43  ;;  %v9763_v5 = vld [vmem:[%s22879_s0 + $0x28f] sm:$0x1]  ;;  %v9762_v47 = vld [vmem:[%s22879_s0 + $0x287] sm:$0x1] }
 0x5ee   :  { %v12984_v45 = vpop.eup %12983  ;;  %v6942_v0 = vmul.f32 %v12982_v40, %v20965_v2  ;;  %v10580_v26 = vrot.slane %v9903_v10, 3  ;;  %v10582_v37 = vrot.slane %v9904_v50, 2  ;;  %v10584_v1 = vrot.slane %v9905_v20, 1 }
 0x5ef   :  { %v12986_v35 = vpop.eup %12985  ;;  %v6940_v60 = vmul.f32 %v12984_v45, %v19551_v38  ;;  %12999 = vrcp.f32 %v6909_v7  ;;  %v10577_v16 = vsel %vm610_vm2, %v10576_v42, %v10575_v6  ;;  %v9765_v38 = vld [vmem:[%s22879_s0 + $0x29f] sm:$0x1]  ;;  %v10336_v20 = vrot.slane %v9764_v41, 6  ;;  %v9770_v41 = vld [vmem:[%s22879_s0 + $0x2c7] sm:$0x1] }
 0x5f0   :  { %v12988_v2 = vpop.eup %12987  ;;  %v21052_v62 = vadd.f32 %v6942_v0, %v6938_v18  ;;  %v6943_v12 = vmul.f32 %v12986_v35, %v20970_v27  ;;  %v10579_v10 = vsel %vm613_vm3, %v10578_v11, %v10577_v16  ;;  %v9766_v27 = vld [vmem:[%s22879_s0 + $0x2a7] sm:$0x1]  ;;  %v9767_v11 = vld [vmem:[%s22879_s0 + $0x2af] sm:$0x1]  ;;  %v10334_v18 = vrot.slane %v9763_v5, 7 }
 0x5f1   :  { %v12990_v40 = vpop.eup %12989  ;;  %v6944_v7 = vmul.f32 %v12988_v2, %v20989_v46  ;;  %v10581_v50 = vsel %vm616_vm4, %v10580_v26, %v10579_v10  ;;  %v9768_v0 = vld [vmem:[%s22879_s0 + $0x2b7] sm:$0x1]  ;;  %v9769_v6 = vld [vmem:[%s22879_s0 + $0x2bf] sm:$0x1]  ;;  %v9771_v26 = vld [vmem:[%s22879_s0 + $0x2cf] sm:$0x1] }
 0x5f2   :  { %v21070_v43 = vpop.eup %12991  ;;  %v6941_v42 = vmul.f32 %v12990_v40, %v19574_v19  ;;  %13001 = vtanh.f32 %v21052_v62  ;;  %v21074_v45 = vadd.f32 %v6943_v12, %v6939_v13  ;;  %v10583_v46 = vsel %vm619_vm5, %v10582_v37, %v10581_v50  ;;  %v9772_v35 = vld [vmem:[%s22879_s0 + $0x2d7] sm:$0x1]  ;;  %v9773_v16 = vld [vmem:[%s22879_s0 + $0x2df] sm:$0x1]  ;;  %v9774_v10 = vld [vmem:[%s22879_s0 + $0x2e7] sm:$0x1] }
 0x5f3   :  { %v12994_v5 = vpop.eup %12993  ;;  %v21086_v19 = vadd.f32 %v6944_v7, %v6940_v60  ;;  %v21089_v13 = vsel %vm622_vm6, %v10584_v1, %v10583_v46  ;;  %v10335_v37 = vsel %vm604_vm0, %v10334_v18, %v9762_v47  ;;  %v10338_v2 = vrot.slane %v9765_v38, 5  ;;  %v9775_v1 = vld [vmem:[%s22879_s0 + $0x2ef] sm:$0x1]  ;;  %v9776_v47 = vld [vmem:[%s22879_s0 + $0x2f7] sm:$0x1] }
 0x5f4   :  { %22893 = vst [vmem:[#allocation3_spill] sm:$0xff] %v21074_v45  ;;  %13003 = vtanh.f32 %v21074_v45  ;;  %v6945_v60 = vmul.f32 %v12994_v5, %v20993_v28  ;;  %v10337_v38 = vsel %vm607_vm1, %v10336_v20, %v10335_v37  ;;  %v9777_v28 = vld [vmem:[%s22879_s0 + $0x2ff] sm:$0x1]  ;;  %v10340_v50 = vrot.slane %v9766_v27, 4  ;;  %v9907_v46 = vld [vmem:[%s22879_s0 + $0x70f] sm:$0x1] }
 0x5f5   :  { %22894 = vst [vmem:[#allocation4_spill] sm:$0xff] %v21086_v19  ;;  %v21115_v40 = vpop.eup %12995  ;;  %13005 = vtanh.f32 %v21086_v19  ;;  %v10339_v7 = vsel %vm610_vm2, %v10338_v2, %v10337_v38  ;;  %v10342_v18 = vrot.slane %v9767_v11, 3  ;;  %v10344_v20 = vrot.slane %v9768_v0, 2  ;;  %v9906_v38 = vld [vmem:[%s22879_s0 + $0x707] sm:$0x1] }
 0x5f6   :  { %v21125_v5 = vpop.eup %12997  ;;  %v21127_v12 = vadd.f32 %v6945_v60, %v6941_v42  ;;  %v10346_v37 = vrot.slane %v9769_v6, 1  ;;  %v10348_v61 = vrot.slane %v9771_v26, 7  ;;  %v10341_v33 = vsel %vm613_vm3, %v10340_v50, %v10339_v7  ;;  %v9909_v42 = vld [vmem:[%s22879_s0 + $0x71f] sm:$0x1]  ;;  %v9792_v45 = vld [vmem:[%s22879_s0 + $0x377] sm:$0x1] }
 0x5f7   :  { %v10350_v2 = vrot.slane %v9772_v35, 6  ;;  %v10352_v27 = vrot.slane %v9773_v16, 5  ;;  %v10354_v11 = vrot.slane %v9774_v10, 4  ;;  %v10343_v0 = vsel %vm616_vm4, %v10342_v18, %v10341_v33  ;;  %v9910_v35 = vld [vmem:[%s22879_s0 + $0x727] sm:$0x1] }
 0x5f8   :  { %22895 = vst [vmem:[#allocation5_spill] sm:$0xff] %v21127_v12  ;;  %13007 = vtanh.f32 %v21127_v12  ;;  %v10349_v6 = vsel %vm604_vm0, %v10348_v61, %v9770_v41  ;;  %v10356_v26 = vrot.slane %v9775_v1, 3  ;;  %v9911_v16 = vld [vmem:[%s22879_s0 + $0x72f] sm:$0x1]  ;;  %v10345_v10 = vsel %vm619_vm5, %v10344_v20, %v10343_v0  ;;  %v9912_v33 = vld [vmem:[%s22879_s0 + $0x737] sm:$0x1] }
 0x5f9   :  { %v21148_v60 = vpop.eup %12999  ;;  %v10351_v7 = vsel %vm607_vm1, %v10350_v2, %v10349_v6  ;;  %v10358_v50 = vrot.slane %v9776_v47, 2  ;;  %v10360_v30 = vrot.slane %v9777_v28, 1  ;;  %v9913_v61 = vld [vmem:[%s22879_s0 + $0x73f] sm:$0x1]  ;;  %v21159_v41 = vsel %vm622_vm6, %v10346_v37, %v10345_v10  ;;  %v9915_v18 = vld [vmem:[%s22879_s0 + $0x74f] sm:$0x1] }
 0x5fa   :  { %v10353_v1 = vsel %vm610_vm2, %v10352_v27, %v10351_v7  ;;  %v9916_v47 = vld [vmem:[%s22879_s0 + $0x757] sm:$0x1]  ;;  %v10586_v28 = vrot.slane %v9907_v46, 7  ;;  %v10588_v20 = vrot.slane %v9908_v9, 6  ;;  %v9917_v0 = vld [vmem:[%s22879_s0 + $0x75f] sm:$0x1] }
 0x5fb   :  { %v10355_v2 = vsel %vm613_vm3, %v10354_v11, %v10353_v1  ;;  %v10590_v37 = vrot.slane %v9909_v42, 5  ;;  %v10592_v6 = vrot.slane %v9910_v35, 4  ;;  %v10594_v10 = vrot.slane %v9911_v16, 3  ;;  %v9914_v12 = vld [vmem:[%s22879_s0 + $0x747] sm:$0x1] }
 0x5fc   :  { %v13002_v27 = vpop.eup %13001  ;;  %v10357_v7 = vsel %vm616_vm4, %v10356_v26, %v10355_v2  ;;  %v10587_v19 = vsel %vm604_vm0, %v10586_v28, %v9906_v38  ;;  %v10596_v46 = vrot.slane %v9912_v33, 2  ;;  %v10598_v9 = vrot.slane %v9913_v61, 1  ;;  %v9918_v42 = vld [vmem:[%s22879_s0 + $0x767] sm:$0x1]  ;;  %v9919_v26 = vld [vmem:[%s22879_s0 + $0x76f] sm:$0x1] }
 0x5fd   :  { %v21178_v11 = vmul.f32 %v13002_v27, %v21070_v43  ;;  %v10359_v1 = vsel %vm619_vm5, %v10358_v50, %v10357_v7  ;;  %v10589_v35 = vsel %vm607_vm1, %v10588_v20, %v10587_v19  ;;  %v10600_v16 = vrot.slane %v9915_v18, 7  ;;  %v9920_v43 = vld [vmem:[%s22879_s0 + $0x777] sm:$0x1]  ;;  %v9921_v50 = vld [vmem:[%s22879_s0 + $0x77f] sm:$0x1] }
 0x5fe   :  { %v13004_v2 = vpop.eup %13003  ;;  %v21189_v38 = vsel %vm622_vm6, %v10360_v30, %v10359_v1  ;;  %v10591_v33 = vsel %vm610_vm2, %v10590_v37, %v10589_v35  ;;  %v10602_v61 = vrot.slane %v9916_v47, 6  ;;  %v10604_v28 = vrot.slane %v9917_v0, 5  ;;  %v9779_v7 = vld [vmem:[%s22879_s0 + $0x30f] sm:$0x1]  ;;  %v9780_v37 = vld [vmem:[%s22879_s0 + $0x317] sm:$0x1] }
 0x5ff   :  { %v13006_v27 = vpop.eup %13005  ;;  %v6955_v19 = vmul.f32 %v13004_v2, %v21115_v40  ;;  %v10593_v30 = vsel %vm613_vm3, %v10592_v6, %v10591_v33  ;;  %v10601_v20 = vsel %vm604_vm0, %v10600_v16, %v9914_v12  ;;  %v9781_v47 = vld [vmem:[%s22879_s0 + $0x31f] sm:$0x1]  ;;  %v10606_v1 = vrot.slane %v9918_v42, 4  ;;  %v9778_v12 = vld [vmem:[%s22879_s0 + $0x307] sm:$0x1] }
 0x600   :  { %v6956_v40 = vmul.f32 %v13006_v27, %v21125_v5  ;;  %v10595_v0 = vsel %vm616_vm4, %v10594_v10, %v10593_v30  ;;  %v10603_v6 = vsel %vm607_vm1, %v10602_v61, %v10601_v20  ;;  %v9782_v35 = vld [vmem:[%s22879_s0 + $0x327] sm:$0x1]  ;;  %v9783_v16 = vld [vmem:[%s22879_s0 + $0x32f] sm:$0x1]  ;;  %v10608_v10 = vrot.slane %v9919_v26, 3 }
 0x601   :  { %v10597_v2 = vsel %vm619_vm5, %v10596_v46, %v10595_v0  ;;  %v10605_v5 = vsel %vm610_vm2, %v10604_v28, %v10603_v6  ;;  %v10610_v33 = vrot.slane %v9920_v43, 2  ;;  %v9784_v42 = vld [vmem:[%s22879_s0 + $0x337] sm:$0x1]  ;;  %v21232_v61 = vld [vmem:[%s22879_s0 + $0x33f] sm:$0x1]  ;;  %v10612_v28 = vrot.slane %v9921_v50, 1 }
 0x602   :  { %v13008_v27 = vpop.eup %13007  ;;  %v12348_v30 = vpack.c.bf16 %v6956_v40, %v21178_v11  ;;  %v21236_v20 = vsel %vm622_vm6, %v10598_v9, %v10597_v2  ;;  %v10607_v46 = vsel %vm613_vm3, %v10606_v1, %v10605_v5  ;;  %v9787_v26 = vld [vmem:[%s22879_s0 + $0x34f] sm:$0x1]  ;;  %v9788_v43 = vld [vmem:[%s22879_s0 + $0x357] sm:$0x1]  ;;  %v9786_v9 = vld [vmem:[%s22879_s0 + $0x347] sm:$0x1] }
 0x603   :  { %v6957_v0 = vmul.f32 %v13008_v27, %v21148_v60  ;;  %v10609_v6 = vsel %vm616_vm4, %v10608_v10, %v10607_v46  ;;  %v9789_v11 = vld [vmem:[%s22879_s0 + $0x35f] sm:$0x1]  ;;  %v9790_v50 = vld [vmem:[%s22879_s0 + $0x367] sm:$0x1]  ;;  %v10362_v40 = vrot.slane %v9779_v7, 7  ;;  %v10364_v1 = vrot.slane %v9780_v37, 6 }
 0x604   :  { %v10611_v2 = vsel %vm619_vm5, %v10610_v33, %v10609_v6  ;;  %v9791_v60 = vld [vmem:[%s22879_s0 + $0x36f] sm:$0x1]  ;;  %v10366_v5 = vrot.slane %v9781_v47, 5  ;;  %v10368_v10 = vrot.slane %v9782_v35, 4  ;;  %v10370_v27 = vrot.slane %v9783_v16, 3 }
 0x605   :  { %v12346_v46 = vpack.c.bf16 %v6957_v0, %v6955_v19  ;;  %v21261_v18 = vsel %vm622_vm6, %v10612_v28, %v10611_v2  ;;  %v9793_v7 = vld [vmem:[%s22879_s0 + $0x37f] sm:$0x1]  ;;  %v10363_v37 = vsel %vm604_vm0, %v10362_v40, %v9778_v12  ;;  %v10372_v33 = vrot.slane %v9784_v42, 2  ;;  %v9922_v28 = vld [vmem:[%s22879_s0 + $0x787] sm:$0x1] }
 0x606   :  { %v10365_v35 = vsel %vm607_vm1, %v10364_v1, %v10363_v37  ;;  %v10374_v19 = vrot.slane %v21232_v61, 1  ;;  %v10376_v16 = vrot.slane %v9787_v26, 7  ;;  %v9923_v0 = vld [vmem:[%s22879_s0 + $0x78f] sm:$0x1]  ;;  %v9924_v12 = vld [vmem:[%s22879_s0 + $0x797] sm:$0x1] }
 0x607   :  { %12347 = vmatprep.subr.bf16.mxu1 %v12346_v46  ;;  %v10367_v42 = vsel %vm610_vm2, %v10366_v5, %v10365_v35  ;;  %v10378_v6 = vrot.slane %v9788_v43, 6  ;;  %v10380_v40 = vrot.slane %v9789_v11, 5  ;;  %v10382_v1 = vrot.slane %v9790_v50, 4  ;;  %v9925_v61 = vld [vmem:[%s22879_s0 + $0x79f] sm:$0x1] }
 0x608   :  { %12349 = vmatpush1.bf16.msra.mxu1 %v12348_v30  ;;  %v10369_v26 = vsel %vm613_vm3, %v10368_v10, %v10367_v42  ;;  %v10377_v2 = vsel %vm604_vm0, %v10376_v16, %v9786_v9  ;;  %v10384_v37 = vrot.slane %v9791_v60, 3  ;;  %v10386_v47 = vrot.slane %v9792_v45, 2  ;;  %v9926_v46 = vld [vmem:[%s22879_s0 + $0x7a7] sm:$0x1]  ;;  %v9927_v43 = vld [vmem:[%s22879_s0 + $0x7af] sm:$0x1] }
 0x609   :  { %v22896_v11 = vpack.c.bf16 %v20390_v31, %v20333_v8  ;;  %v10371_v30 = vsel %vm616_vm4, %v10370_v27, %v10369_v26  ;;  %v10379_v9 = vsel %vm607_vm1, %v10378_v6, %v10377_v2  ;;  %v10388_v50 = vrot.slane %v9793_v7, 1  ;;  %v9928_v45 = vld [vmem:[%s22879_s0 + $0x7b7] sm:$0x1]  ;;  %v9929_v60 = vld [vmem:[%s22879_s0 + $0x7bf] sm:$0x1] }
 0x60a   :  { %v10614_v5 = vrot.slane %v9923_v0, 7  ;;  %v10373_v10 = vsel %vm619_vm5, %v10372_v33, %v10371_v30  ;;  %v10381_v8 = vsel %vm610_vm2, %v10380_v40, %v10379_v9  ;;  %v9930_v31 = vld [vmem:[%s22879_s0 + $0x7c7] sm:$0x1]  ;;  %v9931_v27 = vld [vmem:[%s22879_s0 + $0x7cf] sm:$0x1]  ;;  %v10616_v35 = vrot.slane %v9924_v12, 6 }
 0x60b   :  { %12404 = vmatprep.subr.msk.bf16.mxu1 %vm13442_vm8, %v22896_v11  ;;  %v9932_v7 = vld [vmem:[%s22879_s0 + $0x7d7] sm:$0x1]  ;;  %v10618_v16 = vrot.slane %v9925_v61, 5  ;;  %v13274_v33 = vld [vmem:[%s22882_s2] sm:$0xff]  ;;  %v21324_v0 = vsel %vm622_vm6, %v10374_v19, %v10373_v10  ;;  %v10383_v42 = vsel %vm613_vm3, %v10382_v1, %v10381_v8  ;;  %v9933_v6 = vld [vmem:[%s22879_s0 + $0x7df] sm:$0x1] }
 0x60c   :  { %11494 = vmatmul.mubr.msk.f32.vlgmr.msra.gmra.mrb[40].mxu1 %vm1260_vm9, %v13274_v33  ;;  %v9934_v12 = vld [vmem:[%s22879_s0 + $0x7e7] sm:$0x1]  ;;  %v10615_v40 = vsel %vm604_vm0, %v10614_v5, %v9922_v28  ;;  %v10620_v61 = vrot.slane %v9926_v46, 4  ;;  %v22897_v26 = vmov 0.0   ;;  %v10385_v2 = vsel %vm616_vm4, %v10384_v37, %v10383_v42  ;;  %v9935_v19 = vld [vmem:[%s22879_s0 + $0x7ef] sm:$0x1] }
 0x60d   :  { %8165 = vmatprep.mubr.f32.mxu1 %v22897_v26  ;;  %v9936_v1 = vld [vmem:[%s22879_s0 + $0x7f7] sm:$0x1]  ;;  %v10617_v11 = vsel %vm607_vm1, %v10616_v35, %v10615_v40  ;;  %v10622_v30 = vrot.slane %v9927_v43, 3  ;;  %v10624_v9 = vrot.slane %v9928_v45, 2  ;;  %v10387_v10 = vsel %vm619_vm5, %v10386_v47, %v10385_v2  ;;  %v9937_v28 = vld [vmem:[%s22879_s0 + $0x7ff] sm:$0x1] }
 0x60e   :  { %v10619_v37 = vsel %vm610_vm2, %v10618_v16, %v10617_v11  ;;  %v10626_v46 = vrot.slane %v9929_v60, 1  ;;  %v10628_v5 = vrot.slane %v9931_v27, 7  ;;  %v9795_v8 = vld [vmem:[%s22879_s0 + $0x38f] sm:$0x1]  ;;  %v21352_v33 = vsel %vm622_vm6, %v10388_v50, %v10387_v10  ;;  %v9794_v47 = vld [vmem:[%s22879_s0 + $0x387] sm:$0x1] }
 0x60f   :  { %v10621_v43 = vsel %vm613_vm3, %v10620_v61, %v10619_v37  ;;  %v10630_v45 = vrot.slane %v9932_v7, 6  ;;  %v10632_v35 = vrot.slane %v9933_v6, 5  ;;  %v9796_v60 = vld [vmem:[%s22879_s0 + $0x397] sm:$0x1]  ;;  %v9797_v27 = vld [vmem:[%s22879_s0 + $0x39f] sm:$0x1]  ;;  %v12441_v7 = vpack.c.bf16 %v21352_v33, %v21324_v0 }
 0x610   :  { %v13275_v50 = vld [vmem:[%s22882_s2 + $0x8] sm:$0xff]  ;;  %v10623_v16 = vsel %vm616_vm4, %v10622_v30, %v10621_v43  ;;  %v10629_v42 = vsel %vm604_vm0, %v10628_v5, %v9930_v31  ;;  %v10634_v6 = vrot.slane %v9934_v12, 4  ;;  %v9798_v40 = vld [vmem:[%s22879_s0 + $0x3a7] sm:$0x1]  ;;  %v10636_v10 = vrot.slane %v9935_v19, 3 }
 0x611   :  { %11495 = vmatmul.mubr.msk.f32.gmra.mrb[42].mxu1 %vm1260_vm9, %v13275_v50  ;;  %v9799_v61 = vld [vmem:[%s22879_s0 + $0x3af] sm:$0x1]  ;;  %v10625_v2 = vsel %vm619_vm5, %v10624_v9, %v10623_v16  ;;  %v10631_v11 = vsel %vm607_vm1, %v10630_v45, %v10629_v42  ;;  %v10638_v37 = vrot.slane %v9936_v1, 2  ;;  %v9800_v31 = vld [vmem:[%s22879_s0 + $0x3b7] sm:$0x1]  ;;  %v22898_v30 = vpack.c.bf16 %v20527_v54, %v20451_v52 }
 0x612   :  { %8171 = vmatprep.mubr.f32.mxu1 %v22897_v26  ;;  %v9801_v12 = vld [vmem:[%s22879_s0 + $0x3bf] sm:$0x1]  ;;  %v21393_v9 = vsel %vm622_vm6, %v10626_v46, %v10625_v2  ;;  %v10633_v19 = vsel %vm610_vm2, %v10632_v35, %v10631_v11  ;;  %v10640_v1 = vrot.slane %v9937_v28, 1  ;;  %v9802_v5 = vld [vmem:[%s22879_s0 + $0x3c7] sm:$0x1]  ;;  %v10390_v54 = vrot.slane %v9795_v8, 7 }
 0x613   :  { %12407 = vmatpush3.bf16.xpose.msk.msra.mxu1 %vm13442_vm8, %v22898_v30  ;;  %v9803_v43 = vld [vmem:[%s22879_s0 + $0x3cf] sm:$0x1]  ;;  %v9804_v52 = vld [vmem:[%s22879_s0 + $0x3d7] sm:$0x1]  ;;  %v22899_v46 = vpack.c.bf16 %v20542_v53, %v20539_v24  ;;  %v10635_v28 = vsel %vm613_vm3, %v10634_v6, %v10633_v19  ;;  %v9805_v45 = vld [vmem:[%s22879_s0 + $0x3df] sm:$0x1] }
 0x614   :  { %v10392_v35 = vrot.slane %v9796_v60, 6  ;;  %v10394_v50 = vrot.slane %v9797_v27, 5  ;;  %v10396_v16 = vrot.slane %v9798_v40, 4  ;;  %v13276_v42 = vld [vmem:[%s22882_s2 + $0x10] sm:$0xff]  ;;  %v10637_v24 = vsel %vm616_vm4, %v10636_v10, %v10635_v28  ;;  %v9806_v53 = vld [vmem:[%s22879_s0 + $0x3e7] sm:$0x1] }
 0x615   :  { %12410 = vmatprep.subr.msk.bf16.mxu1 %vm13442_vm8, %v22899_v46  ;;  %11496 = vmatmul.mubr.msk.f32.gmra.mrb[44].mxu1 %vm1260_vm9, %v13276_v42  ;;  %v9807_v8 = vld [vmem:[%s22879_s0 + $0x3ef] sm:$0x1]  ;;  %v10391_v60 = vsel %vm604_vm0, %v10390_v54, %v9794_v47  ;;  %v10398_v27 = vrot.slane %v9799_v61, 3  ;;  %v10400_v6 = vrot.slane %v9800_v31, 2  ;;  %v10639_v40 = vsel %vm619_vm5, %v10638_v37, %v10637_v24  ;;  %v9808_v2 = vld [vmem:[%s22879_s0 + $0x3f7] sm:$0x1] }
 0x616   :  { %8177 = vmatprep.mubr.f32.mxu1 %v22897_v26  ;;  %v9809_v11 = vld [vmem:[%s22879_s0 + $0x3ff] sm:$0x1]  ;;  %v10393_v10 = vsel %vm607_vm1, %v10392_v35, %v10391_v60  ;;  %v10402_v30 = vrot.slane %v9801_v12, 1  ;;  %v10404_v19 = vrot.slane %v9803_v43, 7  ;;  %v21436_v47 = vsel %vm622_vm6, %v10640_v1, %v10639_v40  ;;  %v8448_v37 = vld [vmem:[%s22879_s0 + $0x406] sm:$0x1] }
 0x617   :  { %v10395_v61 = vsel %vm610_vm2, %v10394_v50, %v10393_v10  ;;  %v10406_v31 = vrot.slane %v9804_v52, 6  ;;  %v10408_v54 = vrot.slane %v9805_v45, 5  ;;  %v8449_v46 = vld [vmem:[%s22879_s0 + $0x40e] sm:$0x1]  ;;  %v8450_v12 = vld [vmem:[%s22879_s0 + $0x416] sm:$0x1]  ;;  %v12444_v1 = vpack.c.bf16 %v21436_v47, %v21393_v9 }
 0x618   :  { %v10397_v43 = vsel %vm613_vm3, %v10396_v16, %v10395_v61  ;;  %v10405_v52 = vsel %vm604_vm0, %v10404_v19, %v9802_v5  ;;  %v10410_v28 = vrot.slane %v9806_v53, 4  ;;  %v8451_v45 = vld [vmem:[%s22879_s0 + $0x41e] sm:$0x1]  ;;  %v8452_v35 = vld [vmem:[%s22879_s0 + $0x426] sm:$0x1]  ;;  %v10412_v5 = vrot.slane %v9807_v8, 3 }
 0x619   :  { %v13277_v50 = vld [vmem:[%s22882_s2 + $0x18] sm:$0xff]  ;;  %v10399_v42 = vsel %vm616_vm4, %v10398_v27, %v10397_v43  ;;  %v10407_v16 = vsel %vm607_vm1, %v10406_v31, %v10405_v52  ;;  %v10414_v24 = vrot.slane %v9808_v2, 2  ;;  %v8453_v53 = vld [vmem:[%s22879_s0 + $0x42e] sm:$0x1]  ;;  %v8454_v60 = vld [vmem:[%s22879_s0 + $0x436] sm:$0x1]  ;;  %v22900_v61 = vpack.c.bf16 %v20660_v21, %v20623_v51 }
 0x61a   :  { %11497 = vmatmul.mubr.msk.f32.gmra.mrb[46].mxu1 %vm1260_vm9, %v13277_v50  ;;  %v10401_v40 = vsel %vm619_vm5, %v10400_v6, %v10399_v42  ;;  %v10409_v10 = vsel %vm610_vm2, %v10408_v54, %v10407_v16  ;;  %v10416_v19 = vrot.slane %v9809_v11, 1  ;;  %v8455_v8 = vld [vmem:[%s22879_s0 + $0x43e] sm:$0x1]  ;;  %v8457_v27 = vld [vmem:[%s22879_s0 + $0x44e] sm:$0x1]  ;;  %v9056_v2 = vrot.slane %v8449_v46, 7 }
 0x61b   :  { %8183 = vmatprep.mubr.f32.mxu1 %v22897_v26  ;;  %12413 = vmatpush3.bf16.xpose.msk.msra.mxu1 %vm13442_vm8, %v22900_v61  ;;  %v21485_v6 = vsel %vm622_vm6, %v10402_v30, %v10401_v40  ;;  %v10411_v11 = vsel %vm613_vm3, %v10410_v28, %v10409_v10  ;;  %v8456_v31 = vld [vmem:[%s22879_s0 + $0x446] sm:$0x1]  ;;  %v8458_v54 = vld [vmem:[%s22879_s0 + $0x456] sm:$0x1]  ;;  %v8459_v51 = vld [vmem:[%s22879_s0 + $0x45e] sm:$0x1]  ;;  %v22901_v30 = vpack.c.bf16 %v20706_v55, %v20684_v29 }
 0x61c   :  { %v9058_v21 = vrot.slane %v8450_v12, 6  ;;  %v9060_v46 = vrot.slane %v8451_v45, 5  ;;  %v10413_v43 = vsel %vm616_vm4, %v10412_v5, %v10411_v11  ;;  %v8460_v52 = vld [vmem:[%s22879_s0 + $0x466] sm:$0x1]  ;;  %v8461_v28 = vld [vmem:[%s22879_s0 + $0x46e] sm:$0x1]  ;;  %v9057_v50 = vsel %vm604_vm0, %v9056_v2, %v8448_v37 }
 0x61d   :  { %12416 = vmatprep.subr.msk.bf16.mxu1 %vm13442_vm8, %v22901_v30  ;;  %v9062_v12 = vrot.slane %v8452_v35, 4  ;;  %v9064_v45 = vrot.slane %v8453_v53, 3  ;;  %v13278_v29 = vld [vmem:[%s22882_s2 + $0x20] sm:$0xff]  ;;  %v10415_v55 = vsel %vm619_vm5, %v10414_v24, %v10413_v43  ;;  %v8462_v42 = vld [vmem:[%s22879_s0 + $0x476] sm:$0x1]  ;;  %v9066_v35 = vrot.slane %v8454_v60, 2 }
 0x61e   :  { %11498 = vmatmul.mubr.msk.f32.gmra.mrb[48].mxu1 %vm1260_vm9, %v13278_v29  ;;  %v21521_v16 = vld [vmem:[%s22879_s0 + $0x47e] sm:$0x1]  ;;  %v9059_v37 = vsel %vm607_vm1, %v9058_v21, %v9057_v50  ;;  %v9068_v5 = vrot.slane %v8455_v8, 1  ;;  %v21526_v53 = vsel %vm622_vm6, %v10416_v19, %v10415_v55  ;;  %v9070_v40 = vrot.slane %v8457_v27, 7  ;;  %v8320_v2 = vld [vmem:[%s22879_s0 + $0x6] sm:$0x1] }
 0x61f   :  { %8189 = vmatprep.mubr.f32.mxu1 %v22897_v26  ;;  %v9061_v24 = vsel %vm610_vm2, %v9060_v46, %v9059_v37  ;;  %v9072_v10 = vrot.slane %v8458_v54, 6  ;;  %v8321_v61 = vld [vmem:[%s22879_s0 + $0xe] sm:$0x1]  ;;  %v8322_v60 = vld [vmem:[%s22879_s0 + $0x16] sm:$0x1]  ;;  %v12447_v19 = vpack.c.bf16 %v21526_v53, %v21485_v6  ;;  %v9074_v11 = vrot.slane %v8459_v51, 5 }
 0x620   :  { %v9063_v8 = vsel %vm613_vm3, %v9062_v12, %v9061_v24  ;;  %v9076_v27 = vrot.slane %v8460_v52, 4  ;;  %v8323_v54 = vld [vmem:[%s22879_s0 + $0x1e] sm:$0x1]  ;;  %v8324_v21 = vld [vmem:[%s22879_s0 + $0x26] sm:$0x1]  ;;  %v9071_v30 = vsel %vm604_vm0, %v9070_v40, %v8456_v31  ;;  %v9078_v43 = vrot.slane %v8461_v28, 3 }
 0x621   :  { %v9065_v46 = vsel %vm616_vm4, %v9064_v45, %v9063_v8  ;;  %v9080_v50 = vrot.slane %v8462_v42, 2  ;;  %v8325_v12 = vld [vmem:[%s22879_s0 + $0x2e] sm:$0x1]  ;;  %v8326_v51 = vld [vmem:[%s22879_s0 + $0x36] sm:$0x1]  ;;  %v9073_v31 = vsel %vm607_vm1, %v9072_v10, %v9071_v30  ;;  %v9082_v28 = vrot.slane %v21521_v16, 1 }
 0x622   :  { %v13279_v52 = vld [vmem:[%s22882_s2 + $0x28] sm:$0xff]  ;;  %v9067_v45 = vsel %vm619_vm5, %v9066_v35, %v9065_v46  ;;  %v8327_v29 = vld [vmem:[%s22879_s0 + $0x3e] sm:$0x1]  ;;  %v8832_v42 = vrot.slane %v8321_v61, 7  ;;  %v9075_v24 = vsel %vm610_vm2, %v9074_v11, %v9073_v31  ;;  %v8328_v35 = vld [vmem:[%s22879_s0 + $0x46] sm:$0x1]  ;;  %v22902_v8 = vpack.c.bf16 %v20763_v57, %v20760_v36 }
 0x623   :  { %11499 = vmatmul.mubr.msk.f32.gmra.mrb[50].mxu1 %vm1260_vm9, %v13279_v52  ;;  %v8329_v55 = vld [vmem:[%s22879_s0 + $0x4e] sm:$0x1]  ;;  %v9069_v37 = vsel %vm622_vm6, %v9068_v5, %v9067_v45  ;;  %v8330_v16 = vld [vmem:[%s22879_s0 + $0x56] sm:$0x1]  ;;  %v8331_v40 = vld [vmem:[%s22879_s0 + $0x5e] sm:$0x1]  ;;  %v9077_v5 = vsel %vm613_vm3, %v9076_v27, %v9075_v24  ;;  %v22903_v36 = vpack.c.bf16 %v20790_v22, %v20780_v14 }
 0x624   :  { %8195 = vmatprep.mubr.f32.mxu1 %v22897_v26  ;;  %v8834_v10 = vrot.slane %v8322_v60, 6  ;;  %v8836_v61 = vrot.slane %v8323_v54, 5  ;;  %12419 = vmatpush3.bf16.xpose.msk.msra.mxu1 %vm13442_vm8, %v22902_v8  ;;  %v8332_v11 = vld [vmem:[%s22879_s0 + $0x66] sm:$0x1]  ;;  %v8333_v46 = vld [vmem:[%s22879_s0 + $0x6e] sm:$0x1]  ;;  %v8833_v30 = vsel %vm604_vm0, %v8832_v42, %v8320_v2  ;;  %v9079_v57 = vsel %vm616_vm4, %v9078_v43, %v9077_v5 }
 0x625   :  { %v8838_v60 = vrot.slane %v8324_v21, 4  ;;  %v8840_v54 = vrot.slane %v8325_v12, 3  ;;  %12422 = vmatprep.subr.msk.bf16.mxu1 %vm13442_vm8, %v22903_v36  ;;  %v8334_v27 = vld [vmem:[%s22879_s0 + $0x76] sm:$0x1]  ;;  %v21605_v52 = vld [vmem:[%s22879_s0 + $0x7e] sm:$0x1]  ;;  %v9081_v22 = vsel %vm619_vm5, %v9080_v50, %v9079_v57 }
 0x626   :  { %v8835_v2 = vsel %vm607_vm1, %v8834_v10, %v8833_v30  ;;  %v8842_v21 = vrot.slane %v8326_v51, 2  ;;  %v8844_v12 = vrot.slane %v8327_v29, 1  ;;  %v13280_v14 = vld [vmem:[%s22882_s2 + $0x30] sm:$0xff]  ;;  %v8846_v45 = vrot.slane %v8329_v55, 7  ;;  %v8465_v42 = vld [vmem:[%s22879_s0 + $0x48e] sm:$0x1] }
 0x627   :  { %11500 = vmatmul.mubr.msk.f32.gmra.mrb[52].mxu1 %vm1260_vm9, %v13280_v14  ;;  %v8837_v43 = vsel %vm610_vm2, %v8836_v61, %v8835_v2  ;;  %v8848_v31 = vrot.slane %v8330_v16, 6  ;;  %v8466_v51 = vld [vmem:[%s22879_s0 + $0x496] sm:$0x1]  ;;  %v9083_v29 = vsel %vm622_vm6, %v9082_v28, %v9081_v22  ;;  %v8850_v10 = vrot.slane %v8331_v40, 5  ;;  %v8464_v55 = vld [vmem:[%s22879_s0 + $0x486] sm:$0x1] }
 0x628   :  { %8201 = vmatprep.mubr.f32.mxu1 %v22897_v26  ;;  %v8839_v24 = vsel %vm613_vm3, %v8838_v60, %v8837_v43  ;;  %v8852_v50 = vrot.slane %v8332_v11, 4  ;;  %v8467_v16 = vld [vmem:[%s22879_s0 + $0x49e] sm:$0x1]  ;;  %v8468_v61 = vld [vmem:[%s22879_s0 + $0x4a6] sm:$0x1]  ;;  %v12350_v8 = vpack.c.bf16 %v9083_v29, %v9069_v37  ;;  %v8847_v28 = vsel %vm604_vm0, %v8846_v45, %v8328_v35 }
 0x629   :  { %v8841_v5 = vsel %vm616_vm4, %v8840_v54, %v8839_v24  ;;  %v8854_v30 = vrot.slane %v8333_v46, 3  ;;  %v8469_v40 = vld [vmem:[%s22879_s0 + $0x4ae] sm:$0x1]  ;;  %v8470_v11 = vld [vmem:[%s22879_s0 + $0x4b6] sm:$0x1]  ;;  %v8849_v36 = vsel %vm607_vm1, %v8848_v31, %v8847_v28  ;;  %v8856_v57 = vrot.slane %v8334_v27, 2 }
 0x62a   :  { %v8843_v60 = vsel %vm619_vm5, %v8842_v21, %v8841_v5  ;;  %v8858_v37 = vrot.slane %v21605_v52, 1  ;;  %v8471_v35 = vld [vmem:[%s22879_s0 + $0x4be] sm:$0x1]  ;;  %v8473_v46 = vld [vmem:[%s22879_s0 + $0x4ce] sm:$0x1]  ;;  %12352 = vmatprep.subr.msk.bf16.mxu0 %vm13442_vm8, %v12350_v8  ;;  %v8851_v52 = vsel %vm610_vm2, %v8850_v10, %v8849_v36  ;;  %v9084_v22 = vrot.slane %v8465_v42, 7 }
 0x62b   :  { %v13281_v54 = vld [vmem:[%s22882_s2 + $0x38] sm:$0xff]  ;;  %v8845_v27 = vsel %vm622_vm6, %v8844_v12, %v8843_v60  ;;  %v8472_v2 = vld [vmem:[%s22879_s0 + $0x4c6] sm:$0x1]  ;;  %v8474_v21 = vld [vmem:[%s22879_s0 + $0x4d6] sm:$0x1]  ;;  %v9086_v43 = vrot.slane %v8466_v51, 6  ;;  %v8853_v45 = vsel %vm613_vm3, %v8852_v50, %v8851_v52  ;;  %v22904_v42 = vpack.c.bf16 %v20843_v3, %v20825_v34 }
 0x62c   :  { %11501 = vmatmul.mubr.msk.f32.gmra.mrb[54].mxu1 %vm1260_vm9, %v13281_v54  ;;  %v8475_v14 = vld [vmem:[%s22879_s0 + $0x4de] sm:$0x1]  ;;  %v21669_v12 = vld [vmem:[%s22880_s1] sm:$0xff]  ;;  %v9088_v29 = vrot.slane %v8467_v16, 5  ;;  %v9090_v24 = vrot.slane %v8468_v61, 4  ;;  %v9092_v10 = vrot.slane %v8469_v40, 3  ;;  %v8855_v51 = vsel %vm616_vm4, %v8854_v30, %v8853_v45 }
 0x62d   :  { %12012 = vmatprep.mubr.msk.f32.mxu1 %vm1058_vm7, %v21669_v12  ;;  %v8476_v31 = vld [vmem:[%s22879_s0 + $0x4e6] sm:$0x1]  ;;  %12425 = vmatpush3.bf16.xpose.msk.msra.mxu1 %vm13442_vm8, %v22904_v42  ;;  %v8477_v8 = vld [vmem:[%s22879_s0 + $0x4ee] sm:$0x1]  ;;  %v8478_v50 = vld [vmem:[%s22879_s0 + $0x4f6] sm:$0x1]  ;;  %v9085_v16 = vsel %vm604_vm0, %v9084_v22, %v8464_v55  ;;  %v22905_v34 = vpack.c.bf16 %v20910_v4, %v20891_v56  ;;  %v8857_v3 = vsel %vm619_vm5, %v8856_v57, %v8855_v51 }
 0x62e   :  { %v9094_v61 = vrot.slane %v8470_v11, 2  ;;  %v9096_v5 = vrot.slane %v8471_v35, 1  ;;  %v8479_v28 = vld [vmem:[%s22879_s0 + $0x4fe] sm:$0x1]  ;;  %v9087_v30 = vsel %vm607_vm1, %v9086_v43, %v9085_v16  ;;  %v9098_v40 = vrot.slane %v8473_v46, 7 }
 0x62f   :  { %12428 = vmatprep.subr.msk.bf16.mxu1 %vm13442_vm8, %v22905_v34  ;;  %v9100_v60 = vrot.slane %v8474_v21, 6  ;;  %v8337_v55 = vld [vmem:[%s22879_s0 + $0x8e] sm:$0x1]  ;;  %v8859_v11 = vsel %vm622_vm6, %v8858_v37, %v8857_v3  ;;  %v9089_v56 = vsel %vm610_vm2, %v9088_v29, %v9087_v30  ;;  %v9102_v4 = vrot.slane %v8475_v14, 5  ;;  %v8336_v57 = vld [vmem:[%s22879_s0 + $0x86] sm:$0x1] }
 0x630   :  { %v9104_v36 = vrot.slane %v8476_v31, 4  ;;  %v8338_v35 = vld [vmem:[%s22879_s0 + $0x96] sm:$0x1]  ;;  %v8339_v46 = vld [vmem:[%s22879_s0 + $0x9e] sm:$0x1]  ;;  %v12353_v54 = vpack.c.bf16 %v8859_v11, %v8845_v27  ;;  %v9091_v52 = vsel %vm613_vm3, %v9090_v24, %v9089_v56  ;;  %v9099_v37 = vsel %vm604_vm0, %v9098_v40, %v8472_v2 }
 0x631   :  { %v9106_v21 = vrot.slane %v8477_v8, 3  ;;  %v8340_v14 = vld [vmem:[%s22879_s0 + $0xa6] sm:$0x1]  ;;  %v8341_v22 = vld [vmem:[%s22879_s0 + $0xae] sm:$0x1]  ;;  %v9093_v43 = vsel %vm616_vm4, %v9092_v10, %v9091_v52  ;;  %v9101_v45 = vsel %vm607_vm1, %v9100_v60, %v9099_v37  ;;  %v9108_v31 = vrot.slane %v8478_v50, 2 }
 0x632   :  { %v9110_v29 = vrot.slane %v8479_v28, 1  ;;  %v8342_v27 = vld [vmem:[%s22879_s0 + $0xb6] sm:$0x1]  ;;  %v8343_v2 = vld [vmem:[%s22879_s0 + $0xbe] sm:$0x1]  ;;  %12355 = vmatpush3.bf16.xpose.msk.msra.mxu0 %vm13442_vm8, %v12353_v54  ;;  %v9095_v24 = vsel %vm619_vm5, %v9094_v61, %v9093_v43  ;;  %v9103_v42 = vsel %vm610_vm2, %v9102_v4, %v9101_v45  ;;  %v8860_v8 = vrot.slane %v8337_v55, 7 }
 0x633   :  { %v8344_v10 = vld [vmem:[%s22879_s0 + $0xc6] sm:$0x1]  ;;  %v8345_v51 = vld [vmem:[%s22879_s0 + $0xce] sm:$0x1]  ;;  %v8862_v50 = vrot.slane %v8338_v35, 6  ;;  %v9097_v16 = vsel %vm622_vm6, %v9096_v5, %v9095_v24  ;;  %v9105_v34 = vsel %vm613_vm3, %v9104_v36, %v9103_v42  ;;  %v8864_v28 = vrot.slane %v8339_v46, 5 }
 0x634   :  { %v8346_v61 = vld [vmem:[%s22879_s0 + $0xd6] sm:$0x1]  ;;  %v8347_v3 = vld [vmem:[%s22879_s0 + $0xde] sm:$0x1]  ;;  %v8866_v30 = vrot.slane %v8340_v14, 4  ;;  %v9107_v40 = vsel %vm616_vm4, %v9106_v21, %v9105_v34  ;;  %v8861_v55 = vsel %vm604_vm0, %v8860_v8, %v8336_v57  ;;  %v8868_v11 = vrot.slane %v8341_v22, 3 }
 0x635   :  { %v8348_v60 = vld [vmem:[%s22879_s0 + $0xe6] sm:$0x1]  ;;  %v8349_v5 = vld [vmem:[%s22879_s0 + $0xee] sm:$0x1]  ;;  %v8870_v56 = vrot.slane %v8342_v27, 2  ;;  %v22906_v4 = vpack.c.bf16 %v21004_v15, %v20959_v48  ;;  %v9109_v36 = vsel %vm619_vm5, %v9108_v31, %v9107_v40  ;;  %v8863_v57 = vsel %vm607_vm1, %v8862_v50, %v8861_v55 }
 0x636   :  { %v8350_v35 = vld [vmem:[%s22879_s0 + $0xf6] sm:$0x1]  ;;  %v8351_v46 = vld [vmem:[%s22879_s0 + $0xfe] sm:$0x1]  ;;  %v8872_v54 = vrot.slane %v8343_v2, 1  ;;  %v8874_v52 = vrot.slane %v8345_v51, 7  ;;  %v22907_v48 = vpack.c.bf16 %v21089_v13, %v21039_v49  ;;  %v9111_v15 = vsel %vm622_vm6, %v9110_v29, %v9109_v36 }
 0x637   :  { %12431 = vmatpush3.bf16.xpose.msk.msra.mxu1 %vm13442_vm8, %v22906_v4  ;;  %v8865_v37 = vsel %vm610_vm2, %v8864_v28, %v8863_v57  ;;  %v8876_v21 = vrot.slane %v8346_v61, 6  ;;  %v8878_v14 = vrot.slane %v8347_v3, 5  ;;  %v8480_v22 = vld [vmem:[%s22879_s0 + $0x506] sm:$0x1]  ;;  %v8481_v43 = vld [vmem:[%s22879_s0 + $0x50e] sm:$0x1]  ;;  %v12356_v13 = vpack.c.bf16 %v9111_v15, %v9097_v16 }
 0x638   :  { %12434 = vmatprep.subr.msk.bf16.mxu1 %vm13442_vm8, %v22907_v48  ;;  %v8482_v49 = vld [vmem:[%s22879_s0 + $0x516] sm:$0x1]  ;;  %v8867_v45 = vsel %vm613_vm3, %v8866_v30, %v8865_v37  ;;  %v8875_v31 = vsel %vm604_vm0, %v8874_v52, %v8344_v10  ;;  %v8880_v29 = vrot.slane %v8348_v60, 4  ;;  %v8483_v27 = vld [vmem:[%s22879_s0 + $0x51e] sm:$0x1]  ;;  %v8882_v51 = vrot.slane %v8349_v5, 3 }
 0x639   :  { %v8484_v2 = vld [vmem:[%s22879_s0 + $0x526] sm:$0x1]  ;;  %v8869_v24 = vsel %vm616_vm4, %v8868_v11, %v8867_v45  ;;  %v8877_v42 = vsel %vm607_vm1, %v8876_v21, %v8875_v31  ;;  %v8884_v8 = vrot.slane %v8350_v35, 2  ;;  %v8485_v50 = vld [vmem:[%s22879_s0 + $0x52e] sm:$0x1]  ;;  %12358 = vmatprep.subr.msk.bf16.mxu0 %vm13442_vm8, %v12356_v13  ;;  %v8886_v61 = vrot.slane %v8351_v46, 1 }
 0x63a   :  { %v8486_v10 = vld [vmem:[%s22879_s0 + $0x536] sm:$0x1]  ;;  %v8871_v16 = vsel %vm619_vm5, %v8870_v56, %v8869_v24  ;;  %v8879_v34 = vsel %vm610_vm2, %v8878_v14, %v8877_v42  ;;  %v8487_v3 = vld [vmem:[%s22879_s0 + $0x53e] sm:$0x1]  ;;  %v8489_v28 = vld [vmem:[%s22879_s0 + $0x54e] sm:$0x1] }
 0x63b   :  { %v9112_v30 = vrot.slane %v8481_v43, 7  ;;  %v8873_v40 = vsel %vm622_vm6, %v8872_v54, %v8871_v16  ;;  %v8881_v60 = vsel %vm613_vm3, %v8880_v29, %v8879_v34  ;;  %v8488_v5 = vld [vmem:[%s22879_s0 + $0x546] sm:$0x1]  ;;  %v8490_v55 = vld [vmem:[%s22879_s0 + $0x556] sm:$0x1]  ;;  %v9114_v56 = vrot.slane %v8482_v49, 6 }
 0x63c   :  { %v8491_v11 = vld [vmem:[%s22879_s0 + $0x55e] sm:$0x1]  ;;  %v9116_v4 = vrot.slane %v8483_v27, 5  ;;  %v8883_v36 = vsel %vm616_vm4, %v8882_v51, %v8881_v60  ;;  %v8492_v35 = vld [vmem:[%s22879_s0 + $0x566] sm:$0x1]  ;;  %v9118_v54 = vrot.slane %v8484_v2, 4  ;;  %v22908_v49 = vpack.c.bf16 %v21189_v38, %v21159_v41 }
 0x63d   :  { %v8493_v46 = vld [vmem:[%s22879_s0 + $0x56e] sm:$0x1]  ;;  %v9113_v57 = vsel %vm604_vm0, %v9112_v30, %v8480_v22  ;;  %v9120_v52 = vrot.slane %v8485_v50, 3  ;;  %v8885_v48 = vsel %vm619_vm5, %v8884_v8, %v8883_v36  ;;  %v8494_v15 = vld [vmem:[%s22879_s0 + $0x576] sm:$0x1]  ;;  %v9122_v14 = vrot.slane %v8486_v10, 2 }
 0x63e   :  { %v8495_v37 = vld [vmem:[%s22879_s0 + $0x57e] sm:$0x1]  ;;  %v9115_v21 = vsel %vm607_vm1, %v9114_v56, %v9113_v57  ;;  %v9124_v43 = vrot.slane %v8487_v3, 1  ;;  %v8887_v22 = vsel %vm622_vm6, %v8886_v61, %v8885_v48  ;;  %v9126_v45 = vrot.slane %v8489_v28, 7  ;;  %v8352_v29 = vld [vmem:[%s22879_s0 + $0x106] sm:$0x1] }
 0x63f   :  { %12437 = vmatpush3.bf16.xpose.msk.msra.mxu1 %vm13442_vm8, %v22908_v49  ;;  %v9117_v13 = vsel %vm610_vm2, %v9116_v4, %v9115_v21  ;;  %v9128_v31 = vrot.slane %v8490_v55, 6  ;;  %v8353_v27 = vld [vmem:[%s22879_s0 + $0x10e] sm:$0x1]  ;;  %v8354_v41 = vld [vmem:[%s22879_s0 + $0x116] sm:$0x1]  ;;  %v22909_v38 = vpack.c.bf16 %v21261_v18, %v21236_v20  ;;  %v12359_v2 = vpack.c.bf16 %v8887_v22, %v8873_v40 }
 0x640   :  { %v9119_v24 = vsel %vm613_vm3, %v9118_v54, %v9117_v13  ;;  %v9130_v42 = vrot.slane %v8491_v11, 5  ;;  %v9132_v51 = vrot.slane %v8492_v35, 4  ;;  %v8355_v8 = vld [vmem:[%s22879_s0 + $0x11e] sm:$0x1]  ;;  %v8356_v50 = vld [vmem:[%s22879_s0 + $0x126] sm:$0x1]  ;;  %v9127_v18 = vsel %vm604_vm0, %v9126_v45, %v8488_v5 }
 0x641   :  { %12440 = vmatprep.subr.msk.bf16.mxu1 %vm13442_vm8, %v22909_v38  ;;  %v9121_v10 = vsel %vm616_vm4, %v9120_v52, %v9119_v24  ;;  %v9134_v20 = vrot.slane %v8493_v46, 3  ;;  %v9136_v16 = vrot.slane %v8494_v15, 2  ;;  %v8357_v34 = vld [vmem:[%s22879_s0 + $0x12e] sm:$0x1]  ;;  %v8358_v61 = vld [vmem:[%s22879_s0 + $0x136] sm:$0x1]  ;;  %12361 = vmatpush3.bf16.xpose.msk.msra.mxu0 %vm13442_vm8, %v12359_v2  ;;  %v9129_v28 = vsel %vm607_vm1, %v9128_v31, %v9127_v18 }
 0x642   :  { %v9123_v3 = vsel %vm619_vm5, %v9122_v14, %v9121_v10  ;;  %v9138_v30 = vrot.slane %v8495_v37, 1  ;;  %v8359_v40 = vld [vmem:[%s22879_s0 + $0x13e] sm:$0x1]  ;;  %v8361_v60 = vld [vmem:[%s22879_s0 + $0x14e] sm:$0x1]  ;;  %v8888_v5 = vrot.slane %v8353_v27, 7  ;;  %v9131_v11 = vsel %vm610_vm2, %v9130_v42, %v9129_v28 }
 0x643   :  { %v9125_v55 = vsel %vm622_vm6, %v9124_v43, %v9123_v3  ;;  %v8360_v56 = vld [vmem:[%s22879_s0 + $0x146] sm:$0x1]  ;;  %v8362_v4 = vld [vmem:[%s22879_s0 + $0x156] sm:$0x1]  ;;  %v8363_v36 = vld [vmem:[%s22879_s0 + $0x15e] sm:$0x1]  ;;  %v9133_v57 = vsel %vm613_vm3, %v9132_v51, %v9131_v11 }
 0x644   :  { %v8890_v35 = vrot.slane %v8354_v41, 6  ;;  %v8892_v46 = vrot.slane %v8355_v8, 5  ;;  %v8364_v54 = vld [vmem:[%s22879_s0 + $0x166] sm:$0x1]  ;;  %v8365_v52 = vld [vmem:[%s22879_s0 + $0x16e] sm:$0x1]  ;;  %v8889_v48 = vsel %vm604_vm0, %v8888_v5, %v8352_v29  ;;  %v9135_v21 = vsel %vm616_vm4, %v9134_v20, %v9133_v57 }
 0x645   :  { %v8894_v15 = vrot.slane %v8356_v50, 4  ;;  %v8896_v37 = vrot.slane %v8357_v34, 3  ;;  %v8366_v14 = vld [vmem:[%s22879_s0 + $0x176] sm:$0x1]  ;;  %v8367_v43 = vld [vmem:[%s22879_s0 + $0x17e] sm:$0x1]  ;;  %v9137_v45 = vsel %vm619_vm5, %v9136_v16, %v9135_v21 }
 0x646   :  { %v8891_v49 = vsel %vm607_vm1, %v8890_v35, %v8889_v48  ;;  %v8898_v22 = vrot.slane %v8358_v61, 2  ;;  %v8900_v13 = vrot.slane %v8359_v40, 1  ;;  %v8902_v29 = vrot.slane %v8361_v60, 7  ;;  %v8497_v41 = vld [vmem:[%s22879_s0 + $0x58e] sm:$0x1] }
 0x647   :  { %v8893_v31 = vsel %vm610_vm2, %v8892_v46, %v8891_v49  ;;  %v8904_v27 = vrot.slane %v8362_v4, 6  ;;  %v8498_v38 = vld [vmem:[%s22879_s0 + $0x596] sm:$0x1]  ;;  %12443 = vmatpush3.bf16.xpose.msk.msra.mxu1 %vm13442_vm8, %v12441_v7  ;;  %v9139_v2 = vsel %vm622_vm6, %v9138_v30, %v9137_v45  ;;  %v8906_v42 = vrot.slane %v8363_v36, 5  ;;  %v8496_v8 = vld [vmem:[%s22879_s0 + $0x586] sm:$0x1] }
 0x648   :  { %v8895_v24 = vsel %vm613_vm3, %v8894_v15, %v8893_v31  ;;  %v8908_v51 = vrot.slane %v8364_v54, 4  ;;  %v8499_v50 = vld [vmem:[%s22879_s0 + $0x59e] sm:$0x1]  ;;  %v8500_v0 = vld [vmem:[%s22879_s0 + $0x5a6] sm:$0x1]  ;;  %12446 = vmatprep.subr.msk.bf16.mxu1 %vm13442_vm8, %v12444_v1  ;;  %v12362_v33 = vpack.c.bf16 %v9139_v2, %v9125_v55  ;;  %v8903_v10 = vsel %vm604_vm0, %v8902_v29, %v8360_v56 }
 0x649   :  { %v8897_v7 = vsel %vm616_vm4, %v8896_v37, %v8895_v24  ;;  %v8910_v18 = vrot.slane %v8365_v52, 3  ;;  %v8501_v20 = vld [vmem:[%s22879_s0 + $0x5ae] sm:$0x1]  ;;  %v8502_v16 = vld [vmem:[%s22879_s0 + $0x5b6] sm:$0x1]  ;;  %v8905_v9 = vsel %vm607_vm1, %v8904_v27, %v8903_v10  ;;  %v8912_v47 = vrot.slane %v8366_v14, 2 }
 0x64a   :  { %v8899_v34 = vsel %vm619_vm5, %v8898_v22, %v8897_v7  ;;  %v8914_v1 = vrot.slane %v8367_v43, 1  ;;  %v8503_v61 = vld [vmem:[%s22879_s0 + $0x5be] sm:$0x1]  ;;  %v8505_v3 = vld [vmem:[%s22879_s0 + $0x5ce] sm:$0x1]  ;;  %12364 = vmatprep.subr.msk.bf16.mxu0 %vm13442_vm8, %v12362_v33  ;;  %v8907_v30 = vsel %vm610_vm2, %v8906_v42, %v8905_v9  ;;  %v9140_v5 = vrot.slane %v8497_v41, 7 }
 0x64b   :  { %v8901_v28 = vsel %vm622_vm6, %v8900_v13, %v8899_v34  ;;  %v8506_v40 = vld [vmem:[%s22879_s0 + $0x5d6] sm:$0x1]  ;;  %v8507_v60 = vld [vmem:[%s22879_s0 + $0x5de] sm:$0x1]  ;;  %v9142_v55 = vrot.slane %v8498_v38, 6  ;;  %v8909_v11 = vsel %vm613_vm3, %v8908_v51, %v8907_v30  ;;  %v9144_v4 = vrot.slane %v8499_v50, 5 }
 0x64c   :  { %v8508_v56 = vld [vmem:[%s22879_s0 + $0x5e6] sm:$0x1]  ;;  %v9146_v36 = vrot.slane %v8500_v0, 4  ;;  %v9148_v35 = vrot.slane %v8501_v20, 3  ;;  %v8911_v46 = vsel %vm616_vm4, %v8910_v18, %v8909_v11  ;;  %v8509_v54 = vld [vmem:[%s22879_s0 + $0x5ee] sm:$0x1]  ;;  %v9141_v52 = vsel %vm604_vm0, %v9140_v5, %v8496_v8 }
 0x64d   :  { %v8504_v57 = vld [vmem:[%s22879_s0 + $0x5c6] sm:$0x1]  ;;  %v9150_v48 = vrot.slane %v8502_v16, 2  ;;  %v9152_v15 = vrot.slane %v8503_v61, 1  ;;  %v8913_v37 = vsel %vm619_vm5, %v8912_v47, %v8911_v46  ;;  %v8510_v21 = vld [vmem:[%s22879_s0 + $0x5f6] sm:$0x1]  ;;  %v9143_v43 = vsel %vm607_vm1, %v9142_v55, %v9141_v52 }
 0x64e   :  { %v8511_v14 = vld [vmem:[%s22879_s0 + $0x5fe] sm:$0x1]  ;;  %v9154_v49 = vrot.slane %v8505_v3, 7  ;;  %v9156_v22 = vrot.slane %v8506_v40, 6  ;;  %v8915_v13 = vsel %vm622_vm6, %v8914_v1, %v8913_v37  ;;  %v9145_v45 = vsel %vm610_vm2, %v9144_v4, %v9143_v43  ;;  %v8368_v27 = vld [vmem:[%s22879_s0 + $0x186] sm:$0x1] }
 0x64f   :  { %v9158_v31 = vrot.slane %v8507_v60, 5  ;;  %v9160_v29 = vrot.slane %v8508_v56, 4  ;;  %v8369_v41 = vld [vmem:[%s22879_s0 + $0x18e] sm:$0x1]  ;;  %v8370_v38 = vld [vmem:[%s22879_s0 + $0x196] sm:$0x1]  ;;  %12449 = vmatpush3.bf16.xpose.msk.msra.mxu1 %vm13442_vm8, %v12447_v19  ;;  %v12365_v2 = vpack.c.bf16 %v8915_v13, %v8901_v28  ;;  %v9147_v24 = vsel %vm613_vm3, %v9146_v36, %v9145_v45 }
 0x650   :  { %v9155_v42 = vsel %vm604_vm0, %v9154_v49, %v8504_v57  ;;  %v9162_v51 = vrot.slane %v8509_v54, 3  ;;  %v8371_v8 = vld [vmem:[%s22879_s0 + $0x19e] sm:$0x1]  ;;  %v8372_v50 = vld [vmem:[%s22879_s0 + $0x1a6] sm:$0x1]  ;;  %v9149_v0 = vsel %vm616_vm4, %v9148_v35, %v9147_v24  ;;  %v9164_v53 = vrot.slane %v8510_v21, 2 }
 0x651   :  { %v9157_v6 = vsel %vm607_vm1, %v9156_v22, %v9155_v42  ;;  %v9166_v19 = vrot.slane %v8511_v14, 1  ;;  %v8373_v33 = vld [vmem:[%s22879_s0 + $0x1ae] sm:$0x1]  ;;  %v8374_v7 = vld [vmem:[%s22879_s0 + $0x1b6] sm:$0x1]  ;;  %12367 = vmatpush3.bf16.xpose.msk.msra.mxu0 %vm13442_vm8, %v12365_v2  ;;  %v9151_v10 = vsel %vm619_vm5, %v9150_v48, %v9149_v0  ;;  %v8916_v34 = vrot.slane %v8369_v41, 7 }
 0x652   :  { %v9159_v18 = vsel %vm610_vm2, %v9158_v31, %v9157_v6  ;;  %v8375_v20 = vld [vmem:[%s22879_s0 + $0x1be] sm:$0x1]  ;;  %v8377_v16 = vld [vmem:[%s22879_s0 + $0x1ce] sm:$0x1]  ;;  %v8918_v9 = vrot.slane %v8370_v38, 6  ;;  %v9153_v47 = vsel %vm622_vm6, %v9152_v15, %v9151_v10  ;;  %v8920_v28 = vrot.slane %v8371_v8, 5 }
 0x653   :  { %v9161_v1 = vsel %vm613_vm3, %v9160_v29, %v9159_v18  ;;  %v8378_v61 = vld [vmem:[%s22879_s0 + $0x1d6] sm:$0x1]  ;;  %v8379_v3 = vld [vmem:[%s22879_s0 + $0x1de] sm:$0x1]  ;;  %v8922_v30 = vrot.slane %v8372_v50, 4  ;;  %v8917_v55 = vsel %vm604_vm0, %v8916_v34, %v8368_v27  ;;  %v8924_v11 = vrot.slane %v8373_v33, 3 }
 0x654   :  { %v9163_v40 = vsel %vm616_vm4, %v9162_v51, %v9161_v1  ;;  %v8376_v60 = vld [vmem:[%s22879_s0 + $0x1c6] sm:$0x1]  ;;  %v8926_v56 = vrot.slane %v8374_v7, 2  ;;  %v8381_v36 = vld [vmem:[%s22879_s0 + $0x1ee] sm:$0x1]  ;;  %v8919_v46 = vsel %vm607_vm1, %v8918_v9, %v8917_v55  ;;  %v8928_v57 = vrot.slane %v8375_v20, 1 }
 0x655   :  { %v8380_v5 = vld [vmem:[%s22879_s0 + $0x1e6] sm:$0x1]  ;;  %v9165_v4 = vsel %vm619_vm5, %v9164_v53, %v9163_v40  ;;  %v8382_v35 = vld [vmem:[%s22879_s0 + $0x1f6] sm:$0x1]  ;;  %v8930_v54 = vrot.slane %v8377_v16, 7  ;;  %v8921_v15 = vsel %vm610_vm2, %v8920_v28, %v8919_v46  ;;  %v8932_v37 = vrot.slane %v8378_v61, 6 }
 0x656   :  { %v9167_v52 = vsel %vm622_vm6, %v9166_v19, %v9165_v4  ;;  %v8383_v48 = vld [vmem:[%s22879_s0 + $0x1fe] sm:$0x1]  ;;  %v8934_v21 = vrot.slane %v8379_v3, 5  ;;  %12013 = vmatmul.mubr.msk.f32.vlgmr.msra.gmra.mrb[56].mxu1 %vm1058_vm7, %v21669_v12  ;;  %v8923_v43 = vsel %vm613_vm3, %v8922_v30, %v8921_v15  ;;  %v8936_v22 = vrot.slane %v8380_v5, 4  ;;  %v22064_v13 = vld [vmem:[%s22880_s1 + $0x8] sm:$0xff]  ;;  %v22088_v50 = vld [vmem:[%s22880_s1 + $0x10] sm:$0xff] }
 0x657   :  { %v12368_v14 = vpack.c.bf16 %v9167_v52, %v9153_v47  ;;  %v8931_v49 = vsel %vm604_vm0, %v8930_v54, %v8376_v60  ;;  %12014 = vmatprep.mubr.msk.f32.mxu1 %vm1058_vm7, %v22064_v13  ;;  %v8925_v45 = vsel %vm616_vm4, %v8924_v11, %v8923_v43  ;;  %v8938_v29 = vrot.slane %v8381_v36, 3  ;;  %v8513_v51 = vld [vmem:[%s22879_s0 + $0x60e] sm:$0x1]  ;;  %v8514_v6 = vld [vmem:[%s22879_s0 + $0x616] sm:$0x1] }
 0x658   :  { %v8933_v31 = vsel %vm607_vm1, %v8932_v37, %v8931_v49  ;;  %v8940_v12 = vrot.slane %v8382_v35, 2  ;;  %v8927_v27 = vsel %vm619_vm5, %v8926_v56, %v8925_v45  ;;  %v8942_v38 = vrot.slane %v8383_v48, 1  ;;  %v8521_v8 = vld [vmem:[%s22879_s0 + $0x64e] sm:$0x1]  ;;  %v8522_v53 = vld [vmem:[%s22879_s0 + $0x656] sm:$0x1] }
 0x659   :  { %12370 = vmatprep.subr.msk.bf16.mxu0 %vm13442_vm8, %v12368_v14  ;;  %v8935_v41 = vsel %vm610_vm2, %v8934_v21, %v8933_v31  ;;  %v8929_v24 = vsel %vm622_vm6, %v8928_v57, %v8927_v27  ;;  %v9168_v19 = vrot.slane %v8513_v51, 7  ;;  %v9182_v33 = vrot.slane %v8521_v8, 7  ;;  %v8512_v10 = vld [vmem:[%s22879_s0 + $0x606] sm:$0x1]  ;;  %v8515_v18 = vld [vmem:[%s22879_s0 + $0x61e] sm:$0x1] }
 0x65a   :  { %v8937_v2 = vsel %vm613_vm3, %v8936_v22, %v8935_v41  ;;  %12015 = vmatmul.mubr.msk.f32.gmra.mrb[58].mxu1 %vm1058_vm7, %v22064_v13  ;;  %v8520_v20 = vld [vmem:[%s22879_s0 + $0x646] sm:$0x1]  ;;  %v8523_v9 = vld [vmem:[%s22879_s0 + $0x65e] sm:$0x1]  ;;  %v8517_v61 = vld [vmem:[%s22879_s0 + $0x62e] sm:$0x1] }
 0x65b   :  { %v8939_v42 = vsel %vm616_vm4, %v8938_v29, %v8937_v2  ;;  %12016 = vmatprep.mubr.msk.f32.mxu1 %vm1058_vm7, %v22088_v50  ;;  %v8516_v34 = vld [vmem:[%s22879_s0 + $0x626] sm:$0x1]  ;;  %v9169_v1 = vsel %vm604_vm0, %v9168_v19, %v8512_v10  ;;  %v8525_v3 = vld [vmem:[%s22879_s0 + $0x66e] sm:$0x1]  ;;  %v9170_v28 = vrot.slane %v8514_v6, 6  ;;  %v9172_v30 = vrot.slane %v8515_v18, 5 }
 0x65c   :  { %v8941_v0 = vsel %vm619_vm5, %v8940_v12, %v8939_v42  ;;  %v8524_v47 = vld [vmem:[%s22879_s0 + $0x666] sm:$0x1]  ;;  %v8518_v40 = vld [vmem:[%s22879_s0 + $0x636] sm:$0x1]  ;;  %v9174_v5 = vrot.slane %v8516_v34, 4  ;;  %v9176_v55 = vrot.slane %v8517_v61, 3  ;;  %v9183_v11 = vsel %vm604_vm0, %v9182_v33, %v8520_v20 }
 0x65d   :  { %v8943_v7 = vsel %vm622_vm6, %v8942_v38, %v8941_v0  ;;  %v8526_v60 = vld [vmem:[%s22879_s0 + $0x676] sm:$0x1]  ;;  %v22139_v56 = vld [vmem:[%s22880_s1 + $0x18] sm:$0xff]  ;;  %v9171_v35 = vsel %vm607_vm1, %v9170_v28, %v9169_v1  ;;  %v9178_v46 = vrot.slane %v8518_v40, 2  ;;  %v9184_v57 = vrot.slane %v8522_v53, 6  ;;  %v22166_v27 = vld [vmem:[%s22880_s1 + $0x20] sm:$0xff] }
 0x65e   :  { %v12371_v16 = vpack.c.bf16 %v8943_v7, %v8929_v24  ;;  %12017 = vmatmul.mubr.msk.f32.gmra.mrb[60].mxu1 %vm1058_vm7, %v22088_v50  ;;  %v8519_v4 = vld [vmem:[%s22879_s0 + $0x63e] sm:$0x1]  ;;  %v9173_v54 = vsel %vm610_vm2, %v9172_v30, %v9171_v35  ;;  %v9186_v48 = vrot.slane %v8523_v9, 5  ;;  %v9188_v15 = vrot.slane %v8524_v47, 4  ;;  %v8385_v49 = vld [vmem:[%s22879_s0 + $0x20e] sm:$0x1] }
 0x65f   :  { %12018 = vmatprep.mubr.msk.f32.mxu1 %vm1058_vm7, %v22139_v56  ;;  %v8527_v36 = vld [vmem:[%s22879_s0 + $0x67e] sm:$0x1]  ;;  %v9180_v52 = vrot.slane %v8519_v4, 1  ;;  %v9175_v37 = vsel %vm613_vm3, %v9174_v5, %v9173_v54  ;;  %v9185_v21 = vsel %vm607_vm1, %v9184_v57, %v9183_v11  ;;  %v9190_v14 = vrot.slane %v8525_v3, 3  ;;  %v8384_v29 = vld [vmem:[%s22879_s0 + $0x206] sm:$0x1] }
 0x660   :  { %12373 = vmatpush3.bf16.xpose.msk.msra.mxu0 %vm13442_vm8, %v12371_v16  ;;  %v9192_v43 = vrot.slane %v8526_v60, 2  ;;  %v9177_v22 = vsel %vm616_vm4, %v9176_v55, %v9175_v37  ;;  %v9187_v45 = vsel %vm610_vm2, %v9186_v48, %v9185_v21  ;;  %v9194_v31 = vrot.slane %v8527_v36, 1  ;;  %v8386_v2 = vld [vmem:[%s22879_s0 + $0x216] sm:$0x1]  ;;  %v8387_v24 = vld [vmem:[%s22879_s0 + $0x21e] sm:$0x1] }
 0x661   :  { %v8944_v12 = vrot.slane %v8385_v49, 7  ;;  %v9179_v41 = vsel %vm619_vm5, %v9178_v46, %v9177_v22  ;;  %v9189_v38 = vsel %vm613_vm3, %v9188_v15, %v9187_v45  ;;  %v8388_v8 = vld [vmem:[%s22879_s0 + $0x226] sm:$0x1]  ;;  %v8389_v0 = vld [vmem:[%s22879_s0 + $0x22e] sm:$0x1]  ;;  %v8946_v9 = vrot.slane %v8386_v2, 6 }
 0x662   :  { %12019 = vmatmul.mubr.msk.f32.gmra.mrb[62].mxu1 %vm1058_vm7, %v22139_v56  ;;  %v9181_v42 = vsel %vm622_vm6, %v9180_v52, %v9179_v41  ;;  %v9191_v51 = vsel %vm616_vm4, %v9190_v14, %v9189_v38  ;;  %v8390_v6 = vld [vmem:[%s22879_s0 + $0x236] sm:$0x1]  ;;  %v8391_v19 = vld [vmem:[%s22879_s0 + $0x23e] sm:$0x1]  ;;  %v8392_v33 = vld [vmem:[%s22879_s0 + $0x246] sm:$0x1] }
 0x663   :  { %12020 = vmatprep.mubr.msk.f32.mxu1 %vm1058_vm7, %v22166_v27  ;;  %v9193_v53 = vsel %vm619_vm5, %v9192_v43, %v9191_v51  ;;  %v8393_v7 = vld [vmem:[%s22879_s0 + $0x24e] sm:$0x1]  ;;  %v8394_v10 = vld [vmem:[%s22879_s0 + $0x256] sm:$0x1]  ;;  %v8945_v18 = vsel %vm604_vm0, %v8944_v12, %v8384_v29  ;;  %v8395_v16 = vld [vmem:[%s22879_s0 + $0x25e] sm:$0x1] }
 0x664   :  { %v9195_v20 = vsel %vm622_vm6, %v9194_v31, %v9193_v53  ;;  %v8396_v34 = vld [vmem:[%s22879_s0 + $0x266] sm:$0x1]  ;;  %v8948_v47 = vrot.slane %v8387_v24, 5  ;;  %v22215_v1 = vld [vmem:[%s22880_s1 + $0x28] sm:$0xff]  ;;  %v8398_v28 = vld [vmem:[%s22879_s0 + $0x276] sm:$0x1]  ;;  %v8947_v5 = vsel %vm607_vm1, %v8946_v9, %v8945_v18 }
 0x665   :  { %v12374_v61 = vpack.c.bf16 %v9195_v20, %v9181_v42  ;;  %v8397_v3 = vld [vmem:[%s22879_s0 + $0x26e] sm:$0x1]  ;;  %v8950_v30 = vrot.slane %v8388_v8, 4  ;;  %v8952_v40 = vrot.slane %v8389_v0, 3  ;;  %v8399_v60 = vld [vmem:[%s22879_s0 + $0x27e] sm:$0x1] }
 0x666   :  { %12021 = vmatmul.mubr.msk.f32.gmra.mrb[64].mxu1 %vm1058_vm7, %v22166_v27  ;;  %v8954_v55 = vrot.slane %v8390_v6, 2  ;;  %v8958_v11 = vrot.slane %v8393_v7, 7  ;;  %v8960_v4 = vrot.slane %v8394_v10, 6  ;;  %v8949_v36 = vsel %vm610_vm2, %v8948_v47, %v8947_v5  ;;  %v22239_v15 = vld [vmem:[%s22880_s1 + $0x30] sm:$0xff]  ;;  %v8528_v49 = vld [vmem:[%s22879_s0 + $0x686] sm:$0x1] }
 0x667   :  { %12022 = vmatprep.mubr.msk.f32.mxu1 %vm1058_vm7, %v22215_v1  ;;  %12376 = vmatprep.subr.msk.bf16.mxu0 %vm13442_vm8, %v12374_v61  ;;  %v8962_v35 = vrot.slane %v8395_v16, 5  ;;  %v8964_v46 = vrot.slane %v8396_v34, 4  ;;  %v8951_v57 = vsel %vm613_vm3, %v8950_v30, %v8949_v36  ;;  %v8956_v54 = vrot.slane %v8391_v19, 1  ;;  %v8529_v22 = vld [vmem:[%s22879_s0 + $0x68e] sm:$0x1]  ;;  %v22288_v7 = vld [vmem:[%s22880_s1 + $0x38] sm:$0xff] }
 0x668   :  { %v8959_v52 = vsel %vm604_vm0, %v8958_v11, %v8392_v33  ;;  %v8966_v48 = vrot.slane %v8397_v3, 3  ;;  %v8953_v37 = vsel %vm616_vm4, %v8952_v40, %v8951_v57  ;;  %v8968_v14 = vrot.slane %v8398_v28, 2  ;;  %v8530_v45 = vld [vmem:[%s22879_s0 + $0x696] sm:$0x1]  ;;  %v8531_v12 = vld [vmem:[%s22879_s0 + $0x69e] sm:$0x1] }
 0x669   :  { %v8961_v21 = vsel %vm607_vm1, %v8960_v4, %v8959_v52  ;;  %v8970_v43 = vrot.slane %v8399_v60, 1  ;;  %v8955_v31 = vsel %vm619_vm5, %v8954_v55, %v8953_v37  ;;  %v8532_v41 = vld [vmem:[%s22879_s0 + $0x6a6] sm:$0x1]  ;;  %v8533_v38 = vld [vmem:[%s22879_s0 + $0x6ae] sm:$0x1]  ;;  %v9196_v19 = vrot.slane %v8529_v22, 7 }
 0x66a   :  { %12023 = vmatmul.mubr.msk.f32.gmra.mrb[66].mxu1 %vm1058_vm7, %v22215_v1  ;;  %v8963_v29 = vsel %vm610_vm2, %v8962_v35, %v8961_v21  ;;  %v8534_v24 = vld [vmem:[%s22879_s0 + $0x6b6] sm:$0x1]  ;;  %v8535_v42 = vld [vmem:[%s22879_s0 + $0x6be] sm:$0x1]  ;;  %v8537_v51 = vld [vmem:[%s22879_s0 + $0x6ce] sm:$0x1]  ;;  %v8957_v8 = vsel %vm622_vm6, %v8956_v54, %v8955_v31 }
 0x66b   :  { %12024 = vmatprep.mubr.msk.f32.mxu1 %vm1058_vm7, %v22239_v15  ;;  %v8965_v2 = vsel %vm613_vm3, %v8964_v46, %v8963_v29  ;;  %v8538_v6 = vld [vmem:[%s22879_s0 + $0x6d6] sm:$0x1]  ;;  %v8539_v53 = vld [vmem:[%s22879_s0 + $0x6de] sm:$0x1]  ;;  %v9198_v33 = vrot.slane %v8530_v45, 6  ;;  %v9200_v20 = vrot.slane %v8531_v12, 5  ;;  %v9197_v3 = vsel %vm604_vm0, %v9196_v19, %v8528_v49 }
 0x66c   :  { %v8967_v0 = vsel %vm616_vm4, %v8966_v48, %v8965_v2  ;;  %v8540_v18 = vld [vmem:[%s22879_s0 + $0x6e6] sm:$0x1]  ;;  %v9202_v16 = vrot.slane %v8532_v41, 4  ;;  %v9204_v34 = vrot.slane %v8533_v38, 3  ;;  %v8541_v61 = vld [vmem:[%s22879_s0 + $0x6ee] sm:$0x1] }
 0x66d   :  { %v8969_v10 = vsel %vm619_vm5, %v8968_v14, %v8967_v0  ;;  %v8536_v47 = vld [vmem:[%s22879_s0 + $0x6c6] sm:$0x1]  ;;  %v9206_v28 = vrot.slane %v8534_v24, 2  ;;  %v9208_v30 = vrot.slane %v8535_v42, 1  ;;  %v8542_v60 = vld [vmem:[%s22879_s0 + $0x6f6] sm:$0x1]  ;;  %v9199_v55 = vsel %vm607_vm1, %v9198_v33, %v9197_v3 }
 0x66e   :  { %12025 = vmatmul.mubr.msk.f32.gmra.mrb[68].mxu1 %vm1058_vm7, %v22239_v15  ;;  %v8971_v9 = vsel %vm622_vm6, %v8970_v43, %v8969_v10  ;;  %v8543_v5 = vld [vmem:[%s22879_s0 + $0x6fe] sm:$0x1]  ;;  %v9210_v11 = vrot.slane %v8537_v51, 7  ;;  %v9212_v4 = vrot.slane %v8538_v6, 6  ;;  %v9201_v36 = vsel %vm610_vm2, %v9200_v20, %v9199_v55  ;;  %v8401_v57 = vld [vmem:[%s22879_s0 + $0x28e] sm:$0x1] }
 0x66f   :  { %12026 = vmatprep.mubr.msk.f32.mxu1 %vm1058_vm7, %v22288_v7  ;;  %v12377_v40 = vpack.c.bf16 %v8971_v9, %v8957_v8  ;;  %v9214_v35 = vrot.slane %v8539_v53, 5  ;;  %v9216_v46 = vrot.slane %v8540_v18, 4  ;;  %v8402_v54 = vld [vmem:[%s22879_s0 + $0x296] sm:$0x1]  ;;  %v9203_v52 = vsel %vm613_vm3, %v9202_v16, %v9201_v36  ;;  %v8400_v21 = vld [vmem:[%s22879_s0 + $0x286] sm:$0x1] }
 0x670   :  { %v9211_v48 = vsel %vm604_vm0, %v9210_v11, %v8536_v47  ;;  %v9218_v37 = vrot.slane %v8541_v61, 3  ;;  %v8403_v14 = vld [vmem:[%s22879_s0 + $0x29e] sm:$0x1]  ;;  %v8404_v43 = vld [vmem:[%s22879_s0 + $0x2a6] sm:$0x1]  ;;  %v9205_v49 = vsel %vm616_vm4, %v9204_v34, %v9203_v52  ;;  %v9220_v45 = vrot.slane %v8542_v60, 2 }
 0x671   :  { %12379 = vmatpush3.bf16.xpose.msk.msra.mxu0 %vm13442_vm8, %v12377_v40  ;;  %v9213_v22 = vsel %vm607_vm1, %v9212_v4, %v9211_v48  ;;  %v9222_v31 = vrot.slane %v8543_v5, 1  ;;  %v8405_v29 = vld [vmem:[%s22879_s0 + $0x2ae] sm:$0x1]  ;;  %v8406_v12 = vld [vmem:[%s22879_s0 + $0x2b6] sm:$0x1]  ;;  %v9207_v41 = vsel %vm619_vm5, %v9206_v28, %v9205_v49  ;;  %v8972_v19 = vrot.slane %v8401_v57, 7 }
 0x672   :  { %12027 = vmatmul.mubr.msk.f32.gmra.mrb[70].mxu1 %vm1058_vm7, %v22288_v7  ;;  %v9215_v38 = vsel %vm610_vm2, %v9214_v35, %v9213_v22  ;;  %v8407_v2 = vld [vmem:[%s22879_s0 + $0x2be] sm:$0x1]  ;;  %v8409_v24 = vld [vmem:[%s22879_s0 + $0x2ce] sm:$0x1]  ;;  %v8410_v42 = vld [vmem:[%s22879_s0 + $0x2d6] sm:$0x1]  ;;  %v9209_v51 = vsel %vm622_vm6, %v9208_v30, %v9207_v41 }
 0x673   :  { %10901 = vmatprep.mubr.f32.mxu1 %v22897_v26  ;;  %v9217_v8 = vsel %vm613_vm3, %v9216_v46, %v9215_v38  ;;  %v8408_v0 = vld [vmem:[%s22879_s0 + $0x2c6] sm:$0x1]  ;;  %v8411_v6 = vld [vmem:[%s22879_s0 + $0x2de] sm:$0x1]  ;;  %v8974_v33 = vrot.slane %v8402_v54, 6  ;;  %v8976_v20 = vrot.slane %v8403_v14, 5  ;;  %v8973_v3 = vsel %vm604_vm0, %v8972_v19, %v8400_v21 }
 0x674   :  { %v8412_v53 = vld [vmem:[%s22879_s0 + $0x2e6] sm:$0x1]  ;;  %v9219_v10 = vsel %vm616_vm4, %v9218_v37, %v9217_v8  ;;  %v8413_v18 = vld [vmem:[%s22879_s0 + $0x2ee] sm:$0x1]  ;;  %v8978_v16 = vrot.slane %v8404_v43, 4  ;;  %v8980_v34 = vrot.slane %v8405_v29, 3 }
 0x675   :  { %v9221_v9 = vsel %vm619_vm5, %v9220_v45, %v9219_v10  ;;  %v8414_v47 = vld [vmem:[%s22879_s0 + $0x2f6] sm:$0x1]  ;;  %v8415_v61 = vld [vmem:[%s22879_s0 + $0x2fe] sm:$0x1]  ;;  %v8982_v28 = vrot.slane %v8406_v12, 2  ;;  %v8984_v30 = vrot.slane %v8407_v2, 1  ;;  %v8975_v60 = vsel %vm607_vm1, %v8974_v33, %v8973_v3 }
 0x676   :  { %v9223_v40 = vsel %vm622_vm6, %v9222_v31, %v9221_v9  ;;  %v8986_v5 = vrot.slane %v8409_v24, 7  ;;  %v8988_v55 = vrot.slane %v8410_v42, 6  ;;  %v8544_v11 = vld [vmem:[%s22879_s0 + $0x706] sm:$0x1]  ;;  %v8545_v4 = vld [vmem:[%s22879_s0 + $0x70e] sm:$0x1]  ;;  %v8977_v35 = vsel %vm610_vm2, %v8976_v20, %v8975_v60 }
 0x677   :  { %v12380_v36 = vpack.c.bf16 %v9223_v40, %v9209_v51  ;;  %v8990_v46 = vrot.slane %v8411_v6, 5  ;;  %v8992_v57 = vrot.slane %v8412_v53, 4  ;;  %v8546_v54 = vld [vmem:[%s22879_s0 + $0x716] sm:$0x1]  ;;  %v8547_v52 = vld [vmem:[%s22879_s0 + $0x71e] sm:$0x1]  ;;  %v8979_v48 = vsel %vm613_vm3, %v8978_v16, %v8977_v35 }
 0x678   :  { %v8987_v37 = vsel %vm604_vm0, %v8986_v5, %v8408_v0  ;;  %v8994_v21 = vrot.slane %v8413_v18, 3  ;;  %v8548_v14 = vld [vmem:[%s22879_s0 + $0x726] sm:$0x1]  ;;  %v8549_v43 = vld [vmem:[%s22879_s0 + $0x72e] sm:$0x1]  ;;  %v8981_v49 = vsel %vm616_vm4, %v8980_v34, %v8979_v48  ;;  %v8996_v45 = vrot.slane %v8414_v47, 2 }
 0x679   :  { %12382 = vmatprep.subr.msk.bf16.mxu0 %vm13442_vm8, %v12380_v36  ;;  %v8989_v22 = vsel %vm607_vm1, %v8988_v55, %v8987_v37  ;;  %v8550_v31 = vld [vmem:[%s22879_s0 + $0x736] sm:$0x1]  ;;  %v8551_v29 = vld [vmem:[%s22879_s0 + $0x73e] sm:$0x1]  ;;  %v9224_v12 = vrot.slane %v8545_v4, 7  ;;  %v8983_v41 = vsel %vm619_vm5, %v8982_v28, %v8981_v49  ;;  %v8998_v2 = vrot.slane %v8415_v61, 1 }
 0x67a   :  { %v8991_v38 = vsel %vm610_vm2, %v8990_v46, %v8989_v22  ;;  %v8553_v24 = vld [vmem:[%s22879_s0 + $0x74e] sm:$0x1]  ;;  %v8554_v42 = vld [vmem:[%s22879_s0 + $0x756] sm:$0x1]  ;;  %v8985_v51 = vsel %vm622_vm6, %v8984_v30, %v8983_v41  ;;  %v8552_v0 = vld [vmem:[%s22879_s0 + $0x746] sm:$0x1] }
 0x67b   :  { %v8993_v8 = vsel %vm613_vm3, %v8992_v57, %v8991_v38  ;;  %v8555_v6 = vld [vmem:[%s22879_s0 + $0x75e] sm:$0x1]  ;;  %v8556_v53 = vld [vmem:[%s22879_s0 + $0x766] sm:$0x1]  ;;  %v9225_v19 = vsel %vm604_vm0, %v9224_v12, %v8544_v11  ;;  %v9226_v33 = vrot.slane %v8546_v54, 6  ;;  %v9228_v20 = vrot.slane %v8547_v52, 5 }
 0x67c   :  { %v8995_v10 = vsel %vm616_vm4, %v8994_v21, %v8993_v8  ;;  %v8557_v18 = vld [vmem:[%s22879_s0 + $0x76e] sm:$0x1]  ;;  %v9230_v16 = vrot.slane %v8548_v14, 4  ;;  %v9232_v34 = vrot.slane %v8549_v43, 3  ;;  %v8558_v47 = vld [vmem:[%s22879_s0 + $0x776] sm:$0x1] }
 0x67d   :  { %v8997_v9 = vsel %vm619_vm5, %v8996_v45, %v8995_v10  ;;  %v8559_v61 = vld [vmem:[%s22879_s0 + $0x77e] sm:$0x1]  ;;  %v9227_v3 = vsel %vm607_vm1, %v9226_v33, %v9225_v19  ;;  %v9234_v28 = vrot.slane %v8550_v31, 2  ;;  %v9236_v30 = vrot.slane %v8551_v29, 1  ;;  %v8416_v11 = vld [vmem:[%s22879_s0 + $0x306] sm:$0x1] }
 0x67e   :  { %v8999_v40 = vsel %vm622_vm6, %v8998_v2, %v8997_v9  ;;  %v9229_v60 = vsel %vm610_vm2, %v9228_v20, %v9227_v3  ;;  %v9238_v5 = vrot.slane %v8553_v24, 7  ;;  %v9240_v55 = vrot.slane %v8554_v42, 6  ;;  %v8417_v4 = vld [vmem:[%s22879_s0 + $0x30e] sm:$0x1]  ;;  %v8418_v54 = vld [vmem:[%s22879_s0 + $0x316] sm:$0x1] }
 0x67f   :  { %v12383_v36 = vpack.c.bf16 %v8999_v40, %v8985_v51  ;;  %v9231_v35 = vsel %vm613_vm3, %v9230_v16, %v9229_v60  ;;  %v9242_v46 = vrot.slane %v8555_v6, 5  ;;  %v9244_v57 = vrot.slane %v8556_v53, 4  ;;  %v8419_v52 = vld [vmem:[%s22879_s0 + $0x31e] sm:$0x1]  ;;  %v8420_v14 = vld [vmem:[%s22879_s0 + $0x326] sm:$0x1] }
 0x680   :  { %v9233_v48 = vsel %vm616_vm4, %v9232_v34, %v9231_v35  ;;  %v9239_v37 = vsel %vm604_vm0, %v9238_v5, %v8552_v0  ;;  %v9246_v21 = vrot.slane %v8557_v18, 3  ;;  %v8421_v43 = vld [vmem:[%s22879_s0 + $0x32e] sm:$0x1]  ;;  %v9248_v45 = vrot.slane %v8558_v47, 2  ;;  %v8422_v31 = vld [vmem:[%s22879_s0 + $0x336] sm:$0x1] }
 0x681   :  { %12385 = vmatpush3.bf16.xpose.msk.msra.mxu0 %vm13442_vm8, %v12383_v36  ;;  %v9235_v49 = vsel %vm619_vm5, %v9234_v28, %v9233_v48  ;;  %v9241_v22 = vsel %vm607_vm1, %v9240_v55, %v9239_v37  ;;  %v8423_v29 = vld [vmem:[%s22879_s0 + $0x33e] sm:$0x1]  ;;  %v9000_v12 = vrot.slane %v8417_v4, 7  ;;  %v9250_v2 = vrot.slane %v8559_v61, 1  ;;  %v8424_v24 = vld [vmem:[%s22879_s0 + $0x346] sm:$0x1] }
 0x682   :  { %v9237_v41 = vsel %vm622_vm6, %v9236_v30, %v9235_v49  ;;  %v9243_v38 = vsel %vm610_vm2, %v9242_v46, %v9241_v22  ;;  %v8425_v42 = vld [vmem:[%s22879_s0 + $0x34e] sm:$0x1]  ;;  %v8426_v51 = vld [vmem:[%s22879_s0 + $0x356] sm:$0x1]  ;;  %v8427_v0 = vld [vmem:[%s22879_s0 + $0x35e] sm:$0x1] }
 0x683   :  { %v9245_v8 = vsel %vm613_vm3, %v9244_v57, %v9243_v38  ;;  %v8428_v6 = vld [vmem:[%s22879_s0 + $0x366] sm:$0x1]  ;;  %v9001_v53 = vsel %vm604_vm0, %v9000_v12, %v8416_v11  ;;  %v9002_v19 = vrot.slane %v8418_v54, 6  ;;  %v9004_v33 = vrot.slane %v8419_v52, 5  ;;  %v8429_v18 = vld [vmem:[%s22879_s0 + $0x36e] sm:$0x1] }
 0x684   :  { %v9247_v10 = vsel %vm616_vm4, %v9246_v21, %v9245_v8  ;;  %v9006_v20 = vrot.slane %v8420_v14, 4  ;;  %v9008_v16 = vrot.slane %v8421_v43, 3  ;;  %v9010_v34 = vrot.slane %v8422_v31, 2  ;;  %v8430_v47 = vld [vmem:[%s22879_s0 + $0x376] sm:$0x1] }
 0x685   :  { %v9249_v9 = vsel %vm619_vm5, %v9248_v45, %v9247_v10  ;;  %v8431_v61 = vld [vmem:[%s22879_s0 + $0x37e] sm:$0x1]  ;;  %v9003_v3 = vsel %vm607_vm1, %v9002_v19, %v9001_v53  ;;  %v9012_v28 = vrot.slane %v8423_v29, 1  ;;  %v9014_v30 = vrot.slane %v8425_v42, 7  ;;  %v8560_v11 = vld [vmem:[%s22879_s0 + $0x786] sm:$0x1] }
 0x686   :  { %v9251_v40 = vsel %vm622_vm6, %v9250_v2, %v9249_v9  ;;  %v9005_v60 = vsel %vm610_vm2, %v9004_v33, %v9003_v3  ;;  %v9016_v5 = vrot.slane %v8426_v51, 6  ;;  %v9018_v55 = vrot.slane %v8427_v0, 5  ;;  %v8561_v4 = vld [vmem:[%s22879_s0 + $0x78e] sm:$0x1]  ;;  %v8562_v54 = vld [vmem:[%s22879_s0 + $0x796] sm:$0x1] }
 0x687   :  { %v12386_v36 = vpack.c.bf16 %v9251_v40, %v9237_v41  ;;  %v9007_v35 = vsel %vm613_vm3, %v9006_v20, %v9005_v60  ;;  %v9015_v46 = vsel %vm604_vm0, %v9014_v30, %v8424_v24  ;;  %v9020_v57 = vrot.slane %v8428_v6, 4  ;;  %v8563_v52 = vld [vmem:[%s22879_s0 + $0x79e] sm:$0x1]  ;;  %v8564_v43 = vld [vmem:[%s22879_s0 + $0x7a6] sm:$0x1] }
 0x688   :  { %v9009_v48 = vsel %vm616_vm4, %v9008_v16, %v9007_v35  ;;  %v9017_v37 = vsel %vm607_vm1, %v9016_v5, %v9015_v46  ;;  %v9022_v21 = vrot.slane %v8429_v18, 3  ;;  %v9024_v14 = vrot.slane %v8430_v47, 2  ;;  %v8565_v49 = vld [vmem:[%s22879_s0 + $0x7ae] sm:$0x1]  ;;  %v8566_v29 = vld [vmem:[%s22879_s0 + $0x7b6] sm:$0x1] }
 0x689   :  { %12388 = vmatprep.subr.msk.bf16.mxu0 %vm13442_vm8, %v12386_v36  ;;  %v9011_v22 = vsel %vm619_vm5, %v9010_v34, %v9009_v48  ;;  %v9019_v45 = vsel %vm610_vm2, %v9018_v55, %v9017_v37  ;;  %v9026_v31 = vrot.slane %v8431_v61, 1  ;;  %v8567_v12 = vld [vmem:[%s22879_s0 + $0x7be] sm:$0x1]  ;;  %v9252_v41 = vrot.slane %v8561_v4, 7  ;;  %v8568_v24 = vld [vmem:[%s22879_s0 + $0x7c6] sm:$0x1] }
 0x68a   :  { %v9013_v38 = vsel %vm622_vm6, %v9012_v28, %v9011_v22  ;;  %v9021_v2 = vsel %vm613_vm3, %v9020_v57, %v9019_v45  ;;  %v8569_v42 = vld [vmem:[%s22879_s0 + $0x7ce] sm:$0x1]  ;;  %v8570_v51 = vld [vmem:[%s22879_s0 + $0x7d6] sm:$0x1]  ;;  %v8571_v0 = vld [vmem:[%s22879_s0 + $0x7de] sm:$0x1] }
 0x68b   :  { %v9023_v8 = vsel %vm616_vm4, %v9022_v21, %v9021_v2  ;;  %v8572_v6 = vld [vmem:[%s22879_s0 + $0x7e6] sm:$0x1]  ;;  %v9253_v53 = vsel %vm604_vm0, %v9252_v41, %v8560_v11  ;;  %v9254_v19 = vrot.slane %v8562_v54, 6  ;;  %v9256_v33 = vrot.slane %v8563_v52, 5  ;;  %v8573_v18 = vld [vmem:[%s22879_s0 + $0x7ee] sm:$0x1] }
 0x68c   :  { %v9025_v10 = vsel %vm619_vm5, %v9024_v14, %v9023_v8  ;;  %v9258_v20 = vrot.slane %v8564_v43, 4  ;;  %v9260_v16 = vrot.slane %v8565_v49, 3  ;;  %v9262_v34 = vrot.slane %v8566_v29, 2  ;;  %v8574_v47 = vld [vmem:[%s22879_s0 + $0x7f6] sm:$0x1] }
 0x68d   :  { %v9027_v9 = vsel %vm622_vm6, %v9026_v31, %v9025_v10  ;;  %v9255_v61 = vsel %vm607_vm1, %v9254_v19, %v9253_v53  ;;  %v9264_v3 = vrot.slane %v8567_v12, 1  ;;  %v9266_v28 = vrot.slane %v8569_v42, 7  ;;  %v8575_v40 = vld [vmem:[%s22879_s0 + $0x7fe] sm:$0x1]  ;;  %v8433_v11 = vld [vmem:[%s22879_s0 + $0x38e] sm:$0x1] }
 0x68e   :  { %v12389_v30 = vpack.c.bf16 %v9027_v9, %v9013_v38  ;;  %v9257_v60 = vsel %vm610_vm2, %v9256_v33, %v9255_v61  ;;  %v9268_v5 = vrot.slane %v8570_v51, 6  ;;  %v9270_v55 = vrot.slane %v8571_v0, 5  ;;  %v8434_v57 = vld [vmem:[%s22879_s0 + $0x396] sm:$0x1]  ;;  %v8435_v54 = vld [vmem:[%s22879_s0 + $0x39e] sm:$0x1] }
 0x68f   :  { %v9259_v4 = vsel %vm613_vm3, %v9258_v20, %v9257_v60  ;;  %v9267_v36 = vsel %vm604_vm0, %v9266_v28, %v8568_v24  ;;  %v9272_v35 = vrot.slane %v8572_v6, 4  ;;  %v9274_v46 = vrot.slane %v8573_v18, 3  ;;  %v8432_v21 = vld [vmem:[%s22879_s0 + $0x386] sm:$0x1]  ;;  %v8437_v43 = vld [vmem:[%s22879_s0 + $0x3ae] sm:$0x1] }
 0x690   :  { %12391 = vmatpush3.bf16.xpose.msk.msra.mxu0 %vm13442_vm8, %v12389_v30  ;;  %v9261_v52 = vsel %vm616_vm4, %v9260_v16, %v9259_v4  ;;  %v9269_v48 = vsel %vm607_vm1, %v9268_v5, %v9267_v36  ;;  %v9276_v37 = vrot.slane %v8574_v47, 2  ;;  %v8436_v14 = vld [vmem:[%s22879_s0 + $0x3a6] sm:$0x1]  ;;  %v9278_v45 = vrot.slane %v8575_v40, 1  ;;  %v8438_v31 = vld [vmem:[%s22879_s0 + $0x3b6] sm:$0x1] }
 0x691   :  { %v9263_v49 = vsel %vm619_vm5, %v9262_v34, %v9261_v52  ;;  %v9271_v22 = vsel %vm610_vm2, %v9270_v55, %v9269_v48  ;;  %v8439_v29 = vld [vmem:[%s22879_s0 + $0x3be] sm:$0x1]  ;;  %v8440_v38 = vld [vmem:[%s22879_s0 + $0x3c6] sm:$0x1]  ;;  %v8441_v2 = vld [vmem:[%s22879_s0 + $0x3ce] sm:$0x1] }
 0x692   :  { %v9265_v12 = vsel %vm622_vm6, %v9264_v3, %v9263_v49  ;;  %v9273_v41 = vsel %vm613_vm3, %v9272_v35, %v9271_v22  ;;  %v8442_v24 = vld [vmem:[%s22879_s0 + $0x3d6] sm:$0x1]  ;;  %v8443_v42 = vld [vmem:[%s22879_s0 + $0x3de] sm:$0x1]  ;;  %v8444_v8 = vld [vmem:[%s22879_s0 + $0x3e6] sm:$0x1] }
 0x693   :  { %v9275_v51 = vsel %vm616_vm4, %v9274_v46, %v9273_v41  ;;  %v9028_v0 = vrot.slane %v8433_v11, 7  ;;  %v9030_v6 = vrot.slane %v8434_v57, 6  ;;  %v9032_v53 = vrot.slane %v8435_v54, 5  ;;  %v8445_v33 = vld [vmem:[%s22879_s0 + $0x3ee] sm:$0x1] }
 0x694   :  { %v9277_v19 = vsel %vm619_vm5, %v9276_v37, %v9275_v51  ;;  %v9034_v10 = vrot.slane %v8436_v14, 4  ;;  %v9036_v18 = vrot.slane %v8437_v43, 3  ;;  %v9038_v20 = vrot.slane %v8438_v31, 2  ;;  %v8446_v34 = vld [vmem:[%s22879_s0 + $0x3f6] sm:$0x1] }
 0x695   :  { %v9279_v16 = vsel %vm622_vm6, %v9278_v45, %v9277_v19  ;;  %v9029_v9 = vsel %vm604_vm0, %v9028_v0, %v8432_v21  ;;  %v9040_v47 = vrot.slane %v8439_v29, 1  ;;  %v9042_v61 = vrot.slane %v8441_v2, 7  ;;  %v8447_v28 = vld [vmem:[%s22879_s0 + $0x3fe] sm:$0x1]  ;;  %v13290_v45 = vld [vmem:[%s22880_s1] sm:$0xff] }
 0x696   :  { %v12392_v3 = vpack.c.bf16 %v9279_v16, %v9265_v12  ;;  %v9031_v30 = vsel %vm607_vm1, %v9030_v6, %v9029_v9  ;;  %v9044_v40 = vrot.slane %v8442_v24, 6  ;;  %v9046_v60 = vrot.slane %v8443_v42, 5 }
 0x697   :  { %v9033_v5 = vsel %vm610_vm2, %v9032_v53, %v9031_v30  ;;  %v9043_v55 = vsel %vm604_vm0, %v9042_v61, %v8440_v38  ;;  %v9048_v11 = vrot.slane %v8444_v8, 4  ;;  %v9050_v4 = vrot.slane %v8445_v33, 3 }
 0x698   :  { %12394 = vmatprep.subr.msk.bf16.mxu0 %vm13442_vm8, %v12392_v3  ;;  %v9035_v36 = vsel %vm613_vm3, %v9034_v10, %v9033_v5  ;;  %v9045_v35 = vsel %vm607_vm1, %v9044_v40, %v9043_v55  ;;  %v9052_v46 = vrot.slane %v8446_v34, 2  ;;  %v9054_v52 = vrot.slane %v8447_v28, 1 }
 0x699   :  { %v9037_v57 = vsel %vm616_vm4, %v9036_v18, %v9035_v36  ;;  %v9047_v54 = vsel %vm610_vm2, %v9046_v60, %v9045_v35 }
 0x69a   :  { %v9039_v48 = vsel %vm619_vm5, %v9038_v20, %v9037_v57  ;;  %v9049_v37 = vsel %vm613_vm3, %v9048_v11, %v9047_v54 }
 0x69b   :  { %v9041_v21 = vsel %vm622_vm6, %v9040_v47, %v9039_v48  ;;  %v9051_v14 = vsel %vm616_vm4, %v9050_v4, %v9049_v37 }
 0x69c   :  { %v9053_v43 = vsel %vm619_vm5, %v9052_v46, %v9051_v14 }
 0x69d   :  { %v9055_v49 = vsel %vm622_vm6, %v9054_v52, %v9053_v43 }
 0x69e   :  { %v12395_v22 = vpack.c.bf16 %v9055_v49, %v9041_v21 }
 0x6a0   :  { %12397 = vmatpush3.bf16.xpose.msk.msra.mxu0 %vm13442_vm8, %v12395_v22 }
 0x6a7   :  { %11965 = vmatmul.mubr.msk.f32.vlgmr.msra.gmra.mrb[48].mxu0 %vm1058_vm7, %v13290_v45 }
 0x6a8   :  { %11966 = vmatprep.mubr.msk.f32.mxu0 %vm1058_vm7, %v22064_v13 }
 0x6ab   :  { %11967 = vmatmul.mubr.msk.f32.gmra.mrb[50].mxu0 %vm1058_vm7, %v22064_v13 }
 0x6ac   :  { %11968 = vmatprep.mubr.msk.f32.mxu0 %vm1058_vm7, %v22088_v50 }
 0x6af   :  { %11969 = vmatmul.mubr.msk.f32.gmra.mrb[52].mxu0 %vm1058_vm7, %v22088_v50 }
 0x6b0   :  { %11970 = vmatprep.mubr.msk.f32.mxu0 %vm1058_vm7, %v22139_v56 }
 0x6b3   :  { %11971 = vmatmul.mubr.msk.f32.gmra.mrb[54].mxu0 %vm1058_vm7, %v22139_v56 }
 0x6b4   :  { %11972 = vmatprep.mubr.msk.f32.mxu0 %vm1058_vm7, %v22166_v27 }
 0x6b7   :  { %11973 = vmatmul.mubr.msk.f32.gmra.mrb[56].mxu0 %vm1058_vm7, %v22166_v27 }
 0x6b8   :  { %11974 = vmatprep.mubr.msk.f32.mxu0 %vm1058_vm7, %v22215_v1 }
 0x6bb   :  { %11975 = vmatmul.mubr.msk.f32.gmra.mrb[58].mxu0 %vm1058_vm7, %v22215_v1 }
 0x6bc   :  { %11976 = vmatprep.mubr.msk.f32.mxu0 %vm1058_vm7, %v22239_v15 }
 0x6bf   :  { %11977 = vmatmul.mubr.msk.f32.gmra.mrb[60].mxu0 %vm1058_vm7, %v22239_v15 }
 0x6c0   :  { %11978 = vmatprep.mubr.msk.f32.mxu0 %vm1058_vm7, %v22288_v7 }
 0x6c3   :  { %11979 = vmatmul.mubr.msk.f32.gmra.mrb[62].mxu0 %vm1058_vm7, %v22288_v7 }
 0x6c4   :  { %9521 = vmatprep.mubr.f32.mxu0 %v22897_v26 }
 0x6df   :  { %v8161_v63 = vpop.f32.mrb[40].mxu1 }
 0x6e0   :  { %v12524_v13 = vadd.f32 %v8161_v63, %v15772_v59  ;;  %v8163_v50 = vpop.f32.mrb[41].mxu1 }
 0x6e1   :  { %v12525_v56 = vadd.f32 %v8163_v50, %v15772_v59 }
 0x6e2   :  { %v11502_v27 = vmul.f32 -1.442695, %v12524_v13 }
 0x6e3   :  { %v11503_v1 = vmul.f32 -1.442695, %v12525_v56 }
 0x6e4   :  { %v8167_v31 = vpop.f32.mrb[42].mxu1  ;;  %13009 = vpow2.f32 %v11502_v27 }
 0x6e5   :  { %v12526_v15 = vadd.f32 %v8167_v31, %v15819_v32  ;;  %v8169_v29 = vpop.f32.mrb[43].mxu1  ;;  %13011 = vpow2.f32 %v11503_v1 }
 0x6e6   :  { %v12527_v41 = vadd.f32 %v8169_v29, %v15819_v32 }
 0x6e7   :  { %v11504_v12 = vmul.f32 -1.442695, %v12526_v15 }
 0x6e8   :  { %v8173_v7 = vpop.f32.mrb[44].mxu1  ;;  %v11505_v51 = vmul.f32 -1.442695, %v12527_v41 }
 0x6e9   :  { %13013 = vpow2.f32 %v11504_v12  ;;  %v12528_v38 = vadd.f32 %v8173_v7, %v15830_v44  ;;  %v8175_v2 = vpop.f32.mrb[45].mxu1 }
 0x6ea   :  { %v12529_v24 = vadd.f32 %v8175_v2, %v15830_v44 }
 0x6eb   :  { %v11506_v42 = vmul.f32 -1.442695, %v12528_v38 }
 0x6ec   :  { %v11507_v8 = vmul.f32 -1.442695, %v12529_v24 }
 0x6ed   :  { %v8179_v0 = vpop.f32.mrb[46].mxu1  ;;  %13015 = vpow2.f32 %v11506_v42 }
 0x6ee   :  { %v12530_v6 = vadd.f32 %v8179_v0, %v15867_v17  ;;  %v8181_v53 = vpop.f32.mrb[47].mxu1  ;;  %13017 = vpow2.f32 %v11507_v8  ;;  %v13010_v33 = vpop.eup %13009 }
 0x6ef   :  { %v12531_v19 = vadd.f32 %v8181_v53, %v15867_v17  ;;  %v13012_v18 = vpop.eup %13011  ;;  %v8260_v20 = vadd.f32 1.0, %v13010_v33  ;;  %13019 = vpow2.f32 %v11505_v51 }
 0x6f0   :  { %v11508_v10 = vmul.f32 -1.442695, %v12530_v6  ;;  %v8261_v9 = vadd.f32 1.0, %v13012_v18  ;;  %v22910_v6 = vld [vmem:[#allocation3_spill] sm:$0xff]  ;;  %v22911_v18 = vld [vmem:[#allocation4_spill] sm:$0xff] }
 0x6f1   :  { %v11509_v16 = vmul.f32 -1.442695, %v12531_v19  ;;  %v8185_v34 = vpop.f32.mrb[48].mxu1 }
 0x6f2   :  { %13021 = vpow2.f32 %v11508_v10  ;;  %v12532_v47 = vadd.f32 %v8185_v34, %v15883_v39  ;;  %v8187_v61 = vpop.f32.mrb[49].mxu1 }
 0x6f3   :  { %v12533_v3 = vadd.f32 %v8187_v61, %v15883_v39  ;;  %v13014_v28 = vpop.eup %13013  ;;  %13023 = vrcp.f32 %v8260_v20 }
 0x6f4   :  { %v11510_v30 = vmul.f32 -1.442695, %v12532_v47  ;;  %v8262_v40 = vadd.f32 1.0, %v13014_v28  ;;  %13025 = vpow2.f32 %v11509_v16 }
 0x6f5   :  { %v11511_v60 = vmul.f32 -1.442695, %v12533_v3  ;;  %13027 = vrcp.f32 %v8261_v9 }
 0x6f6   :  { %v8191_v5 = vpop.f32.mrb[50].mxu1  ;;  %13029 = vpow2.f32 %v11510_v30 }
 0x6f7   :  { %v12534_v55 = vadd.f32 %v8191_v5, %v15902_v58  ;;  %v8193_v11 = vpop.f32.mrb[51].mxu1  ;;  %v13016_v36 = vpop.eup %13015  ;;  %13031 = vrcp.f32 %v8262_v40 }
 0x6f8   :  { %v12535_v4 = vadd.f32 %v8193_v11, %v15902_v58  ;;  %v13018_v46 = vpop.eup %13017  ;;  %v8264_v57 = vadd.f32 1.0, %v13016_v36  ;;  %13033 = vpow2.f32 %v11511_v60 }
 0x6f9   :  { %v11512_v35 = vmul.f32 -1.442695, %v12534_v55  ;;  %v8265_v48 = vadd.f32 1.0, %v13018_v46  ;;  %v13020_v14 = vpop.eup %13019 }
 0x6fa   :  { %v11513_v54 = vmul.f32 -1.442695, %v12535_v4  ;;  %v8197_v52 = vpop.f32.mrb[52].mxu1  ;;  %v8263_v27 = vadd.f32 1.0, %v13020_v14 }
 0x6fb   :  { %13035 = vpow2.f32 %v11512_v35  ;;  %v12536_v37 = vadd.f32 %v8197_v52, %v15924_v25  ;;  %v8199_v21 = vpop.f32.mrb[53].mxu1 }
 0x6fc   :  { %13037 = vrcp.f32 %v8264_v57  ;;  %v13022_v43 = vpop.eup %13021  ;;  %v12537_v49 = vadd.f32 %v8199_v21, %v15924_v25 }
 0x6fd   :  { %13039 = vrcp.f32 %v8265_v48  ;;  %v8266_v22 = vadd.f32 1.0, %v13022_v43  ;;  %v13024_v63 = vpop.eup %13023 }
 0x6fe   :  { %13041 = vpow2.f32 %v11513_v54  ;;  %v13026_v56 = vpop.eup %13025 }
 0x6ff   :  { %v8203_v45 = vpop.f32.mrb[54].mxu1  ;;  %13043 = vtanh.f32 %v12536_v37  ;;  %v13028_v1 = vpop.eup %13027  ;;  %v8267_v31 = vadd.f32 1.0, %v13026_v56  ;;  %v22730_v56 = vld [vmem:[%s22882_s2 + $0x8] sm:$0xff] }
 0x700   :  { %v12538_v13 = vadd.f32 %v8203_v45, %v15937_v23  ;;  %v8205_v50 = vpop.f32.mrb[55].mxu1  ;;  %13045 = vrcp.f32 %v8266_v22  ;;  %v13030_v29 = vpop.eup %13029 }
 0x701   :  { %13047 = vtanh.f32 %v12537_v49  ;;  %v12539_v15 = vadd.f32 %v8205_v50, %v15937_v23  ;;  %v13032_v12 = vpop.eup %13031  ;;  %v8268_v8 = vadd.f32 1.0, %v13030_v29 }
 0x702   :  { %13049 = vtanh.f32 %v12538_v13  ;;  %v13034_v41 = vpop.eup %13033 }
 0x703   :  { %13051 = vrcp.f32 %v8267_v31  ;;  %v8269_v19 = vadd.f32 1.0, %v13034_v41  ;;  %v22742_v31 = vld [vmem:[%s22882_s2 + $0x10] sm:$0xff]  ;;  %v22762_v41 = vld [vmem:[%s22882_s2 + $0x20] sm:$0xff] }
 0x704   :  { %13053 = vrcp.f32 %v8263_v27 }
 0x705   :  { %v13036_v7 = vpop.eup %13035  ;;  %13055 = vtanh.f32 %v12539_v15 }
 0x706   :  { %v13038_v38 = vpop.eup %13037  ;;  %v8270_v34 = vadd.f32 1.0, %v13036_v7  ;;  %13057 = vrcp.f32 %v8268_v8  ;;  %v22770_v7 = vld [vmem:[%s22882_s2 + $0x28] sm:$0xff] }
 0x707   :  { %v13040_v2 = vpop.eup %13039  ;;  %v8300_v42 = vmul.f32 %v13038_v38, %v21052_v62  ;;  %v22912_v62 = vld [vmem:[#allocation5_spill] sm:$0xff]  ;;  %13059 = vrcp.f32 %v8269_v19 }
 0x708   :  { %v13042_v24 = vpop.eup %13041  ;;  %v8301_v53 = vmul.f32 %v13040_v2, %v22910_v6  ;;  %v22778_v38 = vld [vmem:[%s22882_s2 + $0x30] sm:$0xff]  ;;  %v22786_v2 = vld [vmem:[%s22882_s2 + $0x38] sm:$0xff] }
 0x709   :  { %v13044_v51 = vpop.eup %13043  ;;  %v8271_v5 = vadd.f32 1.0, %v13042_v24 }
 0x70a   :  { %v13046_v0 = vpop.eup %13045  ;;  %v8304_v33 = vmul.f32 %v13044_v51, %v13024_v63  ;;  %v22718_v63 = vld [vmem:[%s22882_s2] sm:$0xff] }
 0x70b   :  { %v13048_v10 = vpop.eup %13047  ;;  %v8302_v20 = vmul.f32 %v13046_v0, %v22911_v18 }
 0x70c   :  { %v13050_v16 = vpop.eup %13049  ;;  %v22702_v9 = vadd.f32 %v8304_v33, %v8300_v42  ;;  %v8305_v47 = vmul.f32 %v13048_v10, %v13028_v1 }
 0x70d   :  { %v13052_v61 = vpop.eup %13051  ;;  %v8306_v3 = vmul.f32 %v13050_v16, %v13032_v12  ;;  %v22754_v12 = vld [vmem:[%s22882_s2 + $0x18] sm:$0xff] }
 0x70e   :  { %v13054_v28 = vpop.eup %13053  ;;  %v8303_v30 = vmul.f32 %v13052_v61, %v22912_v62  ;;  %v22705_v40 = vadd.f32 %v8305_v47, %v8301_v53  ;;  %13061 = vtanh.f32 %v22702_v9 }
 0x70f   :  { %v13056_v60 = vpop.eup %13055  ;;  %v22708_v55 = vadd.f32 %v8306_v3, %v8302_v20  ;;  %13063 = vrcp.f32 %v8270_v34 }
 0x710   :  { %v8307_v11 = vmul.f32 %v13056_v60, %v13054_v28  ;;  %v13058_v36 = vpop.eup %13057 }
 0x711   :  { %13065 = vtanh.f32 %v22708_v55  ;;  %v13060_v35 = vpop.eup %13059 }
 0x712   :  { %13067 = vtanh.f32 %v22705_v40  ;;  %v22712_v4 = vadd.f32 %v8307_v11, %v8303_v30 }
 0x713   :  { %13069 = vrcp.f32 %v8271_v5 }
 0x714   :  { %13071 = vtanh.f32 %v22712_v4 }
 0x718   :  { %v13062_v46 = vpop.eup %13061 }
 0x719   :  { %v13064_v57 = vpop.eup %13063  ;;  %v8316_v48 = vmul.f32 %v13062_v46, %v13058_v36 }
 0x71b   :  { %v13066_v54 = vpop.eup %13065 }
 0x71c   :  { %v13068_v52 = vpop.eup %13067  ;;  %v8318_v37 = vmul.f32 %v13066_v54, %v13064_v57 }
 0x71d   :  { %v13070_v21 = vpop.eup %13069  ;;  %v8317_v49 = vmul.f32 %v13068_v52, %v13060_v35 }
 0x71e   :  { %v13072_v14 = vpop.eup %13071  ;;  %v12400_v43 = vpack.c.bf16 %v8318_v37, %v8316_v48 }
 0x71f   :  { %v8319_v22 = vmul.f32 %v13072_v14, %v13070_v21 }
 0x721   :  { %v12398_v45 = vpack.c.bf16 %v8319_v22, %v8317_v49 }
 0x723   :  { %12399 = vmatprep.subr.bf16.mxu0 %v12398_v45 }
 0x724   :  { %12401 = vmatpush1.bf16.msra.mxu0 %v12400_v43 }
 0x727   :  { %11554 = vmatmul.mubr.msk.f32.vlgmr.msra.gmra.mrb[48].mxu0 %vm1260_vm9, %v22718_v63 }
 0x728   :  { %9527 = vmatprep.mubr.f32.mxu0 %v22897_v26 }
 0x729   :  { %v22722_v13 = vpop.f32.mrb[56].mxu1 }
 0x72a   :  { %v22725_v50 = vpop.f32.mrb[57].mxu1 }
 0x72b   :  { %11555 = vmatmul.mubr.msk.f32.gmra.mrb[50].mxu0 %vm1260_vm9, %v22730_v56 }
 0x72c   :  { %9533 = vmatprep.mubr.f32.mxu0 %v22897_v26 }
 0x72d   :  { %v22734_v27 = vpop.f32.mrb[58].mxu1 }
 0x72e   :  { %v22737_v1 = vpop.f32.mrb[59].mxu1 }
 0x72f   :  { %11556 = vmatmul.mubr.msk.f32.gmra.mrb[52].mxu0 %vm1260_vm9, %v22742_v31 }
 0x730   :  { %9539 = vmatprep.mubr.f32.mxu0 %v22897_v26 }
 0x731   :  { %v22746_v15 = vpop.f32.mrb[60].mxu1 }
 0x732   :  { %v22749_v29 = vpop.f32.mrb[61].mxu1 }
 0x733   :  { %11557 = vmatmul.mubr.msk.f32.gmra.mrb[54].mxu0 %vm1260_vm9, %v22754_v12 }
 0x734   :  { %9545 = vmatprep.mubr.f32.mxu0 %v22897_v26 }
 0x737   :  { %11558 = vmatmul.mubr.msk.f32.gmra.mrb[56].mxu0 %vm1260_vm9, %v22762_v41 }
 0x738   :  { %9551 = vmatprep.mubr.f32.mxu0 %v22897_v26 }
 0x73b   :  { %11559 = vmatmul.mubr.msk.f32.gmra.mrb[58].mxu0 %vm1260_vm9, %v22770_v7 }
 0x73c   :  { %9557 = vmatprep.mubr.f32.mxu0 %v22897_v26 }
 0x73f   :  { %11560 = vmatmul.mubr.msk.f32.gmra.mrb[60].mxu0 %vm1260_vm9, %v22778_v38 }
 0x740   :  { %9563 = vmatprep.mubr.f32.mxu0 %v22897_v26 }
 0x743   :  { %11561 = vmatmul.mubr.msk.f32.gmra.mrb[62].mxu0 %vm1260_vm9, %v22786_v2 }
 0x744   :  { %10883 = vmatprep.mubr.f32.mxu0 %v22897_v26 }
 0x7fa   :  { %v9523_v24 = vpop.f32.mrb[48].mxu0 }
 0x7fb   :  { %v12540_v42 = vadd.f32 %v9523_v24, %v15772_v59  ;;  %v9525_v51 = vpop.f32.mrb[49].mxu0 }
 0x7fc   :  { %v12541_v8 = vadd.f32 %v9525_v51, %v15772_v59 }
 0x7fd   :  { %v11562_v0 = vmul.f32 -1.442695, %v12540_v42 }
 0x7fe   :  { %v11563_v6 = vmul.f32 -1.442695, %v12541_v8  ;;  %v9529_v53 = vpop.f32.mrb[50].mxu0 }
 0x7ff   :  { %13073 = vpow2.f32 %v11562_v0  ;;  %v12542_v19 = vadd.f32 %v9529_v53, %v15819_v32  ;;  %v9531_v33 = vpop.f32.mrb[51].mxu0 }
 0x800   :  { %13075 = vpow2.f32 %v11563_v6  ;;  %v12543_v18 = vadd.f32 %v9531_v33, %v15819_v32 }
 0x801   :  { %v11564_v10 = vmul.f32 -1.442695, %v12542_v19 }
 0x802   :  { %v9535_v20 = vpop.f32.mrb[52].mxu0  ;;  %v11565_v3 = vmul.f32 -1.442695, %v12543_v18 }
 0x803   :  { %13077 = vpow2.f32 %v11564_v10  ;;  %v12544_v16 = vadd.f32 %v9535_v20, %v15830_v44  ;;  %v9537_v34 = vpop.f32.mrb[53].mxu0 }
 0x804   :  { %v12545_v47 = vadd.f32 %v9537_v34, %v15830_v44 }
 0x805   :  { %v11566_v61 = vmul.f32 -1.442695, %v12544_v16 }
 0x806   :  { %v11567_v28 = vmul.f32 -1.442695, %v12545_v47  ;;  %v9541_v62 = vpop.f32.mrb[54].mxu0 }
 0x807   :  { %13079 = vpow2.f32 %v11566_v61  ;;  %v12546_v30 = vadd.f32 %v9541_v62, %v15867_v17  ;;  %v9543_v60 = vpop.f32.mrb[55].mxu0 }
 0x808   :  { %13081 = vpow2.f32 %v11567_v28  ;;  %v12547_v5 = vadd.f32 %v9543_v60, %v15867_v17 }
 0x809   :  { %v13074_v11 = vpop.eup %13073  ;;  %v11568_v36 = vmul.f32 -1.442695, %v12546_v30  ;;  %13083 = vpow2.f32 %v11565_v3 }
 0x80a   :  { %v13076_v35 = vpop.eup %13075  ;;  %v9622_v46 = vadd.f32 1.0, %v13074_v11  ;;  %v11569_v57 = vmul.f32 -1.442695, %v12547_v5  ;;  %v9547_v54 = vpop.f32.mrb[56].mxu0 }
 0x80b   :  { %v9623_v52 = vadd.f32 1.0, %v13076_v35  ;;  %13085 = vpow2.f32 %v11568_v36  ;;  %v12548_v48 = vadd.f32 %v9547_v54, %v15883_v39  ;;  %v9549_v37 = vpop.f32.mrb[57].mxu0 }
 0x80c   :  { %v12549_v21 = vadd.f32 %v9549_v37, %v15883_v39  ;;  %13087 = vrcp.f32 %v9622_v46 }
 0x80d   :  { %v13078_v14 = vpop.eup %13077  ;;  %v11570_v43 = vmul.f32 -1.442695, %v12548_v48  ;;  %13089 = vpow2.f32 %v11569_v57 }
 0x80e   :  { %v9624_v49 = vadd.f32 1.0, %v13078_v14  ;;  %v11571_v22 = vmul.f32 -1.442695, %v12549_v21  ;;  %v9553_v45 = vpop.f32.mrb[58].mxu0  ;;  %13091 = vrcp.f32 %v9623_v52 }
 0x80f   :  { %v12550_v24 = vadd.f32 %v9553_v45, %v15902_v58  ;;  %v9555_v42 = vpop.f32.mrb[59].mxu0  ;;  %13093 = vpow2.f32 %v11570_v43 }
 0x810   :  { %v12551_v51 = vadd.f32 %v9555_v42, %v15902_v58  ;;  %13095 = vrcp.f32 %v9624_v49 }
 0x811   :  { %v13080_v8 = vpop.eup %13079  ;;  %v11572_v0 = vmul.f32 -1.442695, %v12550_v24  ;;  %13097 = vpow2.f32 %v11571_v22 }
 0x812   :  { %v13082_v6 = vpop.eup %13081  ;;  %v9626_v53 = vadd.f32 1.0, %v13080_v8  ;;  %v11573_v19 = vmul.f32 -1.442695, %v12551_v51  ;;  %v9559_v33 = vpop.f32.mrb[60].mxu0 }
 0x813   :  { %v9627_v10 = vadd.f32 1.0, %v13082_v6  ;;  %13099 = vpow2.f32 %v11572_v0  ;;  %v12552_v18 = vadd.f32 %v9559_v33, %v15924_v25  ;;  %v9561_v20 = vpop.f32.mrb[61].mxu0  ;;  %v13084_v16 = vpop.eup %13083 }
 0x814   :  { %13101 = vrcp.f32 %v9626_v53  ;;  %v12553_v47 = vadd.f32 %v9561_v20, %v15924_v25  ;;  %v9625_v5 = vadd.f32 1.0, %v13084_v16 }
 0x815   :  { %v13086_v34 = vpop.eup %13085  ;;  %13103 = vrcp.f32 %v9627_v10 }
 0x816   :  { %v9628_v61 = vadd.f32 1.0, %v13086_v34  ;;  %13105 = vpow2.f32 %v11573_v19  ;;  %v9565_v3 = vpop.f32.mrb[62].mxu0  ;;  %v13088_v28 = vpop.eup %13087 }
 0x817   :  { %13107 = vtanh.f32 %v12552_v18  ;;  %v12554_v62 = vadd.f32 %v9565_v3, %v15937_v23  ;;  %v9567_v30 = vpop.f32.mrb[63].mxu0  ;;  %v13090_v60 = vpop.eup %13089 }
 0x818   :  { %13109 = vrcp.f32 %v9628_v61  ;;  %v13092_v11 = vpop.eup %13091  ;;  %v9629_v36 = vadd.f32 1.0, %v13090_v60  ;;  %v12555_v35 = vadd.f32 %v9567_v30, %v15937_v23 }
 0x819   :  { %13111 = vtanh.f32 %v12553_v47  ;;  %v13094_v46 = vpop.eup %13093 }
 0x81a   :  { %13113 = vtanh.f32 %v12554_v62  ;;  %v13096_v57 = vpop.eup %13095  ;;  %v9630_v49 = vadd.f32 1.0, %v13094_v46 }
 0x81b   :  { %13115 = vrcp.f32 %v9629_v36  ;;  %v13098_v54 = vpop.eup %13097 }
 0x81c   :  { %13117 = vrcp.f32 %v9625_v5  ;;  %v9631_v24 = vadd.f32 1.0, %v13098_v54 }
 0x81d   :  { %v13100_v52 = vpop.eup %13099  ;;  %13119 = vtanh.f32 %v12555_v35 }
 0x81e   :  { %v13102_v48 = vpop.eup %13101  ;;  %v9632_v6 = vadd.f32 1.0, %v13100_v52  ;;  %13121 = vrcp.f32 %v9630_v49 }
 0x81f   :  { %v13104_v37 = vpop.eup %13103  ;;  %v9662_v14 = vmul.f32 %v13102_v48, %v22702_v9  ;;  %13123 = vrcp.f32 %v9631_v24 }
 0x820   :  { %v13106_v21 = vpop.eup %13105  ;;  %v9663_v45 = vmul.f32 %v13104_v37, %v22705_v40 }
 0x821   :  { %v13108_v43 = vpop.eup %13107  ;;  %v9633_v16 = vadd.f32 1.0, %v13106_v21 }
 0x822   :  { %v13110_v22 = vpop.eup %13109  ;;  %v9666_v42 = vmul.f32 %v13108_v43, %v13088_v28 }
 0x823   :  { %v13112_v51 = vpop.eup %13111  ;;  %v9664_v8 = vmul.f32 %v13110_v22, %v22708_v55 }
 0x824   :  { %v13114_v0 = vpop.eup %13113  ;;  %v22810_v53 = vadd.f32 %v9666_v42, %v9662_v14  ;;  %v9667_v19 = vmul.f32 %v13112_v51, %v13092_v11  ;;  %v10787_v42 = vadd.f32 %v22749_v29, %v15830_v44 }
 0x825   :  { %v13116_v33 = vpop.eup %13115  ;;  %v9668_v10 = vmul.f32 %v13114_v0, %v13096_v57 }
 0x826   :  { %v13118_v18 = vpop.eup %13117  ;;  %v9665_v9 = vmul.f32 %v13116_v33, %v22712_v4  ;;  %v22813_v20 = vadd.f32 %v9667_v19, %v9663_v45  ;;  %13125 = vtanh.f32 %v22810_v53 }
 0x827   :  { %v13120_v40 = vpop.eup %13119  ;;  %v22816_v34 = vadd.f32 %v9668_v10, %v9664_v8  ;;  %13127 = vrcp.f32 %v9632_v6 }
 0x828   :  { %v9669_v55 = vmul.f32 %v13120_v40, %v13118_v18  ;;  %v13122_v4 = vpop.eup %13121 }
 0x829   :  { %13129 = vtanh.f32 %v22816_v34  ;;  %v13124_v61 = vpop.eup %13123 }
 0x82a   :  { %13131 = vtanh.f32 %v22813_v20  ;;  %v22820_v47 = vadd.f32 %v9669_v55, %v9665_v9 }
 0x82b   :  { %13133 = vrcp.f32 %v9633_v16 }
 0x82c   :  { %13135 = vtanh.f32 %v22820_v47 }
 0x830   :  { %v13126_v3 = vpop.eup %13125 }
 0x831   :  { %v13128_v28 = vpop.eup %13127  ;;  %v9678_v60 = vmul.f32 %v13126_v3, %v13122_v4 }
 0x833   :  { %v13130_v62 = vpop.eup %13129 }
 0x834   :  { %v13132_v30 = vpop.eup %13131  ;;  %v9680_v5 = vmul.f32 %v13130_v62, %v13128_v28 }
 0x835   :  { %v13134_v11 = vpop.eup %13133  ;;  %v9679_v46 = vmul.f32 %v13132_v30, %v13124_v61 }
 0x836   :  { %v13136_v36 = vpop.eup %13135  ;;  %v12452_v35 = vpack.c.bf16 %v9680_v5, %v9678_v60 }
 0x837   :  { %v9681_v57 = vmul.f32 %v13136_v36, %v13134_v11 }
 0x839   :  { %v12450_v54 = vpack.c.bf16 %v9681_v57, %v9679_v46 }
 0x83b   :  { %12451 = vmatprep.subr.bf16.mxu0 %v12450_v54  ;;  %12458 = vmatprep.subr.bf16.mxu1 %v12450_v54 }
 0x83c   :  { %12453 = vmatpush1.bf16.msra.mxu0 %v12452_v35  ;;  %12459 = vmatpush1.bf16.msra.mxu1 %v12452_v35 }
 0x83f   :  { %11614 = vmatmul.mubr.msk.f32.vlgmr.msra.gmra.mrb[64].mxu0 %vm1260_vm9, %v22718_v63  ;;  %11617 = vmatmul.mubr.msk.f32.vlgmr.msra.gmra.mrb[62].mxu1 %vm1260_vm9, %v22754_v12  ;;  %v10773_v63 = vadd.f32 %v22722_v13, %v15772_v59  ;;  %v10781_v13 = vadd.f32 %v22737_v1, %v15819_v32 }
 0x840   :  { %10889 = vmatprep.mubr.f32.mxu0 %v22897_v26  ;;  %10907 = vmatprep.mubr.f32.mxu1 %v22897_v26 }
 0x843   :  { %11615 = vmatmul.mubr.msk.f32.gmra.mrb[66].mxu0 %vm1260_vm9, %v22730_v56  ;;  %11618 = vmatmul.mubr.msk.f32.gmra.mrb[64].mxu1 %vm1260_vm9, %v22762_v41  ;;  %v10775_v56 = vadd.f32 %v22725_v50, %v15772_v59 }
 0x844   :  { %10895 = vmatprep.mubr.f32.mxu0 %v22897_v26  ;;  %10913 = vmatprep.mubr.f32.mxu1 %v22897_v26 }
 0x847   :  { %11616 = vmatmul.mubr.msk.f32.gmra.mrb[68].mxu0 %vm1260_vm9, %v22742_v31  ;;  %11619 = vmatmul.mubr.msk.f32.gmra.mrb[66].mxu1 %vm1260_vm9, %v22770_v7 }
 0x848   :  { %10919 = vmatprep.mubr.f32.mxu1 %v22897_v26  ;;  %11120 = vmatprep.mubr.f32.mxu0 %v22897_v26 }
 0x84b   :  { %11620 = vmatmul.mubr.msk.f32.gmra.mrb[68].mxu1 %vm1260_vm9, %v22778_v38 }
 0x84c   :  { %10925 = vmatprep.mubr.f32.mxu1 %v22897_v26  ;;  %v10779_v26 = vadd.f32 %v22734_v27, %v15819_v32 }
 0x84f   :  { %11621 = vmatmul.mubr.msk.f32.gmra.mrb[70].mxu1 %vm1260_vm9, %v22786_v2 }
 0x912   :  { %v10885_v31 = vpop.f32.mrb[64].mxu0  ;;  %v10903_v12 = vpop.f32.mrb[62].mxu1 }
 0x913   :  { %v10932_v41 = vadd.f32 %v10885_v31, %v10773_v63  ;;  %v12568_v7 = vadd.f32 %v10903_v12, %v15867_v17  ;;  %v10887_v52 = vpop.f32.mrb[65].mxu0  ;;  %v10905_v48 = vpop.f32.mrb[63].mxu1 }
 0x914   :  { %v10933_v37 = vadd.f32 %v10887_v52, %v10775_v56  ;;  %v12569_v38 = vadd.f32 %v10905_v48, %v15867_v17  ;;  %v10785_v17 = vadd.f32 %v22746_v15, %v15830_v44 }
 0x915   :  { %v11622_v2 = vmul.f32 -1.442695, %v10932_v41  ;;  %v11628_v21 = vmul.f32 -1.442695, %v12568_v7 }
 0x916   :  { %v11623_v14 = vmul.f32 -1.442695, %v10933_v37  ;;  %v11629_v59 = vmul.f32 -1.442695, %v12569_v38  ;;  %v10891_v50 = vpop.f32.mrb[66].mxu0  ;;  %v10909_v43 = vpop.f32.mrb[64].mxu1 }
 0x917   :  { %13137 = vpow2.f32 %v11622_v2  ;;  %v10934_v49 = vadd.f32 %v10891_v50, %v10779_v26  ;;  %v10893_v22 = vpop.f32.mrb[67].mxu0  ;;  %v10911_v45 = vpop.f32.mrb[65].mxu1  ;;  %v12570_v33 = vadd.f32 %v10909_v43, %v15883_v39 }
 0x918   :  { %13139 = vpow2.f32 %v11628_v21  ;;  %v10935_v24 = vadd.f32 %v10893_v22, %v10781_v13  ;;  %v12571_v15 = vadd.f32 %v10911_v45, %v15883_v39 }
 0x919   :  { %13141 = vpow2.f32 %v11623_v14  ;;  %v11624_v27 = vmul.f32 -1.442695, %v10934_v49  ;;  %v11630_v4 = vmul.f32 -1.442695, %v12570_v33 }
 0x91a   :  { %13143 = vpow2.f32 %v11629_v59  ;;  %v11625_v32 = vmul.f32 -1.442695, %v10935_v24  ;;  %v10897_v1 = vpop.f32.mrb[68].mxu0  ;;  %v10915_v51 = vpop.f32.mrb[66].mxu1  ;;  %v11631_v28 = vmul.f32 -1.442695, %v12571_v15 }
 0x91b   :  { %v10936_v8 = vadd.f32 %v10897_v1, %v10785_v17  ;;  %v10899_v0 = vpop.f32.mrb[69].mxu0  ;;  %v10917_v6 = vpop.f32.mrb[67].mxu1  ;;  %13145 = vpow2.f32 %v11624_v27  ;;  %v12572_v44 = vadd.f32 %v10915_v51, %v15902_v58 }
 0x91c   :  { %v10937_v19 = vadd.f32 %v10899_v0, %v10787_v42  ;;  %13147 = vpow2.f32 %v11625_v32  ;;  %v12573_v16 = vadd.f32 %v10917_v6, %v15902_v58 }
 0x91d   :  { %v11626_v10 = vmul.f32 -1.442695, %v10936_v8  ;;  %v11632_v60 = vmul.f32 -1.442695, %v12572_v44 }
 0x91e   :  { %v11627_v18 = vmul.f32 -1.442695, %v10937_v19  ;;  %v10921_v9 = vpop.f32.mrb[68].mxu1  ;;  %v11633_v11 = vmul.f32 -1.442695, %v12573_v16 }
 0x91f   :  { %13149 = vpow2.f32 %v11626_v10  ;;  %v12574_v29 = vadd.f32 %v10921_v9, %v15924_v25  ;;  %v10923_v40 = vpop.f32.mrb[69].mxu1 }
 0x920   :  { %13151 = vpow2.f32 %v11627_v18  ;;  %v12575_v7 = vadd.f32 %v10923_v40, %v15924_v25 }
 0x921   :  { %v13138_v55 = vpop.eup %13137  ;;  %13153 = vtanh.f32 %v12574_v29 }
 0x922   :  { %v13140_v61 = vpop.eup %13139  ;;  %v10984_v3 = vadd.f32 1.0, %v13138_v55  ;;  %v10927_v62 = vpop.f32.mrb[70].mxu1 }
 0x923   :  { %v13142_v30 = vpop.eup %13141  ;;  %v10929_v39 = vpop.f32.mrb[71].mxu1  ;;  %v10990_v36 = vadd.f32 1.0, %v13140_v61  ;;  %v12576_v48 = vadd.f32 %v10927_v62, %v15937_v23 }
 0x924   :  { %v13144_v5 = vpop.eup %13143  ;;  %13155 = vrcp.f32 %v10984_v3  ;;  %v10985_v46 = vadd.f32 1.0, %v13142_v30  ;;  %v12577_v38 = vadd.f32 %v10929_v39, %v15937_v23  ;;  %v11049_v39 = vlaneseq }
 0x925   :  { %13157 = vpow2.f32 %v11630_v4  ;;  %v13146_v35 = vpop.eup %13145  ;;  %v10991_v58 = vadd.f32 1.0, %v13144_v5 }
 0x926   :  { %13159 = vpow2.f32 %v11631_v28  ;;  %v13148_v57 = vpop.eup %13147  ;;  %v10986_v63 = vadd.f32 1.0, %v13146_v35  ;;  %v11050_v5 = vshrl.u32 %v11049_v39, 7  ;;  %vm11147_vm10 = vcmp.lt.s32.totalorder %v11049_v39, 256 }
 0x927   :  { %13161 = vpow2.f32 %v11632_v60  ;;  %v10987_v12 = vadd.f32 1.0, %v13148_v57  ;;  %v49_v60 = vld [vmem:[%s22884_s4] sm:$0x1] }
 0x928   :  { %13163 = vpow2.f32 %v11633_v11  ;;  %v13301_v11 = vmov 1966171168   ;;  %v11051_v35 = vsub.s32 0, %v11050_v5 }
 0x929   :  { %v13150_v54 = vpop.eup %13149  ;;  %13165 = vrcp.f32 %v10990_v36  ;;  %v11131_v36 = vunpack.c.l.s4 %v13301_v11 }
 0x92a   :  { %13167 = vrcp.f32 %v10985_v46  ;;  %v10988_v56 = vadd.f32 1.0, %v13150_v54  ;;  %v13152_v31 = vpop.eup %13151  ;;  %v11047_v46 = vpop.permute.xlu0 %11046 }
 0x92b   :  { %13169 = vrcp.f32 %v10991_v58  ;;  %v10989_v41 = vadd.f32 1.0, %v13152_v31  ;;  %v13154_v52 = vpop.eup %13153  ;;  %v11132_v58 = vunpack.c.0.s8 %v11131_v36  ;;  %v11052_v57 = vrot.slane %v11047_v46, %v11051_v35 }
 0x92c   :  { %13171 = vrcp.f32 %v10988_v56 }
 0x92d   :  { %13173 = vrcp.f32 %v10986_v63 }
 0x92e   :  { %v13156_v37 = vpop.eup %13155  ;;  %13175 = vrcp.f32 %v10989_v41 }
 0x92f   :  { %v13158_v26 = vpop.eup %13157  ;;  %13177 = vrcp.f32 %v10987_v12  ;;  %v11028_v2 = vmul.f32 %v13156_v37, %v13154_v52  ;;  %v11135_v12 = vsub.s32 %v11132_v58, %v11050_v5 }
 0x930   :  { %v13160_v21 = vpop.eup %13159  ;;  %13179 = vtanh.f32 %v12575_v7  ;;  %v10992_v49 = vadd.f32 1.0, %v13158_v26 }
 0x931   :  { %v13162_v13 = vpop.eup %13161  ;;  %13181 = vtanh.f32 %v12576_v48  ;;  %v10993_v17 = vadd.f32 1.0, %v13160_v21 }
 0x932   :  { %v13164_v14 = vpop.eup %13163  ;;  %13183 = vtanh.f32 %v12577_v38  ;;  %v10994_v27 = vadd.f32 1.0, %v13162_v13 }
 0x933   :  { %v13166_v59 = vpop.eup %13165  ;;  %13185 = vrcp.f32 %v10992_v49  ;;  %v10995_v51 = vadd.f32 1.0, %v13164_v14 }
 0x934   :  { %v13168_v50 = vpop.eup %13167  ;;  %v11026_v19 = vmul.f32 %v13166_v59, %v22816_v34 }
 0x935   :  { %v13170_v25 = vpop.eup %13169 }
 0x936   :  { %v13172_v43 = vpop.eup %13171 }
 0x937   :  { %v13174_v22 = vpop.eup %13173  ;;  %v11024_v45 = vmul.f32 %v13172_v43, %v22810_v53  ;;  %v11027_v53 = vmul.f32 %v13170_v25, %v22820_v47 }
 0x938   :  { %v13176_v24 = vpop.eup %13175 }
 0x939   :  { %v13178_v23 = vpop.eup %13177  ;;  %v11025_v42 = vmul.f32 %v13176_v24, %v22813_v20  ;;  %v11032_v32 = vadd.f32 %v11028_v2, %v11024_v45 }
 0x93a   :  { %v13180_v1 = vpop.eup %13179 }
 0x93b   :  { %v13182_v8 = vpop.eup %13181  ;;  %13187 = vtanh.f32 %v11032_v32  ;;  %v11029_v0 = vmul.f32 %v13180_v1, %v13168_v50 }
 0x93c   :  { %v13184_v6 = vpop.eup %13183  ;;  %13189 = vrcp.f32 %v10993_v17  ;;  %v11030_v33 = vmul.f32 %v13182_v8, %v13174_v22 }
 0x93d   :  { %13191 = vrcp.f32 %v10994_v27  ;;  %v11033_v10 = vadd.f32 %v11029_v0, %v11025_v42  ;;  %v11031_v15 = vmul.f32 %v13184_v6, %v13178_v23  ;;  %v13186_v9 = vpop.eup %13185 }
 0x93e   :  { %13193 = vrcp.f32 %v10995_v51  ;;  %v11034_v18 = vadd.f32 %v11030_v33, %v11026_v19 }
 0x93f   :  { %13195 = vtanh.f32 %v11033_v10  ;;  %v11035_v20 = vadd.f32 %v11031_v15, %v11027_v53 }
 0x940   :  { %13197 = vtanh.f32 %v11034_v18 }
 0x941   :  { %13199 = vtanh.f32 %v11035_v20 }
 0x945   :  { %v13188_v44 = vpop.eup %13187 }
 0x946   :  { %v13190_v29 = vpop.eup %13189  ;;  %v11040_v40 = vmul.f32 %v13188_v44, %v13186_v9 }
 0x947   :  { %v13192_v16 = vpop.eup %13191 }
 0x948   :  { %v13194_v55 = vpop.eup %13193 }
 0x949   :  { %v13196_v34 = vpop.eup %13195 }
 0x94a   :  { %v13198_v4 = vpop.eup %13197  ;;  %v11041_v61 = vmul.f32 %v13196_v34, %v13190_v29 }
 0x94b   :  { %v13200_v3 = vpop.eup %13199  ;;  %v11042_v47 = vmul.f32 %v13198_v4, %v13192_v16 }
 0x94c   :  { %v11043_v28 = vmul.f32 %v13200_v3, %v13194_v55 }
 0x94d   :  { %v12456_v62 = vpack.c.bf16 %v11042_v47, %v11040_v40 }
 0x94e   :  { %v12454_v30 = vpack.c.bf16 %v11043_v28, %v11041_v61 }
 0x950   :  { %12455 = vmatprep.subr.bf16.mxu0 %v12454_v30 }
 0x951   :  { %12457 = vmatpush1.bf16.msra.mxu0 %v12456_v62 }
 0x954   :  { %11634 = vmatmul.mubr.msk.f32.vlgmr.msra.gmra.mrb[70].mxu0 %vm1260_vm9, %v49_v60 }
 0xa27   :  { %v11122_v54 = vpop.f32.mrb[70].mxu0 }
 0xa28   :  { %v11123_v63 = vadd.f32 %v11122_v54, %v11052_v57  ;;  %v11124_v56 = vpop.f32.mrb[71].mxu0 }
 0xa29   :  { %v11125_v31 = vadd.f32 %v11124_v56, %v11052_v57 }
 0xa2b   :  { %v11129_v41 = vcombine.low %v11123_v63, %v11125_v31 }
 0xa2d   :  { %v11136_v7 = vrot.slane %v11129_v41, %v11135_v12 }
 0xa2f   :  { %v11143_v52 = vrot.slane %v11136_v7, %v11135_v12 }
 0xa31   :  { %11149 = vst.msk [vmem:[%s22885_s6] sm:$0x3] %vm11147_vm10, %v11143_v52 }

</bundles_post_ra>
